<compile_context>
chip_gen: v6e
topology: v6e:2x2x1
jax: 0.10.0
libtpu: 0.0.40
codegen_flags: <defaults>
</compile_context>

<pallas_src>
import math

import jax
import jax.numpy as jnp
from jax.experimental import pallas as pl
from jax.experimental.pallas import tpu as pltpu

# ----- model configuration (TinyGPT defaults) -------------------------------
B = 2             # batch
T = 8             # block_size (sequence length)
C = 128           # embed_size
H = 4             # num_heads
D = C // H        # head_size = 32
L = 4             # num_layers
V = 64            # vocab_size
VP = 128          # vocab padded to a full lane width for the output store
HID = 4 * C       # MLP hidden
M = B * T         # token rows in the slab
EPS = 1e-5        # nn.LayerNorm default eps

assert T & (T - 1) == 0, "mask construction assumes power-of-two block_size"


def _layernorm(x, w, b):
    # Matches nn.LayerNorm: biased variance, eps inside rsqrt.
    mu = jnp.mean(x, axis=-1, keepdims=True)
    xc = x - mu
    var = jnp.mean(xc * xc, axis=-1, keepdims=True)
    return xc * jax.lax.rsqrt(var + EPS) * w + b


def _gelu_exact(x):
    # Exact (erf-based) GELU, as in torch.nn.GELU().  erf uses the
    # Abramowitz & Stegun 7.1.26 rational approximation (~1.5e-7 abs error)
    # built only from ops guaranteed to lower in Mosaic (abs/exp/where).
    # TODO(synk): swap for jax.lax.erf if/when Mosaic guarantees an erf lowering.
    z = x * (1.0 / math.sqrt(2.0))
    az = jnp.abs(z)
    t = 1.0 / (1.0 + 0.3275911 * az)
    poly = t * (0.254829592 + t * (-0.284496736 + t * (1.421413741
               + t * (-1.453152027 + t * 1.061405429))))
    erf_abs = 1.0 - poly * jnp.exp(-az * az)
    erf_z = jnp.where(z >= 0.0, erf_abs, -erf_abs)
    return 0.5 * x * (1.0 + erf_z)


# ---------------------------------------------------------------------------
# The fused kernel: embedding slab -> 4 transformer blocks -> final LN + head.
# No grid; all arrays are full VMEM blocks.  Per-layer weights are stacked on
# a leading L axis and selected with static Python indices (L=4 unrolled).
# ---------------------------------------------------------------------------
def tinygpt_kernel(x_ref, wqkv_ref, wo_ref, w1_ref, w2_ref,
                   vecs_ref, b1_ref, wout_ref, head_vecs_ref, out_ref):
    x = x_ref[...]                                          # (M, C) f32

    # Additive mask (M, M): causal within each length-T batch block,
    # -1e30 elsewhere (including cross-batch entries).  Built once per kernel
    # with iota + bitwise ops only (no integer division, no captured consts).
    row = jax.lax.broadcasted_iota(jnp.int32, (M, M), 0)
    col = jax.lax.broadcasted_iota(jnp.int32, (M, M), 1)
    row_start = row - jnp.bitwise_and(row, T - 1)           # first row of this batch block
    ok = (col <= row) & (col >= row_start)
    mask_bias = jnp.where(ok, 0.0, -1e30).astype(jnp.float32)   # (M, M)

    for l in range(L):                                      # statically unrolled layers
        vc = vecs_ref[l]                                    # (6, C) f32
        ln1w, ln1b = vc[0:1, :], vc[1:2, :]
        bo = vc[2:3, :]
        ln2w, ln2b = vc[3:4, :], vc[4:5, :]
        b2 = vc[5:6, :]
        b1 = b1_ref[l]                                      # (1, HID) f32

        # ---- multi-head causal self-attention (head dim = leading batch) ---
        xn = _layernorm(x, ln1w, ln1b).astype(jnp.bfloat16)     # (M, C)
        xb = jnp.broadcast_to(xn, (H, M, C))                    # (H, M, C) bf16

        # 1/sqrt(D) is folded into Wq at init time.
        q = jnp.einsum('hmc,hcd->hmd', xb, wqkv_ref[l, 0],
                       preferred_element_type=jnp.float32)      # (H, M, D)
        k = jnp.einsum('hmc,hcd->hmd', xb, wqkv_ref[l, 1],
                       preferred_element_type=jnp.float32)
        v = jnp.einsum('hmc,hcd->hmd', xb, wqkv_ref[l, 2],
                       preferred_element_type=jnp.float32)

        s = jnp.einsum('hmd,hnd->hmn',
                       q.astype(jnp.bfloat16), k.astype(jnp.bfloat16),
                       preferred_element_type=jnp.float32)      # (H, M, M) f32
        s = s + mask_bias
        s = s - jnp.max(s, axis=-1, keepdims=True)
        p = jnp.exp(s)
        p = p / jnp.sum(p, axis=-1, keepdims=True)              # exact softmax
        # attention dropout: identity in eval mode

        o = jnp.einsum('hmn,hnd->hmd',
                       p.astype(jnp.bfloat16), v.astype(jnp.bfloat16),
                       preferred_element_type=jnp.float32)      # (H, M, D)

        att = jnp.einsum('hmd,hdc->hmc',
                         o.astype(jnp.bfloat16), wo_ref[l],
                         preferred_element_type=jnp.float32)    # (H, M, C)
        att = jnp.sum(att, axis=0) + bo                         # (M, C)
        x = x + att                                             # residual 1

        # ---- MLP ------------------------------------------------------------
        xn2 = _layernorm(x, ln2w, ln2b)
        h1 = jnp.dot(xn2.astype(jnp.bfloat16), w1_ref[l],
                     preferred_element_type=jnp.float32) + b1
        h1 = _gelu_exact(h1)
        h2 = jnp.dot(h1.astype(jnp.bfloat16), w2_ref[l],
                     preferred_element_type=jnp.float32) + b2
        # MLP dropout: identity in eval mode
        x = x + h2                                              # residual 2

    # ---- fused head: final LayerNorm + output projection (128-lane padded) --
    hv = head_vecs_ref[...]                                     # (3, VP) f32
    lnfw, lnfb, bout = hv[0:1, :], hv[1:2, :], hv[2:3, :]
    xn = _layernorm(x, lnfw, lnfb)
    out_ref[...] = jnp.dot(xn.astype(jnp.bfloat16), wout_ref[...],
                           preferred_element_type=jnp.float32) + bout


def run_tinygpt_kernel(x2d, flat_weights):
    vmem = pltpu.MemorySpace.VMEM
    n_in = 1 + len(flat_weights)
    return pl.pallas_call(
        tinygpt_kernel,
        out_shape=jax.ShapeDtypeStruct((M, VP), jnp.float32),
        in_specs=[pl.BlockSpec(memory_space=vmem)] * n_in,
        out_specs=pl.BlockSpec(memory_space=vmem),
        cost_estimate=pl.CostEstimate(flops=27_000_000,
                                      transcendentals=40_000,
                                      bytes_accessed=1_700_000),
    )(x2d, *flat_weights)


# ---------------------------------------------------------------------------
# Full forward (embedding gather / reshape glue in plain JAX).
# ---------------------------------------------------------------------------
def tinygpt_forward(idx, params):
    # token + position embedding; embedding dropout is identity in eval mode.
    x = params["tok_emb"][idx] + params["pos_emb"][:, :T, :]   # (B, T, C)
    x2d = x.reshape(M, C).astype(jnp.float32)
    logits_padded = run_tinygpt_kernel(x2d, params["flat"])     # (B*T, 128)
    return logits_padded[:, :V].reshape(B, T, V)


def init_params(key):
    ks = jax.random.split(key, 8)
    s = 0.02
    qscale = 1.0 / math.sqrt(D)

    def normal(k, shape):
        return jax.random.normal(k, shape, jnp.float32) * s

    def to_heads(w):                           # (L, C, C) -> (L, H, C, D)
        return w.reshape(L, C, H, D).transpose(0, 2, 1, 3)

    # Head-batched QKV weights, 1/sqrt(D) folded into Wq.  Shape (L, 3, H, C, D), bf16.
    wq = normal(ks[2], (L, C, C)) * qscale
    wk = normal(ks[3], (L, C, C))
    wv = normal(ks[4], (L, C, C))
    wqkv = jnp.stack([to_heads(wq), to_heads(wk), to_heads(wv)],
                     axis=1).astype(jnp.bfloat16)                       # (L, 3, H, C, D)

    # Output projection split by head on the input side: (L, H, D, C), bf16.
    wo = normal(ks[5], (L, C, C)).reshape(L, H, D, C).astype(jnp.bfloat16)

    w1 = normal(ks[6], (L, C, HID)).astype(jnp.bfloat16)                # MLP W1
    w2 = normal(ks[7], (L, HID, C)).astype(jnp.bfloat16)                # MLP W2

    # Small per-layer f32 params packed into one slab:
    # rows = [ln1_w, ln1_b, proj_b, ln2_w, ln2_b, mlp_b2]
    vecs = jnp.stack([
        jnp.ones((L, C), jnp.float32),     # ln1 w
        jnp.zeros((L, C), jnp.float32),    # ln1 b
        jnp.zeros((L, C), jnp.float32),    # proj bias
        jnp.ones((L, C), jnp.float32),     # ln2 w
        jnp.zeros((L, C), jnp.float32),    # ln2 b
        jnp.zeros((L, C), jnp.float32),    # mlp b2
    ], axis=1)                             # (L, 6, C)

    b1 = jnp.zeros((L, 1, HID), jnp.float32)

    # Output head padded from V=64 to 128 lanes (extra columns zero).
    w_out = normal(ks[1], (C, V))
    w_out_p = jnp.zeros((C, VP), jnp.float32).at[:, :V].set(w_out).astype(jnp.bfloat16)

    # Head slab: rows = [final LN w, final LN b, out bias (padded)]  (C == VP)
    head_vecs = jnp.stack([
        jnp.ones((VP,), jnp.float32),
        jnp.zeros((VP,), jnp.float32),
        jnp.zeros((VP,), jnp.float32),
    ], axis=0)                             # (3, VP)

    flat = (wqkv, wo, w1, w2, vecs, b1, w_out_p, head_vecs)
    return {
        "tok_emb": normal(ks[0], (V, C)),
        "pos_emb": jnp.zeros((1, T, C), jnp.float32),   # torch.zeros init
        "flat": flat,
    }


if __name__ == "__main__":
    key = jax.random.PRNGKey(0)
    pkey, ikey = jax.random.split(key)
    params = init_params(pkey)
    idx = jax.random.randint(ikey, (B, T), 0, V, dtype=jnp.int32)

    logits = jax.jit(tinygpt_forward)(idx, params)
    jax.block_until_ready(logits)
    assert logits.shape == (B, T, V)
    assert bool(jnp.all(jnp.isfinite(logits)))
    print("KERNEL_OK")
</pallas_src>

<mosaic_0001>
module attributes {stable_mosaic.version = 11 : i64} {
  func.func @tinygpt_kernel(%arg0: memref<16x128xf32, #tpu.memory_space<vmem>>, %arg1: memref<4x3x4x128x32xbf16, #tpu.memory_space<vmem>>, %arg2: memref<4x4x32x128xbf16, #tpu.memory_space<vmem>>, %arg3: memref<4x128x512xbf16, #tpu.memory_space<vmem>>, %arg4: memref<4x512x128xbf16, #tpu.memory_space<vmem>>, %arg5: memref<4x6x128xf32, #tpu.memory_space<vmem>>, %arg6: memref<4x1x512xf32, #tpu.memory_space<vmem>>, %arg7: memref<128x128xbf16, #tpu.memory_space<vmem>>, %arg8: memref<3x128xf32, #tpu.memory_space<vmem>>, %arg9: memref<16x128xf32, #tpu.memory_space<vmem>>) attributes {dimension_semantics = [], scalar_prefetch = 0 : i64, scratch_operands = 0 : i64, tpu.core_type = #tpu.core_type<tc>} {
    %c0 = arith.constant 0 : index
    %c0_0 = arith.constant 0 : index
    %0 = vector.load %arg0[%c0, %c0_0] : memref<16x128xf32, #tpu.memory_space<vmem>>, vector<16x128xf32>
    %1 = tpu.iota {dimensions = array<i32: 0>} : vector<16x16xi32>
    %2 = tpu.iota {dimensions = array<i32: 1>} : vector<16x16xi32>
    %c7_i32 = arith.constant 7 : i32
    %3 = vector.broadcast %c7_i32 : i32 to vector<16x16xi32>
    %4 = arith.andi %1, %3 : vector<16x16xi32>
    %5 = arith.subi %1, %4 : vector<16x16xi32>
    %6 = arith.cmpi sle, %2, %1 : vector<16x16xi32>
    %7 = arith.cmpi sge, %2, %5 : vector<16x16xi32>
    %8 = arith.andi %6, %7 : vector<16x16xi1>
    %cst = arith.constant 0.000000e+00 : f32
    %cst_1 = arith.constant -1.000000e+30 : f32
    %9 = vector.broadcast %cst : f32 to vector<16x16xf32>
    %10 = vector.broadcast %cst_1 : f32 to vector<16x16xf32>
    %11 = arith.select %8, %9, %10 : vector<16x16xi1>, vector<16x16xf32>
    %c0_2 = arith.constant 0 : index
    %c0_3 = arith.constant 0 : index
    %c0_4 = arith.constant 0 : index
    %12 = vector.load %arg5[%c0_2, %c0_3, %c0_4] : memref<4x6x128xf32, #tpu.memory_space<vmem>>, vector<1x6x128xf32>
    %13 = vector.shape_cast %12 : vector<1x6x128xf32> to vector<6x128xf32>
    %14 = vector.extract_strided_slice %13 {offsets = [0, 0], sizes = [1, 128], strides = [1, 1]} : vector<6x128xf32> to vector<1x128xf32>
    %15 = vector.extract_strided_slice %13 {offsets = [1, 0], sizes = [1, 128], strides = [1, 1]} : vector<6x128xf32> to vector<1x128xf32>
    %16 = vector.extract_strided_slice %13 {offsets = [2, 0], sizes = [1, 128], strides = [1, 1]} : vector<6x128xf32> to vector<1x128xf32>
    %17 = vector.extract_strided_slice %13 {offsets = [3, 0], sizes = [1, 128], strides = [1, 1]} : vector<6x128xf32> to vector<1x128xf32>
    %18 = vector.extract_strided_slice %13 {offsets = [4, 0], sizes = [1, 128], strides = [1, 1]} : vector<6x128xf32> to vector<1x128xf32>
    %19 = vector.extract_strided_slice %13 {offsets = [5, 0], sizes = [1, 128], strides = [1, 1]} : vector<6x128xf32> to vector<1x128xf32>
    %c0_5 = arith.constant 0 : index
    %c0_6 = arith.constant 0 : index
    %c0_7 = arith.constant 0 : index
    %20 = vector.load %arg6[%c0_5, %c0_6, %c0_7] : memref<4x1x512xf32, #tpu.memory_space<vmem>>, vector<1x1x512xf32>
    %21 = vector.shape_cast %20 : vector<1x1x512xf32> to vector<1x512xf32>
    %cst_8 = arith.constant dense<0.000000e+00> : vector<16xf32>
    %22 = vector.multi_reduction <add>, %0, %cst_8 [1] : vector<16x128xf32> to vector<16xf32>
    %23 = vector.shape_cast %22 : vector<16xf32> to vector<16x1xf32>
    %cst_9 = arith.constant 1.280000e+02 : f32
    %24 = vector.broadcast %cst_9 : f32 to vector<16x1xf32>
    %25 = arith.divf %23, %24 : vector<16x1xf32>
    %26 = vector.broadcast %25 : vector<16x1xf32> to vector<16x128xf32>
    %27 = arith.subf %0, %26 : vector<16x128xf32>
    %28 = arith.mulf %27, %27 : vector<16x128xf32>
    %cst_10 = arith.constant dense<0.000000e+00> : vector<16xf32>
    %29 = vector.multi_reduction <add>, %28, %cst_10 [1] : vector<16x128xf32> to vector<16xf32>
    %30 = vector.shape_cast %29 : vector<16xf32> to vector<16x1xf32>
    %cst_11 = arith.constant 1.280000e+02 : f32
    %31 = vector.broadcast %cst_11 : f32 to vector<16x1xf32>
    %32 = arith.divf %30, %31 : vector<16x1xf32>
    %cst_12 = arith.constant 9.99999974E-6 : f32
    %33 = vector.broadcast %cst_12 : f32 to vector<16x1xf32>
    %34 = arith.addf %32, %33 : vector<16x1xf32>
    %35 = math.rsqrt %34 : vector<16x1xf32>
    %36 = vector.broadcast %35 : vector<16x1xf32> to vector<16x128xf32>
    %37 = arith.mulf %27, %36 : vector<16x128xf32>
    %38 = vector.broadcast %14 : vector<1x128xf32> to vector<16x128xf32>
    %39 = arith.mulf %37, %38 : vector<16x128xf32>
    %40 = vector.broadcast %15 : vector<1x128xf32> to vector<16x128xf32>
    %41 = arith.addf %39, %40 : vector<16x128xf32>
    %42 = arith.truncf %41 : vector<16x128xf32> to vector<16x128xbf16>
    %43 = vector.shape_cast %42 : vector<16x128xbf16> to vector<1x16x128xbf16>
    %44 = vector.broadcast %43 : vector<1x16x128xbf16> to vector<4x16x128xbf16>
    %c0_13 = arith.constant 0 : index
    %c0_14 = arith.constant 0 : index
    %c0_15 = arith.constant 0 : index
    %c0_16 = arith.constant 0 : index
    %c0_17 = arith.constant 0 : index
    %45 = vector.load %arg1[%c0_13, %c0_14, %c0_15, %c0_16, %c0_17] : memref<4x3x4x128x32xbf16, #tpu.memory_space<vmem>>, vector<1x1x4x128x32xbf16>
    %46 = vector.shape_cast %45 : vector<1x1x4x128x32xbf16> to vector<4x128x32xbf16>
    "tpu.trace_start"() <{level = 10 : i32, message = "hmc,hcd->hmd"}> : () -> ()
    %cst_18 = arith.constant dense<0.000000e+00> : vector<4x16x32xf32>
    %47 = tpu.matmul %44, %46, %cst_18 {dimension_numbers = #tpu.dot_dimension_numbers<[2], [1], [1], [2], [0, 0, 0, 1, 1, 2], [0], [0]>} : vector<4x16x128xbf16>, vector<4x128x32xbf16>, vector<4x16x32xf32> -> vector<4x16x32xf32>
    "tpu.trace_stop"() : () -> ()
    %c0_19 = arith.constant 0 : index
    %c1 = arith.constant 1 : index
    %c0_20 = arith.constant 0 : index
    %c0_21 = arith.constant 0 : index
    %c0_22 = arith.constant 0 : index
    %48 = vector.load %arg1[%c0_19, %c1, %c0_20, %c0_21, %c0_22] : memref<4x3x4x128x32xbf16, #tpu.memory_space<vmem>>, vector<1x1x4x128x32xbf16>
    %49 = vector.shape_cast %48 : vector<1x1x4x128x32xbf16> to vector<4x128x32xbf16>
    "tpu.trace_start"() <{level = 10 : i32, message = "hmc,hcd->hmd"}> : () -> ()
    %cst_23 = arith.constant dense<0.000000e+00> : vector<4x16x32xf32>
    %50 = tpu.matmul %44, %49, %cst_23 {dimension_numbers = #tpu.dot_dimension_numbers<[2], [1], [1], [2], [0, 0, 0, 1, 1, 2], [0], [0]>} : vector<4x16x128xbf16>, vector<4x128x32xbf16>, vector<4x16x32xf32> -> vector<4x16x32xf32>
    "tpu.trace_stop"() : () -> ()
    %c0_24 = arith.constant 0 : index
    %c2 = arith.constant 2 : index
    %c0_25 = arith.constant 0 : index
    %c0_26 = arith.constant 0 : index
    %c0_27 = arith.constant 0 : index
    %51 = vector.load %arg1[%c0_24, %c2, %c0_25, %c0_26, %c0_27] : memref<4x3x4x128x32xbf16, #tpu.memory_space<vmem>>, vector<1x1x4x128x32xbf16>
    %52 = vector.shape_cast %51 : vector<1x1x4x128x32xbf16> to vector<4x128x32xbf16>
    "tpu.trace_start"() <{level = 10 : i32, message = "hmc,hcd->hmd"}> : () -> ()
    %cst_28 = arith.constant dense<0.000000e+00> : vector<4x16x32xf32>
    %53 = tpu.matmul %44, %52, %cst_28 {dimension_numbers = #tpu.dot_dimension_numbers<[2], [1], [1], [2], [0, 0, 0, 1, 1, 2], [0], [0]>} : vector<4x16x128xbf16>, vector<4x128x32xbf16>, vector<4x16x32xf32> -> vector<4x16x32xf32>
    "tpu.trace_stop"() : () -> ()
    %54 = arith.truncf %47 : vector<4x16x32xf32> to vector<4x16x32xbf16>
    %55 = arith.truncf %50 : vector<4x16x32xf32> to vector<4x16x32xbf16>
    "tpu.trace_start"() <{level = 10 : i32, message = "hmd,hnd->hmn"}> : () -> ()
    %cst_29 = arith.constant dense<0.000000e+00> : vector<4x16x16xf32>
    %56 = tpu.matmul %54, %55, %cst_29 {dimension_numbers = #tpu.dot_dimension_numbers<[2], [2], [1], [1], [0, 0, 0, 1, 1, 1], [0], [0]>} : vector<4x16x32xbf16>, vector<4x16x32xbf16>, vector<4x16x16xf32> -> vector<4x16x16xf32>
    "tpu.trace_stop"() : () -> ()
    %57 = vector.shape_cast %11 : vector<16x16xf32> to vector<1x16x16xf32>
    %58 = vector.broadcast %57 : vector<1x16x16xf32> to vector<4x16x16xf32>
    %59 = arith.addf %56, %58 : vector<4x16x16xf32>
    %cst_30 = arith.constant dense<0xFF800000> : vector<4x16xf32>
    %60 = vector.multi_reduction <maximumf>, %59, %cst_30 [2] : vector<4x16x16xf32> to vector<4x16xf32>
    %61 = vector.shape_cast %60 : vector<4x16xf32> to vector<4x16x1xf32>
    %62 = vector.broadcast %61 : vector<4x16x1xf32> to vector<4x16x16xf32>
    %63 = arith.subf %59, %62 : vector<4x16x16xf32>
    %64 = math.exp %63 : vector<4x16x16xf32>
    %cst_31 = arith.constant dense<0.000000e+00> : vector<4x16xf32>
    %65 = vector.multi_reduction <add>, %64, %cst_31 [2] : vector<4x16x16xf32> to vector<4x16xf32>
    %66 = vector.shape_cast %65 : vector<4x16xf32> to vector<4x16x1xf32>
    %67 = vector.broadcast %66 : vector<4x16x1xf32> to vector<4x16x16xf32>
    %68 = arith.divf %64, %67 : vector<4x16x16xf32>
    %69 = arith.truncf %68 : vector<4x16x16xf32> to vector<4x16x16xbf16>
    %70 = arith.truncf %53 : vector<4x16x32xf32> to vector<4x16x32xbf16>
    "tpu.trace_start"() <{level = 10 : i32, message = "hmn,hnd->hmd"}> : () -> ()
    %cst_32 = arith.constant dense<0.000000e+00> : vector<4x16x32xf32>
    %71 = tpu.matmul %69, %70, %cst_32 {dimension_numbers = #tpu.dot_dimension_numbers<[2], [1], [1], [2], [0, 0, 0, 1, 1, 2], [0], [0]>} : vector<4x16x16xbf16>, vector<4x16x32xbf16>, vector<4x16x32xf32> -> vector<4x16x32xf32>
    "tpu.trace_stop"() : () -> ()
    %72 = arith.truncf %71 : vector<4x16x32xf32> to vector<4x16x32xbf16>
    %c0_33 = arith.constant 0 : index
    %c0_34 = arith.constant 0 : index
    %c0_35 = arith.constant 0 : index
    %c0_36 = arith.constant 0 : index
    %73 = vector.load %arg2[%c0_33, %c0_34, %c0_35, %c0_36] : memref<4x4x32x128xbf16, #tpu.memory_space<vmem>>, vector<1x4x32x128xbf16>
    %74 = vector.shape_cast %73 : vector<1x4x32x128xbf16> to vector<4x32x128xbf16>
    "tpu.trace_start"() <{level = 10 : i32, message = "hmd,hdc->hmc"}> : () -> ()
    %cst_37 = arith.constant dense<0.000000e+00> : vector<4x16x128xf32>
    %75 = tpu.matmul %72, %74, %cst_37 {dimension_numbers = #tpu.dot_dimension_numbers<[2], [1], [1], [2], [0, 0, 0, 1, 1, 2], [0], [0]>} : vector<4x16x32xbf16>, vector<4x32x128xbf16>, vector<4x16x128xf32> -> vector<4x16x128xf32>
    "tpu.trace_stop"() : () -> ()
    %cst_38 = arith.constant dense<0.000000e+00> : vector<16x128xf32>
    %76 = vector.multi_reduction <add>, %75, %cst_38 [0] : vector<4x16x128xf32> to vector<16x128xf32>
    %77 = vector.broadcast %16 : vector<1x128xf32> to vector<16x128xf32>
    %78 = arith.addf %76, %77 : vector<16x128xf32>
    %79 = arith.addf %0, %78 : vector<16x128xf32>
    %cst_39 = arith.constant dense<0.000000e+00> : vector<16xf32>
    %80 = vector.multi_reduction <add>, %79, %cst_39 [1] : vector<16x128xf32> to vector<16xf32>
    %81 = vector.shape_cast %80 : vector<16xf32> to vector<16x1xf32>
    %cst_40 = arith.constant 1.280000e+02 : f32
    %82 = vector.broadcast %cst_40 : f32 to vector<16x1xf32>
    %83 = arith.divf %81, %82 : vector<16x1xf32>
    %84 = vector.broadcast %83 : vector<16x1xf32> to vector<16x128xf32>
    %85 = arith.subf %79, %84 : vector<16x128xf32>
    %86 = arith.mulf %85, %85 : vector<16x128xf32>
    %cst_41 = arith.constant dense<0.000000e+00> : vector<16xf32>
    %87 = vector.multi_reduction <add>, %86, %cst_41 [1] : vector<16x128xf32> to vector<16xf32>
    %88 = vector.shape_cast %87 : vector<16xf32> to vector<16x1xf32>
    %cst_42 = arith.constant 1.280000e+02 : f32
    %89 = vector.broadcast %cst_42 : f32 to vector<16x1xf32>
    %90 = arith.divf %88, %89 : vector<16x1xf32>
    %cst_43 = arith.constant 9.99999974E-6 : f32
    %91 = vector.broadcast %cst_43 : f32 to vector<16x1xf32>
    %92 = arith.addf %90, %91 : vector<16x1xf32>
    %93 = math.rsqrt %92 : vector<16x1xf32>
    %94 = vector.broadcast %93 : vector<16x1xf32> to vector<16x128xf32>
    %95 = arith.mulf %85, %94 : vector<16x128xf32>
    %96 = vector.broadcast %17 : vector<1x128xf32> to vector<16x128xf32>
    %97 = arith.mulf %95, %96 : vector<16x128xf32>
    %98 = vector.broadcast %18 : vector<1x128xf32> to vector<16x128xf32>
    %99 = arith.addf %97, %98 : vector<16x128xf32>
    %100 = arith.truncf %99 : vector<16x128xf32> to vector<16x128xbf16>
    %c0_44 = arith.constant 0 : index
    %c0_45 = arith.constant 0 : index
    %c0_46 = arith.constant 0 : index
    %101 = vector.load %arg3[%c0_44, %c0_45, %c0_46] : memref<4x128x512xbf16, #tpu.memory_space<vmem>>, vector<1x128x512xbf16>
    %102 = vector.shape_cast %101 : vector<1x128x512xbf16> to vector<128x512xbf16>
    %cst_47 = arith.constant dense<0.000000e+00> : vector<16x512xf32>
    %103 = tpu.matmul %100, %102, %cst_47 {dimension_numbers = #tpu.dot_dimension_numbers<[1], [0], [0], [1], [0, 0, 1, 1], [], []>} : vector<16x128xbf16>, vector<128x512xbf16>, vector<16x512xf32> -> vector<16x512xf32>
    %104 = vector.broadcast %21 : vector<1x512xf32> to vector<16x512xf32>
    %105 = arith.addf %103, %104 : vector<16x512xf32>
    %cst_48 = arith.constant 0.707106769 : f32
    %106 = vector.broadcast %cst_48 : f32 to vector<16x512xf32>
    %107 = arith.mulf %105, %106 : vector<16x512xf32>
    %108 = math.absf %107 : vector<16x512xf32>
    %cst_49 = arith.constant 0.327591091 : f32
    %109 = vector.broadcast %cst_49 : f32 to vector<16x512xf32>
    %110 = arith.mulf %109, %108 : vector<16x512xf32>
    %cst_50 = arith.constant 1.000000e+00 : f32
    %111 = vector.broadcast %cst_50 : f32 to vector<16x512xf32>
    %112 = arith.addf %111, %110 : vector<16x512xf32>
    %cst_51 = arith.constant 1.000000e+00 : f32
    %113 = vector.broadcast %cst_51 : f32 to vector<16x512xf32>
    %114 = arith.divf %113, %112 : vector<16x512xf32>
    %cst_52 = arith.constant 1.06140542 : f32
    %115 = vector.broadcast %cst_52 : f32 to vector<16x512xf32>
    %116 = arith.mulf %114, %115 : vector<16x512xf32>
    %cst_53 = arith.constant -1.45315206 : f32
    %117 = vector.broadcast %cst_53 : f32 to vector<16x512xf32>
    %118 = arith.addf %117, %116 : vector<16x512xf32>
    %119 = arith.mulf %114, %118 : vector<16x512xf32>
    %cst_54 = arith.constant 1.42141378 : f32
    %120 = vector.broadcast %cst_54 : f32 to vector<16x512xf32>
    %121 = arith.addf %120, %119 : vector<16x512xf32>
    %122 = arith.mulf %114, %121 : vector<16x512xf32>
    %cst_55 = arith.constant -0.284496725 : f32
    %123 = vector.broadcast %cst_55 : f32 to vector<16x512xf32>
    %124 = arith.addf %123, %122 : vector<16x512xf32>
    %125 = arith.mulf %114, %124 : vector<16x512xf32>
    %cst_56 = arith.constant 0.254829586 : f32
    %126 = vector.broadcast %cst_56 : f32 to vector<16x512xf32>
    %127 = arith.addf %126, %125 : vector<16x512xf32>
    %128 = arith.mulf %114, %127 : vector<16x512xf32>
    %cst_57 = arith.constant 0.000000e+00 : f32
    %129 = vector.broadcast %cst_57 : f32 to vector<16x512xf32>
    %130 = arith.subf %129, %108 : vector<16x512xf32>
    %131 = arith.mulf %130, %108 : vector<16x512xf32>
    %132 = math.exp %131 : vector<16x512xf32>
    %133 = arith.mulf %128, %132 : vector<16x512xf32>
    %cst_58 = arith.constant 1.000000e+00 : f32
    %134 = vector.broadcast %cst_58 : f32 to vector<16x512xf32>
    %135 = arith.subf %134, %133 : vector<16x512xf32>
    %cst_59 = arith.constant 0.000000e+00 : f32
    %136 = vector.broadcast %cst_59 : f32 to vector<16x512xf32>
    %137 = arith.cmpf oge, %107, %136 : vector<16x512xf32>
    %cst_60 = arith.constant 0.000000e+00 : f32
    %138 = vector.broadcast %cst_60 : f32 to vector<16x512xf32>
    %139 = arith.subf %138, %135 : vector<16x512xf32>
    %140 = arith.select %137, %135, %139 : vector<16x512xi1>, vector<16x512xf32>
    %cst_61 = arith.constant 5.000000e-01 : f32
    %141 = vector.broadcast %cst_61 : f32 to vector<16x512xf32>
    %142 = arith.mulf %141, %105 : vector<16x512xf32>
    %cst_62 = arith.constant 1.000000e+00 : f32
    %143 = vector.broadcast %cst_62 : f32 to vector<16x512xf32>
    %144 = arith.addf %143, %140 : vector<16x512xf32>
    %145 = arith.mulf %142, %144 : vector<16x512xf32>
    %146 = arith.truncf %145 : vector<16x512xf32> to vector<16x512xbf16>
    %c0_63 = arith.constant 0 : index
    %c0_64 = arith.constant 0 : index
    %c0_65 = arith.constant 0 : index
    %147 = vector.load %arg4[%c0_63, %c0_64, %c0_65] : memref<4x512x128xbf16, #tpu.memory_space<vmem>>, vector<1x512x128xbf16>
    %148 = vector.shape_cast %147 : vector<1x512x128xbf16> to vector<512x128xbf16>
    %cst_66 = arith.constant dense<0.000000e+00> : vector<16x128xf32>
    %149 = tpu.matmul %146, %148, %cst_66 {dimension_numbers = #tpu.dot_dimension_numbers<[1], [0], [0], [1], [0, 0, 1, 1], [], []>} : vector<16x512xbf16>, vector<512x128xbf16>, vector<16x128xf32> -> vector<16x128xf32>
    %150 = vector.broadcast %19 : vector<1x128xf32> to vector<16x128xf32>
    %151 = arith.addf %149, %150 : vector<16x128xf32>
    %152 = arith.addf %79, %151 : vector<16x128xf32>
    %c1_67 = arith.constant 1 : index
    %c0_68 = arith.constant 0 : index
    %c0_69 = arith.constant 0 : index
    %153 = vector.load %arg5[%c1_67, %c0_68, %c0_69] : memref<4x6x128xf32, #tpu.memory_space<vmem>>, vector<1x6x128xf32>
    %154 = vector.shape_cast %153 : vector<1x6x128xf32> to vector<6x128xf32>
    %155 = vector.extract_strided_slice %154 {offsets = [0, 0], sizes = [1, 128], strides = [1, 1]} : vector<6x128xf32> to vector<1x128xf32>
    %156 = vector.extract_strided_slice %154 {offsets = [1, 0], sizes = [1, 128], strides = [1, 1]} : vector<6x128xf32> to vector<1x128xf32>
    %157 = vector.extract_strided_slice %154 {offsets = [2, 0], sizes = [1, 128], strides = [1, 1]} : vector<6x128xf32> to vector<1x128xf32>
    %158 = vector.extract_strided_slice %154 {offsets = [3, 0], sizes = [1, 128], strides = [1, 1]} : vector<6x128xf32> to vector<1x128xf32>
    %159 = vector.extract_strided_slice %154 {offsets = [4, 0], sizes = [1, 128], strides = [1, 1]} : vector<6x128xf32> to vector<1x128xf32>
    %160 = vector.extract_strided_slice %154 {offsets = [5, 0], sizes = [1, 128], strides = [1, 1]} : vector<6x128xf32> to vector<1x128xf32>
    %c1_70 = arith.constant 1 : index
    %c0_71 = arith.constant 0 : index
    %c0_72 = arith.constant 0 : index
    %161 = vector.load %arg6[%c1_70, %c0_71, %c0_72] : memref<4x1x512xf32, #tpu.memory_space<vmem>>, vector<1x1x512xf32>
    %162 = vector.shape_cast %161 : vector<1x1x512xf32> to vector<1x512xf32>
    %cst_73 = arith.constant dense<0.000000e+00> : vector<16xf32>
    %163 = vector.multi_reduction <add>, %152, %cst_73 [1] : vector<16x128xf32> to vector<16xf32>
    %164 = vector.shape_cast %163 : vector<16xf32> to vector<16x1xf32>
    %cst_74 = arith.constant 1.280000e+02 : f32
    %165 = vector.broadcast %cst_74 : f32 to vector<16x1xf32>
    %166 = arith.divf %164, %165 : vector<16x1xf32>
    %167 = vector.broadcast %166 : vector<16x1xf32> to vector<16x128xf32>
    %168 = arith.subf %152, %167 : vector<16x128xf32>
    %169 = arith.mulf %168, %168 : vector<16x128xf32>
    %cst_75 = arith.constant dense<0.000000e+00> : vector<16xf32>
    %170 = vector.multi_reduction <add>, %169, %cst_75 [1] : vector<16x128xf32> to vector<16xf32>
    %171 = vector.shape_cast %170 : vector<16xf32> to vector<16x1xf32>
    %cst_76 = arith.constant 1.280000e+02 : f32
    %172 = vector.broadcast %cst_76 : f32 to vector<16x1xf32>
    %173 = arith.divf %171, %172 : vector<16x1xf32>
    %cst_77 = arith.constant 9.99999974E-6 : f32
    %174 = vector.broadcast %cst_77 : f32 to vector<16x1xf32>
    %175 = arith.addf %173, %174 : vector<16x1xf32>
    %176 = math.rsqrt %175 : vector<16x1xf32>
    %177 = vector.broadcast %176 : vector<16x1xf32> to vector<16x128xf32>
    %178 = arith.mulf %168, %177 : vector<16x128xf32>
    %179 = vector.broadcast %155 : vector<1x128xf32> to vector<16x128xf32>
    %180 = arith.mulf %178, %179 : vector<16x128xf32>
    %181 = vector.broadcast %156 : vector<1x128xf32> to vector<16x128xf32>
    %182 = arith.addf %180, %181 : vector<16x128xf32>
    %183 = arith.truncf %182 : vector<16x128xf32> to vector<16x128xbf16>
    %184 = vector.shape_cast %183 : vector<16x128xbf16> to vector<1x16x128xbf16>
    %185 = vector.broadcast %184 : vector<1x16x128xbf16> to vector<4x16x128xbf16>
    %c1_78 = arith.constant 1 : index
    %c0_79 = arith.constant 0 : index
    %c0_80 = arith.constant 0 : index
    %c0_81 = arith.constant 0 : index
    %c0_82 = arith.constant 0 : index
    %186 = vector.load %arg1[%c1_78, %c0_79, %c0_80, %c0_81, %c0_82] : memref<4x3x4x128x32xbf16, #tpu.memory_space<vmem>>, vector<1x1x4x128x32xbf16>
    %187 = vector.shape_cast %186 : vector<1x1x4x128x32xbf16> to vector<4x128x32xbf16>
    "tpu.trace_start"() <{level = 10 : i32, message = "hmc,hcd->hmd"}> : () -> ()
    %cst_83 = arith.constant dense<0.000000e+00> : vector<4x16x32xf32>
    %188 = tpu.matmul %185, %187, %cst_83 {dimension_numbers = #tpu.dot_dimension_numbers<[2], [1], [1], [2], [0, 0, 0, 1, 1, 2], [0], [0]>} : vector<4x16x128xbf16>, vector<4x128x32xbf16>, vector<4x16x32xf32> -> vector<4x16x32xf32>
    "tpu.trace_stop"() : () -> ()
    %c1_84 = arith.constant 1 : index
    %c1_85 = arith.constant 1 : index
    %c0_86 = arith.constant 0 : index
    %c0_87 = arith.constant 0 : index
    %c0_88 = arith.constant 0 : index
    %189 = vector.load %arg1[%c1_84, %c1_85, %c0_86, %c0_87, %c0_88] : memref<4x3x4x128x32xbf16, #tpu.memory_space<vmem>>, vector<1x1x4x128x32xbf16>
    %190 = vector.shape_cast %189 : vector<1x1x4x128x32xbf16> to vector<4x128x32xbf16>
    "tpu.trace_start"() <{level = 10 : i32, message = "hmc,hcd->hmd"}> : () -> ()
    %cst_89 = arith.constant dense<0.000000e+00> : vector<4x16x32xf32>
    %191 = tpu.matmul %185, %190, %cst_89 {dimension_numbers = #tpu.dot_dimension_numbers<[2], [1], [1], [2], [0, 0, 0, 1, 1, 2], [0], [0]>} : vector<4x16x128xbf16>, vector<4x128x32xbf16>, vector<4x16x32xf32> -> vector<4x16x32xf32>
    "tpu.trace_stop"() : () -> ()
    %c1_90 = arith.constant 1 : index
    %c2_91 = arith.constant 2 : index
    %c0_92 = arith.constant 0 : index
    %c0_93 = arith.constant 0 : index
    %c0_94 = arith.constant 0 : index
    %192 = vector.load %arg1[%c1_90, %c2_91, %c0_92, %c0_93, %c0_94] : memref<4x3x4x128x32xbf16, #tpu.memory_space<vmem>>, vector<1x1x4x128x32xbf16>
    %193 = vector.shape_cast %192 : vector<1x1x4x128x32xbf16> to vector<4x128x32xbf16>
    "tpu.trace_start"() <{level = 10 : i32, message = "hmc,hcd->hmd"}> : () -> ()
    %cst_95 = arith.constant dense<0.000000e+00> : vector<4x16x32xf32>
    %194 = tpu.matmul %185, %193, %cst_95 {dimension_numbers = #tpu.dot_dimension_numbers<[2], [1], [1], [2], [0, 0, 0, 1, 1, 2], [0], [0]>} : vector<4x16x128xbf16>, vector<4x128x32xbf16>, vector<4x16x32xf32> -> vector<4x16x32xf32>
    "tpu.trace_stop"() : () -> ()
    %195 = arith.truncf %188 : vector<4x16x32xf32> to vector<4x16x32xbf16>
    %196 = arith.truncf %191 : vector<4x16x32xf32> to vector<4x16x32xbf16>
    "tpu.trace_start"() <{level = 10 : i32, message = "hmd,hnd->hmn"}> : () -> ()
    %cst_96 = arith.constant dense<0.000000e+00> : vector<4x16x16xf32>
    %197 = tpu.matmul %195, %196, %cst_96 {dimension_numbers = #tpu.dot_dimension_numbers<[2], [2], [1], [1], [0, 0, 0, 1, 1, 1], [0], [0]>} : vector<4x16x32xbf16>, vector<4x16x32xbf16>, vector<4x16x16xf32> -> vector<4x16x16xf32>
    "tpu.trace_stop"() : () -> ()
    %198 = vector.shape_cast %11 : vector<16x16xf32> to vector<1x16x16xf32>
    %199 = vector.broadcast %198 : vector<1x16x16xf32> to vector<4x16x16xf32>
    %200 = arith.addf %197, %199 : vector<4x16x16xf32>
    %cst_97 = arith.constant dense<0xFF800000> : vector<4x16xf32>
    %201 = vector.multi_reduction <maximumf>, %200, %cst_97 [2] : vector<4x16x16xf32> to vector<4x16xf32>
    %202 = vector.shape_cast %201 : vector<4x16xf32> to vector<4x16x1xf32>
    %203 = vector.broadcast %202 : vector<4x16x1xf32> to vector<4x16x16xf32>
    %204 = arith.subf %200, %203 : vector<4x16x16xf32>
    %205 = math.exp %204 : vector<4x16x16xf32>
    %cst_98 = arith.constant dense<0.000000e+00> : vector<4x16xf32>
    %206 = vector.multi_reduction <add>, %205, %cst_98 [2] : vector<4x16x16xf32> to vector<4x16xf32>
    %207 = vector.shape_cast %206 : vector<4x16xf32> to vector<4x16x1xf32>
    %208 = vector.broadcast %207 : vector<4x16x1xf32> to vector<4x16x16xf32>
    %209 = arith.divf %205, %208 : vector<4x16x16xf32>
    %210 = arith.truncf %209 : vector<4x16x16xf32> to vector<4x16x16xbf16>
    %211 = arith.truncf %194 : vector<4x16x32xf32> to vector<4x16x32xbf16>
    "tpu.trace_start"() <{level = 10 : i32, message = "hmn,hnd->hmd"}> : () -> ()
    %cst_99 = arith.constant dense<0.000000e+00> : vector<4x16x32xf32>
    %212 = tpu.matmul %210, %211, %cst_99 {dimension_numbers = #tpu.dot_dimension_numbers<[2], [1], [1], [2], [0, 0, 0, 1, 1, 2], [0], [0]>} : vector<4x16x16xbf16>, vector<4x16x32xbf16>, vector<4x16x32xf32> -> vector<4x16x32xf32>
    "tpu.trace_stop"() : () -> ()
    %213 = arith.truncf %212 : vector<4x16x32xf32> to vector<4x16x32xbf16>
    %c1_100 = arith.constant 1 : index
    %c0_101 = arith.constant 0 : index
    %c0_102 = arith.constant 0 : index
    %c0_103 = arith.constant 0 : index
    %214 = vector.load %arg2[%c1_100, %c0_101, %c0_102, %c0_103] : memref<4x4x32x128xbf16, #tpu.memory_space<vmem>>, vector<1x4x32x128xbf16>
    %215 = vector.shape_cast %214 : vector<1x4x32x128xbf16> to vector<4x32x128xbf16>
    "tpu.trace_start"() <{level = 10 : i32, message = "hmd,hdc->hmc"}> : () -> ()
    %cst_104 = arith.constant dense<0.000000e+00> : vector<4x16x128xf32>
    %216 = tpu.matmul %213, %215, %cst_104 {dimension_numbers = #tpu.dot_dimension_numbers<[2], [1], [1], [2], [0, 0, 0, 1, 1, 2], [0], [0]>} : vector<4x16x32xbf16>, vector<4x32x128xbf16>, vector<4x16x128xf32> -> vector<4x16x128xf32>
    "tpu.trace_stop"() : () -> ()
    %cst_105 = arith.constant dense<0.000000e+00> : vector<16x128xf32>
    %217 = vector.multi_reduction <add>, %216, %cst_105 [0] : vector<4x16x128xf32> to vector<16x128xf32>
    %218 = vector.broadcast %157 : vector<1x128xf32> to vector<16x128xf32>
    %219 = arith.addf %217, %218 : vector<16x128xf32>
    %220 = arith.addf %152, %219 : vector<16x128xf32>
    %cst_106 = arith.constant dense<0.000000e+00> : vector<16xf32>
    %221 = vector.multi_reduction <add>, %220, %cst_106 [1] : vector<16x128xf32> to vector<16xf32>
    %222 = vector.shape_cast %221 : vector<16xf32> to vector<16x1xf32>
    %cst_107 = arith.constant 1.280000e+02 : f32
    %223 = vector.broadcast %cst_107 : f32 to vector<16x1xf32>
    %224 = arith.divf %222, %223 : vector<16x1xf32>
    %225 = vector.broadcast %224 : vector<16x1xf32> to vector<16x128xf32>
    %226 = arith.subf %220, %225 : vector<16x128xf32>
    %227 = arith.mulf %226, %226 : vector<16x128xf32>
    %cst_108 = arith.constant dense<0.000000e+00> : vector<16xf32>
    %228 = vector.multi_reduction <add>, %227, %cst_108 [1] : vector<16x128xf32> to vector<16xf32>
    %229 = vector.shape_cast %228 : vector<16xf32> to vector<16x1xf32>
    %cst_109 = arith.constant 1.280000e+02 : f32
    %230 = vector.broadcast %cst_109 : f32 to vector<16x1xf32>
    %231 = arith.divf %229, %230 : vector<16x1xf32>
    %cst_110 = arith.constant 9.99999974E-6 : f32
    %232 = vector.broadcast %cst_110 : f32 to vector<16x1xf32>
    %233 = arith.addf %231, %232 : vector<16x1xf32>
    %234 = math.rsqrt %233 : vector<16x1xf32>
    %235 = vector.broadcast %234 : vector<16x1xf32> to vector<16x128xf32>
    %236 = arith.mulf %226, %235 : vector<16x128xf32>
    %237 = vector.broadcast %158 : vector<1x128xf32> to vector<16x128xf32>
    %238 = arith.mulf %236, %237 : vector<16x128xf32>
    %239 = vector.broadcast %159 : vector<1x128xf32> to vector<16x128xf32>
    %240 = arith.addf %238, %239 : vector<16x128xf32>
    %241 = arith.truncf %240 : vector<16x128xf32> to vector<16x128xbf16>
    %c1_111 = arith.constant 1 : index
    %c0_112 = arith.constant 0 : index
    %c0_113 = arith.constant 0 : index
    %242 = vector.load %arg3[%c1_111, %c0_112, %c0_113] : memref<4x128x512xbf16, #tpu.memory_space<vmem>>, vector<1x128x512xbf16>
    %243 = vector.shape_cast %242 : vector<1x128x512xbf16> to vector<128x512xbf16>
    %cst_114 = arith.constant dense<0.000000e+00> : vector<16x512xf32>
    %244 = tpu.matmul %241, %243, %cst_114 {dimension_numbers = #tpu.dot_dimension_numbers<[1], [0], [0], [1], [0, 0, 1, 1], [], []>} : vector<16x128xbf16>, vector<128x512xbf16>, vector<16x512xf32> -> vector<16x512xf32>
    %245 = vector.broadcast %162 : vector<1x512xf32> to vector<16x512xf32>
    %246 = arith.addf %244, %245 : vector<16x512xf32>
    %cst_115 = arith.constant 0.707106769 : f32
    %247 = vector.broadcast %cst_115 : f32 to vector<16x512xf32>
    %248 = arith.mulf %246, %247 : vector<16x512xf32>
    %249 = math.absf %248 : vector<16x512xf32>
    %cst_116 = arith.constant 0.327591091 : f32
    %250 = vector.broadcast %cst_116 : f32 to vector<16x512xf32>
    %251 = arith.mulf %250, %249 : vector<16x512xf32>
    %cst_117 = arith.constant 1.000000e+00 : f32
    %252 = vector.broadcast %cst_117 : f32 to vector<16x512xf32>
    %253 = arith.addf %252, %251 : vector<16x512xf32>
    %cst_118 = arith.constant 1.000000e+00 : f32
    %254 = vector.broadcast %cst_118 : f32 to vector<16x512xf32>
    %255 = arith.divf %254, %253 : vector<16x512xf32>
    %cst_119 = arith.constant 1.06140542 : f32
    %256 = vector.broadcast %cst_119 : f32 to vector<16x512xf32>
    %257 = arith.mulf %255, %256 : vector<16x512xf32>
    %cst_120 = arith.constant -1.45315206 : f32
    %258 = vector.broadcast %cst_120 : f32 to vector<16x512xf32>
    %259 = arith.addf %258, %257 : vector<16x512xf32>
    %260 = arith.mulf %255, %259 : vector<16x512xf32>
    %cst_121 = arith.constant 1.42141378 : f32
    %261 = vector.broadcast %cst_121 : f32 to vector<16x512xf32>
    %262 = arith.addf %261, %260 : vector<16x512xf32>
    %263 = arith.mulf %255, %262 : vector<16x512xf32>
    %cst_122 = arith.constant -0.284496725 : f32
    %264 = vector.broadcast %cst_122 : f32 to vector<16x512xf32>
    %265 = arith.addf %264, %263 : vector<16x512xf32>
    %266 = arith.mulf %255, %265 : vector<16x512xf32>
    %cst_123 = arith.constant 0.254829586 : f32
    %267 = vector.broadcast %cst_123 : f32 to vector<16x512xf32>
    %268 = arith.addf %267, %266 : vector<16x512xf32>
    %269 = arith.mulf %255, %268 : vector<16x512xf32>
    %cst_124 = arith.constant 0.000000e+00 : f32
    %270 = vector.broadcast %cst_124 : f32 to vector<16x512xf32>
    %271 = arith.subf %270, %249 : vector<16x512xf32>
    %272 = arith.mulf %271, %249 : vector<16x512xf32>
    %273 = math.exp %272 : vector<16x512xf32>
    %274 = arith.mulf %269, %273 : vector<16x512xf32>
    %cst_125 = arith.constant 1.000000e+00 : f32
    %275 = vector.broadcast %cst_125 : f32 to vector<16x512xf32>
    %276 = arith.subf %275, %274 : vector<16x512xf32>
    %cst_126 = arith.constant 0.000000e+00 : f32
    %277 = vector.broadcast %cst_126 : f32 to vector<16x512xf32>
    %278 = arith.cmpf oge, %248, %277 : vector<16x512xf32>
    %cst_127 = arith.constant 0.000000e+00 : f32
    %279 = vector.broadcast %cst_127 : f32 to vector<16x512xf32>
    %280 = arith.subf %279, %276 : vector<16x512xf32>
    %281 = arith.select %278, %276, %280 : vector<16x512xi1>, vector<16x512xf32>
    %cst_128 = arith.constant 5.000000e-01 : f32
    %282 = vector.broadcast %cst_128 : f32 to vector<16x512xf32>
    %283 = arith.mulf %282, %246 : vector<16x512xf32>
    %cst_129 = arith.constant 1.000000e+00 : f32
    %284 = vector.broadcast %cst_129 : f32 to vector<16x512xf32>
    %285 = arith.addf %284, %281 : vector<16x512xf32>
    %286 = arith.mulf %283, %285 : vector<16x512xf32>
    %287 = arith.truncf %286 : vector<16x512xf32> to vector<16x512xbf16>
    %c1_130 = arith.constant 1 : index
    %c0_131 = arith.constant 0 : index
    %c0_132 = arith.constant 0 : index
    %288 = vector.load %arg4[%c1_130, %c0_131, %c0_132] : memref<4x512x128xbf16, #tpu.memory_space<vmem>>, vector<1x512x128xbf16>
    %289 = vector.shape_cast %288 : vector<1x512x128xbf16> to vector<512x128xbf16>
    %cst_133 = arith.constant dense<0.000000e+00> : vector<16x128xf32>
    %290 = tpu.matmul %287, %289, %cst_133 {dimension_numbers = #tpu.dot_dimension_numbers<[1], [0], [0], [1], [0, 0, 1, 1], [], []>} : vector<16x512xbf16>, vector<512x128xbf16>, vector<16x128xf32> -> vector<16x128xf32>
    %291 = vector.broadcast %160 : vector<1x128xf32> to vector<16x128xf32>
    %292 = arith.addf %290, %291 : vector<16x128xf32>
    %293 = arith.addf %220, %292 : vector<16x128xf32>
    %c2_134 = arith.constant 2 : index
    %c0_135 = arith.constant 0 : index
    %c0_136 = arith.constant 0 : index
    %294 = vector.load %arg5[%c2_134, %c0_135, %c0_136] : memref<4x6x128xf32, #tpu.memory_space<vmem>>, vector<1x6x128xf32>
    %295 = vector.shape_cast %294 : vector<1x6x128xf32> to vector<6x128xf32>
    %296 = vector.extract_strided_slice %295 {offsets = [0, 0], sizes = [1, 128], strides = [1, 1]} : vector<6x128xf32> to vector<1x128xf32>
    %297 = vector.extract_strided_slice %295 {offsets = [1, 0], sizes = [1, 128], strides = [1, 1]} : vector<6x128xf32> to vector<1x128xf32>
    %298 = vector.extract_strided_slice %295 {offsets = [2, 0], sizes = [1, 128], strides = [1, 1]} : vector<6x128xf32> to vector<1x128xf32>
    %299 = vector.extract_strided_slice %295 {offsets = [3, 0], sizes = [1, 128], strides = [1, 1]} : vector<6x128xf32> to vector<1x128xf32>
    %300 = vector.extract_strided_slice %295 {offsets = [4, 0], sizes = [1, 128], strides = [1, 1]} : vector<6x128xf32> to vector<1x128xf32>
    %301 = vector.extract_strided_slice %295 {offsets = [5, 0], sizes = [1, 128], strides = [1, 1]} : vector<6x128xf32> to vector<1x128xf32>
    %c2_137 = arith.constant 2 : index
    %c0_138 = arith.constant 0 : index
    %c0_139 = arith.constant 0 : index
    %302 = vector.load %arg6[%c2_137, %c0_138, %c0_139] : memref<4x1x512xf32, #tpu.memory_space<vmem>>, vector<1x1x512xf32>
    %303 = vector.shape_cast %302 : vector<1x1x512xf32> to vector<1x512xf32>
    %cst_140 = arith.constant dense<0.000000e+00> : vector<16xf32>
    %304 = vector.multi_reduction <add>, %293, %cst_140 [1] : vector<16x128xf32> to vector<16xf32>
    %305 = vector.shape_cast %304 : vector<16xf32> to vector<16x1xf32>
    %cst_141 = arith.constant 1.280000e+02 : f32
    %306 = vector.broadcast %cst_141 : f32 to vector<16x1xf32>
    %307 = arith.divf %305, %306 : vector<16x1xf32>
    %308 = vector.broadcast %307 : vector<16x1xf32> to vector<16x128xf32>
    %309 = arith.subf %293, %308 : vector<16x128xf32>
    %310 = arith.mulf %309, %309 : vector<16x128xf32>
    %cst_142 = arith.constant dense<0.000000e+00> : vector<16xf32>
    %311 = vector.multi_reduction <add>, %310, %cst_142 [1] : vector<16x128xf32> to vector<16xf32>
    %312 = vector.shape_cast %311 : vector<16xf32> to vector<16x1xf32>
    %cst_143 = arith.constant 1.280000e+02 : f32
    %313 = vector.broadcast %cst_143 : f32 to vector<16x1xf32>
    %314 = arith.divf %312, %313 : vector<16x1xf32>
    %cst_144 = arith.constant 9.99999974E-6 : f32
    %315 = vector.broadcast %cst_144 : f32 to vector<16x1xf32>
    %316 = arith.addf %314, %315 : vector<16x1xf32>
    %317 = math.rsqrt %316 : vector<16x1xf32>
    %318 = vector.broadcast %317 : vector<16x1xf32> to vector<16x128xf32>
    %319 = arith.mulf %309, %318 : vector<16x128xf32>
    %320 = vector.broadcast %296 : vector<1x128xf32> to vector<16x128xf32>
    %321 = arith.mulf %319, %320 : vector<16x128xf32>
    %322 = vector.broadcast %297 : vector<1x128xf32> to vector<16x128xf32>
    %323 = arith.addf %321, %322 : vector<16x128xf32>
    %324 = arith.truncf %323 : vector<16x128xf32> to vector<16x128xbf16>
    %325 = vector.shape_cast %324 : vector<16x128xbf16> to vector<1x16x128xbf16>
    %326 = vector.broadcast %325 : vector<1x16x128xbf16> to vector<4x16x128xbf16>
    %c2_145 = arith.constant 2 : index
    %c0_146 = arith.constant 0 : index
    %c0_147 = arith.constant 0 : index
    %c0_148 = arith.constant 0 : index
    %c0_149 = arith.constant 0 : index
    %327 = vector.load %arg1[%c2_145, %c0_146, %c0_147, %c0_148, %c0_149] : memref<4x3x4x128x32xbf16, #tpu.memory_space<vmem>>, vector<1x1x4x128x32xbf16>
    %328 = vector.shape_cast %327 : vector<1x1x4x128x32xbf16> to vector<4x128x32xbf16>
    "tpu.trace_start"() <{level = 10 : i32, message = "hmc,hcd->hmd"}> : () -> ()
    %cst_150 = arith.constant dense<0.000000e+00> : vector<4x16x32xf32>
    %329 = tpu.matmul %326, %328, %cst_150 {dimension_numbers = #tpu.dot_dimension_numbers<[2], [1], [1], [2], [0, 0, 0, 1, 1, 2], [0], [0]>} : vector<4x16x128xbf16>, vector<4x128x32xbf16>, vector<4x16x32xf32> -> vector<4x16x32xf32>
    "tpu.trace_stop"() : () -> ()
    %c2_151 = arith.constant 2 : index
    %c1_152 = arith.constant 1 : index
    %c0_153 = arith.constant 0 : index
    %c0_154 = arith.constant 0 : index
    %c0_155 = arith.constant 0 : index
    %330 = vector.load %arg1[%c2_151, %c1_152, %c0_153, %c0_154, %c0_155] : memref<4x3x4x128x32xbf16, #tpu.memory_space<vmem>>, vector<1x1x4x128x32xbf16>
    %331 = vector.shape_cast %330 : vector<1x1x4x128x32xbf16> to vector<4x128x32xbf16>
    "tpu.trace_start"() <{level = 10 : i32, message = "hmc,hcd->hmd"}> : () -> ()
    %cst_156 = arith.constant dense<0.000000e+00> : vector<4x16x32xf32>
    %332 = tpu.matmul %326, %331, %cst_156 {dimension_numbers = #tpu.dot_dimension_numbers<[2], [1], [1], [2], [0, 0, 0, 1, 1, 2], [0], [0]>} : vector<4x16x128xbf16>, vector<4x128x32xbf16>, vector<4x16x32xf32> -> vector<4x16x32xf32>
    "tpu.trace_stop"() : () -> ()
    %c2_157 = arith.constant 2 : index
    %c2_158 = arith.constant 2 : index
    %c0_159 = arith.constant 0 : index
    %c0_160 = arith.constant 0 : index
    %c0_161 = arith.constant 0 : index
    %333 = vector.load %arg1[%c2_157, %c2_158, %c0_159, %c0_160, %c0_161] : memref<4x3x4x128x32xbf16, #tpu.memory_space<vmem>>, vector<1x1x4x128x32xbf16>
    %334 = vector.shape_cast %333 : vector<1x1x4x128x32xbf16> to vector<4x128x32xbf16>
    "tpu.trace_start"() <{level = 10 : i32, message = "hmc,hcd->hmd"}> : () -> ()
    %cst_162 = arith.constant dense<0.000000e+00> : vector<4x16x32xf32>
    %335 = tpu.matmul %326, %334, %cst_162 {dimension_numbers = #tpu.dot_dimension_numbers<[2], [1], [1], [2], [0, 0, 0, 1, 1, 2], [0], [0]>} : vector<4x16x128xbf16>, vector<4x128x32xbf16>, vector<4x16x32xf32> -> vector<4x16x32xf32>
    "tpu.trace_stop"() : () -> ()
    %336 = arith.truncf %329 : vector<4x16x32xf32> to vector<4x16x32xbf16>
    %337 = arith.truncf %332 : vector<4x16x32xf32> to vector<4x16x32xbf16>
    "tpu.trace_start"() <{level = 10 : i32, message = "hmd,hnd->hmn"}> : () -> ()
    %cst_163 = arith.constant dense<0.000000e+00> : vector<4x16x16xf32>
    %338 = tpu.matmul %336, %337, %cst_163 {dimension_numbers = #tpu.dot_dimension_numbers<[2], [2], [1], [1], [0, 0, 0, 1, 1, 1], [0], [0]>} : vector<4x16x32xbf16>, vector<4x16x32xbf16>, vector<4x16x16xf32> -> vector<4x16x16xf32>
    "tpu.trace_stop"() : () -> ()
    %339 = vector.shape_cast %11 : vector<16x16xf32> to vector<1x16x16xf32>
    %340 = vector.broadcast %339 : vector<1x16x16xf32> to vector<4x16x16xf32>
    %341 = arith.addf %338, %340 : vector<4x16x16xf32>
    %cst_164 = arith.constant dense<0xFF800000> : vector<4x16xf32>
    %342 = vector.multi_reduction <maximumf>, %341, %cst_164 [2] : vector<4x16x16xf32> to vector<4x16xf32>
    %343 = vector.shape_cast %342 : vector<4x16xf32> to vector<4x16x1xf32>
    %344 = vector.broadcast %343 : vector<4x16x1xf32> to vector<4x16x16xf32>
    %345 = arith.subf %341, %344 : vector<4x16x16xf32>
    %346 = math.exp %345 : vector<4x16x16xf32>
    %cst_165 = arith.constant dense<0.000000e+00> : vector<4x16xf32>
    %347 = vector.multi_reduction <add>, %346, %cst_165 [2] : vector<4x16x16xf32> to vector<4x16xf32>
    %348 = vector.shape_cast %347 : vector<4x16xf32> to vector<4x16x1xf32>
    %349 = vector.broadcast %348 : vector<4x16x1xf32> to vector<4x16x16xf32>
    %350 = arith.divf %346, %349 : vector<4x16x16xf32>
    %351 = arith.truncf %350 : vector<4x16x16xf32> to vector<4x16x16xbf16>
    %352 = arith.truncf %335 : vector<4x16x32xf32> to vector<4x16x32xbf16>
    "tpu.trace_start"() <{level = 10 : i32, message = "hmn,hnd->hmd"}> : () -> ()
    %cst_166 = arith.constant dense<0.000000e+00> : vector<4x16x32xf32>
    %353 = tpu.matmul %351, %352, %cst_166 {dimension_numbers = #tpu.dot_dimension_numbers<[2], [1], [1], [2], [0, 0, 0, 1, 1, 2], [0], [0]>} : vector<4x16x16xbf16>, vector<4x16x32xbf16>, vector<4x16x32xf32> -> vector<4x16x32xf32>
    "tpu.trace_stop"() : () -> ()
    %354 = arith.truncf %353 : vector<4x16x32xf32> to vector<4x16x32xbf16>
    %c2_167 = arith.constant 2 : index
    %c0_168 = arith.constant 0 : index
    %c0_169 = arith.constant 0 : index
    %c0_170 = arith.constant 0 : index
    %355 = vector.load %arg2[%c2_167, %c0_168, %c0_169, %c0_170] : memref<4x4x32x128xbf16, #tpu.memory_space<vmem>>, vector<1x4x32x128xbf16>
    %356 = vector.shape_cast %355 : vector<1x4x32x128xbf16> to vector<4x32x128xbf16>
    "tpu.trace_start"() <{level = 10 : i32, message = "hmd,hdc->hmc"}> : () -> ()
    %cst_171 = arith.constant dense<0.000000e+00> : vector<4x16x128xf32>
    %357 = tpu.matmul %354, %356, %cst_171 {dimension_numbers = #tpu.dot_dimension_numbers<[2], [1], [1], [2], [0, 0, 0, 1, 1, 2], [0], [0]>} : vector<4x16x32xbf16>, vector<4x32x128xbf16>, vector<4x16x128xf32> -> vector<4x16x128xf32>
    "tpu.trace_stop"() : () -> ()
    %cst_172 = arith.constant dense<0.000000e+00> : vector<16x128xf32>
    %358 = vector.multi_reduction <add>, %357, %cst_172 [0] : vector<4x16x128xf32> to vector<16x128xf32>
    %359 = vector.broadcast %298 : vector<1x128xf32> to vector<16x128xf32>
    %360 = arith.addf %358, %359 : vector<16x128xf32>
    %361 = arith.addf %293, %360 : vector<16x128xf32>
    %cst_173 = arith.constant dense<0.000000e+00> : vector<16xf32>
    %362 = vector.multi_reduction <add>, %361, %cst_173 [1] : vector<16x128xf32> to vector<16xf32>
    %363 = vector.shape_cast %362 : vector<16xf32> to vector<16x1xf32>
    %cst_174 = arith.constant 1.280000e+02 : f32
    %364 = vector.broadcast %cst_174 : f32 to vector<16x1xf32>
    %365 = arith.divf %363, %364 : vector<16x1xf32>
    %366 = vector.broadcast %365 : vector<16x1xf32> to vector<16x128xf32>
    %367 = arith.subf %361, %366 : vector<16x128xf32>
    %368 = arith.mulf %367, %367 : vector<16x128xf32>
    %cst_175 = arith.constant dense<0.000000e+00> : vector<16xf32>
    %369 = vector.multi_reduction <add>, %368, %cst_175 [1] : vector<16x128xf32> to vector<16xf32>
    %370 = vector.shape_cast %369 : vector<16xf32> to vector<16x1xf32>
    %cst_176 = arith.constant 1.280000e+02 : f32
    %371 = vector.broadcast %cst_176 : f32 to vector<16x1xf32>
    %372 = arith.divf %370, %371 : vector<16x1xf32>
    %cst_177 = arith.constant 9.99999974E-6 : f32
    %373 = vector.broadcast %cst_177 : f32 to vector<16x1xf32>
    %374 = arith.addf %372, %373 : vector<16x1xf32>
    %375 = math.rsqrt %374 : vector<16x1xf32>
    %376 = vector.broadcast %375 : vector<16x1xf32> to vector<16x128xf32>
    %377 = arith.mulf %367, %376 : vector<16x128xf32>
    %378 = vector.broadcast %299 : vector<1x128xf32> to vector<16x128xf32>
    %379 = arith.mulf %377, %378 : vector<16x128xf32>
    %380 = vector.broadcast %300 : vector<1x128xf32> to vector<16x128xf32>
    %381 = arith.addf %379, %380 : vector<16x128xf32>
    %382 = arith.truncf %381 : vector<16x128xf32> to vector<16x128xbf16>
    %c2_178 = arith.constant 2 : index
    %c0_179 = arith.constant 0 : index
    %c0_180 = arith.constant 0 : index
    %383 = vector.load %arg3[%c2_178, %c0_179, %c0_180] : memref<4x128x512xbf16, #tpu.memory_space<vmem>>, vector<1x128x512xbf16>
    %384 = vector.shape_cast %383 : vector<1x128x512xbf16> to vector<128x512xbf16>
    %cst_181 = arith.constant dense<0.000000e+00> : vector<16x512xf32>
    %385 = tpu.matmul %382, %384, %cst_181 {dimension_numbers = #tpu.dot_dimension_numbers<[1], [0], [0], [1], [0, 0, 1, 1], [], []>} : vector<16x128xbf16>, vector<128x512xbf16>, vector<16x512xf32> -> vector<16x512xf32>
    %386 = vector.broadcast %303 : vector<1x512xf32> to vector<16x512xf32>
    %387 = arith.addf %385, %386 : vector<16x512xf32>
    %cst_182 = arith.constant 0.707106769 : f32
    %388 = vector.broadcast %cst_182 : f32 to vector<16x512xf32>
    %389 = arith.mulf %387, %388 : vector<16x512xf32>
    %390 = math.absf %389 : vector<16x512xf32>
    %cst_183 = arith.constant 0.327591091 : f32
    %391 = vector.broadcast %cst_183 : f32 to vector<16x512xf32>
    %392 = arith.mulf %391, %390 : vector<16x512xf32>
    %cst_184 = arith.constant 1.000000e+00 : f32
    %393 = vector.broadcast %cst_184 : f32 to vector<16x512xf32>
    %394 = arith.addf %393, %392 : vector<16x512xf32>
    %cst_185 = arith.constant 1.000000e+00 : f32
    %395 = vector.broadcast %cst_185 : f32 to vector<16x512xf32>
    %396 = arith.divf %395, %394 : vector<16x512xf32>
    %cst_186 = arith.constant 1.06140542 : f32
    %397 = vector.broadcast %cst_186 : f32 to vector<16x512xf32>
    %398 = arith.mulf %396, %397 : vector<16x512xf32>
    %cst_187 = arith.constant -1.45315206 : f32
    %399 = vector.broadcast %cst_187 : f32 to vector<16x512xf32>
    %400 = arith.addf %399, %398 : vector<16x512xf32>
    %401 = arith.mulf %396, %400 : vector<16x512xf32>
    %cst_188 = arith.constant 1.42141378 : f32
    %402 = vector.broadcast %cst_188 : f32 to vector<16x512xf32>
    %403 = arith.addf %402, %401 : vector<16x512xf32>
    %404 = arith.mulf %396, %403 : vector<16x512xf32>
    %cst_189 = arith.constant -0.284496725 : f32
    %405 = vector.broadcast %cst_189 : f32 to vector<16x512xf32>
    %406 = arith.addf %405, %404 : vector<16x512xf32>
    %407 = arith.mulf %396, %406 : vector<16x512xf32>
    %cst_190 = arith.constant 0.254829586 : f32
    %408 = vector.broadcast %cst_190 : f32 to vector<16x512xf32>
    %409 = arith.addf %408, %407 : vector<16x512xf32>
    %410 = arith.mulf %396, %409 : vector<16x512xf32>
    %cst_191 = arith.constant 0.000000e+00 : f32
    %411 = vector.broadcast %cst_191 : f32 to vector<16x512xf32>
    %412 = arith.subf %411, %390 : vector<16x512xf32>
    %413 = arith.mulf %412, %390 : vector<16x512xf32>
    %414 = math.exp %413 : vector<16x512xf32>
    %415 = arith.mulf %410, %414 : vector<16x512xf32>
    %cst_192 = arith.constant 1.000000e+00 : f32
    %416 = vector.broadcast %cst_192 : f32 to vector<16x512xf32>
    %417 = arith.subf %416, %415 : vector<16x512xf32>
    %cst_193 = arith.constant 0.000000e+00 : f32
    %418 = vector.broadcast %cst_193 : f32 to vector<16x512xf32>
    %419 = arith.cmpf oge, %389, %418 : vector<16x512xf32>
    %cst_194 = arith.constant 0.000000e+00 : f32
    %420 = vector.broadcast %cst_194 : f32 to vector<16x512xf32>
    %421 = arith.subf %420, %417 : vector<16x512xf32>
    %422 = arith.select %419, %417, %421 : vector<16x512xi1>, vector<16x512xf32>
    %cst_195 = arith.constant 5.000000e-01 : f32
    %423 = vector.broadcast %cst_195 : f32 to vector<16x512xf32>
    %424 = arith.mulf %423, %387 : vector<16x512xf32>
    %cst_196 = arith.constant 1.000000e+00 : f32
    %425 = vector.broadcast %cst_196 : f32 to vector<16x512xf32>
    %426 = arith.addf %425, %422 : vector<16x512xf32>
    %427 = arith.mulf %424, %426 : vector<16x512xf32>
    %428 = arith.truncf %427 : vector<16x512xf32> to vector<16x512xbf16>
    %c2_197 = arith.constant 2 : index
    %c0_198 = arith.constant 0 : index
    %c0_199 = arith.constant 0 : index
    %429 = vector.load %arg4[%c2_197, %c0_198, %c0_199] : memref<4x512x128xbf16, #tpu.memory_space<vmem>>, vector<1x512x128xbf16>
    %430 = vector.shape_cast %429 : vector<1x512x128xbf16> to vector<512x128xbf16>
    %cst_200 = arith.constant dense<0.000000e+00> : vector<16x128xf32>
    %431 = tpu.matmul %428, %430, %cst_200 {dimension_numbers = #tpu.dot_dimension_numbers<[1], [0], [0], [1], [0, 0, 1, 1], [], []>} : vector<16x512xbf16>, vector<512x128xbf16>, vector<16x128xf32> -> vector<16x128xf32>
    %432 = vector.broadcast %301 : vector<1x128xf32> to vector<16x128xf32>
    %433 = arith.addf %431, %432 : vector<16x128xf32>
    %434 = arith.addf %361, %433 : vector<16x128xf32>
    %c3 = arith.constant 3 : index
    %c0_201 = arith.constant 0 : index
    %c0_202 = arith.constant 0 : index
    %435 = vector.load %arg5[%c3, %c0_201, %c0_202] : memref<4x6x128xf32, #tpu.memory_space<vmem>>, vector<1x6x128xf32>
    %436 = vector.shape_cast %435 : vector<1x6x128xf32> to vector<6x128xf32>
    %437 = vector.extract_strided_slice %436 {offsets = [0, 0], sizes = [1, 128], strides = [1, 1]} : vector<6x128xf32> to vector<1x128xf32>
    %438 = vector.extract_strided_slice %436 {offsets = [1, 0], sizes = [1, 128], strides = [1, 1]} : vector<6x128xf32> to vector<1x128xf32>
    %439 = vector.extract_strided_slice %436 {offsets = [2, 0], sizes = [1, 128], strides = [1, 1]} : vector<6x128xf32> to vector<1x128xf32>
    %440 = vector.extract_strided_slice %436 {offsets = [3, 0], sizes = [1, 128], strides = [1, 1]} : vector<6x128xf32> to vector<1x128xf32>
    %441 = vector.extract_strided_slice %436 {offsets = [4, 0], sizes = [1, 128], strides = [1, 1]} : vector<6x128xf32> to vector<1x128xf32>
    %442 = vector.extract_strided_slice %436 {offsets = [5, 0], sizes = [1, 128], strides = [1, 1]} : vector<6x128xf32> to vector<1x128xf32>
    %c3_203 = arith.constant 3 : index
    %c0_204 = arith.constant 0 : index
    %c0_205 = arith.constant 0 : index
    %443 = vector.load %arg6[%c3_203, %c0_204, %c0_205] : memref<4x1x512xf32, #tpu.memory_space<vmem>>, vector<1x1x512xf32>
    %444 = vector.shape_cast %443 : vector<1x1x512xf32> to vector<1x512xf32>
    %cst_206 = arith.constant dense<0.000000e+00> : vector<16xf32>
    %445 = vector.multi_reduction <add>, %434, %cst_206 [1] : vector<16x128xf32> to vector<16xf32>
    %446 = vector.shape_cast %445 : vector<16xf32> to vector<16x1xf32>
    %cst_207 = arith.constant 1.280000e+02 : f32
    %447 = vector.broadcast %cst_207 : f32 to vector<16x1xf32>
    %448 = arith.divf %446, %447 : vector<16x1xf32>
    %449 = vector.broadcast %448 : vector<16x1xf32> to vector<16x128xf32>
    %450 = arith.subf %434, %449 : vector<16x128xf32>
    %451 = arith.mulf %450, %450 : vector<16x128xf32>
    %cst_208 = arith.constant dense<0.000000e+00> : vector<16xf32>
    %452 = vector.multi_reduction <add>, %451, %cst_208 [1] : vector<16x128xf32> to vector<16xf32>
    %453 = vector.shape_cast %452 : vector<16xf32> to vector<16x1xf32>
    %cst_209 = arith.constant 1.280000e+02 : f32
    %454 = vector.broadcast %cst_209 : f32 to vector<16x1xf32>
    %455 = arith.divf %453, %454 : vector<16x1xf32>
    %cst_210 = arith.constant 9.99999974E-6 : f32
    %456 = vector.broadcast %cst_210 : f32 to vector<16x1xf32>
    %457 = arith.addf %455, %456 : vector<16x1xf32>
    %458 = math.rsqrt %457 : vector<16x1xf32>
    %459 = vector.broadcast %458 : vector<16x1xf32> to vector<16x128xf32>
    %460 = arith.mulf %450, %459 : vector<16x128xf32>
    %461 = vector.broadcast %437 : vector<1x128xf32> to vector<16x128xf32>
    %462 = arith.mulf %460, %461 : vector<16x128xf32>
    %463 = vector.broadcast %438 : vector<1x128xf32> to vector<16x128xf32>
    %464 = arith.addf %462, %463 : vector<16x128xf32>
    %465 = arith.truncf %464 : vector<16x128xf32> to vector<16x128xbf16>
    %466 = vector.shape_cast %465 : vector<16x128xbf16> to vector<1x16x128xbf16>
    %467 = vector.broadcast %466 : vector<1x16x128xbf16> to vector<4x16x128xbf16>
    %c3_211 = arith.constant 3 : index
    %c0_212 = arith.constant 0 : index
    %c0_213 = arith.constant 0 : index
    %c0_214 = arith.constant 0 : index
    %c0_215 = arith.constant 0 : index
    %468 = vector.load %arg1[%c3_211, %c0_212, %c0_213, %c0_214, %c0_215] : memref<4x3x4x128x32xbf16, #tpu.memory_space<vmem>>, vector<1x1x4x128x32xbf16>
    %469 = vector.shape_cast %468 : vector<1x1x4x128x32xbf16> to vector<4x128x32xbf16>
    "tpu.trace_start"() <{level = 10 : i32, message = "hmc,hcd->hmd"}> : () -> ()
    %cst_216 = arith.constant dense<0.000000e+00> : vector<4x16x32xf32>
    %470 = tpu.matmul %467, %469, %cst_216 {dimension_numbers = #tpu.dot_dimension_numbers<[2], [1], [1], [2], [0, 0, 0, 1, 1, 2], [0], [0]>} : vector<4x16x128xbf16>, vector<4x128x32xbf16>, vector<4x16x32xf32> -> vector<4x16x32xf32>
    "tpu.trace_stop"() : () -> ()
    %c3_217 = arith.constant 3 : index
    %c1_218 = arith.constant 1 : index
    %c0_219 = arith.constant 0 : index
    %c0_220 = arith.constant 0 : index
    %c0_221 = arith.constant 0 : index
    %471 = vector.load %arg1[%c3_217, %c1_218, %c0_219, %c0_220, %c0_221] : memref<4x3x4x128x32xbf16, #tpu.memory_space<vmem>>, vector<1x1x4x128x32xbf16>
    %472 = vector.shape_cast %471 : vector<1x1x4x128x32xbf16> to vector<4x128x32xbf16>
    "tpu.trace_start"() <{level = 10 : i32, message = "hmc,hcd->hmd"}> : () -> ()
    %cst_222 = arith.constant dense<0.000000e+00> : vector<4x16x32xf32>
    %473 = tpu.matmul %467, %472, %cst_222 {dimension_numbers = #tpu.dot_dimension_numbers<[2], [1], [1], [2], [0, 0, 0, 1, 1, 2], [0], [0]>} : vector<4x16x128xbf16>, vector<4x128x32xbf16>, vector<4x16x32xf32> -> vector<4x16x32xf32>
    "tpu.trace_stop"() : () -> ()
    %c3_223 = arith.constant 3 : index
    %c2_224 = arith.constant 2 : index
    %c0_225 = arith.constant 0 : index
    %c0_226 = arith.constant 0 : index
    %c0_227 = arith.constant 0 : index
    %474 = vector.load %arg1[%c3_223, %c2_224, %c0_225, %c0_226, %c0_227] : memref<4x3x4x128x32xbf16, #tpu.memory_space<vmem>>, vector<1x1x4x128x32xbf16>
    %475 = vector.shape_cast %474 : vector<1x1x4x128x32xbf16> to vector<4x128x32xbf16>
    "tpu.trace_start"() <{level = 10 : i32, message = "hmc,hcd->hmd"}> : () -> ()
    %cst_228 = arith.constant dense<0.000000e+00> : vector<4x16x32xf32>
    %476 = tpu.matmul %467, %475, %cst_228 {dimension_numbers = #tpu.dot_dimension_numbers<[2], [1], [1], [2], [0, 0, 0, 1, 1, 2], [0], [0]>} : vector<4x16x128xbf16>, vector<4x128x32xbf16>, vector<4x16x32xf32> -> vector<4x16x32xf32>
    "tpu.trace_stop"() : () -> ()
    %477 = arith.truncf %470 : vector<4x16x32xf32> to vector<4x16x32xbf16>
    %478 = arith.truncf %473 : vector<4x16x32xf32> to vector<4x16x32xbf16>
    "tpu.trace_start"() <{level = 10 : i32, message = "hmd,hnd->hmn"}> : () -> ()
    %cst_229 = arith.constant dense<0.000000e+00> : vector<4x16x16xf32>
    %479 = tpu.matmul %477, %478, %cst_229 {dimension_numbers = #tpu.dot_dimension_numbers<[2], [2], [1], [1], [0, 0, 0, 1, 1, 1], [0], [0]>} : vector<4x16x32xbf16>, vector<4x16x32xbf16>, vector<4x16x16xf32> -> vector<4x16x16xf32>
    "tpu.trace_stop"() : () -> ()
    %480 = vector.shape_cast %11 : vector<16x16xf32> to vector<1x16x16xf32>
    %481 = vector.broadcast %480 : vector<1x16x16xf32> to vector<4x16x16xf32>
    %482 = arith.addf %479, %481 : vector<4x16x16xf32>
    %cst_230 = arith.constant dense<0xFF800000> : vector<4x16xf32>
    %483 = vector.multi_reduction <maximumf>, %482, %cst_230 [2] : vector<4x16x16xf32> to vector<4x16xf32>
    %484 = vector.shape_cast %483 : vector<4x16xf32> to vector<4x16x1xf32>
    %485 = vector.broadcast %484 : vector<4x16x1xf32> to vector<4x16x16xf32>
    %486 = arith.subf %482, %485 : vector<4x16x16xf32>
    %487 = math.exp %486 : vector<4x16x16xf32>
    %cst_231 = arith.constant dense<0.000000e+00> : vector<4x16xf32>
    %488 = vector.multi_reduction <add>, %487, %cst_231 [2] : vector<4x16x16xf32> to vector<4x16xf32>
    %489 = vector.shape_cast %488 : vector<4x16xf32> to vector<4x16x1xf32>
    %490 = vector.broadcast %489 : vector<4x16x1xf32> to vector<4x16x16xf32>
    %491 = arith.divf %487, %490 : vector<4x16x16xf32>
    %492 = arith.truncf %491 : vector<4x16x16xf32> to vector<4x16x16xbf16>
    %493 = arith.truncf %476 : vector<4x16x32xf32> to vector<4x16x32xbf16>
    "tpu.trace_start"() <{level = 10 : i32, message = "hmn,hnd->hmd"}> : () -> ()
    %cst_232 = arith.constant dense<0.000000e+00> : vector<4x16x32xf32>
    %494 = tpu.matmul %492, %493, %cst_232 {dimension_numbers = #tpu.dot_dimension_numbers<[2], [1], [1], [2], [0, 0, 0, 1, 1, 2], [0], [0]>} : vector<4x16x16xbf16>, vector<4x16x32xbf16>, vector<4x16x32xf32> -> vector<4x16x32xf32>
    "tpu.trace_stop"() : () -> ()
    %495 = arith.truncf %494 : vector<4x16x32xf32> to vector<4x16x32xbf16>
    %c3_233 = arith.constant 3 : index
    %c0_234 = arith.constant 0 : index
    %c0_235 = arith.constant 0 : index
    %c0_236 = arith.constant 0 : index
    %496 = vector.load %arg2[%c3_233, %c0_234, %c0_235, %c0_236] : memref<4x4x32x128xbf16, #tpu.memory_space<vmem>>, vector<1x4x32x128xbf16>
    %497 = vector.shape_cast %496 : vector<1x4x32x128xbf16> to vector<4x32x128xbf16>
    "tpu.trace_start"() <{level = 10 : i32, message = "hmd,hdc->hmc"}> : () -> ()
    %cst_237 = arith.constant dense<0.000000e+00> : vector<4x16x128xf32>
    %498 = tpu.matmul %495, %497, %cst_237 {dimension_numbers = #tpu.dot_dimension_numbers<[2], [1], [1], [2], [0, 0, 0, 1, 1, 2], [0], [0]>} : vector<4x16x32xbf16>, vector<4x32x128xbf16>, vector<4x16x128xf32> -> vector<4x16x128xf32>
    "tpu.trace_stop"() : () -> ()
    %cst_238 = arith.constant dense<0.000000e+00> : vector<16x128xf32>
    %499 = vector.multi_reduction <add>, %498, %cst_238 [0] : vector<4x16x128xf32> to vector<16x128xf32>
    %500 = vector.broadcast %439 : vector<1x128xf32> to vector<16x128xf32>
    %501 = arith.addf %499, %500 : vector<16x128xf32>
    %502 = arith.addf %434, %501 : vector<16x128xf32>
    %cst_239 = arith.constant dense<0.000000e+00> : vector<16xf32>
    %503 = vector.multi_reduction <add>, %502, %cst_239 [1] : vector<16x128xf32> to vector<16xf32>
    %504 = vector.shape_cast %503 : vector<16xf32> to vector<16x1xf32>
    %cst_240 = arith.constant 1.280000e+02 : f32
    %505 = vector.broadcast %cst_240 : f32 to vector<16x1xf32>
    %506 = arith.divf %504, %505 : vector<16x1xf32>
    %507 = vector.broadcast %506 : vector<16x1xf32> to vector<16x128xf32>
    %508 = arith.subf %502, %507 : vector<16x128xf32>
    %509 = arith.mulf %508, %508 : vector<16x128xf32>
    %cst_241 = arith.constant dense<0.000000e+00> : vector<16xf32>
    %510 = vector.multi_reduction <add>, %509, %cst_241 [1] : vector<16x128xf32> to vector<16xf32>
    %511 = vector.shape_cast %510 : vector<16xf32> to vector<16x1xf32>
    %cst_242 = arith.constant 1.280000e+02 : f32
    %512 = vector.broadcast %cst_242 : f32 to vector<16x1xf32>
    %513 = arith.divf %511, %512 : vector<16x1xf32>
    %cst_243 = arith.constant 9.99999974E-6 : f32
    %514 = vector.broadcast %cst_243 : f32 to vector<16x1xf32>
    %515 = arith.addf %513, %514 : vector<16x1xf32>
    %516 = math.rsqrt %515 : vector<16x1xf32>
    %517 = vector.broadcast %516 : vector<16x1xf32> to vector<16x128xf32>
    %518 = arith.mulf %508, %517 : vector<16x128xf32>
    %519 = vector.broadcast %440 : vector<1x128xf32> to vector<16x128xf32>
    %520 = arith.mulf %518, %519 : vector<16x128xf32>
    %521 = vector.broadcast %441 : vector<1x128xf32> to vector<16x128xf32>
    %522 = arith.addf %520, %521 : vector<16x128xf32>
    %523 = arith.truncf %522 : vector<16x128xf32> to vector<16x128xbf16>
    %c3_244 = arith.constant 3 : index
    %c0_245 = arith.constant 0 : index
    %c0_246 = arith.constant 0 : index
    %524 = vector.load %arg3[%c3_244, %c0_245, %c0_246] : memref<4x128x512xbf16, #tpu.memory_space<vmem>>, vector<1x128x512xbf16>
    %525 = vector.shape_cast %524 : vector<1x128x512xbf16> to vector<128x512xbf16>
    %cst_247 = arith.constant dense<0.000000e+00> : vector<16x512xf32>
    %526 = tpu.matmul %523, %525, %cst_247 {dimension_numbers = #tpu.dot_dimension_numbers<[1], [0], [0], [1], [0, 0, 1, 1], [], []>} : vector<16x128xbf16>, vector<128x512xbf16>, vector<16x512xf32> -> vector<16x512xf32>
    %527 = vector.broadcast %444 : vector<1x512xf32> to vector<16x512xf32>
    %528 = arith.addf %526, %527 : vector<16x512xf32>
    %cst_248 = arith.constant 0.707106769 : f32
    %529 = vector.broadcast %cst_248 : f32 to vector<16x512xf32>
    %530 = arith.mulf %528, %529 : vector<16x512xf32>
    %531 = math.absf %530 : vector<16x512xf32>
    %cst_249 = arith.constant 0.327591091 : f32
    %532 = vector.broadcast %cst_249 : f32 to vector<16x512xf32>
    %533 = arith.mulf %532, %531 : vector<16x512xf32>
    %cst_250 = arith.constant 1.000000e+00 : f32
    %534 = vector.broadcast %cst_250 : f32 to vector<16x512xf32>
    %535 = arith.addf %534, %533 : vector<16x512xf32>
    %cst_251 = arith.constant 1.000000e+00 : f32
    %536 = vector.broadcast %cst_251 : f32 to vector<16x512xf32>
    %537 = arith.divf %536, %535 : vector<16x512xf32>
    %cst_252 = arith.constant 1.06140542 : f32
    %538 = vector.broadcast %cst_252 : f32 to vector<16x512xf32>
    %539 = arith.mulf %537, %538 : vector<16x512xf32>
    %cst_253 = arith.constant -1.45315206 : f32
    %540 = vector.broadcast %cst_253 : f32 to vector<16x512xf32>
    %541 = arith.addf %540, %539 : vector<16x512xf32>
    %542 = arith.mulf %537, %541 : vector<16x512xf32>
    %cst_254 = arith.constant 1.42141378 : f32
    %543 = vector.broadcast %cst_254 : f32 to vector<16x512xf32>
    %544 = arith.addf %543, %542 : vector<16x512xf32>
    %545 = arith.mulf %537, %544 : vector<16x512xf32>
    %cst_255 = arith.constant -0.284496725 : f32
    %546 = vector.broadcast %cst_255 : f32 to vector<16x512xf32>
    %547 = arith.addf %546, %545 : vector<16x512xf32>
    %548 = arith.mulf %537, %547 : vector<16x512xf32>
    %cst_256 = arith.constant 0.254829586 : f32
    %549 = vector.broadcast %cst_256 : f32 to vector<16x512xf32>
    %550 = arith.addf %549, %548 : vector<16x512xf32>
    %551 = arith.mulf %537, %550 : vector<16x512xf32>
    %cst_257 = arith.constant 0.000000e+00 : f32
    %552 = vector.broadcast %cst_257 : f32 to vector<16x512xf32>
    %553 = arith.subf %552, %531 : vector<16x512xf32>
    %554 = arith.mulf %553, %531 : vector<16x512xf32>
    %555 = math.exp %554 : vector<16x512xf32>
    %556 = arith.mulf %551, %555 : vector<16x512xf32>
    %cst_258 = arith.constant 1.000000e+00 : f32
    %557 = vector.broadcast %cst_258 : f32 to vector<16x512xf32>
    %558 = arith.subf %557, %556 : vector<16x512xf32>
    %cst_259 = arith.constant 0.000000e+00 : f32
    %559 = vector.broadcast %cst_259 : f32 to vector<16x512xf32>
    %560 = arith.cmpf oge, %530, %559 : vector<16x512xf32>
    %cst_260 = arith.constant 0.000000e+00 : f32
    %561 = vector.broadcast %cst_260 : f32 to vector<16x512xf32>
    %562 = arith.subf %561, %558 : vector<16x512xf32>
    %563 = arith.select %560, %558, %562 : vector<16x512xi1>, vector<16x512xf32>
    %cst_261 = arith.constant 5.000000e-01 : f32
    %564 = vector.broadcast %cst_261 : f32 to vector<16x512xf32>
    %565 = arith.mulf %564, %528 : vector<16x512xf32>
    %cst_262 = arith.constant 1.000000e+00 : f32
    %566 = vector.broadcast %cst_262 : f32 to vector<16x512xf32>
    %567 = arith.addf %566, %563 : vector<16x512xf32>
    %568 = arith.mulf %565, %567 : vector<16x512xf32>
    %569 = arith.truncf %568 : vector<16x512xf32> to vector<16x512xbf16>
    %c3_263 = arith.constant 3 : index
    %c0_264 = arith.constant 0 : index
    %c0_265 = arith.constant 0 : index
    %570 = vector.load %arg4[%c3_263, %c0_264, %c0_265] : memref<4x512x128xbf16, #tpu.memory_space<vmem>>, vector<1x512x128xbf16>
    %571 = vector.shape_cast %570 : vector<1x512x128xbf16> to vector<512x128xbf16>
    %cst_266 = arith.constant dense<0.000000e+00> : vector<16x128xf32>
    %572 = tpu.matmul %569, %571, %cst_266 {dimension_numbers = #tpu.dot_dimension_numbers<[1], [0], [0], [1], [0, 0, 1, 1], [], []>} : vector<16x512xbf16>, vector<512x128xbf16>, vector<16x128xf32> -> vector<16x128xf32>
    %573 = vector.broadcast %442 : vector<1x128xf32> to vector<16x128xf32>
    %574 = arith.addf %572, %573 : vector<16x128xf32>
    %575 = arith.addf %502, %574 : vector<16x128xf32>
    %c0_267 = arith.constant 0 : index
    %c0_268 = arith.constant 0 : index
    %576 = vector.load %arg8[%c0_267, %c0_268] : memref<3x128xf32, #tpu.memory_space<vmem>>, vector<3x128xf32>
    %577 = vector.extract_strided_slice %576 {offsets = [0, 0], sizes = [1, 128], strides = [1, 1]} : vector<3x128xf32> to vector<1x128xf32>
    %578 = vector.extract_strided_slice %576 {offsets = [1, 0], sizes = [1, 128], strides = [1, 1]} : vector<3x128xf32> to vector<1x128xf32>
    %579 = vector.extract_strided_slice %576 {offsets = [2, 0], sizes = [1, 128], strides = [1, 1]} : vector<3x128xf32> to vector<1x128xf32>
    %cst_269 = arith.constant dense<0.000000e+00> : vector<16xf32>
    %580 = vector.multi_reduction <add>, %575, %cst_269 [1] : vector<16x128xf32> to vector<16xf32>
    %581 = vector.shape_cast %580 : vector<16xf32> to vector<16x1xf32>
    %cst_270 = arith.constant 1.280000e+02 : f32
    %582 = vector.broadcast %cst_270 : f32 to vector<16x1xf32>
    %583 = arith.divf %581, %582 : vector<16x1xf32>
    %584 = vector.broadcast %583 : vector<16x1xf32> to vector<16x128xf32>
    %585 = arith.subf %575, %584 : vector<16x128xf32>
    %586 = arith.mulf %585, %585 : vector<16x128xf32>
    %cst_271 = arith.constant dense<0.000000e+00> : vector<16xf32>
    %587 = vector.multi_reduction <add>, %586, %cst_271 [1] : vector<16x128xf32> to vector<16xf32>
    %588 = vector.shape_cast %587 : vector<16xf32> to vector<16x1xf32>
    %cst_272 = arith.constant 1.280000e+02 : f32
    %589 = vector.broadcast %cst_272 : f32 to vector<16x1xf32>
    %590 = arith.divf %588, %589 : vector<16x1xf32>
    %cst_273 = arith.constant 9.99999974E-6 : f32
    %591 = vector.broadcast %cst_273 : f32 to vector<16x1xf32>
    %592 = arith.addf %590, %591 : vector<16x1xf32>
    %593 = math.rsqrt %592 : vector<16x1xf32>
    %594 = vector.broadcast %593 : vector<16x1xf32> to vector<16x128xf32>
    %595 = arith.mulf %585, %594 : vector<16x128xf32>
    %596 = vector.broadcast %577 : vector<1x128xf32> to vector<16x128xf32>
    %597 = arith.mulf %595, %596 : vector<16x128xf32>
    %598 = vector.broadcast %578 : vector<1x128xf32> to vector<16x128xf32>
    %599 = arith.addf %597, %598 : vector<16x128xf32>
    %600 = arith.truncf %599 : vector<16x128xf32> to vector<16x128xbf16>
    %c0_274 = arith.constant 0 : index
    %c0_275 = arith.constant 0 : index
    %601 = vector.load %arg7[%c0_274, %c0_275] : memref<128x128xbf16, #tpu.memory_space<vmem>>, vector<128x128xbf16>
    %cst_276 = arith.constant dense<0.000000e+00> : vector<16x128xf32>
    %602 = tpu.matmul %600, %601, %cst_276 {dimension_numbers = #tpu.dot_dimension_numbers<[1], [0], [0], [1], [0, 0, 1, 1], [], []>} : vector<16x128xbf16>, vector<128x128xbf16>, vector<16x128xf32> -> vector<16x128xf32>
    %603 = vector.broadcast %579 : vector<1x128xf32> to vector<16x128xf32>
    %604 = arith.addf %602, %603 : vector<16x128xf32>
    %c0_277 = arith.constant 0 : index
    %c0_278 = arith.constant 0 : index
    %605 = vector.load %arg9[%c0_277, %c0_278] : memref<16x128xf32, #tpu.memory_space<vmem>>, vector<16x128xf32>
    tpu.vector_store %arg9[%c0_277, %c0_278], %604 {strides = array<i32>} : memref<16x128xf32, #tpu.memory_space<vmem>>, vector<16x128xf32>,
    return
  }
}

</mosaic_0001>

<bundles_post_ra>
// kernel: tinygpt_forward.1
= control target key start
LH: loop header
LB: loop body
LE: loop exit
PB: predicated region body
PF: predicated region fallthrough
CT: control target
= control target key end

     0   :  { %v16766_v2 = vmov 0.0   ;;  %vm16767_vm0 = vmmov 0   ;;  %v35_v32 = vlaneseq  ;;  %vm1360_vm1 = vcmask 261120   ;;  %s20600_s0 = inlined_call_operand.vmem [shape: f32[16,128], index: 0, kind: input, shape index: {}]   ;;  %s20601_s1 = inlined_call_operand.vmem [shape: bf16[4,3,4,128,32], index: 1, kind: input, shape index: {}]   ;;  %s20602_s5 = inlined_call_operand.vmem [shape: f32[4,6,128], index: 5, kind: input, shape index: {}]   ;;  %s20603_s2 = inlined_call_operand.vmem [shape: bf16[4,4,32,128], index: 2, kind: input, shape index: {}]   ;;  %s20604_s3 = inlined_call_operand.vmem [shape: bf16[4,128,512], index: 3, kind: input, shape index: {}]   ;;  %s20605_s4 = inlined_call_operand.vmem [shape: bf16[4,512,128], index: 4, kind: input, shape index: {}]   ;;  %s20606_s6 = inlined_call_operand.vmem [shape: f32[4,1,512], index: 6, kind: input, shape index: {}]   ;;  %s20607_s7 = inlined_call_operand.vmem [shape: bf16[128,128], index: 7, kind: input, shape index: {}]   ;;  %s20608_s8 = inlined_call_operand.vmem [shape: f32[3,128], index: 8, kind: input, shape index: {}]   ;;  %s20609_s9 = inlined_call_operand.vmem [shape: f32[16,128], index: 9, kind: output, shape index: {}]  }
   0x1   :  { %v33_v0 = vld [vmem:[%s20600_s0] sm:$0xff]  ;;  %v34_v1 = vld [vmem:[%s20600_s0 + $0x8] sm:$0xff]  ;;  %14419 = vmatprep.subr.bf16.mxu0 %v16766_v2  ;;  %14439 = vmatprep.subr.bf16.mxu1 %v16766_v2  ;;  %v15723_v3 = vld [vmem:[%s20601_s1 + $0x38] sm:$0xff]   ;;  %vm1549_vm6 = vcmask 130048  }
   0x2   :  { %54 = vadd.xlane.f32.xlu0 %v33_v0  ;;  %v15724_v4 = vld [vmem:[%s20601_s1 + $0x78] sm:$0xff]   ;;  %14420 = vmatpush3.bf16.msra.mxu0 %v15723_v3  ;;  %v15725_v13 = vld [vmem:[%s20601_s1 + $0x30] sm:$0xff]   ;;  %v15727_v15 = vld [vmem:[%s20601_s1 + $0x28] sm:$0xff]   ;;  %v16905_v34 = vshrl.u32 %v35_v32, 7 }
   0x3   :  { %14440 = vmatpush3.bf16.msra.mxu1 %v15724_v4  ;;  %14421 = vmatprep.subr.bf16.mxu0 %v16766_v2  ;;  %v15726_v14 = vld [vmem:[%s20601_s1 + $0x70] sm:$0xff]   ;;  %v15728_v16 = vld [vmem:[%s20601_s1 + $0x68] sm:$0xff]   ;;  %v15729_v17 = vld [vmem:[%s20601_s1 + $0x20] sm:$0xff]  }
   0x4   :  { %14441 = vmatprep.subr.bf16.mxu1 %v16766_v2  ;;  %v15730_v18 = vld [vmem:[%s20601_s1 + $0x60] sm:$0xff]   ;;  %v15731_v19 = vld [vmem:[%s20601_s1 + $0x18] sm:$0xff]   ;;  %v15733_v21 = vld [vmem:[%s20601_s1 + $0x10] sm:$0xff]   ;;  %14435 = vmatprep.mubr.msk.bf16.mxu0 %vm16767_vm0, %v16766_v2  ;;  %v16911_v36 = vsub.s32 0, %v16905_v34  ;;  %v16914_v38 = vsub.s32 1, %v16905_v34 }
   0x5   :  { %v15732_v20 = vld [vmem:[%s20601_s1 + $0x58] sm:$0xff]   ;;  %v15734_v22 = vld [vmem:[%s20601_s1 + $0x50] sm:$0xff]   ;;  %v15735_v23 = vld [vmem:[%s20601_s1 + $0x8] sm:$0xff]   ;;  %14455 = vmatprep.mubr.msk.bf16.mxu1 %vm16767_vm0, %v16766_v2 }
   0x6   :  { %56 = vadd.xlane.f32.xlu0 %v34_v1  ;;  %14422 = vmatpush3.bf16.msra.mxu0 %v15725_v13  ;;  %v15736_v24 = vld [vmem:[%s20601_s1 + $0x48] sm:$0xff]   ;;  %v15737_v25 = vld [vmem:[%s20601_s1] sm:$0xff]   ;;  %v15739_v48 = vld [vmem:[%s20601_s1 + $0xb8] sm:$0xff]  }
   0x7   :  { %14442 = vmatpush3.bf16.msra.mxu1 %v15726_v14  ;;  %14423 = vmatprep.subr.bf16.mxu0 %v16766_v2  ;;  %v15738_v26 = vld [vmem:[%s20601_s1 + $0x40] sm:$0xff]   ;;  %v15740_v49 = vld [vmem:[%s20601_s1 + $0xf8] sm:$0xff]   ;;  %v15741_v51 = vld [vmem:[%s20601_s1 + $0xb0] sm:$0xff]  }
   0x8   :  { %14443 = vmatprep.subr.bf16.mxu1 %v16766_v2  ;;  %v52_v35 = vld [vmem:[%s20602_s5] sm:$0x3f]  ;;  %v15742_v52 = vld [vmem:[%s20601_s1 + $0xf0] sm:$0xff]   ;;  %v15743_v53 = vld [vmem:[%s20601_s1 + $0xa8] sm:$0xff]  }
   0x9   :  { %v80_v39 = vrot.slane %v52_v35, %v16911_v36  ;;  %v86_v42 = vrot.slane %v52_v35, %v16914_v38  ;;  %v15744_v54 = vld [vmem:[%s20601_s1 + $0xe8] sm:$0xff]   ;;  %v15745_v55 = vld [vmem:[%s20601_s1 + $0xa0] sm:$0xff]   ;;  %v15747_v57 = vld [vmem:[%s20601_s1 + $0x98] sm:$0xff]  }
   0xa   :  { %14424 = vmatpush3.bf16.msra.mxu0 %v15727_v15  ;;  %v15746_v56 = vld [vmem:[%s20601_s1 + $0xe0] sm:$0xff]   ;;  %v15748_v58 = vld [vmem:[%s20601_s1 + $0xd8] sm:$0xff]   ;;  %v15749_v59 = vld [vmem:[%s20601_s1 + $0x90] sm:$0xff]  }
   0xb   :  { %14444 = vmatpush3.bf16.msra.mxu1 %v15728_v16  ;;  %14425 = vmatprep.subr.bf16.mxu0 %v16766_v2  ;;  %v15750_v60 = vld [vmem:[%s20601_s1 + $0xd0] sm:$0xff]   ;;  %v15751_v61 = vld [vmem:[%s20601_s1 + $0x88] sm:$0xff]   ;;  %v15753_v63 = vld [vmem:[%s20601_s1 + $0x80] sm:$0xff]  }
   0xc   :  { %14445 = vmatprep.subr.bf16.mxu1 %v16766_v2  ;;  %v15752_v62 = vld [vmem:[%s20601_s1 + $0xc8] sm:$0xff]   ;;  %v15756_v3 = vld [vmem:[%s20601_s1 + $0x178] sm:$0xff]   ;;  %v15757_v4 = vld [vmem:[%s20601_s1 + $0x130] sm:$0xff]  }
   0xd   :  { %v15766_v13 = vld [vmem:[%s20601_s1 + $0x150] sm:$0xff]   ;;  %v15767_v14 = vld [vmem:[%s20601_s1 + $0x108] sm:$0xff]   ;;  %v15769_v16 = vld [vmem:[%s20601_s1 + $0x100] sm:$0xff]  }
   0xe   :  { %14426 = vmatpush3.bf16.msra.mxu0 %v15729_v17  ;;  %v15768_v15 = vld [vmem:[%s20601_s1 + $0x148] sm:$0xff]   ;;  %v15770_v17 = vld [vmem:[%s20601_s1 + $0x140] sm:$0xff]  }
   0xf   :  { %14446 = vmatpush3.bf16.msra.mxu1 %v15730_v18  ;;  %14427 = vmatprep.subr.bf16.mxu0 %v16766_v2  ;;  %v15771_v18 = vld [vmem:[%s20601_s1 + $0x1b8] sm:$0xff]   ;;  %v15786_v35 = vld [vmem:[%s20601_s1 + $0x1c0] sm:$0xff]  }
  0x10   :  { %14447 = vmatprep.subr.bf16.mxu1 %v16766_v2 }
  0x12   :  { %14428 = vmatpush3.bf16.msra.mxu0 %v15731_v19  ;;  %v15772_v19 = vld [vmem:[%s20601_s1 + $0x1f8] sm:$0xff]  }
  0x13   :  { %14448 = vmatpush3.bf16.msra.mxu1 %v15732_v20  ;;  %14429 = vmatprep.subr.bf16.mxu0 %v16766_v2  ;;  %v15773_v20 = vld [vmem:[%s20601_s1 + $0x1b0] sm:$0xff]  }
  0x14   :  { %14449 = vmatprep.subr.bf16.mxu1 %v16766_v2 }
  0x16   :  { %14430 = vmatpush3.bf16.msra.mxu0 %v15733_v21  ;;  %v15774_v21 = vld [vmem:[%s20601_s1 + $0x1f0] sm:$0xff]  }
  0x17   :  { %14450 = vmatpush3.bf16.msra.mxu1 %v15734_v22  ;;  %14431 = vmatprep.subr.bf16.mxu0 %v16766_v2  ;;  %v15775_v22 = vld [vmem:[%s20601_s1 + $0x1a8] sm:$0xff]  }
  0x18   :  { %14451 = vmatprep.subr.bf16.mxu1 %v16766_v2 }
  0x1a   :  { %14432 = vmatpush3.bf16.msra.mxu0 %v15735_v23  ;;  %v15776_v23 = vld [vmem:[%s20601_s1 + $0x1e8] sm:$0xff]  }
  0x1b   :  { %14452 = vmatpush3.bf16.msra.mxu1 %v15736_v24  ;;  %14433 = vmatprep.subr.bf16.mxu0 %v16766_v2  ;;  %v15777_v24 = vld [vmem:[%s20601_s1 + $0x1a0] sm:$0xff]  }
  0x1c   :  { %14453 = vmatprep.subr.bf16.mxu1 %v16766_v2 }
  0x1e   :  { %14434 = vmatpush3.bf16.msra.mxu0 %v15737_v25  ;;  %v15778_v25 = vld [vmem:[%s20601_s1 + $0x1e0] sm:$0xff]  }
  0x1f   :  { %14454 = vmatpush3.bf16.msra.mxu1 %v15738_v26  ;;  %14459 = vmatprep.subr.bf16.mxu0 %v16766_v2  ;;  %v15779_v26 = vld [vmem:[%s20601_s1 + $0x198] sm:$0xff]  }
  0x20   :  { %14479 = vmatprep.subr.bf16.mxu1 %v16766_v2 }
  0x8b   :  { %v55_v5 = vpop.xlane.xlu0 %54 }
  0x8c   :  { %v59_v6 = vmul.f32 0.0078125, %v55_v5  ;;  %v15758_v5 = vld [vmem:[%s20601_s1 + $0x170] sm:$0xff]  }
  0x8e   :  { %v16836_v7 = vsub.f32 %v33_v0, %v59_v6  ;;  %v15754_v0 = vld [vmem:[%s20601_s1 + $0xc0] sm:$0xff]   ;;  %v15759_v6 = vld [vmem:[%s20601_s1 + $0x128] sm:$0xff]  }
  0x8f   :  { %v57_v8 = vpop.xlane.xlu0 %56 }
  0x90   :  { %v60_v9 = vmul.f32 0.0078125, %v57_v8  ;;  %v63_v10 = vmul.f32 %v16836_v7, %v16836_v7  ;;  %v15761_v8 = vld [vmem:[%s20601_s1 + $0x120] sm:$0xff]  }
  0x92   :  { %v16840_v11 = vsub.f32 %v34_v1, %v60_v9  ;;  %65 = vadd.xlane.f32.xlu1 %v63_v10  ;;  %v15755_v1 = vld [vmem:[%s20601_s1 + $0x138] sm:$0xff]   ;;  %v15762_v9 = vld [vmem:[%s20601_s1 + $0x160] sm:$0xff]  }
  0x93   :  { %v15763_v10 = vld [vmem:[%s20601_s1 + $0x118] sm:$0xff]  }
  0x94   :  { %v64_v12 = vmul.f32 %v16840_v11, %v16840_v11 }
  0x96   :  { %67 = vadd.xlane.f32.xlu1 %v64_v12  ;;  %v15765_v12 = vld [vmem:[%s20601_s1 + $0x110] sm:$0xff]  }
 0x11b   :  { %v66_v27 = vpop.xlane.xlu1 %65 }
 0x11c   :  { %v69_v28 = vmul.f32 0.0078125, %v66_v27  ;;  %v15780_v27 = vld [vmem:[%s20601_s1 + $0x1d8] sm:$0xff]  }
 0x11e   :  { %v71_v29 = vadd.f32 1e-05, %v69_v28  ;;  %v15781_v28 = vld [vmem:[%s20601_s1 + $0x190] sm:$0xff]  }
 0x11f   :  { %v68_v30 = vpop.xlane.xlu1 %67 }
 0x120   :  { %16467 = vrsqrt.f32 %v71_v29  ;;  %v70_v31 = vmul.f32 0.0078125, %v68_v30  ;;  %v15782_v29 = vld [vmem:[%s20601_s1 + $0x1d0] sm:$0xff]   ;;  %v15783_v30 = vld [vmem:[%s20601_s1 + $0x188] sm:$0xff]  }
 0x122   :  { %v72_v33 = vadd.f32 1e-05, %v70_v31  ;;  %v15784_v31 = vld [vmem:[%s20601_s1 + $0x1c8] sm:$0xff]  }
 0x124   :  { %16469 = vrsqrt.f32 %v72_v33  ;;  %v15785_v33 = vld [vmem:[%s20601_s1 + $0x180] sm:$0xff]  }
 0x12d   :  { %v16468_v37 = vpop.eup %16467 }
 0x12e   :  { %v75_v40 = vmul.f32 %v16468_v37, %v16836_v7  ;;  %v15760_v7 = vld [vmem:[%s20601_s1 + $0x168] sm:$0xff]   ;;  %v15787_v37 = vld [vmem:[%s20601_s1 + $0x238] sm:$0xff]  }
 0x130   :  { %v81_v43 = vmul.f32 %v80_v39, %v75_v40  ;;  %v15789_v40 = vld [vmem:[%s20601_s1 + $0x230] sm:$0xff]  }
 0x131   :  { %v16470_v41 = vpop.eup %16469 }
 0x132   :  { %v76_v44 = vmul.f32 %v16470_v41, %v16840_v11  ;;  %v87_v46 = vadd.f32 %v86_v42, %v81_v43  ;;  %v15764_v11 = vld [vmem:[%s20601_s1 + $0x158] sm:$0xff]   ;;  %v15790_v41 = vld [vmem:[%s20601_s1 + $0x270] sm:$0xff]   ;;  %v15792_v43 = vld [vmem:[%s20601_s1 + $0x268] sm:$0xff]  }
 0x134   :  { %v82_v45 = vmul.f32 %v80_v39, %v76_v44  ;;  %v15788_v39 = vld [vmem:[%s20601_s1 + $0x278] sm:$0xff]   ;;  %v15793_v44 = vld [vmem:[%s20601_s1 + $0x220] sm:$0xff]  }
 0x136   :  { %v88_v47 = vadd.f32 %v86_v42, %v82_v45  ;;  %v15791_v42 = vld [vmem:[%s20601_s1 + $0x228] sm:$0xff]   ;;  %v15794_v45 = vld [vmem:[%s20601_s1 + $0x260] sm:$0xff]  }
 0x138   :  { %v16926_v50 = vpack.c.bf16 %v88_v47, %v87_v46  ;;  %v15795_v46 = vld [vmem:[%s20601_s1 + $0x218] sm:$0xff]  }
 0x139   :  { %v15796_v47 = vld [vmem:[%s20601_s1 + $0x258] sm:$0xff]  }
 0x13a   :  { %14436 = vmatmul.mubr.bf16.vlgmr.msra.gmra.mxu0 %v16926_v50  ;;  %14456 = vmatmul.mubr.bf16.vlgmr.msra.gmra.mxu1 %v16926_v50 }
 0x13b   :  { %14460 = vmatpush3.bf16.msra.mxu0 %v15739_v48  ;;  %14480 = vmatpush3.bf16.msra.mxu1 %v15740_v49  ;;  %v15797_v48 = vld [vmem:[%s20601_s1 + $0x210] sm:$0xff]  }
 0x13c   :  { %14461 = vmatprep.subr.bf16.mxu0 %v16766_v2  ;;  %14481 = vmatprep.subr.bf16.mxu1 %v16766_v2  ;;  %v15798_v49 = vld [vmem:[%s20601_s1 + $0x250] sm:$0xff]  }
 0x13d   :  { %14475 = vmatprep.mubr.msk.bf16.mxu0 %vm16767_vm0, %v16766_v2  ;;  %14495 = vmatprep.mubr.msk.bf16.mxu1 %vm16767_vm0, %v16766_v2 }
 0x13f   :  { %14462 = vmatpush3.bf16.msra.mxu0 %v15741_v51  ;;  %14482 = vmatpush3.bf16.msra.mxu1 %v15742_v52  ;;  %v15799_v51 = vld [vmem:[%s20601_s1 + $0x208] sm:$0xff]  }
 0x140   :  { %14463 = vmatprep.subr.bf16.mxu0 %v16766_v2  ;;  %14483 = vmatprep.subr.bf16.mxu1 %v16766_v2  ;;  %v15800_v52 = vld [vmem:[%s20601_s1 + $0x248] sm:$0xff]  }
 0x143   :  { %14464 = vmatpush3.bf16.msra.mxu0 %v15743_v53  ;;  %14484 = vmatpush3.bf16.msra.mxu1 %v15744_v54  ;;  %v15801_v53 = vld [vmem:[%s20601_s1 + $0x200] sm:$0xff]  }
 0x144   :  { %14465 = vmatprep.subr.bf16.mxu0 %v16766_v2  ;;  %14485 = vmatprep.subr.bf16.mxu1 %v16766_v2  ;;  %v15802_v54 = vld [vmem:[%s20601_s1 + $0x240] sm:$0xff]  }
 0x147   :  { %14466 = vmatpush3.bf16.msra.mxu0 %v15745_v55  ;;  %14486 = vmatpush3.bf16.msra.mxu1 %v15746_v56  ;;  %v15803_v55 = vld [vmem:[%s20601_s1 + $0x2b8] sm:$0xff]  }
 0x148   :  { %14467 = vmatprep.subr.bf16.mxu0 %v16766_v2  ;;  %14487 = vmatprep.subr.bf16.mxu1 %v16766_v2  ;;  %v15804_v56 = vld [vmem:[%s20601_s1 + $0x2f8] sm:$0xff]  }
 0x14b   :  { %14468 = vmatpush3.bf16.msra.mxu0 %v15747_v57  ;;  %14488 = vmatpush3.bf16.msra.mxu1 %v15748_v58  ;;  %v15805_v57 = vld [vmem:[%s20601_s1 + $0x2b0] sm:$0xff]  }
 0x14c   :  { %14469 = vmatprep.subr.bf16.mxu0 %v16766_v2  ;;  %14489 = vmatprep.subr.bf16.mxu1 %v16766_v2  ;;  %v15806_v58 = vld [vmem:[%s20601_s1 + $0x2f0] sm:$0xff]  }
 0x14f   :  { %14470 = vmatpush3.bf16.msra.mxu0 %v15749_v59  ;;  %14490 = vmatpush3.bf16.msra.mxu1 %v15750_v60  ;;  %v15807_v59 = vld [vmem:[%s20601_s1 + $0x2a8] sm:$0xff]  }
 0x150   :  { %14471 = vmatprep.subr.bf16.mxu0 %v16766_v2  ;;  %14491 = vmatprep.subr.bf16.mxu1 %v16766_v2  ;;  %v15808_v60 = vld [vmem:[%s20601_s1 + $0x2e8] sm:$0xff]  }
 0x153   :  { %14472 = vmatpush3.bf16.msra.mxu0 %v15751_v61  ;;  %14492 = vmatpush3.bf16.msra.mxu1 %v15752_v62  ;;  %v15809_v61 = vld [vmem:[%s20601_s1 + $0x2a0] sm:$0xff]  }
 0x154   :  { %14473 = vmatprep.subr.bf16.mxu0 %v16766_v2  ;;  %14493 = vmatprep.subr.bf16.mxu1 %v16766_v2  ;;  %v15810_v62 = vld [vmem:[%s20601_s1 + $0x2e0] sm:$0xff]  }
 0x157   :  { %14474 = vmatpush3.bf16.msra.mxu0 %v15753_v63  ;;  %14494 = vmatpush3.bf16.msra.mxu1 %v15754_v0  ;;  %v15811_v63 = vld [vmem:[%s20601_s1 + $0x298] sm:$0xff]  }
 0x158   :  { %14499 = vmatprep.subr.bf16.mxu0 %v16766_v2  ;;  %14519 = vmatprep.subr.bf16.mxu1 %v16766_v2  ;;  %v15812_v0 = vld [vmem:[%s20601_s1 + $0x2d8] sm:$0xff]  }
 0x15a   :  { %14476 = vmatmul.mubr.bf16.vlgmr.msra.gmra.mxu0 %v16926_v50  ;;  %14496 = vmatmul.mubr.bf16.vlgmr.msra.gmra.mxu1 %v16926_v50 }
 0x15b   :  { %14500 = vmatpush3.bf16.msra.mxu0 %v15755_v1  ;;  %14520 = vmatpush3.bf16.msra.mxu1 %v15756_v3  ;;  %v15813_v1 = vld [vmem:[%s20601_s1 + $0x290] sm:$0xff]  }
 0x15c   :  { %14501 = vmatprep.subr.bf16.mxu0 %v16766_v2  ;;  %14521 = vmatprep.subr.bf16.mxu1 %v16766_v2  ;;  %v15814_v3 = vld [vmem:[%s20601_s1 + $0x2d0] sm:$0xff]  }
 0x15d   :  { %14515 = vmatprep.mubr.msk.bf16.mxu0 %vm16767_vm0, %v16766_v2  ;;  %14535 = vmatprep.mubr.msk.bf16.mxu1 %vm16767_vm0, %v16766_v2 }
 0x15f   :  { %14502 = vmatpush3.bf16.msra.mxu0 %v15757_v4  ;;  %14522 = vmatpush3.bf16.msra.mxu1 %v15758_v5  ;;  %v15815_v4 = vld [vmem:[%s20601_s1 + $0x288] sm:$0xff]  }
 0x160   :  { %14503 = vmatprep.subr.bf16.mxu0 %v16766_v2  ;;  %14523 = vmatprep.subr.bf16.mxu1 %v16766_v2  ;;  %v15816_v5 = vld [vmem:[%s20601_s1 + $0x2c8] sm:$0xff]  }
 0x163   :  { %14504 = vmatpush3.bf16.msra.mxu0 %v15759_v6  ;;  %14524 = vmatpush3.bf16.msra.mxu1 %v15760_v7  ;;  %v15817_v6 = vld [vmem:[%s20601_s1 + $0x280] sm:$0xff]  }
 0x164   :  { %14505 = vmatprep.subr.bf16.mxu0 %v16766_v2  ;;  %14525 = vmatprep.subr.bf16.mxu1 %v16766_v2  ;;  %v15818_v7 = vld [vmem:[%s20601_s1 + $0x2c0] sm:$0xff]  }
 0x167   :  { %14506 = vmatpush3.bf16.msra.mxu0 %v15761_v8  ;;  %14526 = vmatpush3.bf16.msra.mxu1 %v15762_v9 }
 0x168   :  { %14507 = vmatprep.subr.bf16.mxu0 %v16766_v2  ;;  %14527 = vmatprep.subr.bf16.mxu1 %v16766_v2 }
 0x16b   :  { %14508 = vmatpush3.bf16.msra.mxu0 %v15763_v10  ;;  %14528 = vmatpush3.bf16.msra.mxu1 %v15764_v11 }
 0x16c   :  { %14509 = vmatprep.subr.bf16.mxu0 %v16766_v2  ;;  %14529 = vmatprep.subr.bf16.mxu1 %v16766_v2 }
 0x16f   :  { %14510 = vmatpush3.bf16.msra.mxu0 %v15765_v12  ;;  %14530 = vmatpush3.bf16.msra.mxu1 %v15766_v13 }
 0x170   :  { %14511 = vmatprep.subr.bf16.mxu0 %v16766_v2  ;;  %14531 = vmatprep.subr.bf16.mxu1 %v16766_v2 }
 0x173   :  { %14512 = vmatpush3.bf16.msra.mxu0 %v15767_v14  ;;  %14532 = vmatpush3.bf16.msra.mxu1 %v15768_v15 }
 0x174   :  { %14513 = vmatprep.subr.bf16.mxu0 %v16766_v2  ;;  %14533 = vmatprep.subr.bf16.mxu1 %v16766_v2 }
 0x177   :  { %14514 = vmatpush3.bf16.msra.mxu0 %v15769_v16  ;;  %14534 = vmatpush3.bf16.msra.mxu1 %v15770_v17 }
 0x178   :  { %14539 = vmatprep.subr.bf16.mxu0 %v16766_v2  ;;  %14559 = vmatprep.subr.bf16.mxu1 %v16766_v2 }
 0x17a   :  { %14516 = vmatmul.mubr.bf16.vlgmr.msra.gmra.mxu0 %v16926_v50  ;;  %14536 = vmatmul.mubr.bf16.vlgmr.msra.gmra.mxu1 %v16926_v50 }
 0x17b   :  { %14540 = vmatpush3.bf16.msra.mxu0 %v15771_v18  ;;  %14560 = vmatpush3.bf16.msra.mxu1 %v15772_v19 }
 0x17c   :  { %14541 = vmatprep.subr.bf16.mxu0 %v16766_v2  ;;  %14561 = vmatprep.subr.bf16.mxu1 %v16766_v2 }
 0x17d   :  { %14555 = vmatprep.mubr.msk.bf16.mxu0 %vm16767_vm0, %v16766_v2  ;;  %14575 = vmatprep.mubr.msk.bf16.mxu1 %vm16767_vm0, %v16766_v2 }
 0x17f   :  { %14542 = vmatpush3.bf16.msra.mxu0 %v15773_v20  ;;  %14562 = vmatpush3.bf16.msra.mxu1 %v15774_v21 }
 0x180   :  { %14543 = vmatprep.subr.bf16.mxu0 %v16766_v2  ;;  %14563 = vmatprep.subr.bf16.mxu1 %v16766_v2 }
 0x183   :  { %14544 = vmatpush3.bf16.msra.mxu0 %v15775_v22  ;;  %14564 = vmatpush3.bf16.msra.mxu1 %v15776_v23 }
 0x184   :  { %14545 = vmatprep.subr.bf16.mxu0 %v16766_v2  ;;  %14565 = vmatprep.subr.bf16.mxu1 %v16766_v2 }
 0x187   :  { %14546 = vmatpush3.bf16.msra.mxu0 %v15777_v24  ;;  %14566 = vmatpush3.bf16.msra.mxu1 %v15778_v25 }
 0x188   :  { %14547 = vmatprep.subr.bf16.mxu0 %v16766_v2  ;;  %14567 = vmatprep.subr.bf16.mxu1 %v16766_v2 }
 0x18b   :  { %14548 = vmatpush3.bf16.msra.mxu0 %v15779_v26  ;;  %14568 = vmatpush3.bf16.msra.mxu1 %v15780_v27 }
 0x18c   :  { %14549 = vmatprep.subr.bf16.mxu0 %v16766_v2  ;;  %14569 = vmatprep.subr.bf16.mxu1 %v16766_v2 }
 0x18f   :  { %14550 = vmatpush3.bf16.msra.mxu0 %v15781_v28  ;;  %14570 = vmatpush3.bf16.msra.mxu1 %v15782_v29 }
 0x190   :  { %14551 = vmatprep.subr.bf16.mxu0 %v16766_v2  ;;  %14571 = vmatprep.subr.bf16.mxu1 %v16766_v2 }
 0x193   :  { %14552 = vmatpush3.bf16.msra.mxu0 %v15783_v30  ;;  %14572 = vmatpush3.bf16.msra.mxu1 %v15784_v31 }
 0x194   :  { %14553 = vmatprep.subr.bf16.mxu0 %v16766_v2  ;;  %14573 = vmatprep.subr.bf16.mxu1 %v16766_v2 }
 0x197   :  { %14554 = vmatpush3.bf16.msra.mxu0 %v15785_v33  ;;  %14574 = vmatpush3.bf16.msra.mxu1 %v15786_v35 }
 0x198   :  { %14579 = vmatprep.subr.bf16.mxu0 %v16766_v2  ;;  %14599 = vmatprep.subr.bf16.mxu1 %v16766_v2 }
 0x19a   :  { %14556 = vmatmul.mubr.bf16.vlgmr.msra.gmra.mxu0 %v16926_v50  ;;  %14576 = vmatmul.mubr.bf16.vlgmr.msra.gmra.mxu1 %v16926_v50 }
 0x19b   :  { %14580 = vmatpush3.bf16.msra.mxu0 %v15787_v37  ;;  %14600 = vmatpush3.bf16.msra.mxu1 %v15788_v39 }
 0x19c   :  { %14581 = vmatprep.subr.bf16.mxu0 %v16766_v2  ;;  %14601 = vmatprep.subr.bf16.mxu1 %v16766_v2 }
 0x19d   :  { %14595 = vmatprep.mubr.msk.bf16.mxu0 %vm16767_vm0, %v16766_v2  ;;  %14615 = vmatprep.mubr.msk.bf16.mxu1 %vm16767_vm0, %v16766_v2 }
 0x19f   :  { %14582 = vmatpush3.bf16.msra.mxu0 %v15789_v40  ;;  %14602 = vmatpush3.bf16.msra.mxu1 %v15790_v41 }
 0x1a0   :  { %14583 = vmatprep.subr.bf16.mxu0 %v16766_v2  ;;  %14603 = vmatprep.subr.bf16.mxu1 %v16766_v2 }
 0x1a3   :  { %14584 = vmatpush3.bf16.msra.mxu0 %v15791_v42  ;;  %14604 = vmatpush3.bf16.msra.mxu1 %v15792_v43 }
 0x1a4   :  { %14585 = vmatprep.subr.bf16.mxu0 %v16766_v2  ;;  %14605 = vmatprep.subr.bf16.mxu1 %v16766_v2 }
 0x1a7   :  { %14586 = vmatpush3.bf16.msra.mxu0 %v15793_v44  ;;  %14606 = vmatpush3.bf16.msra.mxu1 %v15794_v45 }
 0x1a8   :  { %14587 = vmatprep.subr.bf16.mxu0 %v16766_v2  ;;  %14607 = vmatprep.subr.bf16.mxu1 %v16766_v2 }
 0x1ab   :  { %14588 = vmatpush3.bf16.msra.mxu0 %v15795_v46  ;;  %14608 = vmatpush3.bf16.msra.mxu1 %v15796_v47 }
 0x1ac   :  { %14589 = vmatprep.subr.bf16.mxu0 %v16766_v2  ;;  %14609 = vmatprep.subr.bf16.mxu1 %v16766_v2 }
 0x1af   :  { %14590 = vmatpush3.bf16.msra.mxu0 %v15797_v48  ;;  %14610 = vmatpush3.bf16.msra.mxu1 %v15798_v49 }
 0x1b0   :  { %14591 = vmatprep.subr.bf16.mxu0 %v16766_v2  ;;  %14611 = vmatprep.subr.bf16.mxu1 %v16766_v2 }
 0x1b3   :  { %14592 = vmatpush3.bf16.msra.mxu0 %v15799_v51  ;;  %14612 = vmatpush3.bf16.msra.mxu1 %v15800_v52 }
 0x1b4   :  { %14593 = vmatprep.subr.bf16.mxu0 %v16766_v2  ;;  %14613 = vmatprep.subr.bf16.mxu1 %v16766_v2 }
 0x1b7   :  { %14594 = vmatpush3.bf16.msra.mxu0 %v15801_v53  ;;  %14614 = vmatpush3.bf16.msra.mxu1 %v15802_v54 }
 0x1b8   :  { %14619 = vmatprep.subr.bf16.mxu0 %v16766_v2  ;;  %14639 = vmatprep.subr.bf16.mxu1 %v16766_v2 }
 0x1ba   :  { %14596 = vmatmul.mubr.bf16.vlgmr.msra.gmra.mxu0 %v16926_v50  ;;  %14616 = vmatmul.mubr.bf16.vlgmr.msra.gmra.mxu1 %v16926_v50 }
 0x1bb   :  { %14620 = vmatpush3.bf16.msra.mxu0 %v15803_v55  ;;  %14640 = vmatpush3.bf16.msra.mxu1 %v15804_v56 }
 0x1bc   :  { %14621 = vmatprep.subr.bf16.mxu0 %v16766_v2  ;;  %14641 = vmatprep.subr.bf16.mxu1 %v16766_v2 }
 0x1bd   :  { %14635 = vmatprep.mubr.msk.bf16.mxu0 %vm16767_vm0, %v16766_v2  ;;  %14655 = vmatprep.mubr.msk.bf16.mxu1 %vm16767_vm0, %v16766_v2 }
 0x1bf   :  { %14622 = vmatpush3.bf16.msra.mxu0 %v15805_v57  ;;  %14642 = vmatpush3.bf16.msra.mxu1 %v15806_v58 }
 0x1c0   :  { %14623 = vmatprep.subr.bf16.mxu0 %v16766_v2  ;;  %14643 = vmatprep.subr.bf16.mxu1 %v16766_v2 }
 0x1c3   :  { %14624 = vmatpush3.bf16.msra.mxu0 %v15807_v59  ;;  %14644 = vmatpush3.bf16.msra.mxu1 %v15808_v60 }
 0x1c4   :  { %14625 = vmatprep.subr.bf16.mxu0 %v16766_v2  ;;  %14645 = vmatprep.subr.bf16.mxu1 %v16766_v2 }
 0x1c7   :  { %14626 = vmatpush3.bf16.msra.mxu0 %v15809_v61  ;;  %14646 = vmatpush3.bf16.msra.mxu1 %v15810_v62 }
 0x1c8   :  { %14627 = vmatprep.subr.bf16.mxu0 %v16766_v2  ;;  %14647 = vmatprep.subr.bf16.mxu1 %v16766_v2 }
 0x1cb   :  { %14628 = vmatpush3.bf16.msra.mxu0 %v15811_v63  ;;  %14648 = vmatpush3.bf16.msra.mxu1 %v15812_v0 }
 0x1cc   :  { %14629 = vmatprep.subr.bf16.mxu0 %v16766_v2  ;;  %14649 = vmatprep.subr.bf16.mxu1 %v16766_v2 }
 0x1cf   :  { %14630 = vmatpush3.bf16.msra.mxu0 %v15813_v1  ;;  %14650 = vmatpush3.bf16.msra.mxu1 %v15814_v3 }
 0x1d0   :  { %14631 = vmatprep.subr.bf16.mxu0 %v16766_v2  ;;  %14651 = vmatprep.subr.bf16.mxu1 %v16766_v2 }
 0x1d3   :  { %14632 = vmatpush3.bf16.msra.mxu0 %v15815_v4  ;;  %14652 = vmatpush3.bf16.msra.mxu1 %v15816_v5 }
 0x1d4   :  { %14633 = vmatprep.subr.bf16.mxu0 %v16766_v2  ;;  %14653 = vmatprep.subr.bf16.mxu1 %v16766_v2 }
 0x1d7   :  { %14634 = vmatpush3.bf16.msra.mxu0 %v15817_v6  ;;  %14654 = vmatpush3.bf16.msra.mxu1 %v15818_v7 }
 0x1d8   :  { %14659 = vmatprep.subr.bf16.mxu1 %v16766_v2  ;;  %14683 = vmatprep.subr.bf16.mxu0 %v16766_v2 }
 0x1da   :  { %14636 = vmatmul.mubr.bf16.vlgmr.msra.gmra.mxu0 %v16926_v50  ;;  %14656 = vmatmul.mubr.bf16.vlgmr.msra.gmra.mxu1 %v16926_v50 }
 0x1db   :  { %14661 = vmatprep.mubr.msk.bf16.mxu1 %vm16767_vm0, %v16766_v2  ;;  %14685 = vmatprep.mubr.msk.bf16.mxu0 %vm16767_vm0, %v16766_v2 }
 0x1fa   :  { %v236_v8 = vpop.f32.mrf.mxu0  ;;  %v325_v9 = vpop.f32.mrf.mxu1 }
 0x1fc   :  { %v14437_v10 = vpop.f32.mrf.mxu0  ;;  %v14457_v11 = vpop.f32.mrf.mxu1 }
 0x1fe   :  { %v239_v12 = vpop.f32.mrf.mxu0  ;;  %v328_v13 = vpop.f32.mrf.mxu1 }
 0x1ff   :  { %v1352_v14 = vpack.c.bf16 %v239_v12, %v236_v8  ;;  %v1353_v15 = vpack.c.bf16 %v328_v13, %v325_v9  ;;  %v37_v13 = vadd.s32 8, %v16905_v34 }
 0x200   :  { %v14438_v16 = vpop.f32.mrf.mxu0  ;;  %v14458_v17 = vpop.f32.mrf.mxu1 }
 0x201   :  { %v16768_v17 = vmov -1e+30  }
 0x21a   :  { %v414_v18 = vpop.f32.mrf.mxu0  ;;  %v503_v19 = vpop.f32.mrf.mxu1 }
 0x21c   :  { %v14477_v20 = vpop.f32.mrf.mxu0  ;;  %v14497_v50 = vpop.f32.mrf.mxu1 }
 0x21e   :  { %v417_v21 = vpop.f32.mrf.mxu0  ;;  %v506_v22 = vpop.f32.mrf.mxu1 }
 0x21f   :  { %v1354_v23 = vpack.c.bf16 %v417_v21, %v414_v18  ;;  %v1355_v24 = vpack.c.bf16 %v506_v22, %v503_v19 }
 0x220   :  { %v14478_v25 = vpop.f32.mrf.mxu0  ;;  %v14498_v26 = vpop.f32.mrf.mxu1 }
 0x23a   :  { %v657_v27 = vpop.f32.mrf.mxu0  ;;  %v746_v28 = vpop.f32.mrf.mxu1 }
 0x23c   :  { %v14517_v29 = vpop.f32.mrf.mxu0  ;;  %v14537_v30 = vpop.f32.mrf.mxu1 }
 0x23e   :  { %v660_v31 = vpop.f32.mrf.mxu0  ;;  %v749_v33 = vpop.f32.mrf.mxu1 }
 0x23f   :  { %v1356_v35 = vpack.c.bf16 %v660_v31, %v657_v27  ;;  %v1357_v41 = vpack.c.bf16 %v749_v33, %v746_v28 }
 0x240   :  { %v14518_v37 = vpop.f32.mrf.mxu0  ;;  %v14538_v39 = vpop.f32.mrf.mxu1 }
 0x241   :  { %v1365_v40 = vsel %vm1360_vm1, %v1356_v35, 0  ;;  %v1412_v42 = vsel %vm1360_vm1, %v1357_v41, 0 }
 0x242   :  { %14660 = vmatpush3.bf16.xpose.msra.mxu1 %v1365_v40 }
 0x243   :  { %14665 = vmatprep.subr.bf16.mxu1 %v16766_v2 }
 0x249   :  { %14662 = vmatmul.mubr.msk.bf16.vlgmr.msra.gmra.mxu1 %vm1360_vm1, %v1352_v14  ;;  %v41_v14 = vand.u32 7, %v37_v13 }
 0x24a   :  { %14666 = vmatpush3.bf16.xpose.msra.mxu1 %v1412_v42  ;;  %14667 = vmatprep.mubr.msk.bf16.mxu1 %vm16767_vm0, %v16766_v2 }
 0x24b   :  { %14671 = vmatprep.subr.bf16.mxu1 %v16766_v2  ;;  %v43_v16 = vsub.s32 %v37_v13, %v41_v14 }
 0x251   :  { %14668 = vmatmul.mubr.msk.bf16.vlgmr.msra.gmra.mxu1 %vm1360_vm1, %v1353_v15  ;;  %v39_v15 = vand.u32 127, %v35_v32 }
 0x252   :  { %14673 = vmatprep.mubr.msk.bf16.mxu1 %vm16767_vm0, %v16766_v2 }
 0x253   :  { %vm44_vm2 = vcmp.le.s32.totalorder %v39_v15, %v16905_v34  ;;  %vm45_vm3 = vcmp.le.s32.totalorder %v39_v15, %v37_v13  ;;  %vm47_vm4 = vcmp.ge.s32.totalorder %v39_v15, %v43_v16 }
 0x254   :  { %v17315_v18 = vsel %vm44_vm2, 0.0, %v16768_v17  ;;  %vm49_vm5 = vmand %vm45_vm3, %vm47_vm4 }
 0x255   :  { %v17318_v21 = vsel %vm49_vm5, 0.0, %v16768_v17 }
 0x25a   :  { %v835_v43 = vpop.f32.mrf.mxu0  ;;  %v924_v44 = vpop.f32.mrf.mxu1 }
 0x25c   :  { %v14557_v45 = vpop.f32.mrf.mxu0  ;;  %v14577_v46 = vpop.f32.mrf.mxu1 }
 0x25e   :  { %v838_v47 = vpop.f32.mrf.mxu0  ;;  %v927_v48 = vpop.f32.mrf.mxu1 }
 0x25f   :  { %v1358_v49 = vpack.c.bf16 %v838_v47, %v835_v43  ;;  %v1359_v54 = vpack.c.bf16 %v927_v48, %v924_v44 }
 0x260   :  { %v14558_v51 = vpop.f32.mrf.mxu0  ;;  %v14578_v52 = vpop.f32.mrf.mxu1 }
 0x261   :  { %v1459_v53 = vsel %vm1360_vm1, %v1358_v49, 0  ;;  %v1506_v55 = vsel %vm1360_vm1, %v1359_v54, 0 }
 0x262   :  { %14672 = vmatpush3.bf16.xpose.msra.mxu1 %v1459_v53 }
 0x263   :  { %14677 = vmatprep.subr.bf16.mxu1 %v16766_v2 }
 0x269   :  { %14674 = vmatmul.mubr.msk.bf16.vlgmr.msra.gmra.mxu1 %vm1360_vm1, %v1354_v23 }
 0x26a   :  { %14678 = vmatpush3.bf16.xpose.msra.mxu1 %v1506_v55  ;;  %14679 = vmatprep.mubr.msk.bf16.mxu1 %vm16767_vm0, %v16766_v2 }
 0x26b   :  { %14689 = vmatprep.subr.bf16.mxu1 %v16766_v2 }
 0x271   :  { %14680 = vmatmul.mubr.msk.bf16.vlgmr.msra.gmra.mxu1 %vm1360_vm1, %v1355_v24 }
 0x272   :  { %14691 = vmatprep.mubr.msk.bf16.mxu1 %vm16767_vm0, %v16766_v2 }
 0x27a   :  { %v1078_v56 = vpop.f32.mrf.mxu0  ;;  %v1167_v57 = vpop.f32.mrf.mxu1 }
 0x27c   :  { %v14597_v58 = vpop.f32.mrf.mxu0  ;;  %v14617_v59 = vpop.f32.mrf.mxu1 }
 0x27e   :  { %v1081_v60 = vpop.f32.mrf.mxu0  ;;  %v1170_v61 = vpop.f32.mrf.mxu1 }
 0x27f   :  { %v1642_v62 = vpack.c.bf16 %v1081_v60, %v1078_v56  ;;  %v1643_v63 = vpack.c.bf16 %v1170_v61, %v1167_v57 }
 0x280   :  { %v14598_v0 = vpop.f32.mrf.mxu0  ;;  %v14618_v1 = vpop.f32.mrf.mxu1 }
 0x281   :  { %14684 = vmatpush3.bf16.msra.mxu0 %v1642_v62  ;;  %14690 = vmatpush3.bf16.msra.mxu1 %v1643_v63 }
 0x282   :  { %14695 = vmatprep.subr.bf16.mxu0 %v16766_v2  ;;  %14701 = vmatprep.subr.bf16.mxu1 %v16766_v2 }
 0x29a   :  { %v17300_v3 = vpop.f32.mrf.mxu0  ;;  %v17302_v4 = vpop.f32.mrf.mxu1 }
 0x29c   :  { %v14637_v5 = vpop.f32.mrf.mxu0  ;;  %v14657_v6 = vpop.f32.mrf.mxu1 }
 0x29e   :  { %v17304_v7 = vpop.f32.mrf.mxu0  ;;  %v17306_v8 = vpop.f32.mrf.mxu1 }
 0x29f   :  { %v1644_v9 = vpack.c.bf16 %v17304_v7, %v17300_v3  ;;  %v1645_v10 = vpack.c.bf16 %v17306_v8, %v17302_v4 }
 0x2a0   :  { %v14638_v11 = vpop.f32.mrf.mxu0  ;;  %v14658_v12 = vpop.f32.mrf.mxu1 }
 0x309   :  { %v1401_v19 = vpop.f32.mrf.mxu1 }
 0x30a   :  { %v1402_v20 = vadd.f32 %v1401_v19, %v17315_v18 }
 0x30b   :  { %v14663_v50 = vpop.f32.mrf.mxu1 }
 0x30c   :  { %v1550_v22 = vsel %vm1549_vm6, %v1402_v20, -inf }
 0x30d   :  { %1551 = vmax.xlane.f32.xlu0 %v1550_v22  ;;  %v1404_v32 = vpop.f32.mrf.mxu1 }
 0x30e   :  { %v1405_v23 = vadd.f32 %v1404_v32, %v17318_v21 }
 0x30f   :  { %v14664_v24 = vpop.f32.mrf.mxu1 }
 0x310   :  { %v1553_v25 = vsel %vm1549_vm6, %v1405_v23, -inf }
 0x311   :  { %1554 = vmax.xlane.f32.xlu1 %v1553_v25  ;;  %v1448_v26 = vpop.f32.mrf.mxu1 }
 0x312   :  { %v1449_v27 = vadd.f32 %v1448_v26, %v17315_v18 }
 0x313   :  { %v14669_v28 = vpop.f32.mrf.mxu1 }
 0x314   :  { %v1556_v29 = vsel %vm1549_vm6, %v1449_v27, -inf }
 0x315   :  { %1557 = vmax.xlane.f32.xlu0 %v1556_v29  ;;  %v1451_v30 = vpop.f32.mrf.mxu1 }
 0x316   :  { %v1452_v31 = vadd.f32 %v1451_v30, %v17318_v21 }
 0x317   :  { %v14670_v33 = vpop.f32.mrf.mxu1 }
 0x318   :  { %v1559_v35 = vsel %vm1549_vm6, %v1452_v31, -inf }
 0x319   :  { %1560 = vmax.xlane.f32.xlu1 %v1559_v35 }
 0x329   :  { %v1495_v37 = vpop.f32.mrf.mxu1 }
 0x32a   :  { %v1496_v39 = vadd.f32 %v1495_v37, %v17315_v18 }
 0x32b   :  { %v14675_v40 = vpop.f32.mrf.mxu1 }
 0x32c   :  { %v1562_v41 = vsel %vm1549_vm6, %v1496_v39, -inf }
 0x32d   :  { %1563 = vmax.xlane.f32.xlu0 %v1562_v41  ;;  %v1498_v42 = vpop.f32.mrf.mxu1 }
 0x32e   :  { %v1499_v43 = vadd.f32 %v1498_v42, %v17318_v21 }
 0x32f   :  { %v14676_v44 = vpop.f32.mrf.mxu1 }
 0x330   :  { %v1565_v45 = vsel %vm1549_vm6, %v1499_v43, -inf }
 0x331   :  { %1566 = vmax.xlane.f32.xlu1 %v1565_v45  ;;  %v1542_v46 = vpop.f32.mrf.mxu1 }
 0x332   :  { %v1543_v47 = vadd.f32 %v1542_v46, %v17315_v18 }
 0x333   :  { %v14681_v48 = vpop.f32.mrf.mxu1 }
 0x334   :  { %v1568_v49 = vsel %vm1549_vm6, %v1543_v47, -inf }
 0x335   :  { %1569 = vmax.xlane.f32.xlu0 %v1568_v49  ;;  %v1545_v51 = vpop.f32.mrf.mxu1 }
 0x336   :  { %v1546_v52 = vadd.f32 %v1545_v51, %v17318_v21 }
 0x337   :  { %v14682_v53 = vpop.f32.mrf.mxu1 }
 0x338   :  { %v1571_v54 = vsel %vm1549_vm6, %v1546_v52, -inf }
 0x339   :  { %1572 = vmax.xlane.f32.xlu1 %v1571_v54 }
 0x396   :  { %v1552_v55 = vpop.xlane.xlu0 %1551 }
 0x397   :  { %v1574_v56 = vsub.f32 %v1402_v20, %v1552_v55 }
 0x399   :  { %v1582_v57 = vmul.f32 1.442695, %v1574_v56 }
 0x39a   :  { %v1555_v58 = vpop.xlane.xlu1 %1554 }
 0x39b   :  { %16471 = vpow2.f32 %v1582_v57  ;;  %v1575_v59 = vsub.f32 %v1405_v23, %v1555_v58 }
 0x39d   :  { %v1584_v60 = vmul.f32 1.442695, %v1575_v59 }
 0x39e   :  { %v1558_v61 = vpop.xlane.xlu0 %1557 }
 0x39f   :  { %16473 = vpow2.f32 %v1584_v60  ;;  %v1576_v62 = vsub.f32 %v1449_v27, %v1558_v61 }
 0x3a1   :  { %v1586_v63 = vmul.f32 1.442695, %v1576_v62 }
 0x3a2   :  { %v1561_v0 = vpop.xlane.xlu1 %1560 }
 0x3a3   :  { %16475 = vpow2.f32 %v1586_v63  ;;  %v1577_v1 = vsub.f32 %v1452_v31, %v1561_v0 }
 0x3a5   :  { %v1588_v5 = vmul.f32 1.442695, %v1577_v1  ;;  %v15819_v1 = vld [vmem:[%s20603_s2 + $0x8] sm:$0xff]  }
 0x3a7   :  { %16477 = vpow2.f32 %v1588_v5  ;;  %v15820_v5 = vld [vmem:[%s20603_s2] sm:$0xff]  }
 0x3a8   :  { %v16472_v6 = vpop.eup %16471 }
 0x3a9   :  { %v1598_v11 = vsel %vm1549_vm6, %v16472_v6, 0.0 }
 0x3aa   :  { %1599 = vadd.xlane.f32.xlu0 %v1598_v11  ;;  %v15822_v11 = vld [vmem:[%s20603_s2 + $0x10] sm:$0xff]  }
 0x3ac   :  { %v16474_v12 = vpop.eup %16473 }
 0x3ad   :  { %v1601_v13 = vsel %vm1549_vm6, %v16474_v12, 0.0 }
 0x3ae   :  { %1602 = vadd.xlane.f32.xlu1 %v1601_v13 }
 0x3b0   :  { %v16476_v14 = vpop.eup %16475 }
 0x3b1   :  { %v1604_v15 = vsel %vm1549_vm6, %v16476_v14, 0.0 }
 0x3b2   :  { %1605 = vadd.xlane.f32.xlu0 %v1604_v15  ;;  %v15823_v15 = vld [vmem:[%s20603_s2 + $0x28] sm:$0xff]  }
 0x3b4   :  { %v16478_v16 = vpop.eup %16477 }
 0x3b5   :  { %v1607_v17 = vsel %vm1549_vm6, %v16478_v16, 0.0 }
 0x3b6   :  { %v1564_v19 = vpop.xlane.xlu0 %1563  ;;  %1608 = vadd.xlane.f32.xlu1 %v1607_v17 }
 0x3b7   :  { %v1578_v20 = vsub.f32 %v1496_v39, %v1564_v19 }
 0x3b9   :  { %v1590_v50 = vmul.f32 1.442695, %v1578_v20  ;;  %v15824_v20 = vld [vmem:[%s20603_s2 + $0x20] sm:$0xff]  }
 0x3ba   :  { %v1567_v22 = vpop.xlane.xlu1 %1566 }
 0x3bb   :  { %16479 = vpow2.f32 %v1590_v50  ;;  %v1579_v32 = vsub.f32 %v1499_v43, %v1567_v22 }
 0x3bd   :  { %v1592_v23 = vmul.f32 1.442695, %v1579_v32  ;;  %v15825_v32 = vld [vmem:[%s20603_s2 + $0x38] sm:$0xff]  }
 0x3be   :  { %v1570_v24 = vpop.xlane.xlu0 %1569 }
 0x3bf   :  { %16481 = vpow2.f32 %v1592_v23  ;;  %v1580_v25 = vsub.f32 %v1543_v47, %v1570_v24 }
 0x3c1   :  { %v1594_v26 = vmul.f32 1.442695, %v1580_v25  ;;  %v15826_v25 = vld [vmem:[%s20603_s2 + $0x30] sm:$0xff]  }
 0x3c2   :  { %v1573_v27 = vpop.xlane.xlu1 %1572 }
 0x3c3   :  { %16483 = vpow2.f32 %v1594_v26  ;;  %v1581_v28 = vsub.f32 %v1546_v52, %v1573_v27 }
 0x3c5   :  { %v1596_v29 = vmul.f32 1.442695, %v1581_v28 }
 0x3c7   :  { %16485 = vpow2.f32 %v1596_v29 }
 0x3c8   :  { %v16480_v30 = vpop.eup %16479 }
 0x3c9   :  { %v1610_v31 = vsel %vm1549_vm6, %v16480_v30, 0.0 }
 0x3ca   :  { %1611 = vadd.xlane.f32.xlu0 %v1610_v31 }
 0x3cc   :  { %v16482_v33 = vpop.eup %16481 }
 0x3cd   :  { %v1613_v35 = vsel %vm1549_vm6, %v16482_v33, 0.0 }
 0x3ce   :  { %1614 = vadd.xlane.f32.xlu1 %v1613_v35 }
 0x3d0   :  { %v16484_v37 = vpop.eup %16483 }
 0x3d1   :  { %v1616_v39 = vsel %vm1549_vm6, %v16484_v37, 0.0 }
 0x3d2   :  { %1617 = vadd.xlane.f32.xlu0 %v1616_v39 }
 0x3d4   :  { %v16486_v40 = vpop.eup %16485 }
 0x3d5   :  { %v1619_v41 = vsel %vm1549_vm6, %v16486_v40, 0.0 }
 0x3d6   :  { %1620 = vadd.xlane.f32.xlu1 %v1619_v41 }
 0x433   :  { %v1600_v42 = vpop.xlane.xlu0 %1599 }
 0x434   :  { %16487 = vrcp.f32 %v1600_v42 }
 0x437   :  { %v1603_v43 = vpop.xlane.xlu1 %1602 }
 0x438   :  { %16489 = vrcp.f32 %v1603_v43 }
 0x43b   :  { %v1606_v44 = vpop.xlane.xlu0 %1605 }
 0x43c   :  { %16491 = vrcp.f32 %v1606_v44 }
 0x43f   :  { %v1609_v45 = vpop.xlane.xlu1 %1608 }
 0x440   :  { %16493 = vrcp.f32 %v1609_v45 }
 0x441   :  { %v16488_v46 = vpop.eup %16487 }
 0x442   :  { %v1623_v48 = vmul.f32 %v16488_v46, %v16472_v6  ;;  %v15821_v6 = vld [vmem:[%s20603_s2 + $0x18] sm:$0xff]  }
 0x445   :  { %v16490_v47 = vpop.eup %16489 }
 0x446   :  { %v1625_v49 = vmul.f32 %v16490_v47, %v16474_v12 }
 0x448   :  { %v1638_v51 = vpack.c.bf16 %v1625_v49, %v1623_v48 }
 0x449   :  { %v16492_v52 = vpop.eup %16491 }
 0x44a   :  { %14686 = vmatmul.mubr.msk.bf16.vlgmr.msra.gmra.mxu0 %vm1549_vm6, %v1638_v51  ;;  %v1627_v54 = vmul.f32 %v16492_v52, %v16476_v14  ;;  %v17402_v51 = vsub.s32 2, %v16905_v34 }
 0x44b   :  { %14696 = vmatpush3.bf16.msra.mxu0 %v1644_v9  ;;  %14697 = vmatprep.mubr.msk.bf16.mxu0 %vm16767_vm0, %v16766_v2 }
 0x44c   :  { %14707 = vmatprep.subr.bf16.mxu0 %v16766_v2 }
 0x44d   :  { %v16494_v53 = vpop.eup %16493 }
 0x44e   :  { %v1629_v55 = vmul.f32 %v16494_v53, %v16478_v16 }
 0x450   :  { %v1639_v56 = vpack.c.bf16 %v1629_v55, %v1627_v54 }
 0x452   :  { %14692 = vmatmul.mubr.msk.bf16.vlgmr.msra.gmra.mxu1 %vm1549_vm6, %v1639_v56  ;;  %v17407_v56 = vld [vmem:[%s20602_s5] sm:$0x3f] }
 0x453   :  { %14702 = vmatpush3.bf16.msra.mxu1 %v1645_v10  ;;  %v1612_v57 = vpop.xlane.xlu0 %1611  ;;  %14703 = vmatprep.mubr.msk.bf16.mxu1 %vm16767_vm0, %v16766_v2 }
 0x454   :  { %14715 = vmatprep.subr.bf16.mxu1 %v16766_v2  ;;  %16495 = vrcp.f32 %v1612_v57  ;;  %v2075_v57 = vrot.slane %v17407_v56, %v17402_v51 }
 0x457   :  { %v1615_v3 = vpop.xlane.xlu1 %1614 }
 0x458   :  { %16497 = vrcp.f32 %v1615_v3 }
 0x45b   :  { %v1618_v7 = vpop.xlane.xlu0 %1617 }
 0x45c   :  { %16499 = vrcp.f32 %v1618_v7 }
 0x45f   :  { %v1621_v9 = vpop.xlane.xlu1 %1620 }
 0x460   :  { %16501 = vrcp.f32 %v1621_v9 }
 0x461   :  { %v16496_v58 = vpop.eup %16495 }
 0x462   :  { %v1631_v60 = vmul.f32 %v16496_v58, %v16480_v30 }
 0x465   :  { %v16498_v59 = vpop.eup %16497 }
 0x466   :  { %v1633_v61 = vmul.f32 %v16498_v59, %v16482_v33 }
 0x468   :  { %v1640_v62 = vpack.c.bf16 %v1633_v61, %v1631_v60 }
 0x469   :  { %v16500_v4 = vpop.eup %16499 }
 0x46a   :  { %14698 = vmatmul.mubr.msk.bf16.vlgmr.msra.gmra.mxu0 %vm1549_vm6, %v1640_v62  ;;  %v1635_v10 = vmul.f32 %v16500_v4, %v16484_v37  ;;  %v16760_v4 = vld [vmem:[%s20600_s0] sm:$0xff] }
 0x46b   :  { %14711 = vmatprep.mubr.msk.bf16.mxu0 %vm16767_vm0, %v16766_v2  ;;  %14708 = vmatpush3.bf16.msra.mxu0 %v15819_v1 }
 0x46c   :  { %14709 = vmatprep.subr.bf16.mxu0 %v16766_v2 }
 0x46d   :  { %v16502_v8 = vpop.eup %16501 }
 0x46e   :  { %v1637_v63 = vmul.f32 %v16502_v8, %v16486_v40 }
 0x46f   :  { %14710 = vmatpush3.bf16.msra.mxu0 %v15820_v5  ;;  %v15827_v5 = vld [vmem:[%s20604_s3 + $0xe0] ss:$16 sps:$4 sm:$0xff]  }
 0x470   :  { %v1641_v0 = vpack.c.bf16 %v1637_v63, %v1635_v10  ;;  %14723 = vmatprep.subr.bf16.mxu0 %v16766_v2 }
 0x472   :  { %14704 = vmatmul.mubr.msk.bf16.vlgmr.msra.gmra.mxu1 %vm1549_vm6, %v1641_v0  ;;  %v16761_v0 = vld [vmem:[%s20600_s0 + $0x8] sm:$0xff] }
 0x473   :  { %14719 = vmatprep.mubr.msk.bf16.mxu1 %vm16767_vm0, %v16766_v2  ;;  %14716 = vmatpush3.bf16.msra.mxu1 %v15821_v6  ;;  %v15829_v6 = vld [vmem:[%s20604_s3 + $0xe4] ss:$16 sps:$4 sm:$0xff]  }
 0x474   :  { %14717 = vmatprep.subr.bf16.mxu1 %v16766_v2 }
 0x477   :  { %14718 = vmatpush3.bf16.msra.mxu1 %v15822_v11  ;;  %v15830_v11 = vld [vmem:[%s20604_s3 + $0xe8] ss:$16 sps:$4 sm:$0xff]  }
 0x478   :  { %14731 = vmatprep.subr.bf16.mxu1 %v16766_v2 }
 0x50a   :  { %v1683_v12 = vpop.f32.mrf.mxu0 }
 0x50c   :  { %v14687_v13 = vpop.f32.mrf.mxu0 }
 0x50e   :  { %v1686_v14 = vpop.f32.mrf.mxu0 }
 0x50f   :  { %v1822_v16 = vpack.c.bf16 %v1686_v14, %v1683_v12  ;;  %v15832_v12 = vld [vmem:[%s20604_s3 + $0xec] ss:$16 sps:$4 sm:$0xff]  }
 0x510   :  { %v14688_v17 = vpop.f32.mrf.mxu0 }
 0x511   :  { %14712 = vmatmul.mubr.msk.bf16.vlgmr.msra.gmra.mxu0 %vm1360_vm1, %v1822_v16 }
 0x512   :  { %v1727_v19 = vpop.f32.mrf.mxu1  ;;  %14724 = vmatpush3.bf16.msra.mxu0 %v15823_v15  ;;  %14727 = vmatprep.mubr.msk.bf16.mxu0 %vm16767_vm0, %v16766_v2 }
 0x513   :  { %14725 = vmatprep.subr.bf16.mxu0 %v16766_v2 }
 0x514   :  { %v14693_v50 = vpop.f32.mrf.mxu1 }
 0x516   :  { %v1730_v22 = vpop.f32.mrf.mxu1  ;;  %14726 = vmatpush3.bf16.msra.mxu0 %v15824_v20 }
 0x517   :  { %v1823_v23 = vpack.c.bf16 %v1730_v22, %v1727_v19  ;;  %2328 = vmatprep.subr.bf16.mxu0 %v15829_v6  ;;  %v15835_v22 = vld [vmem:[%s20604_s3 + $0xc4] ss:$16 sps:$4 sm:$0xff]  }
 0x518   :  { %v14694_v24 = vpop.f32.mrf.mxu1 }
 0x519   :  { %14720 = vmatmul.mubr.msk.bf16.vlgmr.msra.gmra.mxu1 %vm1360_vm1, %v1823_v23  ;;  %v15833_v23 = vld [vmem:[%s20604_s3 + $0xc0] ss:$16 sps:$4 sm:$0xff]   ;;  %v15836_v24 = vld [vmem:[%s20604_s3 + $0xc8] ss:$16 sps:$4 sm:$0xff]  }
 0x51a   :  { %14732 = vmatpush3.bf16.msra.mxu1 %v15825_v32  ;;  %14735 = vmatprep.mubr.msk.bf16.mxu1 %vm16767_vm0, %v16766_v2  ;;  %v15838_v32 = vld [vmem:[%s20604_s3 + $0xcc] ss:$16 sps:$4 sm:$0xff]  }
 0x51b   :  { %14733 = vmatprep.subr.bf16.mxu1 %v16766_v2 }
 0x51e   :  { %14734 = vmatpush3.bf16.msra.mxu1 %v15826_v25  ;;  %v15841_v25 = vld [vmem:[%s20604_s3 + $0xa4] ss:$16 sps:$4 sm:$0xff]  }
 0x51f   :  { %2371 = vmatprep.subr.bf16.mxu1 %v15832_v12 }
 0x52a   :  { %v1771_v26 = vpop.f32.mrf.mxu0 }
 0x52c   :  { %v14699_v27 = vpop.f32.mrf.mxu0 }
 0x52d   :  { %v15839_v27 = vld [vmem:[%s20604_s3 + $0xa0] ss:$16 sps:$4 sm:$0xff]  }
 0x52e   :  { %v1774_v28 = vpop.f32.mrf.mxu0 }
 0x52f   :  { %v1824_v29 = vpack.c.bf16 %v1774_v28, %v1771_v26  ;;  %v15844_v26 = vld [vmem:[%s20604_s3 + $0xac] ss:$16 sps:$4 sm:$0xff]   ;;  %v15842_v28 = vld [vmem:[%s20604_s3 + $0xa8] ss:$16 sps:$4 sm:$0xff]  }
 0x530   :  { %v14700_v30 = vpop.f32.mrf.mxu0 }
 0x531   :  { %14728 = vmatmul.mubr.msk.bf16.vlgmr.msra.gmra.mxu0 %vm1360_vm1, %v1824_v29  ;;  %v15845_v29 = vld [vmem:[%s20604_s3 + $0x80] ss:$16 sps:$4 sm:$0xff]   ;;  %v15847_v30 = vld [vmem:[%s20604_s3 + $0x84] ss:$16 sps:$4 sm:$0xff]  }
 0x532   :  { %v1815_v31 = vpop.f32.mrf.mxu1  ;;  %2329 = vmatpush1.bf16.msra.mxu0 %v15827_v5 }
 0x533   :  { %2330 = vmatprep.subr.bf16.mxu0 %v15835_v22  ;;  %v15882_v22 = vld [vmem:[%s20605_s4 + $0xb0] sm:$0xff]  }
 0x534   :  { %v14705_v33 = vpop.f32.mrf.mxu1 }
 0x535   :  { %v15850_v33 = vld [vmem:[%s20604_s3 + $0x8c] ss:$16 sps:$4 sm:$0xff]  }
 0x536   :  { %v1818_v35 = vpop.f32.mrf.mxu1  ;;  %2331 = vmatpush1.bf16.msra.mxu0 %v15833_v23  ;;  %v15884_v23 = vld [vmem:[%s20605_s4 + $0xe8] sm:$0xff]  }
 0x537   :  { %v1825_v37 = vpack.c.bf16 %v1818_v35, %v1815_v31  ;;  %2332 = vmatprep.subr.bf16.mxu0 %v15841_v25  ;;  %v15848_v31 = vld [vmem:[%s20604_s3 + $0x88] ss:$16 sps:$4 sm:$0xff]   ;;  %v15853_v35 = vld [vmem:[%s20604_s3 + $0x64] ss:$16 sps:$4 sm:$0xff]  }
 0x538   :  { %v14706_v39 = vpop.f32.mrf.mxu1  ;;  %v15886_v25 = vld [vmem:[%s20605_s4 + $0xa8] sm:$0xff]  }
 0x539   :  { %14736 = vmatmul.mubr.msk.bf16.vlgmr.msra.gmra.mxu1 %vm1360_vm1, %v1825_v37  ;;  %v15856_v37 = vld [vmem:[%s20604_s3 + $0x6c] ss:$16 sps:$4 sm:$0xff]   ;;  %v15851_v39 = vld [vmem:[%s20604_s3 + $0x60] ss:$16 sps:$4 sm:$0xff]  }
 0x53a   :  { %2372 = vmatpush1.bf16.msra.mxu1 %v15830_v11  ;;  %2333 = vmatpush1.bf16.msra.mxu0 %v15839_v27  ;;  %v15888_v27 = vld [vmem:[%s20605_s4 + $0xe0] sm:$0xff]  }
 0x53b   :  { %2373 = vmatprep.subr.bf16.mxu1 %v15838_v32  ;;  %2334 = vmatprep.subr.bf16.mxu0 %v15847_v30  ;;  %v15883_v32 = vld [vmem:[%s20605_s4 + $0x68] sm:$0xff]   ;;  %v15891_v30 = vld [vmem:[%s20605_s4 + $0x58] sm:$0xff]  }
 0x53e   :  { %2374 = vmatpush1.bf16.msra.mxu1 %v15836_v24  ;;  %2335 = vmatpush1.bf16.msra.mxu0 %v15845_v29  ;;  %v15885_v24 = vld [vmem:[%s20605_s4 + $0x28] sm:$0xff]   ;;  %v15890_v29 = vld [vmem:[%s20605_s4 + $0xa0] sm:$0xff]  }
 0x53f   :  { %2375 = vmatprep.subr.bf16.mxu1 %v15844_v26  ;;  %2336 = vmatprep.subr.bf16.mxu0 %v15853_v35  ;;  %v15887_v26 = vld [vmem:[%s20605_s4 + $0x60] sm:$0xff]   ;;  %v15894_v35 = vld [vmem:[%s20605_s4 + $0x98] sm:$0xff]  }
 0x542   :  { %2376 = vmatpush1.bf16.msra.mxu1 %v15842_v28  ;;  %2337 = vmatpush1.bf16.msra.mxu0 %v15851_v39  ;;  %v15889_v28 = vld [vmem:[%s20605_s4 + $0x20] sm:$0xff]   ;;  %v15896_v39 = vld [vmem:[%s20605_s4 + $0xd0] sm:$0xff]  }
 0x543   :  { %2377 = vmatprep.subr.bf16.mxu1 %v15850_v33  ;;  %v15893_v33 = vld [vmem:[%s20605_s4 + $0x18] sm:$0xff]  }
 0x546   :  { %2378 = vmatpush1.bf16.msra.mxu1 %v15848_v31  ;;  %v15892_v31 = vld [vmem:[%s20605_s4 + $0xd8] sm:$0xff]  }
 0x547   :  { %2379 = vmatprep.subr.bf16.mxu1 %v15856_v37  ;;  %v15895_v37 = vld [vmem:[%s20605_s4 + $0x50] sm:$0xff]  }
 0x5d1   :  { %v1891_v40 = vpop.f32.mrf.mxu0 }
 0x5d3   :  { %v14713_v41 = vpop.f32.mrf.mxu0 }
 0x5d4   :  { %v15859_v41 = vld [vmem:[%s20604_s3 + $0x44] ss:$16 sps:$4 sm:$0xff]  }
 0x5d5   :  { %v1894_v42 = vpop.f32.mrf.mxu0  ;;  %2338 = vmatprep.subr.bf16.mxu0 %v15859_v41  ;;  %v15898_v41 = vld [vmem:[%s20605_s4 + $0x90] sm:$0xff]  }
 0x5d7   :  { %v14714_v43 = vpop.f32.mrf.mxu0 }
 0x5d8   :  { %v16769_v43 = vmov 0  }
 0x5d9   :  { %v1947_v44 = vpop.f32.mrf.mxu1  ;;  %2360 = vmatprep.mubr.bf16.mxu0 %v16769_v43  ;;  %2403 = vmatprep.mubr.bf16.mxu1 %v16769_v43 }
 0x5da   :  { %v2066_v53 = vadd.f32 %v1947_v44, %v1891_v40  ;;  %v15854_v40 = vld [vmem:[%s20604_s3 + $0x68] ss:$16 sps:$4 sm:$0xff]   ;;  %v15857_v44 = vld [vmem:[%s20604_s3 + $0x40] ss:$16 sps:$4 sm:$0xff]  }
 0x5db   :  { %v14721_v45 = vpop.f32.mrf.mxu1  ;;  %2380 = vmatpush1.bf16.msra.mxu1 %v15854_v40  ;;  %2339 = vmatpush1.bf16.msra.mxu0 %v15857_v44  ;;  %v15897_v40 = vld [vmem:[%s20605_s4 + $0x10] sm:$0xff]   ;;  %v15900_v44 = vld [vmem:[%s20605_s4 + $0xc8] sm:$0xff]  }
 0x5dc   :  { %v15860_v45 = vld [vmem:[%s20604_s3 + $0x48] ss:$16 sps:$4 sm:$0xff]  }
 0x5dd   :  { %v1950_v46 = vpop.f32.mrf.mxu1 }
 0x5de   :  { %v2069_v7 = vadd.f32 %v1950_v46, %v1894_v42  ;;  %v15862_v42 = vld [vmem:[%s20604_s3 + $0x4c] ss:$16 sps:$4 sm:$0xff]   ;;  %v15865_v46 = vld [vmem:[%s20604_s3 + $0x24] ss:$16 sps:$4 sm:$0xff]  }
 0x5df   :  { %v14722_v47 = vpop.f32.mrf.mxu1  ;;  %2381 = vmatprep.subr.bf16.mxu1 %v15862_v42  ;;  %2340 = vmatprep.subr.bf16.mxu0 %v15865_v46  ;;  %v15899_v42 = vld [vmem:[%s20605_s4 + $0x48] sm:$0xff]  }
 0x5e0   :  { %v15868_v47 = vld [vmem:[%s20604_s3 + $0x2c] ss:$16 sps:$4 sm:$0xff]   ;;  %2382 = vmatpush1.bf16.msra.mxu1 %v15860_v45 }
 0x5e1   :  { %2383 = vmatprep.subr.bf16.mxu1 %v15868_v47  ;;  %v15901_v45 = vld [vmem:[%s20605_s4 + $0x8] sm:$0xff]   ;;  %v15903_v47 = vld [vmem:[%s20605_s4 + $0x40] sm:$0xff]  }
 0x5e2   :  { %v15902_v46 = vld [vmem:[%s20605_s4 + $0x88] sm:$0xff]  }
 0x5f1   :  { %v2003_v48 = vpop.f32.mrf.mxu0 }
 0x5f2   :  { %v2067_v55 = vadd.f32 %v2066_v53, %v2003_v48  ;;  %v15863_v48 = vld [vmem:[%s20604_s3 + $0x20] ss:$16 sps:$4 sm:$0xff]   ;;  %v15874_v53 = vld [vmem:[%s20604_s3 + $0xc] ss:$16 sps:$4 sm:$0xff]  }
 0x5f3   :  { %v14729_v49 = vpop.f32.mrf.mxu0  ;;  %2341 = vmatpush1.bf16.msra.mxu0 %v15863_v48  ;;  %v15904_v48 = vld [vmem:[%s20605_s4 + $0xc0] sm:$0xff]  }
 0x5f4   :  { %v15866_v49 = vld [vmem:[%s20604_s3 + $0x28] ss:$16 sps:$4 sm:$0xff]  }
 0x5f5   :  { %v2006_v52 = vpop.f32.mrf.mxu0  ;;  %2384 = vmatpush1.bf16.msra.mxu1 %v15866_v49  ;;  %v15905_v49 = vld [vmem:[%s20605_s4] sm:$0xff]  }
 0x5f6   :  { %v2070_v59 = vadd.f32 %v2069_v7, %v2006_v52  ;;  %v15871_v52 = vld [vmem:[%s20604_s3 + $0x4] ss:$16 sps:$4 sm:$0xff]   ;;  %2385 = vmatprep.subr.bf16.mxu1 %v15874_v53  ;;  %v53_v53 = vld [vmem:[%s20606_s6] sm:$0xf] }
 0x5f7   :  { %v14730_v54 = vpop.f32.mrf.mxu0  ;;  %2342 = vmatprep.subr.bf16.mxu0 %v15871_v52  ;;  %v15906_v52 = vld [vmem:[%s20605_s4 + $0x80] sm:$0xff]  }
 0x5f8   :  { %v15869_v54 = vld [vmem:[%s20604_s3] ss:$16 sps:$4 sm:$0xff]  }
 0x5f9   :  { %v2059_v3 = vpop.f32.mrf.mxu1  ;;  %2343 = vmatpush1.bf16.msra.mxu0 %v15869_v54  ;;  %v2151_v54 = vrot.slane %v53_v53, %v16911_v36 }
 0x5fa   :  { %v2068_v9 = vadd.f32 %v2067_v55, %v2059_v3  ;;  %v15872_v55 = vld [vmem:[%s20604_s3 + $0x8] ss:$16 sps:$4 sm:$0xff]  }
 0x5fb   :  { %v14737_v58 = vpop.f32.mrf.mxu1  ;;  %2386 = vmatpush1.bf16.msra.mxu1 %v15872_v55  ;;  %v2159_v55 = vrot.slane %v53_v53, %v17402_v51 }
 0x5fc   :  { %v2076_v60 = vadd.f32 %v2075_v57, %v2068_v9 }
 0x5fd   :  { %v2062_v61 = vpop.f32.mrf.mxu1 }
 0x5fe   :  { %v2071_v62 = vadd.f32 %v2070_v59, %v2062_v61  ;;  %v17414_v8 = vadd.f32 %v16760_v4, %v2076_v60  ;;  %v17532_v60 = vsub.s32 3, %v16905_v34 }
 0x5ff   :  { %v14738_v10 = vpop.f32.mrf.mxu1 }
 0x600   :  { %v2077_v63 = vadd.f32 %v2075_v57, %v2071_v62  ;;  %2080 = vadd.xlane.f32.xlu0 %v17414_v8  ;;  %v2105_v4 = vrot.slane %v17407_v56, %v17532_v60  ;;  %v17538_v10 = vsub.s32 4, %v16905_v34 }
 0x602   :  { %v17420_v1 = vadd.f32 %v16761_v0, %v2077_v63  ;;  %v2111_v6 = vrot.slane %v17407_v56, %v17538_v10  ;;  %v15878_v56 = vld [vmem:[%s20605_s4 + $0xb8] sm:$0xff]  }
 0x604   :  { %2082 = vadd.xlane.f32.xlu1 %v17420_v1 }
 0x689   :  { %v2081_v13 = vpop.xlane.xlu0 %2080 }
 0x68a   :  { %v2084_v14 = vmul.f32 0.0078125, %v2081_v13 }
 0x68c   :  { %v17436_v15 = vsub.f32 %v17414_v8, %v2084_v14 }
 0x68d   :  { %v2083_v16 = vpop.xlane.xlu1 %2082 }
 0x68e   :  { %v2085_v17 = vmul.f32 0.0078125, %v2083_v16  ;;  %v2088_v19 = vmul.f32 %v17436_v15, %v17436_v15  ;;  %v15876_v16 = vld [vmem:[%s20605_s4 + $0xf8] sm:$0xff]  }
 0x68f   :  { %13848 = vmatprep.subr.bf16.mxu1 %v15876_v16 }
 0x690   :  { %v17441_v20 = vsub.f32 %v17420_v1, %v2085_v17  ;;  %2090 = vadd.xlane.f32.xlu0 %v2088_v19  ;;  %v15877_v17 = vld [vmem:[%s20605_s4 + $0x38] sm:$0xff]   ;;  %v15879_v19 = vld [vmem:[%s20605_s4 + $0x70] sm:$0xff]  }
 0x692   :  { %v2089_v50 = vmul.f32 %v17441_v20, %v17441_v20 }
 0x694   :  { %2092 = vadd.xlane.f32.xlu1 %v2089_v50  ;;  %v15881_v50 = vld [vmem:[%s20605_s4 + $0x30] sm:$0xff]  }
 0x719   :  { %v2091_v57 = vpop.xlane.xlu0 %2090 }
 0x71a   :  { %v2094_v3 = vmul.f32 0.0078125, %v2091_v57 }
 0x71c   :  { %v2096_v7 = vadd.f32 1e-05, %v2094_v3 }
 0x71d   :  { %v2093_v9 = vpop.xlane.xlu1 %2092 }
 0x71e   :  { %16503 = vrsqrt.f32 %v2096_v7  ;;  %v2095_v58 = vmul.f32 0.0078125, %v2093_v9  ;;  %v2155_v7 = vrot.slane %v53_v53, %v16914_v38  ;;  %v2163_v9 = vrot.slane %v53_v53, %v17532_v60 }
 0x720   :  { %v2097_v59 = vadd.f32 1e-05, %v2095_v58 }
 0x722   :  { %16505 = vrsqrt.f32 %v2097_v59 }
 0x72b   :  { %v16504_v61 = vpop.eup %16503 }
 0x72c   :  { %v2100_v62 = vmul.f32 %v16504_v61, %v17436_v15  ;;  %v15875_v15 = vld [vmem:[%s20605_s4 + $0x78] sm:$0xff]  }
 0x72d   :  { %13826 = vmatprep.subr.bf16.mxu0 %v15875_v15 }
 0x72e   :  { %v2106_v5 = vmul.f32 %v2105_v4, %v2100_v62 }
 0x72f   :  { %v16506_v63 = vpop.eup %16505 }
 0x730   :  { %v2101_v0 = vmul.f32 %v16506_v63, %v17441_v20  ;;  %v2112_v12 = vadd.f32 %v2111_v6, %v2106_v5  ;;  %v15880_v20 = vld [vmem:[%s20605_s4 + $0xf0] sm:$0xff]  }
 0x732   :  { %v2107_v11 = vmul.f32 %v2105_v4, %v2101_v0 }
 0x734   :  { %v2113_v13 = vadd.f32 %v2111_v6, %v2107_v11 }
 0x736   :  { %v2114_v14 = vpack.c.bf16 %v2113_v13, %v2112_v12 }
 0x738   :  { %2361 = vmatmul.mubr.bf16.vlgmr.msra.gmra.mxu0 %v2114_v14  ;;  %2404 = vmatmul.mubr.bf16.vlgmr.msra.gmra.mxu1 %v2114_v14 }
 0x739   :  { %13827 = vmatpush3.bf16.msra.mxu0 %v15877_v17  ;;  %13849 = vmatpush3.bf16.msra.mxu1 %v15878_v56 }
 0x73a   :  { %13828 = vmatprep.subr.bf16.mxu0 %v15879_v19  ;;  %13850 = vmatprep.subr.bf16.mxu1 %v15880_v20 }
 0x73d   :  { %13829 = vmatpush3.bf16.msra.mxu0 %v15881_v50  ;;  %13851 = vmatpush3.bf16.msra.mxu1 %v15882_v22 }
 0x73e   :  { %13830 = vmatprep.subr.bf16.mxu0 %v15883_v32  ;;  %13852 = vmatprep.subr.bf16.mxu1 %v15884_v23 }
 0x741   :  { %13831 = vmatpush3.bf16.msra.mxu0 %v15885_v24  ;;  %13853 = vmatpush3.bf16.msra.mxu1 %v15886_v25 }
 0x742   :  { %13832 = vmatprep.subr.bf16.mxu0 %v15887_v26  ;;  %13854 = vmatprep.subr.bf16.mxu1 %v15888_v27 }
 0x745   :  { %13833 = vmatpush3.bf16.msra.mxu0 %v15889_v28  ;;  %13855 = vmatpush3.bf16.msra.mxu1 %v15890_v29 }
 0x746   :  { %13834 = vmatprep.subr.bf16.mxu0 %v15891_v30  ;;  %13856 = vmatprep.subr.bf16.mxu1 %v15892_v31 }
 0x749   :  { %13835 = vmatpush3.bf16.msra.mxu0 %v15893_v33  ;;  %13857 = vmatpush3.bf16.msra.mxu1 %v15894_v35 }
 0x74a   :  { %13836 = vmatprep.subr.bf16.mxu0 %v15895_v37  ;;  %13858 = vmatprep.subr.bf16.mxu1 %v15896_v39 }
 0x74d   :  { %13837 = vmatpush3.bf16.msra.mxu0 %v15897_v40  ;;  %13859 = vmatpush3.bf16.msra.mxu1 %v15898_v41 }
 0x74e   :  { %13838 = vmatprep.subr.bf16.mxu0 %v15899_v42  ;;  %13860 = vmatprep.subr.bf16.mxu1 %v15900_v44 }
 0x751   :  { %13839 = vmatpush3.bf16.msra.mxu0 %v15901_v45  ;;  %13861 = vmatpush3.bf16.msra.mxu1 %v15902_v46 }
 0x752   :  { %13840 = vmatprep.subr.bf16.mxu0 %v15903_v47  ;;  %13862 = vmatprep.subr.bf16.mxu1 %v15904_v48 }
 0x755   :  { %13841 = vmatpush3.bf16.msra.mxu0 %v15905_v49  ;;  %13863 = vmatpush3.bf16.msra.mxu1 %v15906_v52 }
 0x756   :  { %14739 = vmatprep.subr.bf16.mxu0 %v16766_v2  ;;  %14759 = vmatprep.subr.bf16.mxu1 %v16766_v2 }
 0x7f8   :  { %v2362_v57 = vpop.f32.mrf.mxu0  ;;  %v2405_v3 = vpop.f32.mrf.mxu1 }
 0x7f9   :  { %v17648_v58 = vadd.f32 %v2362_v57, %v2151_v54  ;;  %v17650_v59 = vadd.f32 %v2405_v3, %v2159_v55 }
 0x7fa   :  { %v2364_v61 = vpop.f32.mrf.mxu0  ;;  %v2407_v62 = vpop.f32.mrf.mxu1 }
 0x7fb   :  { %v17653_v4 = vmul.f32 0.70710677, %v17648_v58  ;;  %v17656_v63 = vmul.f32 0.70710677, %v17650_v59  ;;  %v17658_v0 = vadd.f32 %v2364_v61, %v2155_v7  ;;  %v17660_v5 = vadd.f32 %v2407_v62, %v2163_v9 }
 0x7fc   :  { %v2366_v16 = vpop.f32.mrf.mxu0  ;;  %v2409_v23 = vpop.f32.mrf.mxu1 }
 0x7fd   :  { %v2422_v6 = vand.u32 2147483647, %v17653_v4  ;;  %v2424_v11 = vand.u32 2147483647, %v17656_v63  ;;  %v17665_v12 = vmul.f32 0.70710677, %v17658_v0  ;;  %v17675_v32 = vadd.f32 %v2366_v16, %v2151_v54 }
 0x7fe   :  { %v17668_v13 = vmul.f32 0.70710677, %v17660_v5  ;;  %v2368_v24 = vpop.f32.mrf.mxu0  ;;  %v17680_v28 = vadd.f32 %v2409_v23, %v2159_v55  ;;  %v2411_v40 = vpop.f32.mrf.mxu1  ;;  %vm2582_vm9 = vcmp.ge.f32.partialorder %v17653_v4, 0.0  ;;  %vm2584_vm12 = vcmp.ge.f32.partialorder %v17656_v63, 0.0 }
 0x7ff   :  { %v2430_v14 = vmul.f32 0.3275911, %v2422_v6  ;;  %v2432_v15 = vmul.f32 0.3275911, %v2424_v11  ;;  %v2423_v17 = vand.u32 2147483647, %v17665_v12  ;;  %v17682_v29 = vadd.f32 %v2368_v24, %v2155_v7 }
 0x800   :  { %v17672_v56 = vand.u32 2147483647, %v17668_v13  ;;  %v17678_v27 = vmul.f32 0.70710677, %v17675_v32  ;;  %v2534_v30 = vsub.f32 0.0, %v2422_v6  ;;  %v2536_v33 = vsub.f32 0.0, %v2424_v11 }
 0x801   :  { %v2438_v19 = vadd.f32 1.0, %v2430_v14  ;;  %v2440_v20 = vadd.f32 1.0, %v2432_v15  ;;  %v2431_v50 = vmul.f32 0.3275911, %v2423_v17  ;;  %v2535_v35 = vsub.f32 0.0, %v2423_v17 }
 0x802   :  { %v2433_v22 = vmul.f32 0.3275911, %v17672_v56  ;;  %v2426_v31 = vand.u32 2147483647, %v17678_v27  ;;  %v17686_v37 = vmul.f32 0.70710677, %v17680_v28  ;;  %v2542_v45 = vmul.f32 %v2534_v30, %v2422_v6 }
 0x803   :  { %16507 = vrcp.f32 %v2438_v19  ;;  %v2439_v25 = vadd.f32 1.0, %v2431_v50  ;;  %v17689_v39 = vmul.f32 0.70710677, %v17682_v29  ;;  %v17693_v47 = vadd.f32 %v2411_v40, %v2163_v9 }
 0x804   :  { %16509 = vrcp.f32 %v2440_v20  ;;  %v2441_v26 = vadd.f32 1.0, %v2433_v22  ;;  %v2434_v41 = vmul.f32 0.3275911, %v2426_v31  ;;  %v2428_v42 = vand.u32 2147483647, %v17686_v37 }
 0x805   :  { %16511 = vrcp.f32 %v2439_v25  ;;  %v2427_v44 = vand.u32 2147483647, %v17689_v39  ;;  %v2544_v48 = vmul.f32 %v2536_v33, %v2424_v11  ;;  %v2543_v49 = vmul.f32 %v2535_v35, %v2423_v17 }
 0x806   :  { %16513 = vrcp.f32 %v2441_v26  ;;  %v2442_v46 = vadd.f32 1.0, %v2434_v41  ;;  %v2436_v52 = vmul.f32 0.3275911, %v2428_v42  ;;  %v2537_v54 = vsub.f32 0.0, %v17672_v56 }
 0x807   :  { %v2435_v53 = vmul.f32 0.3275911, %v2427_v44  ;;  %v17697_v55 = vmul.f32 0.70710677, %v17693_v47  ;;  %v2550_v7 = vmul.f32 1.442695, %v2542_v45 }
 0x808   :  { %16515 = vrcp.f32 %v2442_v46  ;;  %v2444_v57 = vadd.f32 1.0, %v2436_v52  ;;  %v2554_v9 = vmul.f32 1.442695, %v2544_v48  ;;  %v2552_v6 = vmul.f32 1.442695, %v2543_v49 }
 0x809   :  { %v2443_v3 = vadd.f32 1.0, %v2435_v53  ;;  %v17700_v61 = vand.u32 2147483647, %v17697_v55  ;;  %v2538_v15 = vsub.f32 0.0, %v2426_v31  ;;  %v2540_v20 = vsub.f32 0.0, %v2428_v42 }
 0x80a   :  { %16517 = vrcp.f32 %v2444_v57  ;;  %v2539_v26 = vsub.f32 0.0, %v2427_v44  ;;  %v2545_v48 = vmul.f32 %v2537_v54, %v17672_v56  ;;  %vm2586_vm7 = vcmp.ge.f32.partialorder %v17678_v27, 0.0 }
 0x80b   :  { %16519 = vrcp.f32 %v2443_v3  ;;  %v2437_v16 = vmul.f32 0.3275911, %v17700_v61  ;;  %v2546_v35 = vmul.f32 %v2538_v15, %v2426_v31  ;;  %v2548_v31 = vmul.f32 %v2540_v20, %v2428_v42 }
 0x80c   :  { %v2556_v56 = vmul.f32 1.442695, %v2545_v48  ;;  %v2547_v54 = vmul.f32 %v2539_v26, %v2427_v44  ;;  %vm2583_vm8 = vcmp.ge.f32.partialorder %v17665_v12, 0.0  ;;  %vm2587_vm10 = vcmp.ge.f32.partialorder %v17689_v39, 0.0 }
 0x80d   :  { %v2445_v50 = vadd.f32 1.0, %v2437_v16  ;;  %v2562_v20 = vmul.f32 1.442695, %v2548_v31  ;;  %vm2588_vm11 = vcmp.ge.f32.partialorder %v17686_v37, 0.0  ;;  %vm2585_vm13 = vcmp.ge.f32.partialorder %v17668_v13, 0.0 }
 0x80e   :  { %vm2589_vm14 = vcmp.ge.f32.partialorder %v17697_v55, 0.0  ;;  %v2612_v63 = vmul.f32 0.5, %v17680_v28  ;;  %v2609_v13 = vmul.f32 0.5, %v17660_v5  ;;  %v17783_v28 = vsub.s32 5, %v16905_v34 }
 0x80f   :  { %16521 = vrcp.f32 %v2445_v50 }
 0x810   :  { %v17702_v62 = vpop.eup %16507  ;;  %16523 = vpow2.f32 %v2550_v7 }
 0x811   :  { %v17704_v11 = vpop.eup %16509  ;;  %v2462_v14 = vmul.f32 1.0614054, %v17702_v62  ;;  %16525 = vpow2.f32 %v2552_v6 }
 0x812   :  { %v2464_v17 = vmul.f32 1.0614054, %v17704_v11  ;;  %v17709_v22 = vpop.eup %16511  ;;  %16527 = vpow2.f32 %v2554_v9 }
 0x813   :  { %v2470_v19 = vadd.f32 -1.4531521, %v2462_v14  ;;  %v2463_v25 = vmul.f32 1.0614054, %v17709_v22  ;;  %v17713_v30 = vpop.eup %16513  ;;  %v2558_v14 = vmul.f32 1.442695, %v2546_v35 }
 0x814   :  { %v2472_v23 = vadd.f32 -1.4531521, %v2464_v17  ;;  %v2465_v45 = vmul.f32 1.0614054, %v17713_v30 }
 0x815   :  { %v2478_v24 = vmul.f32 %v17702_v62, %v2470_v19  ;;  %v2471_v41 = vadd.f32 -1.4531521, %v2463_v25  ;;  %v17720_v57 = vpop.eup %16515  ;;  %16529 = vpow2.f32 %v2558_v14 }
 0x816   :  { %v2480_v33 = vmul.f32 %v17704_v11, %v2472_v23  ;;  %v2473_v53 = vadd.f32 -1.4531521, %v2465_v45  ;;  %v2466_v19 = vmul.f32 1.0614054, %v17720_v57  ;;  %16531 = vpow2.f32 %v2556_v56 }
 0x817   :  { %v2486_v40 = vadd.f32 1.4214138, %v2478_v24  ;;  %v2479_v52 = vmul.f32 %v17709_v22, %v2471_v41  ;;  %v17725_v7 = vpop.eup %16517  ;;  %v2560_v45 = vmul.f32 1.442695, %v2547_v54  ;;  %16533 = vpow2.f32 %v2562_v20 }
 0x818   :  { %v2488_v46 = vadd.f32 1.4214138, %v2480_v33  ;;  %v2481_v17 = vmul.f32 %v17713_v30, %v2473_v53  ;;  %v2474_v25 = vadd.f32 -1.4531521, %v2466_v19  ;;  %v17729_v6 = vpop.eup %16519  ;;  %v2468_v42 = vmul.f32 1.0614054, %v17725_v7 }
 0x819   :  { %v2494_v49 = vmul.f32 %v17702_v62, %v2486_v40  ;;  %v2487_v16 = vadd.f32 1.4214138, %v2479_v52  ;;  %v2541_v33 = vsub.f32 0.0, %v17700_v61  ;;  %v2467_v41 = vmul.f32 1.0614054, %v17729_v6 }
 0x81a   :  { %v2496_v3 = vmul.f32 %v17704_v11, %v2488_v46  ;;  %v2489_v24 = vadd.f32 1.4214138, %v2481_v17  ;;  %v2482_v26 = vmul.f32 %v17720_v57, %v2474_v25  ;;  %v2476_v40 = vadd.f32 -1.4531521, %v2468_v42 }
 0x81b   :  { %v2502_v15 = vadd.f32 -0.28449672, %v2494_v49  ;;  %v2495_v23 = vmul.f32 %v17709_v22, %v2487_v16  ;;  %v2549_v31 = vmul.f32 %v2541_v33, %v17700_v61  ;;  %16535 = vpow2.f32 %v2560_v45 }
 0x81c   :  { %v2504_v35 = vadd.f32 -0.28449672, %v2496_v3  ;;  %v2497_v44 = vmul.f32 %v17713_v30, %v2489_v24  ;;  %v2490_v52 = vadd.f32 1.4214138, %v2482_v26  ;;  %v17737_v53 = vpop.eup %16521  ;;  %v2484_v14 = vmul.f32 %v17725_v7, %v2476_v40 }
 0x81d   :  { %v2510_v50 = vmul.f32 %v17702_v62, %v2502_v15  ;;  %v2503_v9 = vadd.f32 -0.28449672, %v2495_v23  ;;  %v2475_v3 = vadd.f32 -1.4531521, %v2467_v41  ;;  %v16524_v42 = vpop.eup %16523  ;;  %v2564_v40 = vmul.f32 1.442695, %v2549_v31 }
 0x81e   :  { %v2505_v49 = vadd.f32 -0.28449672, %v2497_v44  ;;  %v2512_v15 = vmul.f32 %v17704_v11, %v2504_v35  ;;  %v2498_v19 = vmul.f32 %v17720_v57, %v2490_v52  ;;  %v2492_v56 = vadd.f32 1.4214138, %v2484_v14  ;;  %v16526_v35 = vpop.eup %16525 }
 0x81f   :  { %v2518_v46 = vadd.f32 0.2548296, %v2510_v50  ;;  %v2511_v48 = vmul.f32 %v17709_v22, %v2503_v9  ;;  %v2483_v54 = vmul.f32 %v17729_v6, %v2475_v3  ;;  %v2469_v50 = vmul.f32 1.0614054, %v17737_v53 }
 0x820   :  { %v2513_v17 = vmul.f32 %v17713_v30, %v2505_v49  ;;  %v2506_v25 = vadd.f32 -0.28449672, %v2498_v19  ;;  %v2500_v61 = vmul.f32 %v17725_v7, %v2492_v56  ;;  %v2520_v9 = vadd.f32 0.2548296, %v2512_v15 }
 0x821   :  { %v2519_v16 = vadd.f32 0.2548296, %v2511_v48  ;;  %v2526_v23 = vmul.f32 %v17702_v62, %v2518_v46  ;;  %v2491_v20 = vadd.f32 1.4214138, %v2483_v54  ;;  %v2477_v33 = vadd.f32 -1.4531521, %v2469_v50  ;;  %v16528_v46 = vpop.eup %16527 }
 0x822   :  { %v2521_v44 = vadd.f32 0.2548296, %v2513_v17  ;;  %v2514_v26 = vmul.f32 %v17720_v57, %v2506_v25  ;;  %v2508_v45 = vadd.f32 -0.28449672, %v2500_v61  ;;  %v16530_v3 = vpop.eup %16529  ;;  %16537 = vpow2.f32 %v2564_v40 }
 0x823   :  { %v2527_v24 = vmul.f32 %v17709_v22, %v2519_v16  ;;  %v2499_v48 = vmul.f32 %v17729_v6, %v2491_v20  ;;  %v2485_v62 = vmul.f32 %v17737_v53, %v2477_v33  ;;  %v2566_v22 = vmul.f32 %v16524_v42, %v2526_v23  ;;  %v16532_v50 = vpop.eup %16531 }
 0x824   :  { %v2522_v49 = vadd.f32 0.2548296, %v2514_v26  ;;  %v2516_v52 = vmul.f32 %v17725_v7, %v2508_v45  ;;  %v2528_v16 = vmul.f32 %v17704_v11, %v2520_v9  ;;  %v2529_v15 = vmul.f32 %v17713_v30, %v2521_v44  ;;  %v16534_v20 = vpop.eup %16533 }
 0x825   :  { %v2567_v41 = vmul.f32 %v16526_v35, %v2527_v24  ;;  %v2507_v14 = vadd.f32 -0.28449672, %v2499_v48  ;;  %v2493_v54 = vadd.f32 1.4214138, %v2485_v62  ;;  %v2574_v24 = vsub.f32 1.0, %v2566_v22 }
 0x826   :  { %v2530_v17 = vmul.f32 %v17720_v57, %v2522_v49  ;;  %v2524_v19 = vadd.f32 0.2548296, %v2516_v52  ;;  %v2569_v11 = vmul.f32 %v16532_v50, %v2529_v15  ;;  %v2568_v30 = vmul.f32 %v16528_v46, %v2528_v16 }
 0x827   :  { %v2575_v31 = vsub.f32 1.0, %v2567_v41  ;;  %v2515_v56 = vmul.f32 %v17729_v6, %v2507_v14  ;;  %v2501_v61 = vmul.f32 %v17737_v53, %v2493_v54  ;;  %v2590_v26 = vsub.f32 0.0, %v2574_v24 }
 0x828   :  { %v2570_v23 = vmul.f32 %v16530_v3, %v2530_v17  ;;  %v2532_v25 = vmul.f32 %v17725_v7, %v2524_v19  ;;  %v16536_v44 = vpop.eup %16535  ;;  %v2577_v7 = vsub.f32 1.0, %v2569_v11  ;;  %v2576_v46 = vsub.f32 1.0, %v2568_v30 }
 0x829   :  { %v2523_v42 = vadd.f32 0.2548296, %v2515_v56  ;;  %v2591_v35 = vsub.f32 0.0, %v2575_v31  ;;  %v2509_v41 = vadd.f32 -0.28449672, %v2501_v61  ;;  %v2606_v14 = vmul.f32 0.5, %v17648_v58 }
 0x82a   :  { %v2578_v33 = vsub.f32 1.0, %v2570_v23  ;;  %v2572_v57 = vmul.f32 %v16534_v20, %v2532_v25  ;;  %v2607_v16 = vmul.f32 0.5, %v17658_v0  ;;  %v2593_v12 = vsub.f32 0.0, %v2577_v7 }
 0x82b   :  { %v2531_v9 = vmul.f32 %v17729_v6, %v2523_v42  ;;  %v2517_v22 = vmul.f32 %v17737_v53, %v2509_v41  ;;  %v2599_v49 = vsel %vm2583_vm8, %v2575_v31, %v2591_v35  ;;  %v2598_v6 = vsel %vm2582_vm9, %v2574_v24, %v2590_v26 }
 0x82c   :  { %v2594_v40 = vsub.f32 0.0, %v2578_v33  ;;  %v2580_v45 = vsub.f32 1.0, %v2572_v57  ;;  %v2615_v19 = vadd.f32 1.0, %v2599_v49  ;;  %v2614_v4 = vadd.f32 1.0, %v2598_v6 }
 0x82d   :  { %v2571_v48 = vmul.f32 %v16536_v44, %v2531_v9  ;;  %v2525_v3 = vadd.f32 0.2548296, %v2517_v22  ;;  %v2592_v50 = vsub.f32 0.0, %v2576_v46  ;;  %v2610_v31 = vmul.f32 0.5, %v17675_v32 }
 0x82e   :  { %v2602_v62 = vsel %vm2586_vm7, %v2578_v33, %v2594_v40  ;;  %v2596_v15 = vsub.f32 0.0, %v2580_v45  ;;  %v2611_v58 = vmul.f32 0.5, %v17682_v29  ;;  %v2623_v42 = vmul.f32 %v2615_v19, %v2607_v16 }
 0x82f   :  { %v2579_v52 = vsub.f32 1.0, %v2571_v48  ;;  %v2618_v27 = vadd.f32 1.0, %v2602_v62  ;;  %v2533_v56 = vmul.f32 %v17737_v53, %v2525_v3  ;;  %v16538_v54 = vpop.eup %16537  ;;  %v2601_v53 = vsel %vm2585_vm13, %v2577_v7, %v2593_v12 }
 0x830   :  { %v2604_v39 = vsel %vm2588_vm11, %v2580_v45, %v2596_v15  ;;  %v2622_v11 = vmul.f32 %v2614_v4, %v2606_v14  ;;  %v2600_v33 = vsel %vm2584_vm12, %v2576_v46, %v2592_v50  ;;  %v2617_v37 = vadd.f32 1.0, %v2601_v53  ;;  %v15907_v50 = vld [vmem:[%s20601_s1 + $0x338] sm:$0xff]   ;;  %v15910_v53 = vld [vmem:[%s20601_s1 + $0x370] sm:$0xff]  }
 0x831   :  { %v2595_v17 = vsub.f32 0.0, %v2579_v52  ;;  %v2573_v23 = vmul.f32 %v16538_v54, %v2533_v56  ;;  %v2626_v25 = vmul.f32 %v2618_v27, %v2610_v31  ;;  %v2620_v32 = vadd.f32 1.0, %v2604_v39  ;;  %v15908_v31 = vld [vmem:[%s20601_s1 + $0x378] sm:$0xff]  }
 0x832   :  { %v2616_v29 = vadd.f32 1.0, %v2600_v33  ;;  %v2613_v44 = vmul.f32 0.5, %v17693_v47  ;;  %v2608_v40 = vmul.f32 0.5, %v17650_v59  ;;  %v2625_v45 = vmul.f32 %v2617_v37, %v2609_v13  ;;  %v16762_v59 = vld [vmem:[%s20602_s5] sm:$0x3f]  ;;  %v15918_v37 = vld [vmem:[%s20601_s1 + $0x350] sm:$0xff]  }
 0x833   :  { %v2603_v24 = vsel %vm2587_vm10, %v2579_v52, %v2595_v17  ;;  %v2581_v20 = vsub.f32 1.0, %v2573_v23  ;;  %v2630_v57 = vpack.c.bf16 %v2626_v25, %v2622_v11  ;;  %v2628_v41 = vmul.f32 %v2620_v32, %v2612_v63  ;;  %v15913_v11 = vld [vmem:[%s20601_s1 + $0x320] sm:$0xff]   ;;  %v15915_v32 = vld [vmem:[%s20601_s1 + $0x318] sm:$0xff]  }
 0x834   :  { %v2619_v0 = vadd.f32 1.0, %v2603_v24  ;;  %v2624_v55 = vmul.f32 %v2616_v29, %v2608_v40  ;;  %v2701_v22 = vrot.slane %v16762_v59, %v17783_v28  ;;  %v15914_v33 = vld [vmem:[%s20601_s1 + $0x360] sm:$0xff]   ;;  %v15920_v29 = vld [vmem:[%s20601_s1 + $0x348] sm:$0xff]  }
 0x835   :  { %v2597_v30 = vsub.f32 0.0, %v2581_v20  ;;  %v15921_v63 = vld [vmem:[%s20601_s1 + $0x300] sm:$0xff]  }
 0x836   :  { %v2627_v61 = vmul.f32 %v2619_v0, %v2611_v58  ;;  %v2632_v62 = vpack.c.bf16 %v2628_v41, %v2624_v55 }
 0x837   :  { %v2605_v9 = vsel %vm2589_vm14, %v2581_v20, %v2597_v30  ;;  %v15912_v20 = vld [vmem:[%s20601_s1 + $0x368] sm:$0xff]   ;;  %v15916_v30 = vld [vmem:[%s20601_s1 + $0x358] sm:$0xff]  }
 0x838   :  { %v2631_v35 = vpack.c.bf16 %v2627_v61, %v2623_v42  ;;  %v2621_v26 = vadd.f32 1.0, %v2605_v9  ;;  %v15909_v42 = vld [vmem:[%s20601_s1 + $0x330] sm:$0xff]   ;;  %v15911_v61 = vld [vmem:[%s20601_s1 + $0x328] sm:$0xff]   ;;  %v15922_v9 = vld [vmem:[%s20601_s1 + $0x340] sm:$0xff]  }
 0x83a   :  { %2926 = vmatprep.mubr.bf16.mxu0 %v2631_v35  ;;  %v2629_v48 = vmul.f32 %v2621_v26, %v2613_v44  ;;  %v15917_v35 = vld [vmem:[%s20601_s1 + $0x310] sm:$0xff]  }
 0x83b   :  { %2927 = vmatmul.mubr.bf16.vlgmr.msra.gmra.mxu0 %v2630_v57  ;;  %v15919_v57 = vld [vmem:[%s20601_s1 + $0x308] sm:$0xff]  }
 0x83c   :  { %14755 = vmatprep.mubr.msk.bf16.mxu0 %vm16767_vm0, %v16766_v2  ;;  %v2633_v7 = vpack.c.bf16 %v2629_v48, %v2625_v45  ;;  %14740 = vmatpush3.bf16.msra.mxu0 %v15907_v50  ;;  %v12224_v48 = vld [vmem:[%s20602_s5 + $0x8] sm:$0x3f]  ;;  %v15933_v50 = vld [vmem:[%s20601_s1 + $0x390] sm:$0xff]  }
 0x83d   :  { %14741 = vmatprep.subr.bf16.mxu0 %v16766_v2 }
 0x83e   :  { %2967 = vmatprep.mubr.bf16.mxu1 %v2633_v7  ;;  %v3007_v7 = vrot.slane %v12224_v48, %v16911_v36 }
 0x83f   :  { %2968 = vmatmul.mubr.bf16.vlgmr.msra.gmra.mxu1 %v2632_v62 }
 0x840   :  { %14775 = vmatprep.mubr.msk.bf16.mxu1 %vm16767_vm0, %v16766_v2  ;;  %14760 = vmatpush3.bf16.msra.mxu1 %v15908_v31  ;;  %v15934_v31 = vld [vmem:[%s20601_s1 + $0x3d0] sm:$0xff]  }
 0x841   :  { %14761 = vmatprep.subr.bf16.mxu1 %v16766_v2  ;;  %14742 = vmatpush3.bf16.msra.mxu0 %v15909_v42  ;;  %v15943_v42 = vld [vmem:[%s20601_s1 + $0x428] sm:$0xff]  }
 0x842   :  { %14743 = vmatprep.subr.bf16.mxu0 %v16766_v2 }
 0x844   :  { %14762 = vmatpush3.bf16.msra.mxu1 %v15910_v53  ;;  %v15944_v53 = vld [vmem:[%s20601_s1 + $0x468] sm:$0xff]  }
 0x845   :  { %14763 = vmatprep.subr.bf16.mxu1 %v16766_v2  ;;  %14744 = vmatpush3.bf16.msra.mxu0 %v15911_v61  ;;  %v15945_v61 = vld [vmem:[%s20601_s1 + $0x420] sm:$0xff]  }
 0x846   :  { %14745 = vmatprep.subr.bf16.mxu0 %v16766_v2 }
 0x848   :  { %14764 = vmatpush3.bf16.msra.mxu1 %v15912_v20  ;;  %v15946_v20 = vld [vmem:[%s20601_s1 + $0x460] sm:$0xff]  }
 0x849   :  { %14765 = vmatprep.subr.bf16.mxu1 %v16766_v2  ;;  %14746 = vmatpush3.bf16.msra.mxu0 %v15913_v11  ;;  %v15947_v11 = vld [vmem:[%s20601_s1 + $0x418] sm:$0xff]  }
 0x84a   :  { %14747 = vmatprep.subr.bf16.mxu0 %v16766_v2 }
 0x84c   :  { %14766 = vmatpush3.bf16.msra.mxu1 %v15914_v33  ;;  %v15948_v33 = vld [vmem:[%s20601_s1 + $0x458] sm:$0xff]  }
 0x84d   :  { %14767 = vmatprep.subr.bf16.mxu1 %v16766_v2  ;;  %14748 = vmatpush3.bf16.msra.mxu0 %v15915_v32  ;;  %v15949_v32 = vld [vmem:[%s20601_s1 + $0x410] sm:$0xff]  }
 0x84e   :  { %14749 = vmatprep.subr.bf16.mxu0 %v16766_v2 }
 0x850   :  { %14768 = vmatpush3.bf16.msra.mxu1 %v15916_v30  ;;  %v15950_v30 = vld [vmem:[%s20601_s1 + $0x450] sm:$0xff]  }
 0x851   :  { %14769 = vmatprep.subr.bf16.mxu1 %v16766_v2  ;;  %14750 = vmatpush3.bf16.msra.mxu0 %v15917_v35  ;;  %v15951_v35 = vld [vmem:[%s20601_s1 + $0x408] sm:$0xff]  }
 0x852   :  { %14751 = vmatprep.subr.bf16.mxu0 %v16766_v2 }
 0x854   :  { %14770 = vmatpush3.bf16.msra.mxu1 %v15918_v37  ;;  %v15952_v37 = vld [vmem:[%s20601_s1 + $0x448] sm:$0xff]  }
 0x855   :  { %14771 = vmatprep.subr.bf16.mxu1 %v16766_v2  ;;  %14752 = vmatpush3.bf16.msra.mxu0 %v15919_v57  ;;  %v15953_v57 = vld [vmem:[%s20601_s1 + $0x400] sm:$0xff]  }
 0x856   :  { %14753 = vmatprep.subr.bf16.mxu0 %v16766_v2 }
 0x858   :  { %14772 = vmatpush3.bf16.msra.mxu1 %v15920_v29  ;;  %v15954_v29 = vld [vmem:[%s20601_s1 + $0x440] sm:$0xff]  }
 0x859   :  { %14773 = vmatprep.subr.bf16.mxu1 %v16766_v2  ;;  %14754 = vmatpush3.bf16.msra.mxu0 %v15921_v63  ;;  %v15955_v63 = vld [vmem:[%s20601_s1 + $0x4b8] sm:$0xff]  }
 0x85a   :  { %14779 = vmatprep.subr.bf16.mxu0 %v16766_v2 }
 0x85c   :  { %14774 = vmatpush3.bf16.msra.mxu1 %v15922_v9  ;;  %v15956_v9 = vld [vmem:[%s20601_s1 + $0x4f8] sm:$0xff]  }
 0x85d   :  { %14799 = vmatprep.subr.bf16.mxu1 %v16766_v2 }
 0x8fb   :  { %v13842_v5 = vpop.f32.mrf.mxu0 }
 0x8fd   :  { %v13843_v47 = vpop.f32.mrf.mxu0 }
 0x8fe   :  { %v13844_v46 = vadd.f32 %v13843_v47, %v13842_v5  ;;  %v3013_v47 = vrot.slane %v12224_v48, %v16914_v38  ;;  %v15963_v48 = vld [vmem:[%s20601_s1 + $0x498] sm:$0xff]  }
 0x8ff   :  { %v13845_v49 = vpop.f32.mrf.mxu0  ;;  %v13864_v6 = vpop.f32.mrf.mxu1 }
 0x900   :  { %v2929_v14 = vadd.f32 %v13844_v46, %v2701_v22 }
 0x901   :  { %v13846_v52 = vpop.f32.mrf.mxu0  ;;  %v13865_v16 = vpop.f32.mrf.mxu1 }
 0x902   :  { %v13847_v3 = vadd.f32 %v13846_v52, %v13845_v49  ;;  %v13866_v27 = vadd.f32 %v13865_v16, %v13864_v6  ;;  %v15923_v6 = vld [vmem:[%s20601_s1 + $0x3b8] sm:$0xff]   ;;  %v15925_v16 = vld [vmem:[%s20601_s1 + $0x3b0] sm:$0xff]  }
 0x903   :  { %v13867_v15 = vpop.f32.mrf.mxu1 }
 0x904   :  { %v2970_v17 = vadd.f32 %v13866_v27, %v2929_v14  ;;  %v2932_v19 = vadd.f32 %v13847_v3, %v2701_v22  ;;  %v15924_v14 = vld [vmem:[%s20601_s1 + $0x3f8] sm:$0xff]   ;;  %v15926_v27 = vld [vmem:[%s20601_s1 + $0x3f0] sm:$0xff]  }
 0x905   :  { %v13868_v34 = vpop.f32.mrf.mxu1 }
 0x906   :  { %v13869_v12 = vadd.f32 %v13868_v34, %v13867_v15  ;;  %v17790_v56 = vadd.f32 %v2970_v17, %v17414_v8  ;;  %v15927_v15 = vld [vmem:[%s20601_s1 + $0x3a8] sm:$0xff]   ;;  %v15930_v34 = vld [vmem:[%s20601_s1 + $0x3e0] sm:$0xff]  }
 0x907   :  { %v15928_v17 = vld [vmem:[%s20601_s1 + $0x3e8] sm:$0xff]  }
 0x908   :  { %v2973_v54 = vadd.f32 %v13869_v12, %v2932_v19  ;;  %2982 = vadd.xlane.f32.xlu0 %v17790_v56  ;;  %v15929_v19 = vld [vmem:[%s20601_s1 + $0x3a0] sm:$0xff]   ;;  %v15931_v12 = vld [vmem:[%s20601_s1 + $0x398] sm:$0xff]  }
 0x90a   :  { %v17794_v4 = vadd.f32 %v2973_v54, %v17420_v1  ;;  %v15932_v54 = vld [vmem:[%s20601_s1 + $0x3d8] sm:$0xff]  }
 0x90c   :  { %2984 = vadd.xlane.f32.xlu1 %v17794_v4 }
 0x991   :  { %v2983_v8 = vpop.xlane.xlu0 %2982 }
 0x992   :  { %v2986_v24 = vmul.f32 0.0078125, %v2983_v8  ;;  %v15935_v8 = vld [vmem:[%s20601_s1 + $0x388] sm:$0xff]  }
 0x994   :  { %v2988_v1 = vsub.f32 %v17790_v56, %v2986_v24  ;;  %v15936_v24 = vld [vmem:[%s20601_s1 + $0x3c8] sm:$0xff]  }
 0x995   :  { %v2985_v58 = vpop.xlane.xlu1 %2984 }
 0x996   :  { %v2987_v0 = vmul.f32 0.0078125, %v2985_v58  ;;  %v2990_v23 = vmul.f32 %v2988_v1, %v2988_v1  ;;  %v15938_v58 = vld [vmem:[%s20601_s1 + $0x3c0] sm:$0xff]  }
 0x998   :  { %v2989_v25 = vsub.f32 %v17794_v4, %v2987_v0  ;;  %2992 = vadd.xlane.f32.xlu0 %v2990_v23  ;;  %v15939_v0 = vld [vmem:[%s20601_s1 + $0x438] sm:$0xff]  }
 0x999   :  { %v15940_v23 = vld [vmem:[%s20601_s1 + $0x478] sm:$0xff]  }
 0x99a   :  { %v2991_v39 = vmul.f32 %v2989_v25, %v2989_v25 }
 0x99c   :  { %2994 = vadd.xlane.f32.xlu1 %v2991_v39  ;;  %v15942_v39 = vld [vmem:[%s20601_s1 + $0x470] sm:$0xff]  }
 0xa21   :  { %v2993_v13 = vpop.xlane.xlu0 %2992 }
 0xa22   :  { %v2996_v44 = vmul.f32 0.0078125, %v2993_v13  ;;  %v15957_v13 = vld [vmem:[%s20601_s1 + $0x4b0] sm:$0xff]  }
 0xa24   :  { %v2998_v26 = vadd.f32 1e-05, %v2996_v44  ;;  %v15958_v44 = vld [vmem:[%s20601_s1 + $0x4f0] sm:$0xff]  }
 0xa25   :  { %v2995_v40 = vpop.xlane.xlu1 %2994 }
 0xa26   :  { %16539 = vrsqrt.f32 %v2998_v26  ;;  %v2997_v41 = vmul.f32 0.0078125, %v2995_v40  ;;  %v15959_v26 = vld [vmem:[%s20601_s1 + $0x4a8] sm:$0xff]  }
 0xa27   :  { %v15960_v40 = vld [vmem:[%s20601_s1 + $0x4e8] sm:$0xff]  }
 0xa28   :  { %v2999_v45 = vadd.f32 1e-05, %v2997_v41  ;;  %v15961_v41 = vld [vmem:[%s20601_s1 + $0x4a0] sm:$0xff]  }
 0xa2a   :  { %16541 = vrsqrt.f32 %v2999_v45  ;;  %v15962_v45 = vld [vmem:[%s20601_s1 + $0x4e0] sm:$0xff]  }
 0xa33   :  { %v16540_v55 = vpop.eup %16539 }
 0xa34   :  { %v3002_v62 = vmul.f32 %v16540_v55, %v2988_v1  ;;  %v15937_v1 = vld [vmem:[%s20601_s1 + $0x380] sm:$0xff]   ;;  %v15964_v55 = vld [vmem:[%s20601_s1 + $0x4d8] sm:$0xff]  }
 0xa36   :  { %v3008_v59 = vmul.f32 %v3007_v7, %v3002_v62  ;;  %v15966_v62 = vld [vmem:[%s20601_s1 + $0x4d0] sm:$0xff]  }
 0xa37   :  { %v16542_v5 = vpop.eup %16541 }
 0xa38   :  { %v3003_v22 = vmul.f32 %v16542_v5, %v2989_v25  ;;  %v3014_v49 = vadd.f32 %v3013_v47, %v3008_v59  ;;  %v15941_v25 = vld [vmem:[%s20601_s1 + $0x430] sm:$0xff]   ;;  %v15967_v5 = vld [vmem:[%s20601_s1 + $0x488] sm:$0xff]   ;;  %v15969_v59 = vld [vmem:[%s20601_s1 + $0x480] sm:$0xff]  }
 0xa3a   :  { %v3009_v46 = vmul.f32 %v3007_v7, %v3003_v22  ;;  %v15965_v7 = vld [vmem:[%s20601_s1 + $0x490] sm:$0xff]   ;;  %v15970_v22 = vld [vmem:[%s20601_s1 + $0x4c0] sm:$0xff]  }
 0xa3c   :  { %v3015_v52 = vadd.f32 %v3013_v47, %v3009_v46  ;;  %v15968_v47 = vld [vmem:[%s20601_s1 + $0x4c8] sm:$0xff]   ;;  %v15971_v46 = vld [vmem:[%s20601_s1 + $0x538] sm:$0xff]  }
 0xa3e   :  { %v17874_v3 = vpack.c.bf16 %v3015_v52, %v3014_v49  ;;  %v15972_v49 = vld [vmem:[%s20601_s1 + $0x578] sm:$0xff]   ;;  %v15973_v52 = vld [vmem:[%s20601_s1 + $0x530] sm:$0xff]  }
 0xa40   :  { %14756 = vmatmul.mubr.bf16.vlgmr.msra.gmra.mxu0 %v17874_v3  ;;  %14776 = vmatmul.mubr.bf16.vlgmr.msra.gmra.mxu1 %v17874_v3 }
 0xa41   :  { %14780 = vmatpush3.bf16.msra.mxu0 %v15923_v6  ;;  %14800 = vmatpush3.bf16.msra.mxu1 %v15924_v14  ;;  %v15974_v6 = vld [vmem:[%s20601_s1 + $0x570] sm:$0xff]   ;;  %v15975_v14 = vld [vmem:[%s20601_s1 + $0x528] sm:$0xff]  }
 0xa42   :  { %14781 = vmatprep.subr.bf16.mxu0 %v16766_v2  ;;  %14801 = vmatprep.subr.bf16.mxu1 %v16766_v2 }
 0xa43   :  { %14795 = vmatprep.mubr.msk.bf16.mxu0 %vm16767_vm0, %v16766_v2  ;;  %14815 = vmatprep.mubr.msk.bf16.mxu1 %vm16767_vm0, %v16766_v2 }
 0xa45   :  { %14782 = vmatpush3.bf16.msra.mxu0 %v15925_v16  ;;  %14802 = vmatpush3.bf16.msra.mxu1 %v15926_v27  ;;  %v15976_v16 = vld [vmem:[%s20601_s1 + $0x568] sm:$0xff]   ;;  %v15977_v27 = vld [vmem:[%s20601_s1 + $0x520] sm:$0xff]  }
 0xa46   :  { %14783 = vmatprep.subr.bf16.mxu0 %v16766_v2  ;;  %14803 = vmatprep.subr.bf16.mxu1 %v16766_v2 }
 0xa49   :  { %14784 = vmatpush3.bf16.msra.mxu0 %v15927_v15  ;;  %14804 = vmatpush3.bf16.msra.mxu1 %v15928_v17  ;;  %v15978_v15 = vld [vmem:[%s20601_s1 + $0x560] sm:$0xff]   ;;  %v15979_v17 = vld [vmem:[%s20601_s1 + $0x518] sm:$0xff]  }
 0xa4a   :  { %14785 = vmatprep.subr.bf16.mxu0 %v16766_v2  ;;  %14805 = vmatprep.subr.bf16.mxu1 %v16766_v2 }
 0xa4d   :  { %14786 = vmatpush3.bf16.msra.mxu0 %v15929_v19  ;;  %14806 = vmatpush3.bf16.msra.mxu1 %v15930_v34  ;;  %v15980_v19 = vld [vmem:[%s20601_s1 + $0x558] sm:$0xff]   ;;  %v15981_v34 = vld [vmem:[%s20601_s1 + $0x510] sm:$0xff]  }
 0xa4e   :  { %14787 = vmatprep.subr.bf16.mxu0 %v16766_v2  ;;  %14807 = vmatprep.subr.bf16.mxu1 %v16766_v2 }
 0xa51   :  { %14788 = vmatpush3.bf16.msra.mxu0 %v15931_v12  ;;  %14808 = vmatpush3.bf16.msra.mxu1 %v15932_v54  ;;  %v15982_v12 = vld [vmem:[%s20601_s1 + $0x550] sm:$0xff]   ;;  %v15983_v54 = vld [vmem:[%s20601_s1 + $0x508] sm:$0xff]  }
 0xa52   :  { %14789 = vmatprep.subr.bf16.mxu0 %v16766_v2  ;;  %14809 = vmatprep.subr.bf16.mxu1 %v16766_v2 }
 0xa55   :  { %14790 = vmatpush3.bf16.msra.mxu0 %v15933_v50  ;;  %14810 = vmatpush3.bf16.msra.mxu1 %v15934_v31  ;;  %v15984_v50 = vld [vmem:[%s20601_s1 + $0x548] sm:$0xff]   ;;  %v15985_v31 = vld [vmem:[%s20601_s1 + $0x500] sm:$0xff]  }
 0xa56   :  { %14791 = vmatprep.subr.bf16.mxu0 %v16766_v2  ;;  %14811 = vmatprep.subr.bf16.mxu1 %v16766_v2 }
 0xa59   :  { %14792 = vmatpush3.bf16.msra.mxu0 %v15935_v8  ;;  %14812 = vmatpush3.bf16.msra.mxu1 %v15936_v24  ;;  %v15986_v8 = vld [vmem:[%s20601_s1 + $0x540] sm:$0xff]   ;;  %v15987_v24 = vld [vmem:[%s20601_s1 + $0x5b8] sm:$0xff]  }
 0xa5a   :  { %14793 = vmatprep.subr.bf16.mxu0 %v16766_v2  ;;  %14813 = vmatprep.subr.bf16.mxu1 %v16766_v2 }
 0xa5d   :  { %14794 = vmatpush3.bf16.msra.mxu0 %v15937_v1  ;;  %14814 = vmatpush3.bf16.msra.mxu1 %v15938_v58  ;;  %v15988_v1 = vld [vmem:[%s20601_s1 + $0x5f8] sm:$0xff]   ;;  %v15989_v58 = vld [vmem:[%s20601_s1 + $0x5b0] sm:$0xff]  }
 0xa5e   :  { %14819 = vmatprep.subr.bf16.mxu0 %v16766_v2  ;;  %14839 = vmatprep.subr.bf16.mxu1 %v16766_v2 }
 0xa60   :  { %14796 = vmatmul.mubr.bf16.vlgmr.msra.gmra.mxu0 %v17874_v3  ;;  %14816 = vmatmul.mubr.bf16.vlgmr.msra.gmra.mxu1 %v17874_v3 }
 0xa61   :  { %14820 = vmatpush3.bf16.msra.mxu0 %v15939_v0  ;;  %14840 = vmatpush3.bf16.msra.mxu1 %v15940_v23  ;;  %v15990_v0 = vld [vmem:[%s20601_s1 + $0x5f0] sm:$0xff]   ;;  %v15991_v23 = vld [vmem:[%s20601_s1 + $0x5a8] sm:$0xff]  }
 0xa62   :  { %14821 = vmatprep.subr.bf16.mxu0 %v16766_v2  ;;  %14841 = vmatprep.subr.bf16.mxu1 %v16766_v2 }
 0xa63   :  { %14835 = vmatprep.mubr.msk.bf16.mxu0 %vm16767_vm0, %v16766_v2  ;;  %14855 = vmatprep.mubr.msk.bf16.mxu1 %vm16767_vm0, %v16766_v2 }
 0xa65   :  { %14822 = vmatpush3.bf16.msra.mxu0 %v15941_v25  ;;  %14842 = vmatpush3.bf16.msra.mxu1 %v15942_v39  ;;  %v15992_v25 = vld [vmem:[%s20601_s1 + $0x5e8] sm:$0xff]   ;;  %v15993_v39 = vld [vmem:[%s20601_s1 + $0x5a0] sm:$0xff]  }
 0xa66   :  { %14823 = vmatprep.subr.bf16.mxu0 %v16766_v2  ;;  %14843 = vmatprep.subr.bf16.mxu1 %v16766_v2 }
 0xa69   :  { %14824 = vmatpush3.bf16.msra.mxu0 %v15943_v42  ;;  %14844 = vmatpush3.bf16.msra.mxu1 %v15944_v53  ;;  %v15994_v42 = vld [vmem:[%s20601_s1 + $0x5e0] sm:$0xff]   ;;  %v15995_v53 = vld [vmem:[%s20601_s1 + $0x598] sm:$0xff]  }
 0xa6a   :  { %14825 = vmatprep.subr.bf16.mxu0 %v16766_v2  ;;  %14845 = vmatprep.subr.bf16.mxu1 %v16766_v2 }
 0xa6d   :  { %14826 = vmatpush3.bf16.msra.mxu0 %v15945_v61  ;;  %14846 = vmatpush3.bf16.msra.mxu1 %v15946_v20  ;;  %v15996_v61 = vld [vmem:[%s20601_s1 + $0x5d8] sm:$0xff]   ;;  %v15997_v20 = vld [vmem:[%s20601_s1 + $0x590] sm:$0xff]  }
 0xa6e   :  { %14827 = vmatprep.subr.bf16.mxu0 %v16766_v2  ;;  %14847 = vmatprep.subr.bf16.mxu1 %v16766_v2 }
 0xa71   :  { %14828 = vmatpush3.bf16.msra.mxu0 %v15947_v11  ;;  %14848 = vmatpush3.bf16.msra.mxu1 %v15948_v33  ;;  %v15998_v11 = vld [vmem:[%s20601_s1 + $0x5d0] sm:$0xff]   ;;  %v15999_v33 = vld [vmem:[%s20601_s1 + $0x588] sm:$0xff]  }
 0xa72   :  { %14829 = vmatprep.subr.bf16.mxu0 %v16766_v2  ;;  %14849 = vmatprep.subr.bf16.mxu1 %v16766_v2 }
 0xa75   :  { %14830 = vmatpush3.bf16.msra.mxu0 %v15949_v32  ;;  %14850 = vmatpush3.bf16.msra.mxu1 %v15950_v30  ;;  %v16000_v32 = vld [vmem:[%s20601_s1 + $0x5c8] sm:$0xff]   ;;  %v16001_v30 = vld [vmem:[%s20601_s1 + $0x580] sm:$0xff]  }
 0xa76   :  { %14831 = vmatprep.subr.bf16.mxu0 %v16766_v2  ;;  %14851 = vmatprep.subr.bf16.mxu1 %v16766_v2 }
 0xa79   :  { %14832 = vmatpush3.bf16.msra.mxu0 %v15951_v35  ;;  %14852 = vmatpush3.bf16.msra.mxu1 %v15952_v37  ;;  %v16002_v35 = vld [vmem:[%s20601_s1 + $0x5c0] sm:$0xff]  }
 0xa7a   :  { %14833 = vmatprep.subr.bf16.mxu0 %v16766_v2  ;;  %14853 = vmatprep.subr.bf16.mxu1 %v16766_v2 }
 0xa7d   :  { %14834 = vmatpush3.bf16.msra.mxu0 %v15953_v57  ;;  %14854 = vmatpush3.bf16.msra.mxu1 %v15954_v29 }
 0xa7e   :  { %14859 = vmatprep.subr.bf16.mxu0 %v16766_v2  ;;  %14879 = vmatprep.subr.bf16.mxu1 %v16766_v2 }
 0xa80   :  { %14836 = vmatmul.mubr.bf16.vlgmr.msra.gmra.mxu0 %v17874_v3  ;;  %14856 = vmatmul.mubr.bf16.vlgmr.msra.gmra.mxu1 %v17874_v3 }
 0xa81   :  { %14860 = vmatpush3.bf16.msra.mxu0 %v15955_v63  ;;  %14880 = vmatpush3.bf16.msra.mxu1 %v15956_v9 }
 0xa82   :  { %14861 = vmatprep.subr.bf16.mxu0 %v16766_v2  ;;  %14881 = vmatprep.subr.bf16.mxu1 %v16766_v2 }
 0xa83   :  { %14875 = vmatprep.mubr.msk.bf16.mxu0 %vm16767_vm0, %v16766_v2  ;;  %14895 = vmatprep.mubr.msk.bf16.mxu1 %vm16767_vm0, %v16766_v2 }
 0xa85   :  { %14862 = vmatpush3.bf16.msra.mxu0 %v15957_v13  ;;  %14882 = vmatpush3.bf16.msra.mxu1 %v15958_v44 }
 0xa86   :  { %14863 = vmatprep.subr.bf16.mxu0 %v16766_v2  ;;  %14883 = vmatprep.subr.bf16.mxu1 %v16766_v2 }
 0xa89   :  { %14864 = vmatpush3.bf16.msra.mxu0 %v15959_v26  ;;  %14884 = vmatpush3.bf16.msra.mxu1 %v15960_v40 }
 0xa8a   :  { %14865 = vmatprep.subr.bf16.mxu0 %v16766_v2  ;;  %14885 = vmatprep.subr.bf16.mxu1 %v16766_v2 }
 0xa8d   :  { %14866 = vmatpush3.bf16.msra.mxu0 %v15961_v41  ;;  %14886 = vmatpush3.bf16.msra.mxu1 %v15962_v45 }
 0xa8e   :  { %14867 = vmatprep.subr.bf16.mxu0 %v16766_v2  ;;  %14887 = vmatprep.subr.bf16.mxu1 %v16766_v2 }
 0xa91   :  { %14868 = vmatpush3.bf16.msra.mxu0 %v15963_v48  ;;  %14888 = vmatpush3.bf16.msra.mxu1 %v15964_v55 }
 0xa92   :  { %14869 = vmatprep.subr.bf16.mxu0 %v16766_v2  ;;  %14889 = vmatprep.subr.bf16.mxu1 %v16766_v2 }
 0xa95   :  { %14870 = vmatpush3.bf16.msra.mxu0 %v15965_v7  ;;  %14890 = vmatpush3.bf16.msra.mxu1 %v15966_v62 }
 0xa96   :  { %14871 = vmatprep.subr.bf16.mxu0 %v16766_v2  ;;  %14891 = vmatprep.subr.bf16.mxu1 %v16766_v2 }
 0xa99   :  { %14872 = vmatpush3.bf16.msra.mxu0 %v15967_v5  ;;  %14892 = vmatpush3.bf16.msra.mxu1 %v15968_v47 }
 0xa9a   :  { %14873 = vmatprep.subr.bf16.mxu0 %v16766_v2  ;;  %14893 = vmatprep.subr.bf16.mxu1 %v16766_v2 }
 0xa9d   :  { %14874 = vmatpush3.bf16.msra.mxu0 %v15969_v59  ;;  %14894 = vmatpush3.bf16.msra.mxu1 %v15970_v22 }
 0xa9e   :  { %14899 = vmatprep.subr.bf16.mxu0 %v16766_v2  ;;  %14919 = vmatprep.subr.bf16.mxu1 %v16766_v2 }
 0xaa0   :  { %14876 = vmatmul.mubr.bf16.vlgmr.msra.gmra.mxu0 %v17874_v3  ;;  %14896 = vmatmul.mubr.bf16.vlgmr.msra.gmra.mxu1 %v17874_v3 }
 0xaa1   :  { %14900 = vmatpush3.bf16.msra.mxu0 %v15971_v46  ;;  %14920 = vmatpush3.bf16.msra.mxu1 %v15972_v49 }
 0xaa2   :  { %14901 = vmatprep.subr.bf16.mxu0 %v16766_v2  ;;  %14921 = vmatprep.subr.bf16.mxu1 %v16766_v2 }
 0xaa3   :  { %14915 = vmatprep.mubr.msk.bf16.mxu0 %vm16767_vm0, %v16766_v2  ;;  %14935 = vmatprep.mubr.msk.bf16.mxu1 %vm16767_vm0, %v16766_v2 }
 0xaa5   :  { %14902 = vmatpush3.bf16.msra.mxu0 %v15973_v52  ;;  %14922 = vmatpush3.bf16.msra.mxu1 %v15974_v6 }
 0xaa6   :  { %14903 = vmatprep.subr.bf16.mxu0 %v16766_v2  ;;  %14923 = vmatprep.subr.bf16.mxu1 %v16766_v2 }
 0xaa9   :  { %14904 = vmatpush3.bf16.msra.mxu0 %v15975_v14  ;;  %14924 = vmatpush3.bf16.msra.mxu1 %v15976_v16 }
 0xaaa   :  { %14905 = vmatprep.subr.bf16.mxu0 %v16766_v2  ;;  %14925 = vmatprep.subr.bf16.mxu1 %v16766_v2 }
 0xaad   :  { %14906 = vmatpush3.bf16.msra.mxu0 %v15977_v27  ;;  %14926 = vmatpush3.bf16.msra.mxu1 %v15978_v15 }
 0xaae   :  { %14907 = vmatprep.subr.bf16.mxu0 %v16766_v2  ;;  %14927 = vmatprep.subr.bf16.mxu1 %v16766_v2 }
 0xab1   :  { %14908 = vmatpush3.bf16.msra.mxu0 %v15979_v17  ;;  %14928 = vmatpush3.bf16.msra.mxu1 %v15980_v19 }
 0xab2   :  { %14909 = vmatprep.subr.bf16.mxu0 %v16766_v2  ;;  %14929 = vmatprep.subr.bf16.mxu1 %v16766_v2 }
 0xab5   :  { %14910 = vmatpush3.bf16.msra.mxu0 %v15981_v34  ;;  %14930 = vmatpush3.bf16.msra.mxu1 %v15982_v12 }
 0xab6   :  { %14911 = vmatprep.subr.bf16.mxu0 %v16766_v2  ;;  %14931 = vmatprep.subr.bf16.mxu1 %v16766_v2 }
 0xab9   :  { %14912 = vmatpush3.bf16.msra.mxu0 %v15983_v54  ;;  %14932 = vmatpush3.bf16.msra.mxu1 %v15984_v50 }
 0xaba   :  { %14913 = vmatprep.subr.bf16.mxu0 %v16766_v2  ;;  %14933 = vmatprep.subr.bf16.mxu1 %v16766_v2 }
 0xabd   :  { %14914 = vmatpush3.bf16.msra.mxu0 %v15985_v31  ;;  %14934 = vmatpush3.bf16.msra.mxu1 %v15986_v8 }
 0xabe   :  { %14939 = vmatprep.subr.bf16.mxu0 %v16766_v2  ;;  %14959 = vmatprep.subr.bf16.mxu1 %v16766_v2 }
 0xac0   :  { %14916 = vmatmul.mubr.bf16.vlgmr.msra.gmra.mxu0 %v17874_v3  ;;  %14936 = vmatmul.mubr.bf16.vlgmr.msra.gmra.mxu1 %v17874_v3 }
 0xac1   :  { %14940 = vmatpush3.bf16.msra.mxu0 %v15987_v24  ;;  %14960 = vmatpush3.bf16.msra.mxu1 %v15988_v1 }
 0xac2   :  { %14941 = vmatprep.subr.bf16.mxu0 %v16766_v2  ;;  %14961 = vmatprep.subr.bf16.mxu1 %v16766_v2 }
 0xac3   :  { %14955 = vmatprep.mubr.msk.bf16.mxu0 %vm16767_vm0, %v16766_v2  ;;  %14975 = vmatprep.mubr.msk.bf16.mxu1 %vm16767_vm0, %v16766_v2 }
 0xac5   :  { %14942 = vmatpush3.bf16.msra.mxu0 %v15989_v58  ;;  %14962 = vmatpush3.bf16.msra.mxu1 %v15990_v0 }
 0xac6   :  { %14943 = vmatprep.subr.bf16.mxu0 %v16766_v2  ;;  %14963 = vmatprep.subr.bf16.mxu1 %v16766_v2 }
 0xac9   :  { %14944 = vmatpush3.bf16.msra.mxu0 %v15991_v23  ;;  %14964 = vmatpush3.bf16.msra.mxu1 %v15992_v25 }
 0xaca   :  { %14945 = vmatprep.subr.bf16.mxu0 %v16766_v2  ;;  %14965 = vmatprep.subr.bf16.mxu1 %v16766_v2 }
 0xacd   :  { %14946 = vmatpush3.bf16.msra.mxu0 %v15993_v39  ;;  %14966 = vmatpush3.bf16.msra.mxu1 %v15994_v42 }
 0xace   :  { %14947 = vmatprep.subr.bf16.mxu0 %v16766_v2  ;;  %14967 = vmatprep.subr.bf16.mxu1 %v16766_v2 }
 0xad1   :  { %14948 = vmatpush3.bf16.msra.mxu0 %v15995_v53  ;;  %14968 = vmatpush3.bf16.msra.mxu1 %v15996_v61 }
 0xad2   :  { %14949 = vmatprep.subr.bf16.mxu0 %v16766_v2  ;;  %14969 = vmatprep.subr.bf16.mxu1 %v16766_v2 }
 0xad5   :  { %14950 = vmatpush3.bf16.msra.mxu0 %v15997_v20  ;;  %14970 = vmatpush3.bf16.msra.mxu1 %v15998_v11 }
 0xad6   :  { %14951 = vmatprep.subr.bf16.mxu0 %v16766_v2  ;;  %14971 = vmatprep.subr.bf16.mxu1 %v16766_v2 }
 0xad9   :  { %14952 = vmatpush3.bf16.msra.mxu0 %v15999_v33  ;;  %14972 = vmatpush3.bf16.msra.mxu1 %v16000_v32 }
 0xada   :  { %14953 = vmatprep.subr.bf16.mxu0 %v16766_v2  ;;  %14973 = vmatprep.subr.bf16.mxu1 %v16766_v2 }
 0xadd   :  { %14954 = vmatpush3.bf16.msra.mxu0 %v16001_v30  ;;  %14974 = vmatpush3.bf16.msra.mxu1 %v16002_v35 }
 0xade   :  { %14979 = vmatprep.subr.bf16.mxu0 %v16766_v2  ;;  %14985 = vmatprep.subr.bf16.mxu1 %v16766_v2 }
 0xae0   :  { %14956 = vmatmul.mubr.bf16.vlgmr.msra.gmra.mxu0 %v17874_v3  ;;  %14976 = vmatmul.mubr.bf16.vlgmr.msra.gmra.mxu1 %v17874_v3 }
 0xae1   :  { %14981 = vmatprep.mubr.msk.bf16.mxu0 %vm16767_vm0, %v16766_v2  ;;  %14987 = vmatprep.mubr.msk.bf16.mxu1 %vm16767_vm0, %v16766_v2 }
 0xb00   :  { %v3164_v37 = vpop.f32.mrf.mxu0  ;;  %v3253_v57 = vpop.f32.mrf.mxu1 }
 0xb02   :  { %v14757_v29 = vpop.f32.mrf.mxu0  ;;  %v14777_v63 = vpop.f32.mrf.mxu1 }
 0xb04   :  { %v3167_v9 = vpop.f32.mrf.mxu0  ;;  %v3256_v13 = vpop.f32.mrf.mxu1 }
 0xb05   :  { %v4280_v44 = vpack.c.bf16 %v3167_v9, %v3164_v37  ;;  %v4281_v26 = vpack.c.bf16 %v3256_v13, %v3253_v57 }
 0xb06   :  { %v14758_v40 = vpop.f32.mrf.mxu0  ;;  %v14778_v41 = vpop.f32.mrf.mxu1 }
 0xb20   :  { %v3342_v45 = vpop.f32.mrf.mxu0  ;;  %v3431_v48 = vpop.f32.mrf.mxu1 }
 0xb22   :  { %v14797_v55 = vpop.f32.mrf.mxu0  ;;  %v14817_v3 = vpop.f32.mrf.mxu1 }
 0xb24   :  { %v3345_v7 = vpop.f32.mrf.mxu0  ;;  %v3434_v62 = vpop.f32.mrf.mxu1 }
 0xb25   :  { %v4282_v5 = vpack.c.bf16 %v3345_v7, %v3342_v45  ;;  %v4283_v47 = vpack.c.bf16 %v3434_v62, %v3431_v48 }
 0xb26   :  { %v14798_v59 = vpop.f32.mrf.mxu0  ;;  %v14818_v22 = vpop.f32.mrf.mxu1 }
 0xb40   :  { %v3585_v46 = vpop.f32.mrf.mxu0  ;;  %v3674_v49 = vpop.f32.mrf.mxu1 }
 0xb42   :  { %v14837_v52 = vpop.f32.mrf.mxu0  ;;  %v14857_v6 = vpop.f32.mrf.mxu1 }
 0xb44   :  { %v3588_v14 = vpop.f32.mrf.mxu0  ;;  %v3677_v16 = vpop.f32.mrf.mxu1 }
 0xb45   :  { %v4284_v27 = vpack.c.bf16 %v3588_v14, %v3585_v46  ;;  %v4285_v15 = vpack.c.bf16 %v3677_v16, %v3674_v49 }
 0xb46   :  { %v14838_v17 = vpop.f32.mrf.mxu0  ;;  %v14858_v19 = vpop.f32.mrf.mxu1 }
 0xb47   :  { %v4292_v34 = vsel %vm1360_vm1, %v4284_v27, 0  ;;  %v4339_v12 = vsel %vm1360_vm1, %v4285_v15, 0 }
 0xb48   :  { %14980 = vmatpush3.bf16.xpose.msra.mxu0 %v4292_v34  ;;  %14986 = vmatpush3.bf16.xpose.msra.mxu1 %v4339_v12 }
 0xb49   :  { %14991 = vmatprep.subr.bf16.mxu0 %v16766_v2  ;;  %14997 = vmatprep.subr.bf16.mxu1 %v16766_v2 }
 0xb4f   :  { %14982 = vmatmul.mubr.msk.bf16.vlgmr.msra.gmra.mxu0 %vm1360_vm1, %v4280_v44  ;;  %14988 = vmatmul.mubr.msk.bf16.vlgmr.msra.gmra.mxu1 %vm1360_vm1, %v4281_v26 }
 0xb50   :  { %14993 = vmatprep.mubr.msk.bf16.mxu0 %vm16767_vm0, %v16766_v2  ;;  %14999 = vmatprep.mubr.msk.bf16.mxu1 %vm16767_vm0, %v16766_v2 }
 0xb60   :  { %v3763_v54 = vpop.f32.mrf.mxu0  ;;  %v3852_v50 = vpop.f32.mrf.mxu1 }
 0xb62   :  { %v14877_v31 = vpop.f32.mrf.mxu0  ;;  %v14897_v8 = vpop.f32.mrf.mxu1 }
 0xb64   :  { %v3766_v24 = vpop.f32.mrf.mxu0  ;;  %v3855_v1 = vpop.f32.mrf.mxu1 }
 0xb65   :  { %v4286_v58 = vpack.c.bf16 %v3766_v24, %v3763_v54  ;;  %v4287_v0 = vpack.c.bf16 %v3855_v1, %v3852_v50 }
 0xb66   :  { %v14878_v23 = vpop.f32.mrf.mxu0  ;;  %v14898_v25 = vpop.f32.mrf.mxu1 }
 0xb67   :  { %v4386_v39 = vsel %vm1360_vm1, %v4286_v58, 0  ;;  %v4433_v42 = vsel %vm1360_vm1, %v4287_v0, 0 }
 0xb68   :  { %14992 = vmatpush3.bf16.xpose.msra.mxu0 %v4386_v39  ;;  %14998 = vmatpush3.bf16.xpose.msra.mxu1 %v4433_v42 }
 0xb69   :  { %15003 = vmatprep.subr.bf16.mxu0 %v16766_v2  ;;  %15009 = vmatprep.subr.bf16.mxu1 %v16766_v2 }
 0xb6f   :  { %14994 = vmatmul.mubr.msk.bf16.vlgmr.msra.gmra.mxu0 %vm1360_vm1, %v4282_v5  ;;  %15000 = vmatmul.mubr.msk.bf16.vlgmr.msra.gmra.mxu1 %vm1360_vm1, %v4283_v47 }
 0xb70   :  { %15005 = vmatprep.mubr.msk.bf16.mxu0 %vm16767_vm0, %v16766_v2  ;;  %15011 = vmatprep.mubr.msk.bf16.mxu1 %vm16767_vm0, %v16766_v2 }
 0xb80   :  { %v4006_v53 = vpop.f32.mrf.mxu0  ;;  %v4095_v61 = vpop.f32.mrf.mxu1 }
 0xb82   :  { %v14917_v20 = vpop.f32.mrf.mxu0  ;;  %v14937_v11 = vpop.f32.mrf.mxu1 }
 0xb84   :  { %v4009_v33 = vpop.f32.mrf.mxu0  ;;  %v4098_v32 = vpop.f32.mrf.mxu1 }
 0xb85   :  { %v4568_v30 = vpack.c.bf16 %v4009_v33, %v4006_v53  ;;  %v4569_v35 = vpack.c.bf16 %v4098_v32, %v4095_v61 }
 0xb86   :  { %v14918_v37 = vpop.f32.mrf.mxu0  ;;  %v14938_v57 = vpop.f32.mrf.mxu1 }
 0xb87   :  { %15004 = vmatpush3.bf16.msra.mxu0 %v4568_v30  ;;  %15010 = vmatpush3.bf16.msra.mxu1 %v4569_v35 }
 0xb88   :  { %15015 = vmatprep.subr.bf16.mxu0 %v16766_v2  ;;  %15021 = vmatprep.subr.bf16.mxu1 %v16766_v2 }
 0xba0   :  { %v18248_v29 = vpop.f32.mrf.mxu0  ;;  %v18250_v63 = vpop.f32.mrf.mxu1 }
 0xba2   :  { %v14957_v9 = vpop.f32.mrf.mxu0  ;;  %v14977_v13 = vpop.f32.mrf.mxu1 }
 0xba4   :  { %v18252_v44 = vpop.f32.mrf.mxu0  ;;  %v18254_v26 = vpop.f32.mrf.mxu1 }
 0xba5   :  { %v4570_v40 = vpack.c.bf16 %v18252_v44, %v18248_v29  ;;  %v4571_v41 = vpack.c.bf16 %v18254_v26, %v18250_v63 }
 0xba6   :  { %v14958_v45 = vpop.f32.mrf.mxu0  ;;  %v14978_v48 = vpop.f32.mrf.mxu1 }
 0xc0f   :  { %v4328_v55 = vpop.f32.mrf.mxu0  ;;  %v4375_v3 = vpop.f32.mrf.mxu1 }
 0xc10   :  { %v4329_v7 = vadd.f32 %v4328_v55, %v17315_v18  ;;  %v4376_v47 = vadd.f32 %v4375_v3, %v17315_v18 }
 0xc11   :  { %v14983_v62 = vpop.f32.mrf.mxu0  ;;  %v14989_v5 = vpop.f32.mrf.mxu1 }
 0xc12   :  { %v4476_v59 = vsel %vm1549_vm6, %v4329_v7, -inf  ;;  %v4482_v16 = vsel %vm1549_vm6, %v4376_v47, -inf }
 0xc13   :  { %v4378_v22 = vpop.f32.mrf.mxu1  ;;  %4477 = vmax.xlane.f32.xlu0 %v4476_v59  ;;  %v4331_v46 = vpop.f32.mrf.mxu0 }
 0xc14   :  { %v4332_v49 = vadd.f32 %v4331_v46, %v17318_v21  ;;  %v4379_v14 = vadd.f32 %v4378_v22, %v17318_v21 }
 0xc15   :  { %v14984_v52 = vpop.f32.mrf.mxu0  ;;  %v14990_v6 = vpop.f32.mrf.mxu1 }
 0xc16   :  { %v4479_v27 = vsel %vm1549_vm6, %v4332_v49, -inf  ;;  %v4485_v15 = vsel %vm1549_vm6, %v4379_v14, -inf }
 0xc17   :  { %4483 = vmax.xlane.f32.xlu0 %v4482_v16  ;;  %4480 = vmax.xlane.f32.xlu1 %v4479_v27 }
 0xc1b   :  { %4486 = vmax.xlane.f32.xlu1 %v4485_v15 }
 0xc2f   :  { %v4422_v17 = vpop.f32.mrf.mxu0  ;;  %v4469_v19 = vpop.f32.mrf.mxu1 }
 0xc30   :  { %v4423_v34 = vadd.f32 %v4422_v17, %v17315_v18  ;;  %v4470_v50 = vadd.f32 %v4469_v19, %v17315_v18 }
 0xc31   :  { %v14995_v12 = vpop.f32.mrf.mxu0  ;;  %v15001_v54 = vpop.f32.mrf.mxu1 }
 0xc32   :  { %v4488_v31 = vsel %vm1549_vm6, %v4423_v34, -inf  ;;  %v4494_v25 = vsel %vm1549_vm6, %v4470_v50, -inf }
 0xc33   :  { %v4472_v8 = vpop.f32.mrf.mxu1  ;;  %4489 = vmax.xlane.f32.xlu0 %v4488_v31  ;;  %v4425_v24 = vpop.f32.mrf.mxu0 }
 0xc34   :  { %v4426_v1 = vadd.f32 %v4425_v24, %v17318_v21  ;;  %v4473_v23 = vadd.f32 %v4472_v8, %v17318_v21 }
 0xc35   :  { %v14996_v58 = vpop.f32.mrf.mxu0  ;;  %v15002_v0 = vpop.f32.mrf.mxu1 }
 0xc36   :  { %v4491_v39 = vsel %vm1549_vm6, %v4426_v1, -inf  ;;  %v4497_v42 = vsel %vm1549_vm6, %v4473_v23, -inf }
 0xc37   :  { %4495 = vmax.xlane.f32.xlu0 %v4494_v25  ;;  %4492 = vmax.xlane.f32.xlu1 %v4491_v39 }
 0xc3b   :  { %4498 = vmax.xlane.f32.xlu1 %v4497_v42 }
 0xc9c   :  { %v4478_v53 = vpop.xlane.xlu0 %4477 }
 0xc9d   :  { %v4500_v61 = vsub.f32 %v4329_v7, %v4478_v53 }
 0xc9f   :  { %v4508_v20 = vmul.f32 1.442695, %v4500_v61 }
 0xca0   :  { %v4484_v11 = vpop.xlane.xlu0 %4483  ;;  %v4481_v33 = vpop.xlane.xlu1 %4480 }
 0xca1   :  { %16543 = vpow2.f32 %v4508_v20  ;;  %v4502_v32 = vsub.f32 %v4376_v47, %v4484_v11  ;;  %v4501_v30 = vsub.f32 %v4332_v49, %v4481_v33 }
 0xca3   :  { %v4512_v35 = vmul.f32 1.442695, %v4502_v32  ;;  %v4510_v37 = vmul.f32 1.442695, %v4501_v30 }
 0xca4   :  { %v4487_v57 = vpop.xlane.xlu1 %4486 }
 0xca5   :  { %16545 = vpow2.f32 %v4512_v35  ;;  %v4503_v9 = vsub.f32 %v4379_v14, %v4487_v57 }
 0xca6   :  { %16547 = vpow2.f32 %v4510_v37 }
 0xca7   :  { %v4514_v13 = vmul.f32 1.442695, %v4503_v9 }
 0xca9   :  { %16549 = vpow2.f32 %v4514_v13 }
 0xcae   :  { %v16544_v45 = vpop.eup %16543 }
 0xcaf   :  { %v4524_v48 = vsel %vm1549_vm6, %v16544_v45, 0.0 }
 0xcb0   :  { %4525 = vadd.xlane.f32.xlu0 %v4524_v48 }
 0xcb2   :  { %v16546_v55 = vpop.eup %16545 }
 0xcb3   :  { %v16548_v3 = vpop.eup %16547  ;;  %v4530_v7 = vsel %vm1549_vm6, %v16546_v55, 0.0 }
 0xcb4   :  { %4531 = vadd.xlane.f32.xlu0 %v4530_v7  ;;  %v4527_v62 = vsel %vm1549_vm6, %v16548_v3, 0.0  ;;  %v16003_v7 = vld [vmem:[%s20603_s2 + $0x48] sm:$0xff]  }
 0xcb5   :  { %4528 = vadd.xlane.f32.xlu1 %v4527_v62  ;;  %v16004_v62 = vld [vmem:[%s20603_s2 + $0x40] sm:$0xff]  }
 0xcb6   :  { %v16550_v5 = vpop.eup %16549 }
 0xcb7   :  { %v4533_v47 = vsel %vm1549_vm6, %v16550_v5, 0.0 }
 0xcb9   :  { %4534 = vadd.xlane.f32.xlu1 %v4533_v47  ;;  %v16006_v47 = vld [vmem:[%s20603_s2 + $0x50] sm:$0xff]  }
 0xcbc   :  { %v4490_v59 = vpop.xlane.xlu0 %4489 }
 0xcbd   :  { %v4504_v22 = vsub.f32 %v4423_v34, %v4490_v59 }
 0xcbf   :  { %v4516_v46 = vmul.f32 1.442695, %v4504_v22 }
 0xcc0   :  { %v4496_v49 = vpop.xlane.xlu0 %4495  ;;  %v4493_v52 = vpop.xlane.xlu1 %4492 }
 0xcc1   :  { %16551 = vpow2.f32 %v4516_v46  ;;  %v4506_v6 = vsub.f32 %v4470_v50, %v4496_v49  ;;  %v4505_v14 = vsub.f32 %v4426_v1, %v4493_v52  ;;  %v16007_v52 = vld [vmem:[%s20603_s2 + $0x68] sm:$0xff]  }
 0xcc3   :  { %v4520_v16 = vmul.f32 1.442695, %v4506_v6  ;;  %v4518_v27 = vmul.f32 1.442695, %v4505_v14 }
 0xcc4   :  { %v4499_v15 = vpop.xlane.xlu1 %4498 }
 0xcc5   :  { %16553 = vpow2.f32 %v4520_v16  ;;  %v4507_v17 = vsub.f32 %v4473_v23, %v4499_v15  ;;  %v16008_v15 = vld [vmem:[%s20603_s2 + $0x60] sm:$0xff]  }
 0xcc6   :  { %16555 = vpow2.f32 %v4518_v27 }
 0xcc7   :  { %v4522_v19 = vmul.f32 1.442695, %v4507_v17  ;;  %v16009_v17 = vld [vmem:[%s20603_s2 + $0x78] sm:$0xff]  }
 0xcc9   :  { %16557 = vpow2.f32 %v4522_v19 }
 0xcce   :  { %v16552_v12 = vpop.eup %16551 }
 0xccf   :  { %v4536_v54 = vsel %vm1549_vm6, %v16552_v12, 0.0 }
 0xcd0   :  { %4537 = vadd.xlane.f32.xlu0 %v4536_v54  ;;  %v16010_v54 = vld [vmem:[%s20603_s2 + $0x70] sm:$0xff]  }
 0xcd2   :  { %v16554_v31 = vpop.eup %16553 }
 0xcd3   :  { %v16556_v34 = vpop.eup %16555  ;;  %v4542_v8 = vsel %vm1549_vm6, %v16554_v31, 0.0 }
 0xcd4   :  { %4543 = vadd.xlane.f32.xlu0 %v4542_v8  ;;  %v4539_v50 = vsel %vm1549_vm6, %v16556_v34, 0.0 }
 0xcd5   :  { %4540 = vadd.xlane.f32.xlu1 %v4539_v50 }
 0xcd6   :  { %v16558_v24 = vpop.eup %16557 }
 0xcd7   :  { %v4545_v1 = vsel %vm1549_vm6, %v16558_v24, 0.0 }
 0xcd9   :  { %4546 = vadd.xlane.f32.xlu1 %v4545_v1 }
 0xd39   :  { %v4526_v58 = vpop.xlane.xlu0 %4525 }
 0xd3a   :  { %16559 = vrcp.f32 %v4526_v58 }
 0xd3d   :  { %v4532_v0 = vpop.xlane.xlu0 %4531 }
 0xd3e   :  { %v4529_v23 = vpop.xlane.xlu1 %4528 }
 0xd3f   :  { %16561 = vrcp.f32 %v4529_v23 }
 0xd40   :  { %16563 = vrcp.f32 %v4532_v0 }
 0xd42   :  { %v4535_v25 = vpop.xlane.xlu1 %4534 }
 0xd43   :  { %16565 = vrcp.f32 %v4535_v25 }
 0xd47   :  { %v16560_v39 = vpop.eup %16559 }
 0xd48   :  { %v4549_v53 = vmul.f32 %v16560_v39, %v16544_v45 }
 0xd4c   :  { %v16562_v42 = vpop.eup %16561 }
 0xd4d   :  { %v4551_v61 = vmul.f32 %v16562_v42, %v16548_v3  ;;  %v16564_v20 = vpop.eup %16563 }
 0xd4e   :  { %v4553_v32 = vmul.f32 %v16564_v20, %v16546_v55 }
 0xd4f   :  { %v4564_v11 = vpack.c.bf16 %v4551_v61, %v4549_v53 }
 0xd50   :  { %v16566_v33 = vpop.eup %16565 }
 0xd51   :  { %15006 = vmatmul.mubr.msk.bf16.vlgmr.msra.gmra.mxu0 %vm1549_vm6, %v4564_v11  ;;  %v4555_v30 = vmul.f32 %v16566_v33, %v16550_v5  ;;  %v16005_v5 = vld [vmem:[%s20603_s2 + $0x58] sm:$0xff]  }
 0xd52   :  { %15016 = vmatpush3.bf16.msra.mxu0 %v4570_v40  ;;  %15017 = vmatprep.mubr.msk.bf16.mxu0 %vm16767_vm0, %v16766_v2 }
 0xd53   :  { %v4565_v35 = vpack.c.bf16 %v4555_v30, %v4553_v32  ;;  %15027 = vmatprep.subr.bf16.mxu0 %v16766_v2 }
 0xd55   :  { %15012 = vmatmul.mubr.msk.bf16.vlgmr.msra.gmra.mxu1 %vm1549_vm6, %v4565_v35 }
 0xd56   :  { %15022 = vmatpush3.bf16.msra.mxu1 %v4571_v41  ;;  %15023 = vmatprep.mubr.msk.bf16.mxu1 %vm16767_vm0, %v16766_v2 }
 0xd57   :  { %15035 = vmatprep.subr.bf16.mxu1 %v16766_v2 }
 0xd59   :  { %v4538_v37 = vpop.xlane.xlu0 %4537 }
 0xd5a   :  { %16567 = vrcp.f32 %v4538_v37 }
 0xd5d   :  { %v4544_v29 = vpop.xlane.xlu0 %4543 }
 0xd5e   :  { %v4541_v44 = vpop.xlane.xlu1 %4540 }
 0xd5f   :  { %16569 = vrcp.f32 %v4541_v44  ;;  %v18347_v44 = vld [vmem:[%s20602_s5 + $0x8] sm:$0x3f] }
 0xd60   :  { %16571 = vrcp.f32 %v4544_v29 }
 0xd62   :  { %v4547_v40 = vpop.xlane.xlu1 %4546 }
 0xd63   :  { %16573 = vrcp.f32 %v4547_v40  ;;  %v5002_v40 = vrot.slane %v18347_v44, %v17402_v51 }
 0xd67   :  { %v16568_v57 = vpop.eup %16567 }
 0xd68   :  { %v4557_v13 = vmul.f32 %v16568_v57, %v16552_v12 }
 0xd6c   :  { %v16570_v9 = vpop.eup %16569 }
 0xd6d   :  { %v4559_v45 = vmul.f32 %v16570_v9, %v16556_v34  ;;  %v16572_v48 = vpop.eup %16571 }
 0xd6e   :  { %v4561_v41 = vmul.f32 %v16572_v48, %v16554_v31 }
 0xd6f   :  { %v4566_v63 = vpack.c.bf16 %v4559_v45, %v4557_v13 }
 0xd70   :  { %v16574_v26 = vpop.eup %16573 }
 0xd71   :  { %15018 = vmatmul.mubr.msk.bf16.vlgmr.msra.gmra.mxu0 %vm1549_vm6, %v4566_v63  ;;  %v4563_v55 = vmul.f32 %v16574_v26, %v16558_v24 }
 0xd72   :  { %15031 = vmatprep.mubr.msk.bf16.mxu0 %vm16767_vm0, %v16766_v2  ;;  %15028 = vmatpush3.bf16.msra.mxu0 %v16003_v7 }
 0xd73   :  { %v4567_v3 = vpack.c.bf16 %v4563_v55, %v4561_v41  ;;  %15029 = vmatprep.subr.bf16.mxu0 %v16766_v2 }
 0xd75   :  { %15024 = vmatmul.mubr.msk.bf16.vlgmr.msra.gmra.mxu1 %vm1549_vm6, %v4567_v3 }
 0xd76   :  { %15039 = vmatprep.mubr.msk.bf16.mxu1 %vm16767_vm0, %v16766_v2  ;;  %15030 = vmatpush3.bf16.msra.mxu0 %v16004_v62 }
 0xd77   :  { %15036 = vmatpush3.bf16.msra.mxu1 %v16005_v5  ;;  %15043 = vmatprep.subr.bf16.mxu0 %v16766_v2 }
 0xd78   :  { %15037 = vmatprep.subr.bf16.mxu1 %v16766_v2 }
 0xd7b   :  { %15038 = vmatpush3.bf16.msra.mxu1 %v16006_v47 }
 0xd7c   :  { %15051 = vmatprep.subr.bf16.mxu1 %v16766_v2 }
 0xe11   :  { %v4609_v59 = vpop.f32.mrf.mxu0 }
 0xe13   :  { %v15007_v22 = vpop.f32.mrf.mxu0 }
 0xe14   :  { %v16013_v22 = vld [vmem:[%s20604_s3 + $0x1e4] ss:$16 sps:$4 sm:$0xff]  }
 0xe15   :  { %v4612_v46 = vpop.f32.mrf.mxu0  ;;  %v4653_v49 = vpop.f32.mrf.mxu1 }
 0xe16   :  { %v4748_v6 = vpack.c.bf16 %v4612_v46, %v4609_v59  ;;  %v16011_v59 = vld [vmem:[%s20604_s3 + $0x1e0] ss:$16 sps:$4 sm:$0xff]   ;;  %v16016_v46 = vld [vmem:[%s20604_s3 + $0x1ec] ss:$16 sps:$4 sm:$0xff]  }
 0xe17   :  { %v15008_v14 = vpop.f32.mrf.mxu0  ;;  %v15013_v16 = vpop.f32.mrf.mxu1 }
 0xe18   :  { %15032 = vmatmul.mubr.msk.bf16.vlgmr.msra.gmra.mxu0 %vm1360_vm1, %v4748_v6 }
 0xe19   :  { %v4656_v27 = vpop.f32.mrf.mxu1  ;;  %15044 = vmatpush3.bf16.msra.mxu0 %v16007_v52  ;;  %15047 = vmatprep.mubr.msk.bf16.mxu0 %vm16767_vm0, %v16766_v2 }
 0xe1a   :  { %v4749_v19 = vpack.c.bf16 %v4656_v27, %v4653_v49  ;;  %15045 = vmatprep.subr.bf16.mxu0 %v16766_v2 }
 0xe1b   :  { %v15014_v12 = vpop.f32.mrf.mxu1 }
 0xe1c   :  { %15040 = vmatmul.mubr.msk.bf16.vlgmr.msra.gmra.mxu1 %vm1360_vm1, %v4749_v19  ;;  %v16022_v19 = vld [vmem:[%s20604_s3 + $0x1cc] ss:$16 sps:$4 sm:$0xff]   ;;  %v16017_v12 = vld [vmem:[%s20604_s3 + $0x1c0] ss:$16 sps:$4 sm:$0xff]  }
 0xe1d   :  { %15046 = vmatpush3.bf16.msra.mxu0 %v16008_v15  ;;  %15052 = vmatpush3.bf16.msra.mxu1 %v16009_v17  ;;  %v16019_v17 = vld [vmem:[%s20604_s3 + $0x1c4] ss:$16 sps:$4 sm:$0xff]  }
 0xe1e   :  { %15053 = vmatprep.subr.bf16.mxu1 %v16766_v2  ;;  %15055 = vmatprep.mubr.msk.bf16.mxu1 %vm16767_vm0, %v16766_v2 }
 0xe1f   :  { %5256 = vmatprep.subr.bf16.mxu0 %v16013_v22  ;;  %v5038_v22 = vrot.slane %v18347_v44, %v17538_v10 }
 0xe21   :  { %15054 = vmatpush3.bf16.msra.mxu1 %v16010_v54  ;;  %v16020_v54 = vld [vmem:[%s20604_s3 + $0x1c8] ss:$16 sps:$4 sm:$0xff]  }
 0xe22   :  { %5299 = vmatprep.subr.bf16.mxu1 %v16016_v46 }
 0xe31   :  { %v4697_v31 = vpop.f32.mrf.mxu0 }
 0xe33   :  { %v15019_v34 = vpop.f32.mrf.mxu0 }
 0xe34   :  { %v16028_v34 = vld [vmem:[%s20604_s3 + $0x1ac] ss:$16 sps:$4 sm:$0xff]  }
 0xe35   :  { %v4700_v8 = vpop.f32.mrf.mxu0  ;;  %v4741_v50 = vpop.f32.mrf.mxu1 }
 0xe36   :  { %v4750_v24 = vpack.c.bf16 %v4700_v8, %v4697_v31  ;;  %v16025_v31 = vld [vmem:[%s20604_s3 + $0x1a4] ss:$16 sps:$4 sm:$0xff]   ;;  %v16023_v8 = vld [vmem:[%s20604_s3 + $0x1a0] ss:$16 sps:$4 sm:$0xff]  }
 0xe37   :  { %v15020_v1 = vpop.f32.mrf.mxu0  ;;  %v15025_v58 = vpop.f32.mrf.mxu1 }
 0xe38   :  { %15048 = vmatmul.mubr.msk.bf16.vlgmr.msra.gmra.mxu0 %vm1360_vm1, %v4750_v24  ;;  %v16029_v24 = vld [vmem:[%s20604_s3 + $0x180] ss:$16 sps:$4 sm:$0xff]   ;;  %v16031_v1 = vld [vmem:[%s20604_s3 + $0x184] ss:$16 sps:$4 sm:$0xff]   ;;  %v16032_v58 = vld [vmem:[%s20604_s3 + $0x188] ss:$16 sps:$4 sm:$0xff]  }
 0xe39   :  { %v4744_v0 = vpop.f32.mrf.mxu1  ;;  %5288 = vmatprep.mubr.bf16.mxu0 %v16769_v43  ;;  %5257 = vmatpush1.bf16.msra.mxu0 %v16011_v59 }
 0xe3a   :  { %v4751_v23 = vpack.c.bf16 %v4744_v0, %v4741_v50  ;;  %5258 = vmatprep.subr.bf16.mxu0 %v16019_v17  ;;  %v16026_v50 = vld [vmem:[%s20604_s3 + $0x1a8] ss:$16 sps:$4 sm:$0xff]   ;;  %v16034_v0 = vld [vmem:[%s20604_s3 + $0x18c] ss:$16 sps:$4 sm:$0xff]   ;;  %v16065_v17 = vld [vmem:[%s20605_s4 + $0x130] sm:$0xff]  }
 0xe3b   :  { %v15026_v25 = vpop.f32.mrf.mxu1 }
 0xe3c   :  { %15056 = vmatmul.mubr.msk.bf16.vlgmr.msra.gmra.mxu1 %vm1360_vm1, %v4751_v23  ;;  %v16037_v23 = vld [vmem:[%s20604_s3 + $0x164] ss:$16 sps:$4 sm:$0xff]   ;;  %v16040_v25 = vld [vmem:[%s20604_s3 + $0x16c] ss:$16 sps:$4 sm:$0xff]  }
 0xe3d   :  { %5331 = vmatprep.mubr.bf16.mxu1 %v16769_v43  ;;  %5259 = vmatpush1.bf16.msra.mxu0 %v16017_v12  ;;  %v16067_v12 = vld [vmem:[%s20605_s4 + $0x168] sm:$0xff]  }
 0xe3e   :  { %5260 = vmatprep.subr.bf16.mxu0 %v16025_v31  ;;  %v16069_v31 = vld [vmem:[%s20605_s4 + $0x128] sm:$0xff]  }
 0xe41   :  { %5261 = vmatpush1.bf16.msra.mxu0 %v16023_v8  ;;  %v16071_v8 = vld [vmem:[%s20605_s4 + $0x160] sm:$0xff]  }
 0xe42   :  { %5262 = vmatprep.subr.bf16.mxu0 %v16031_v1  ;;  %v16074_v1 = vld [vmem:[%s20605_s4 + $0x1a0] sm:$0xff]  }
 0xe45   :  { %5263 = vmatpush1.bf16.msra.mxu0 %v16029_v24  ;;  %v16073_v24 = vld [vmem:[%s20605_s4 + $0x120] sm:$0xff]  }
 0xe46   :  { %5264 = vmatprep.subr.bf16.mxu0 %v16037_v23  ;;  %v16077_v23 = vld [vmem:[%s20605_s4 + $0x118] sm:$0xff]  }
 0xed8   :  { %v4818_v39 = vpop.f32.mrf.mxu0 }
 0xeda   :  { %v15033_v42 = vpop.f32.mrf.mxu0 }
 0xedb   :  { %v16038_v42 = vld [vmem:[%s20604_s3 + $0x168] ss:$16 sps:$4 sm:$0xff]  }
 0xedc   :  { %v4821_v53 = vpop.f32.mrf.mxu0  ;;  %v4874_v61 = vpop.f32.mrf.mxu1 }
 0xedd   :  { %v4993_v35 = vadd.f32 %v4874_v61, %v4818_v39  ;;  %v16035_v39 = vld [vmem:[%s20604_s3 + $0x160] ss:$16 sps:$4 sm:$0xff]   ;;  %v16046_v61 = vld [vmem:[%s20604_s3 + $0x14c] ss:$16 sps:$4 sm:$0xff]  }
 0xede   :  { %v15034_v20 = vpop.f32.mrf.mxu0  ;;  %v15041_v11 = vpop.f32.mrf.mxu1  ;;  %5265 = vmatpush1.bf16.msra.mxu0 %v16035_v39  ;;  %v16079_v39 = vld [vmem:[%s20605_s4 + $0x150] sm:$0xff]  }
 0xedf   :  { %v16041_v20 = vld [vmem:[%s20604_s3 + $0x140] ss:$16 sps:$4 sm:$0xff]   ;;  %v16044_v11 = vld [vmem:[%s20604_s3 + $0x148] ss:$16 sps:$4 sm:$0xff]  }
 0xee0   :  { %v4877_v33 = vpop.f32.mrf.mxu1 }
 0xee1   :  { %v4996_v13 = vadd.f32 %v4877_v33, %v4821_v53  ;;  %v16043_v53 = vld [vmem:[%s20604_s3 + $0x144] ss:$16 sps:$4 sm:$0xff]  }
 0xee2   :  { %v15042_v32 = vpop.f32.mrf.mxu1  ;;  %5266 = vmatprep.subr.bf16.mxu0 %v16043_v53  ;;  %v16049_v33 = vld [vmem:[%s20604_s3 + $0x124] ss:$16 sps:$4 sm:$0xff]  }
 0xee3   :  { %v16052_v32 = vld [vmem:[%s20604_s3 + $0x12c] ss:$16 sps:$4 sm:$0xff]   ;;  %5267 = vmatpush1.bf16.msra.mxu0 %v16041_v20  ;;  %v16081_v53 = vld [vmem:[%s20605_s4 + $0x110] sm:$0xff]  }
 0xee4   :  { %5268 = vmatprep.subr.bf16.mxu0 %v16049_v33  ;;  %v16083_v20 = vld [vmem:[%s20605_s4 + $0x148] sm:$0xff]  }
 0xee5   :  { %v16085_v33 = vld [vmem:[%s20605_s4 + $0x108] sm:$0xff]  }
 0xef8   :  { %v4930_v30 = vpop.f32.mrf.mxu0 }
 0xef9   :  { %v4994_v29 = vadd.f32 %v4993_v35, %v4930_v30  ;;  %v16047_v30 = vld [vmem:[%s20604_s3 + $0x120] ss:$16 sps:$4 sm:$0xff]   ;;  %v16050_v35 = vld [vmem:[%s20604_s3 + $0x128] ss:$16 sps:$4 sm:$0xff]  }
 0xefa   :  { %v15049_v37 = vpop.f32.mrf.mxu0  ;;  %5269 = vmatpush1.bf16.msra.mxu0 %v16047_v30  ;;  %v16087_v30 = vld [vmem:[%s20605_s4 + $0x140] sm:$0xff]  }
 0xefb   :  { %v16055_v37 = vld [vmem:[%s20604_s3 + $0x104] ss:$16 sps:$4 sm:$0xff]  }
 0xefc   :  { %v4933_v57 = vpop.f32.mrf.mxu0  ;;  %v4986_v9 = vpop.f32.mrf.mxu1  ;;  %5270 = vmatprep.subr.bf16.mxu0 %v16055_v37  ;;  %v16089_v37 = vld [vmem:[%s20605_s4 + $0x100] sm:$0xff]  }
 0xefd   :  { %v4995_v45 = vadd.f32 %v4994_v29, %v4986_v9  ;;  %v4997_v26 = vadd.f32 %v4996_v13, %v4933_v57  ;;  %v16058_v29 = vld [vmem:[%s20604_s3 + $0x10c] ss:$16 sps:$4 sm:$0xff]   ;;  %v16056_v57 = vld [vmem:[%s20604_s3 + $0x108] ss:$16 sps:$4 sm:$0xff]  }
 0xefe   :  { %v15050_v48 = vpop.f32.mrf.mxu0  ;;  %v15057_v63 = vpop.f32.mrf.mxu1 }
 0xeff   :  { %v5003_v41 = vadd.f32 %v5002_v40, %v4995_v45 }
 0xf00   :  { %v4989_v55 = vpop.f32.mrf.mxu1 }
 0xf01   :  { %v4998_v3 = vadd.f32 %v4997_v26, %v4989_v55  ;;  %v18352_v7 = vadd.f32 %v5003_v41, %v17790_v56  ;;  %v16014_v56 = vld [vmem:[%s20604_s3 + $0x1e8] ss:$16 sps:$4 sm:$0xff]  }
 0xf02   :  { %v15058_v62 = vpop.f32.mrf.mxu1  ;;  %5300 = vmatpush1.bf16.msra.mxu1 %v16014_v56 }
 0xf03   :  { %v5004_v5 = vadd.f32 %v5002_v40, %v4998_v3  ;;  %5007 = vadd.xlane.f32.xlu0 %v18352_v7  ;;  %5301 = vmatprep.subr.bf16.mxu1 %v16022_v19  ;;  %v16053_v40 = vld [vmem:[%s20604_s3 + $0x100] ss:$16 sps:$4 sm:$0xff]   ;;  %v5032_v3 = vrot.slane %v18347_v44, %v17532_v60 }
 0xf04   :  { %5271 = vmatpush1.bf16.msra.mxu0 %v16053_v40  ;;  %v16066_v19 = vld [vmem:[%s20605_s4 + $0x1b0] sm:$0xff]   ;;  %v12225_v40 = vld [vmem:[%s20606_s6 + $0x4] sm:$0xf] }
 0xf05   :  { %v18356_v47 = vadd.f32 %v5004_v5, %v17794_v4 }
 0xf06   :  { %5302 = vmatpush1.bf16.msra.mxu1 %v16020_v54  ;;  %v16068_v54 = vld [vmem:[%s20605_s4 + $0x1e8] sm:$0xff]  }
 0xf07   :  { %5009 = vadd.xlane.f32.xlu1 %v18356_v47  ;;  %5303 = vmatprep.subr.bf16.mxu1 %v16028_v34  ;;  %v16070_v34 = vld [vmem:[%s20605_s4 + $0x1a8] sm:$0xff]  }
 0xf0a   :  { %5304 = vmatpush1.bf16.msra.mxu1 %v16026_v50  ;;  %v16072_v50 = vld [vmem:[%s20605_s4 + $0x1e0] sm:$0xff]  }
 0xf0b   :  { %5305 = vmatprep.subr.bf16.mxu1 %v16034_v0  ;;  %v16076_v0 = vld [vmem:[%s20605_s4 + $0x1d8] sm:$0xff]  }
 0xf0e   :  { %5306 = vmatpush1.bf16.msra.mxu1 %v16032_v58  ;;  %v16075_v58 = vld [vmem:[%s20605_s4 + $0x158] sm:$0xff]  }
 0xf0f   :  { %5307 = vmatprep.subr.bf16.mxu1 %v16040_v25  ;;  %v16078_v25 = vld [vmem:[%s20605_s4 + $0x198] sm:$0xff]  }
 0xf12   :  { %5308 = vmatpush1.bf16.msra.mxu1 %v16038_v42  ;;  %v16080_v42 = vld [vmem:[%s20605_s4 + $0x1d0] sm:$0xff]  }
 0xf13   :  { %5309 = vmatprep.subr.bf16.mxu1 %v16046_v61  ;;  %v16082_v61 = vld [vmem:[%s20605_s4 + $0x190] sm:$0xff]  }
 0xf16   :  { %5310 = vmatpush1.bf16.msra.mxu1 %v16044_v11  ;;  %v16084_v11 = vld [vmem:[%s20605_s4 + $0x1c8] sm:$0xff]  }
 0xf17   :  { %5311 = vmatprep.subr.bf16.mxu1 %v16052_v32  ;;  %v16086_v32 = vld [vmem:[%s20605_s4 + $0x188] sm:$0xff]  }
 0xf1a   :  { %5312 = vmatpush1.bf16.msra.mxu1 %v16050_v35  ;;  %v16088_v35 = vld [vmem:[%s20605_s4 + $0x1c0] sm:$0xff]  }
 0xf1b   :  { %5313 = vmatprep.subr.bf16.mxu1 %v16058_v29  ;;  %v16090_v29 = vld [vmem:[%s20605_s4 + $0x180] sm:$0xff]  }
 0xf1e   :  { %5314 = vmatpush1.bf16.msra.mxu1 %v16056_v57  ;;  %v5079_v57 = vrot.slane %v12225_v40, %v16911_v36 }
 0xf8c   :  { %v5008_v4 = vpop.xlane.xlu0 %5007 }
 0xf8d   :  { %v5011_v49 = vmul.f32 0.0078125, %v5008_v4 }
 0xf8f   :  { %v18372_v52 = vsub.f32 %v18352_v7, %v5011_v49 }
 0xf90   :  { %v5010_v6 = vpop.xlane.xlu1 %5009 }
 0xf91   :  { %v5012_v14 = vmul.f32 0.0078125, %v5010_v6  ;;  %v5015_v16 = vmul.f32 %v18372_v52, %v18372_v52  ;;  %v16060_v6 = vld [vmem:[%s20605_s4 + $0x1f8] sm:$0xff]  }
 0xf92   :  { %14028 = vmatprep.subr.bf16.mxu1 %v16060_v6 }
 0xf93   :  { %v18377_v27 = vsub.f32 %v18356_v47, %v5012_v14  ;;  %5017 = vadd.xlane.f32.xlu0 %v5015_v16  ;;  %v16061_v14 = vld [vmem:[%s20605_s4 + $0x138] sm:$0xff]  }
 0xf94   :  { %v16062_v16 = vld [vmem:[%s20605_s4 + $0x1b8] sm:$0xff]  }
 0xf95   :  { %v5016_v15 = vmul.f32 %v18377_v27, %v18377_v27 }
 0xf97   :  { %5019 = vadd.xlane.f32.xlu1 %v5016_v15  ;;  %v16064_v15 = vld [vmem:[%s20605_s4 + $0x1f0] sm:$0xff]  }
0x101c   :  { %v5018_v9 = vpop.xlane.xlu0 %5017 }
0x101d   :  { %v5021_v13 = vmul.f32 0.0078125, %v5018_v9  ;;  %v5087_v9 = vrot.slane %v12225_v40, %v17402_v51 }
0x101f   :  { %v5023_v45 = vadd.f32 1e-05, %v5021_v13 }
0x1020   :  { %v5020_v48 = vpop.xlane.xlu1 %5019 }
0x1021   :  { %16575 = vrsqrt.f32 %v5023_v45  ;;  %v5022_v63 = vmul.f32 0.0078125, %v5020_v48  ;;  %v5083_v48 = vrot.slane %v12225_v40, %v16914_v38 }
0x1023   :  { %v5024_v26 = vadd.f32 1e-05, %v5022_v63  ;;  %v5091_v63 = vrot.slane %v12225_v40, %v17532_v60 }
0x1025   :  { %16577 = vrsqrt.f32 %v5024_v26 }
0x102e   :  { %v16576_v41 = vpop.eup %16575 }
0x102f   :  { %v5027_v55 = vmul.f32 %v16576_v41, %v18372_v52  ;;  %v16059_v52 = vld [vmem:[%s20605_s4 + $0x178] sm:$0xff]  }
0x1030   :  { %14006 = vmatprep.subr.bf16.mxu0 %v16059_v52 }
0x1031   :  { %v5033_v59 = vmul.f32 %v5032_v3, %v5027_v55 }
0x1032   :  { %v16578_v62 = vpop.eup %16577 }
0x1033   :  { %v5028_v5 = vmul.f32 %v16578_v62, %v18377_v27  ;;  %v5039_v46 = vadd.f32 %v5038_v22, %v5033_v59  ;;  %v16063_v27 = vld [vmem:[%s20605_s4 + $0x170] sm:$0xff]  }
0x1035   :  { %v5034_v56 = vmul.f32 %v5032_v3, %v5028_v5 }
0x1037   :  { %v5040_v4 = vadd.f32 %v5038_v22, %v5034_v56 }
0x1039   :  { %v5041_v49 = vpack.c.bf16 %v5040_v4, %v5039_v46 }
0x103b   :  { %5289 = vmatmul.mubr.bf16.vlgmr.msra.gmra.mxu0 %v5041_v49  ;;  %5332 = vmatmul.mubr.bf16.vlgmr.msra.gmra.mxu1 %v5041_v49 }
0x103c   :  { %14007 = vmatpush3.bf16.msra.mxu0 %v16061_v14  ;;  %14029 = vmatpush3.bf16.msra.mxu1 %v16062_v16 }
0x103d   :  { %14008 = vmatprep.subr.bf16.mxu0 %v16063_v27  ;;  %14030 = vmatprep.subr.bf16.mxu1 %v16064_v15 }
0x1040   :  { %14009 = vmatpush3.bf16.msra.mxu0 %v16065_v17  ;;  %14031 = vmatpush3.bf16.msra.mxu1 %v16066_v19 }
0x1041   :  { %14010 = vmatprep.subr.bf16.mxu0 %v16067_v12  ;;  %14032 = vmatprep.subr.bf16.mxu1 %v16068_v54 }
0x1044   :  { %14011 = vmatpush3.bf16.msra.mxu0 %v16069_v31  ;;  %14033 = vmatpush3.bf16.msra.mxu1 %v16070_v34 }
0x1045   :  { %14012 = vmatprep.subr.bf16.mxu0 %v16071_v8  ;;  %14034 = vmatprep.subr.bf16.mxu1 %v16072_v50 }
0x1048   :  { %14013 = vmatpush3.bf16.msra.mxu0 %v16073_v24  ;;  %14035 = vmatpush3.bf16.msra.mxu1 %v16074_v1 }
0x1049   :  { %14014 = vmatprep.subr.bf16.mxu0 %v16075_v58  ;;  %14036 = vmatprep.subr.bf16.mxu1 %v16076_v0 }
0x104c   :  { %14015 = vmatpush3.bf16.msra.mxu0 %v16077_v23  ;;  %14037 = vmatpush3.bf16.msra.mxu1 %v16078_v25 }
0x104d   :  { %14016 = vmatprep.subr.bf16.mxu0 %v16079_v39  ;;  %14038 = vmatprep.subr.bf16.mxu1 %v16080_v42 }
0x1050   :  { %14017 = vmatpush3.bf16.msra.mxu0 %v16081_v53  ;;  %14039 = vmatpush3.bf16.msra.mxu1 %v16082_v61 }
0x1051   :  { %14018 = vmatprep.subr.bf16.mxu0 %v16083_v20  ;;  %14040 = vmatprep.subr.bf16.mxu1 %v16084_v11 }
0x1054   :  { %14019 = vmatpush3.bf16.msra.mxu0 %v16085_v33  ;;  %14041 = vmatpush3.bf16.msra.mxu1 %v16086_v32 }
0x1055   :  { %14020 = vmatprep.subr.bf16.mxu0 %v16087_v30  ;;  %14042 = vmatprep.subr.bf16.mxu1 %v16088_v35 }
0x1058   :  { %14021 = vmatpush3.bf16.msra.mxu0 %v16089_v37  ;;  %14043 = vmatpush3.bf16.msra.mxu1 %v16090_v29 }
0x1059   :  { %15059 = vmatprep.subr.bf16.mxu0 %v16766_v2  ;;  %15079 = vmatprep.subr.bf16.mxu1 %v16766_v2 }
0x10fb   :  { %v5290_v13 = vpop.f32.mrf.mxu0  ;;  %v5333_v45 = vpop.f32.mrf.mxu1 }
0x10fc   :  { %v18576_v26 = vadd.f32 %v5290_v13, %v5079_v57  ;;  %v18578_v41 = vadd.f32 %v5333_v45, %v5087_v9 }
0x10fd   :  { %v5292_v55 = vpop.f32.mrf.mxu0  ;;  %v5335_v3 = vpop.f32.mrf.mxu1 }
0x10fe   :  { %v18581_v62 = vmul.f32 0.70710677, %v18576_v26  ;;  %v18584_v5 = vmul.f32 0.70710677, %v18578_v41  ;;  %v18586_v59 = vadd.f32 %v5292_v55, %v5083_v48  ;;  %v18588_v22 = vadd.f32 %v5335_v3, %v5091_v63 }
0x10ff   :  { %v5294_v14 = vpop.f32.mrf.mxu0  ;;  %v5337_v31 = vpop.f32.mrf.mxu1 }
0x1100   :  { %v5350_v56 = vand.u32 2147483647, %v18581_v62  ;;  %v5352_v46 = vand.u32 2147483647, %v18584_v5  ;;  %v18593_v4 = vmul.f32 0.70710677, %v18586_v59  ;;  %v18603_v54 = vadd.f32 %v5294_v14, %v5079_v57 }
0x1101   :  { %v18596_v49 = vmul.f32 0.70710677, %v18588_v22  ;;  %v5296_v34 = vpop.f32.mrf.mxu0  ;;  %v18608_v1 = vadd.f32 %v5337_v31, %v5087_v9  ;;  %v5339_v39 = vpop.f32.mrf.mxu1  ;;  %vm5510_vm3 = vcmp.ge.f32.partialorder %v18581_v62, 0.0  ;;  %vm5512_vm7 = vcmp.ge.f32.partialorder %v18584_v5, 0.0 }
0x1102   :  { %v5358_v52 = vmul.f32 0.3275911, %v5350_v56  ;;  %v5360_v6 = vmul.f32 0.3275911, %v5352_v46  ;;  %v5351_v16 = vand.u32 2147483647, %v18593_v4  ;;  %v18610_v58 = vadd.f32 %v5296_v34, %v5083_v48 }
0x1103   :  { %v18600_v27 = vand.u32 2147483647, %v18596_v49  ;;  %v18606_v24 = vmul.f32 0.70710677, %v18603_v54  ;;  %v18614_v23 = vmul.f32 0.70710677, %v18608_v1  ;;  %v18621_v11 = vadd.f32 %v5339_v39, %v5091_v63 }
0x1104   :  { %v5366_v15 = vadd.f32 1.0, %v5358_v52  ;;  %v5368_v17 = vadd.f32 1.0, %v5360_v6  ;;  %v5359_v19 = vmul.f32 0.3275911, %v5351_v16  ;;  %v18617_v25 = vmul.f32 0.70710677, %v18610_v58 }
0x1105   :  { %v5361_v12 = vmul.f32 0.3275911, %v18600_v27  ;;  %v5354_v0 = vand.u32 2147483647, %v18606_v24  ;;  %v5356_v53 = vand.u32 2147483647, %v18614_v23 }
0x1106   :  { %16579 = vrcp.f32 %v5366_v15  ;;  %v5367_v8 = vadd.f32 1.0, %v5359_v19  ;;  %v5355_v61 = vand.u32 2147483647, %v18617_v25  ;;  %v5462_v30 = vsub.f32 0.0, %v5350_v56 }
0x1107   :  { %16581 = vrcp.f32 %v5368_v17  ;;  %v5369_v50 = vadd.f32 1.0, %v5361_v12  ;;  %v5362_v42 = vmul.f32 0.3275911, %v5354_v0  ;;  %v5364_v33 = vmul.f32 0.3275911, %v5356_v53 }
0x1108   :  { %16583 = vrcp.f32 %v5367_v8  ;;  %v5363_v32 = vmul.f32 0.3275911, %v5355_v61  ;;  %v18624_v35 = vmul.f32 0.70710677, %v18621_v11  ;;  %v5463_v37 = vsub.f32 0.0, %v5351_v16 }
0x1109   :  { %16585 = vrcp.f32 %v5369_v50  ;;  %v5370_v20 = vadd.f32 1.0, %v5362_v42  ;;  %v5372_v29 = vadd.f32 1.0, %v5364_v33  ;;  %v5464_v13 = vsub.f32 0.0, %v5352_v46 }
0x110a   :  { %v5371_v40 = vadd.f32 1.0, %v5363_v32  ;;  %v18627_v57 = vand.u32 2147483647, %v18624_v35  ;;  %v5470_v63 = vmul.f32 %v5462_v30, %v5350_v56  ;;  %v5471_v52 = vmul.f32 %v5463_v37, %v5351_v16 }
0x110b   :  { %16587 = vrcp.f32 %v5370_v20  ;;  %v5466_v6 = vsub.f32 0.0, %v5354_v0  ;;  %v5472_v12 = vmul.f32 %v5464_v13, %v5352_v46  ;;  %v5465_v31 = vsub.f32 0.0, %v18600_v27 }
0x110c   :  { %16589 = vrcp.f32 %v5372_v29  ;;  %v5365_v55 = vmul.f32 0.3275911, %v18627_v57  ;;  %v5478_v8 = vmul.f32 1.442695, %v5470_v63  ;;  %v5480_v16 = vmul.f32 1.442695, %v5471_v52 }
0x110d   :  { %16591 = vrcp.f32 %v5371_v40  ;;  %v5474_v42 = vmul.f32 %v5466_v6, %v5354_v0  ;;  %v5468_v20 = vsub.f32 0.0, %v5356_v53  ;;  %v5482_v37 = vmul.f32 1.442695, %v5472_v12 }
0x110e   :  { %v5373_v15 = vadd.f32 1.0, %v5365_v55  ;;  %v5473_v29 = vmul.f32 %v5465_v31, %v18600_v27  ;;  %v5467_v40 = vsub.f32 0.0, %v5355_v61  ;;  %vm5514_vm15 = vcmp.ge.f32.partialorder %v18606_v24, 0.0 }
0x110f   :  { %v5476_v52 = vmul.f32 %v5468_v20, %v5356_v53  ;;  %v5469_v20 = vsub.f32 0.0, %v18627_v57  ;;  %vm5511_vm2 = vcmp.ge.f32.partialorder %v18593_v4, 0.0  ;;  %vm5515_vm4 = vcmp.ge.f32.partialorder %v18617_v25, 0.0 }
0x1110   :  { %16593 = vrcp.f32 %v5373_v15  ;;  %v5475_v12 = vmul.f32 %v5467_v40, %v5355_v61  ;;  %vm5516_vm5 = vcmp.ge.f32.partialorder %v18614_v23, 0.0  ;;  %vm5513_vm8 = vcmp.ge.f32.partialorder %v18596_v49, 0.0 }
0x1111   :  { %16595 = vpow2.f32 %v5478_v8  ;;  %vm5517_vm9 = vcmp.ge.f32.partialorder %v18624_v35, 0.0  ;;  %v5540_v5 = vmul.f32 0.5, %v18608_v1  ;;  %v5537_v49 = vmul.f32 0.5, %v18588_v22 }
0x1112   :  { %16597 = vpow2.f32 %v5480_v16 }
0x1113   :  { %v18629_v9 = vpop.eup %16579  ;;  %16599 = vpow2.f32 %v5482_v37 }
0x1114   :  { %v18631_v45 = vpop.eup %16581  ;;  %v5390_v48 = vmul.f32 1.0614054, %v18629_v9 }
0x1115   :  { %v5392_v3 = vmul.f32 1.0614054, %v18631_v45  ;;  %v18636_v17 = vpop.eup %16583 }
0x1116   :  { %v5398_v14 = vadd.f32 -1.4531521, %v5390_v48  ;;  %v5391_v56 = vmul.f32 1.0614054, %v18636_v17  ;;  %v18641_v50 = vpop.eup %16585 }
0x1117   :  { %v5400_v19 = vadd.f32 -1.4531521, %v5392_v3  ;;  %v5393_v30 = vmul.f32 1.0614054, %v18641_v50  ;;  %v5486_v3 = vmul.f32 1.442695, %v5474_v42 }
0x1118   :  { %v5406_v34 = vmul.f32 %v18629_v9, %v5398_v14  ;;  %v5399_v32 = vadd.f32 -1.4531521, %v5391_v56  ;;  %v18648_v55 = vpop.eup %16587  ;;  %v5490_v42 = vmul.f32 1.442695, %v5476_v52 }
0x1119   :  { %v5408_v39 = vmul.f32 %v18631_v45, %v5400_v19  ;;  %v5401_v63 = vadd.f32 -1.4531521, %v5393_v30  ;;  %v5394_v27 = vmul.f32 1.0614054, %v18648_v55  ;;  %v5484_v19 = vmul.f32 1.442695, %v5473_v29  ;;  %v18653_v31 = vpop.eup %16589 }
0x111a   :  { %v5414_v33 = vadd.f32 1.4214138, %v5406_v34  ;;  %v5407_v48 = vmul.f32 %v18636_v17, %v5399_v32  ;;  %v18657_v16 = vpop.eup %16591  ;;  %16601 = vpow2.f32 %v5486_v3  ;;  %v5396_v53 = vmul.f32 1.0614054, %v18653_v31 }
0x111b   :  { %v5416_v46 = vadd.f32 1.4214138, %v5408_v39  ;;  %v5409_v15 = vmul.f32 %v18641_v50, %v5401_v63  ;;  %v5402_v39 = vadd.f32 -1.4531521, %v5394_v27  ;;  %16603 = vpow2.f32 %v5484_v19 }
0x111c   :  { %v5422_v13 = vmul.f32 %v18629_v9, %v5414_v33  ;;  %v5415_v14 = vadd.f32 1.4214138, %v5407_v48  ;;  %v5395_v37 = vmul.f32 1.0614054, %v18657_v16  ;;  %v5488_v29 = vmul.f32 1.442695, %v5475_v12 }
0x111d   :  { %v5424_v0 = vmul.f32 %v18631_v45, %v5416_v46  ;;  %v5417_v56 = vadd.f32 1.4214138, %v5409_v15  ;;  %v5410_v30 = vmul.f32 %v18648_v55, %v5402_v39  ;;  %v5404_v46 = vadd.f32 -1.4531521, %v5396_v53  ;;  %v18665_v3 = vpop.eup %16593 }
0x111e   :  { %v5430_v6 = vadd.f32 -0.28449672, %v5422_v13  ;;  %v5423_v8 = vmul.f32 %v18636_v17, %v5415_v14  ;;  %16605 = vpow2.f32 %v5490_v42  ;;  %v16596_v42 = vpop.eup %16595 }
0x111f   :  { %v5432_v33 = vadd.f32 -0.28449672, %v5424_v0  ;;  %v5425_v61 = vmul.f32 %v18641_v50, %v5417_v56  ;;  %v5418_v63 = vadd.f32 1.4214138, %v5410_v30  ;;  %v5412_v52 = vmul.f32 %v18653_v31, %v5404_v46 }
0x1120   :  { %v5438_v34 = vmul.f32 %v18629_v9, %v5430_v6  ;;  %v5431_v32 = vadd.f32 -0.28449672, %v5423_v8  ;;  %v5403_v0 = vadd.f32 -1.4531521, %v5395_v37  ;;  %v5477_v6 = vmul.f32 %v5469_v20, %v18627_v57 }
0x1121   :  { %v5433_v48 = vadd.f32 -0.28449672, %v5425_v61  ;;  %v5440_v14 = vmul.f32 %v18631_v45, %v5432_v33  ;;  %v5426_v19 = vmul.f32 %v18648_v55, %v5418_v63  ;;  %v5420_v12 = vadd.f32 1.4214138, %v5412_v52 }
0x1122   :  { %v5446_v40 = vadd.f32 0.2548296, %v5438_v34  ;;  %v5439_v13 = vmul.f32 %v18636_v17, %v5431_v32  ;;  %v5411_v34 = vmul.f32 %v18657_v16, %v5403_v0  ;;  %16607 = vpow2.f32 %v5488_v29  ;;  %v16598_v32 = vpop.eup %16597 }
0x1123   :  { %v5441_v27 = vmul.f32 %v18641_v50, %v5433_v48  ;;  %v5397_v8 = vmul.f32 1.0614054, %v18665_v3  ;;  %v5434_v53 = vadd.f32 -0.28449672, %v5426_v19  ;;  %v5428_v57 = vmul.f32 %v18653_v31, %v5420_v12 }
0x1124   :  { %v5447_v15 = vadd.f32 0.2548296, %v5439_v13  ;;  %v5454_v56 = vmul.f32 %v18629_v9, %v5446_v40  ;;  %v5419_v20 = vadd.f32 1.4214138, %v5411_v34  ;;  %v5448_v61 = vadd.f32 0.2548296, %v5440_v14  ;;  %v16600_v40 = vpop.eup %16599 }
0x1125   :  { %v5405_v33 = vadd.f32 -1.4531521, %v5397_v8  ;;  %v5449_v30 = vadd.f32 0.2548296, %v5441_v27  ;;  %v5442_v46 = vmul.f32 %v18648_v55, %v5434_v53  ;;  %v5492_v37 = vmul.f32 1.442695, %v5477_v6 }
0x1126   :  { %v5455_v39 = vmul.f32 %v18636_v17, %v5447_v15  ;;  %v5436_v29 = vadd.f32 -0.28449672, %v5428_v57  ;;  %v5427_v48 = vmul.f32 %v18657_v16, %v5419_v20  ;;  %v5494_v17 = vmul.f32 %v16596_v42, %v5454_v56 }
0x1127   :  { %v5413_v9 = vmul.f32 %v18665_v3, %v5405_v33  ;;  %v5450_v63 = vadd.f32 0.2548296, %v5442_v46  ;;  %v16602_v15 = vpop.eup %16601  ;;  %v5456_v19 = vmul.f32 %v18631_v45, %v5448_v61  ;;  %v5457_v14 = vmul.f32 %v18641_v50, %v5449_v30 }
0x1128   :  { %v5495_v13 = vmul.f32 %v16598_v32, %v5455_v39  ;;  %v5444_v52 = vmul.f32 %v18653_v31, %v5436_v29  ;;  %v5435_v0 = vadd.f32 -0.28449672, %v5427_v48  ;;  %16609 = vpow2.f32 %v5492_v37  ;;  %v16604_v39 = vpop.eup %16603 }
0x1129   :  { %v5458_v27 = vmul.f32 %v18648_v55, %v5450_v63  ;;  %v5421_v8 = vadd.f32 1.4214138, %v5413_v9  ;;  %v5502_v53 = vsub.f32 1.0, %v5494_v17  ;;  %v5497_v45 = vmul.f32 %v16604_v39, %v5457_v14 }
0x112a   :  { %v5503_v6 = vsub.f32 1.0, %v5495_v13  ;;  %v5452_v12 = vadd.f32 0.2548296, %v5444_v52  ;;  %v5443_v34 = vmul.f32 %v18657_v16, %v5435_v0  ;;  %v5496_v50 = vmul.f32 %v16600_v40, %v5456_v19 }
0x112b   :  { %v5498_v56 = vmul.f32 %v16602_v15, %v5458_v27  ;;  %v5429_v20 = vmul.f32 %v18665_v3, %v5421_v8  ;;  %v16606_v33 = vpop.eup %16605  ;;  %v5518_v37 = vsub.f32 0.0, %v5502_v53  ;;  %v5534_v15 = vmul.f32 0.5, %v18576_v26 }
0x112c   :  { %v5460_v42 = vmul.f32 %v18653_v31, %v5452_v12  ;;  %v5451_v57 = vadd.f32 0.2548296, %v5443_v34  ;;  %v5519_v61 = vsub.f32 0.0, %v5503_v6  ;;  %v5505_v31 = vsub.f32 1.0, %v5497_v45 }
0x112d   :  { %v5506_v32 = vsub.f32 1.0, %v5498_v56  ;;  %v5437_v29 = vadd.f32 -0.28449672, %v5429_v20  ;;  %v5504_v40 = vsub.f32 1.0, %v5496_v50  ;;  %v5535_v14 = vmul.f32 0.5, %v18586_v59 }
0x112e   :  { %v5500_v55 = vmul.f32 %v16606_v33, %v5460_v42  ;;  %v5459_v30 = vmul.f32 %v18657_v16, %v5451_v57  ;;  %v5527_v52 = vsel %vm5511_vm2, %v5503_v6, %v5519_v61  ;;  %v5526_v16 = vsel %vm5510_vm3, %v5502_v53, %v5518_v37 }
0x112f   :  { %v16608_v46 = vpop.eup %16607  ;;  %v5522_v13 = vsub.f32 0.0, %v5506_v32  ;;  %v5445_v63 = vmul.f32 %v18665_v3, %v5437_v29  ;;  %v5543_v34 = vadd.f32 1.0, %v5527_v52  ;;  %v5521_v4 = vsub.f32 0.0, %v5505_v31 }
0x1130   :  { %v5508_v48 = vsub.f32 1.0, %v5500_v55  ;;  %v5499_v9 = vmul.f32 %v16608_v46, %v5459_v30  ;;  %v5542_v62 = vadd.f32 1.0, %v5526_v16  ;;  %v5520_v56 = vsub.f32 0.0, %v5504_v40 }
0x1131   :  { %v5530_v17 = vsel %vm5514_vm15, %v5506_v32, %v5522_v13  ;;  %v5453_v19 = vadd.f32 0.2548296, %v5445_v63  ;;  %v5538_v6 = vmul.f32 0.5, %v18603_v54  ;;  %v5539_v26 = vmul.f32 0.5, %v18610_v58 }
0x1132   :  { %v5507_v0 = vsub.f32 1.0, %v5499_v9  ;;  %v5546_v24 = vadd.f32 1.0, %v5530_v17  ;;  %v5524_v27 = vsub.f32 0.0, %v5508_v48  ;;  %v5551_v20 = vmul.f32 %v5543_v34, %v5535_v14 }
0x1133   :  { %v5461_v8 = vmul.f32 %v18665_v3, %v5453_v19  ;;  %v5529_v3 = vsel %vm5513_vm8, %v5505_v31, %v5521_v4  ;;  %v5550_v32 = vmul.f32 %v5542_v62, %v5534_v15  ;;  %v5528_v50 = vsel %vm5512_vm7, %v5504_v40, %v5520_v56  ;;  %v16091_v62 = vld [vmem:[%s20601_s1 + $0x638] sm:$0xff]  }
0x1134   :  { %v5523_v12 = vsub.f32 0.0, %v5507_v0  ;;  %v5554_v57 = vmul.f32 %v5546_v24, %v5538_v6  ;;  %v5532_v25 = vsel %vm5516_vm5, %v5508_v48, %v5524_v27  ;;  %v5545_v23 = vadd.f32 1.0, %v5529_v3  ;;  %v16092_v56 = vld [vmem:[%s20601_s1 + $0x678] sm:$0xff]   ;;  %v16095_v3 = vld [vmem:[%s20601_s1 + $0x628] sm:$0xff]  }
0x1135   :  { %v16610_v39 = vpop.eup %16609  ;;  %v5548_v54 = vadd.f32 1.0, %v5532_v25  ;;  %v5544_v58 = vadd.f32 1.0, %v5528_v50  ;;  %v5541_v37 = vmul.f32 0.5, %v18621_v11  ;;  %v5536_v29 = vmul.f32 0.5, %v18578_v41  ;;  %v16093_v25 = vld [vmem:[%s20601_s1 + $0x630] sm:$0xff]   ;;  %v16099_v50 = vld [vmem:[%s20601_s1 + $0x618] sm:$0xff]  }
0x1136   :  { %v5531_v53 = vsel %vm5515_vm4, %v5507_v0, %v5523_v12  ;;  %v5501_v42 = vmul.f32 %v16610_v39, %v5461_v8  ;;  %v5558_v30 = vpack.c.bf16 %v5554_v57, %v5550_v32  ;;  %v5553_v9 = vmul.f32 %v5545_v23, %v5537_v49  ;;  %v16098_v32 = vld [vmem:[%s20601_s1 + $0x660] sm:$0xff]   ;;  %v16103_v23 = vld [vmem:[%s20601_s1 + $0x608] sm:$0xff]  }
0x1137   :  { %v5547_v59 = vadd.f32 1.0, %v5531_v53  ;;  %v5556_v48 = vmul.f32 %v5548_v54, %v5540_v5  ;;  %v5552_v35 = vmul.f32 %v5544_v58, %v5536_v29  ;;  %v5630_v11 = vrot.slane %v18347_v44, %v17783_v28  ;;  %v16100_v54 = vld [vmem:[%s20601_s1 + $0x658] sm:$0xff]   ;;  %v16105_v58 = vld [vmem:[%s20601_s1 + $0x600] sm:$0xff]  }
0x1138   :  { %v5509_v45 = vsub.f32 1.0, %v5501_v42  ;;  %v16106_v5 = vld [vmem:[%s20601_s1 + $0x640] sm:$0xff]  }
0x1139   :  { %v5555_v33 = vmul.f32 %v5547_v59, %v5539_v26  ;;  %v5560_v63 = vpack.c.bf16 %v5556_v48, %v5552_v35 }
0x113a   :  { %v5525_v61 = vsub.f32 0.0, %v5509_v45 }
0x113b   :  { %v5559_v55 = vpack.c.bf16 %v5555_v33, %v5551_v20  ;;  %v16094_v20 = vld [vmem:[%s20601_s1 + $0x670] sm:$0xff]   ;;  %v16096_v33 = vld [vmem:[%s20601_s1 + $0x668] sm:$0xff]  }
0x113c   :  { %v5533_v46 = vsel %vm5517_vm9, %v5509_v45, %v5525_v61  ;;  %v16097_v45 = vld [vmem:[%s20601_s1 + $0x620] sm:$0xff]   ;;  %v16101_v61 = vld [vmem:[%s20601_s1 + $0x610] sm:$0xff]  }
0x113d   :  { %5855 = vmatprep.mubr.bf16.mxu0 %v5559_v55  ;;  %v5549_v13 = vadd.f32 1.0, %v5533_v46  ;;  %v16102_v55 = vld [vmem:[%s20601_s1 + $0x650] sm:$0xff]  }
0x113e   :  { %5856 = vmatmul.mubr.bf16.vlgmr.msra.gmra.mxu0 %v5558_v30  ;;  %v16104_v30 = vld [vmem:[%s20601_s1 + $0x648] sm:$0xff]  }
0x113f   :  { %15075 = vmatprep.mubr.msk.bf16.mxu0 %vm16767_vm0, %v16766_v2  ;;  %v5557_v31 = vmul.f32 %v5549_v13, %v5541_v37  ;;  %15060 = vmatpush3.bf16.msra.mxu0 %v16091_v62  ;;  %v16117_v62 = vld [vmem:[%s20601_s1 + $0x690] sm:$0xff]  }
0x1140   :  { %15061 = vmatprep.subr.bf16.mxu0 %v16766_v2 }
0x1141   :  { %v5561_v17 = vpack.c.bf16 %v5557_v31, %v5553_v9  ;;  %v12710_v9 = vld [vmem:[%s20602_s5 + $0x10] sm:$0x3f] }
0x1142   :  { %v5936_v35 = vrot.slane %v12710_v9, %v16911_v36 }
0x1143   :  { %5896 = vmatprep.mubr.bf16.mxu1 %v5561_v17  ;;  %15062 = vmatpush3.bf16.msra.mxu0 %v16093_v25  ;;  %v16127_v25 = vld [vmem:[%s20601_s1 + $0x728] sm:$0xff]  }
0x1144   :  { %5897 = vmatmul.mubr.bf16.vlgmr.msra.gmra.mxu1 %v5560_v63  ;;  %15063 = vmatprep.subr.bf16.mxu0 %v16766_v2 }
0x1145   :  { %15095 = vmatprep.mubr.msk.bf16.mxu1 %vm16767_vm0, %v16766_v2  ;;  %15080 = vmatpush3.bf16.msra.mxu1 %v16092_v56  ;;  %v16118_v56 = vld [vmem:[%s20601_s1 + $0x6d0] sm:$0xff]  }
0x1146   :  { %15081 = vmatprep.subr.bf16.mxu1 %v16766_v2 }
0x1147   :  { %15064 = vmatpush3.bf16.msra.mxu0 %v16095_v3  ;;  %v16129_v3 = vld [vmem:[%s20601_s1 + $0x720] sm:$0xff]  }
0x1148   :  { %15065 = vmatprep.subr.bf16.mxu0 %v16766_v2 }
0x1149   :  { %15082 = vmatpush3.bf16.msra.mxu1 %v16094_v20  ;;  %v16128_v20 = vld [vmem:[%s20601_s1 + $0x768] sm:$0xff]  }
0x114a   :  { %15083 = vmatprep.subr.bf16.mxu1 %v16766_v2 }
0x114b   :  { %15066 = vmatpush3.bf16.msra.mxu0 %v16097_v45  ;;  %v16131_v45 = vld [vmem:[%s20601_s1 + $0x718] sm:$0xff]  }
0x114c   :  { %15067 = vmatprep.subr.bf16.mxu0 %v16766_v2 }
0x114d   :  { %15084 = vmatpush3.bf16.msra.mxu1 %v16096_v33  ;;  %v16130_v33 = vld [vmem:[%s20601_s1 + $0x760] sm:$0xff]  }
0x114e   :  { %15085 = vmatprep.subr.bf16.mxu1 %v16766_v2 }
0x114f   :  { %15068 = vmatpush3.bf16.msra.mxu0 %v16099_v50  ;;  %v16133_v50 = vld [vmem:[%s20601_s1 + $0x710] sm:$0xff]  }
0x1150   :  { %15069 = vmatprep.subr.bf16.mxu0 %v16766_v2 }
0x1151   :  { %15086 = vmatpush3.bf16.msra.mxu1 %v16098_v32  ;;  %v16132_v32 = vld [vmem:[%s20601_s1 + $0x758] sm:$0xff]  }
0x1152   :  { %15087 = vmatprep.subr.bf16.mxu1 %v16766_v2 }
0x1153   :  { %15070 = vmatpush3.bf16.msra.mxu0 %v16101_v61  ;;  %v16135_v61 = vld [vmem:[%s20601_s1 + $0x708] sm:$0xff]  }
0x1154   :  { %15071 = vmatprep.subr.bf16.mxu0 %v16766_v2 }
0x1155   :  { %15088 = vmatpush3.bf16.msra.mxu1 %v16100_v54  ;;  %v16134_v54 = vld [vmem:[%s20601_s1 + $0x750] sm:$0xff]  }
0x1156   :  { %15089 = vmatprep.subr.bf16.mxu1 %v16766_v2 }
0x1157   :  { %15072 = vmatpush3.bf16.msra.mxu0 %v16103_v23  ;;  %v16137_v23 = vld [vmem:[%s20601_s1 + $0x700] sm:$0xff]  }
0x1158   :  { %15073 = vmatprep.subr.bf16.mxu0 %v16766_v2 }
0x1159   :  { %15090 = vmatpush3.bf16.msra.mxu1 %v16102_v55  ;;  %v16136_v55 = vld [vmem:[%s20601_s1 + $0x748] sm:$0xff]  }
0x115a   :  { %15091 = vmatprep.subr.bf16.mxu1 %v16766_v2 }
0x115b   :  { %15074 = vmatpush3.bf16.msra.mxu0 %v16105_v58  ;;  %v16139_v58 = vld [vmem:[%s20601_s1 + $0x7b8] sm:$0xff]  }
0x115c   :  { %15099 = vmatprep.subr.bf16.mxu0 %v16766_v2 }
0x115d   :  { %15092 = vmatpush3.bf16.msra.mxu1 %v16104_v30  ;;  %v16138_v30 = vld [vmem:[%s20601_s1 + $0x740] sm:$0xff]  }
0x115e   :  { %15093 = vmatprep.subr.bf16.mxu1 %v16766_v2 }
0x1161   :  { %15094 = vmatpush3.bf16.msra.mxu1 %v16106_v5  ;;  %v16140_v5 = vld [vmem:[%s20601_s1 + $0x7f8] sm:$0xff]  }
0x1162   :  { %15119 = vmatprep.subr.bf16.mxu1 %v16766_v2 }
0x11fe   :  { %v14022_v22 = vpop.f32.mrf.mxu0 }
0x1200   :  { %v14023_v1 = vpop.f32.mrf.mxu0 }
0x1201   :  { %v14024_v41 = vadd.f32 %v14023_v1, %v14022_v22  ;;  %v5942_v22 = vrot.slane %v12710_v9, %v16914_v38  ;;  %v16147_v9 = vld [vmem:[%s20601_s1 + $0x798] sm:$0xff]  }
0x1202   :  { %v14025_v40 = vpop.f32.mrf.mxu0 }
0x1203   :  { %v5858_v16 = vadd.f32 %v14024_v41, %v5630_v11 }
0x1204   :  { %v14026_v52 = vpop.f32.mrf.mxu0  ;;  %v14044_v0 = vpop.f32.mrf.mxu1 }
0x1205   :  { %v14027_v15 = vadd.f32 %v14026_v52, %v14025_v40 }
0x1206   :  { %v14045_v19 = vpop.f32.mrf.mxu1 }
0x1207   :  { %v14046_v14 = vadd.f32 %v14045_v19, %v14044_v0  ;;  %v5861_v12 = vadd.f32 %v14027_v15, %v5630_v11  ;;  %v16107_v0 = vld [vmem:[%s20601_s1 + $0x6b8] sm:$0xff]   ;;  %v16109_v19 = vld [vmem:[%s20601_s1 + $0x6b0] sm:$0xff]  }
0x1208   :  { %v14047_v24 = vpop.f32.mrf.mxu1 }
0x1209   :  { %v5899_v27 = vadd.f32 %v14046_v14, %v5858_v16  ;;  %v16108_v16 = vld [vmem:[%s20601_s1 + $0x6f8] sm:$0xff]   ;;  %v16110_v14 = vld [vmem:[%s20601_s1 + $0x6f0] sm:$0xff]  }
0x120a   :  { %v14048_v34 = vpop.f32.mrf.mxu1 }
0x120b   :  { %v14049_v4 = vadd.f32 %v14048_v34, %v14047_v24  ;;  %v18713_v8 = vadd.f32 %v5899_v27, %v18352_v7  ;;  %v16111_v24 = vld [vmem:[%s20601_s1 + $0x6a8] sm:$0xff]   ;;  %v16114_v34 = vld [vmem:[%s20601_s1 + $0x6e0] sm:$0xff]  }
0x120c   :  { %v16112_v27 = vld [vmem:[%s20601_s1 + $0x6e8] sm:$0xff]  }
0x120d   :  { %v5902_v39 = vadd.f32 %v14049_v4, %v5861_v12  ;;  %5911 = vadd.xlane.f32.xlu0 %v18713_v8  ;;  %v16113_v12 = vld [vmem:[%s20601_s1 + $0x6a0] sm:$0xff]   ;;  %v16115_v4 = vld [vmem:[%s20601_s1 + $0x698] sm:$0xff]  }
0x120f   :  { %v18717_v44 = vadd.f32 %v5902_v39, %v18356_v47  ;;  %v16116_v39 = vld [vmem:[%s20601_s1 + $0x6d8] sm:$0xff]  }
0x1211   :  { %5913 = vadd.xlane.f32.xlu1 %v18717_v44 }
0x1296   :  { %v5912_v7 = vpop.xlane.xlu0 %5911 }
0x1297   :  { %v5915_v6 = vmul.f32 0.0078125, %v5912_v7  ;;  %v16119_v7 = vld [vmem:[%s20601_s1 + $0x688] sm:$0xff]  }
0x1299   :  { %v5917_v47 = vsub.f32 %v18713_v8, %v5915_v6  ;;  %v16120_v6 = vld [vmem:[%s20601_s1 + $0x6c8] sm:$0xff]  }
0x129a   :  { %v5914_v53 = vpop.xlane.xlu1 %5913 }
0x129b   :  { %v5916_v26 = vmul.f32 0.0078125, %v5914_v53  ;;  %v5919_v59 = vmul.f32 %v5917_v47, %v5917_v47  ;;  %v16122_v53 = vld [vmem:[%s20601_s1 + $0x6c0] sm:$0xff]  }
0x129d   :  { %v5918_v42 = vsub.f32 %v18717_v44, %v5916_v26  ;;  %5921 = vadd.xlane.f32.xlu0 %v5919_v59  ;;  %v16123_v26 = vld [vmem:[%s20601_s1 + $0x738] sm:$0xff]  }
0x129e   :  { %v16124_v59 = vld [vmem:[%s20601_s1 + $0x778] sm:$0xff]  }
0x129f   :  { %v5920_v57 = vmul.f32 %v5918_v42, %v5918_v42 }
0x12a1   :  { %5923 = vadd.xlane.f32.xlu1 %v5920_v57  ;;  %v16126_v57 = vld [vmem:[%s20601_s1 + $0x770] sm:$0xff]  }
0x1326   :  { %v5922_v46 = vpop.xlane.xlu0 %5921 }
0x1327   :  { %v5925_v49 = vmul.f32 0.0078125, %v5922_v46  ;;  %v16141_v46 = vld [vmem:[%s20601_s1 + $0x7b0] sm:$0xff]  }
0x1329   :  { %v5927_v37 = vadd.f32 1e-05, %v5925_v49  ;;  %v16142_v49 = vld [vmem:[%s20601_s1 + $0x7f0] sm:$0xff]  }
0x132a   :  { %v5924_v13 = vpop.xlane.xlu1 %5923 }
0x132b   :  { %16611 = vrsqrt.f32 %v5927_v37  ;;  %v5926_v29 = vmul.f32 0.0078125, %v5924_v13  ;;  %v16143_v37 = vld [vmem:[%s20601_s1 + $0x7a8] sm:$0xff]  }
0x132c   :  { %v16144_v13 = vld [vmem:[%s20601_s1 + $0x7e8] sm:$0xff]  }
0x132d   :  { %v5928_v48 = vadd.f32 1e-05, %v5926_v29  ;;  %v16145_v29 = vld [vmem:[%s20601_s1 + $0x7a0] sm:$0xff]  }
0x132f   :  { %16613 = vrsqrt.f32 %v5928_v48  ;;  %v16146_v48 = vld [vmem:[%s20601_s1 + $0x7e0] sm:$0xff]  }
0x1338   :  { %v16612_v31 = vpop.eup %16611 }
0x1339   :  { %v5931_v17 = vmul.f32 %v16612_v31, %v5917_v47  ;;  %v16121_v47 = vld [vmem:[%s20601_s1 + $0x680] sm:$0xff]   ;;  %v16148_v31 = vld [vmem:[%s20601_s1 + $0x7d8] sm:$0xff]  }
0x133b   :  { %v5937_v1 = vmul.f32 %v5936_v35, %v5931_v17  ;;  %v16150_v17 = vld [vmem:[%s20601_s1 + $0x7d0] sm:$0xff]  }
0x133c   :  { %v16614_v63 = vpop.eup %16613 }
0x133d   :  { %v5932_v11 = vmul.f32 %v16614_v63, %v5918_v42  ;;  %v5943_v40 = vadd.f32 %v5942_v22, %v5937_v1  ;;  %v16125_v42 = vld [vmem:[%s20601_s1 + $0x730] sm:$0xff]   ;;  %v16151_v63 = vld [vmem:[%s20601_s1 + $0x788] sm:$0xff]   ;;  %v16153_v1 = vld [vmem:[%s20601_s1 + $0x780] sm:$0xff]  }
0x133f   :  { %v5938_v41 = vmul.f32 %v5936_v35, %v5932_v11  ;;  %v16149_v35 = vld [vmem:[%s20601_s1 + $0x790] sm:$0xff]   ;;  %v16154_v11 = vld [vmem:[%s20601_s1 + $0x7c0] sm:$0xff]  }
0x1341   :  { %v5944_v52 = vadd.f32 %v5942_v22, %v5938_v41  ;;  %v16152_v22 = vld [vmem:[%s20601_s1 + $0x7c8] sm:$0xff]   ;;  %v16155_v41 = vld [vmem:[%s20601_s1 + $0x838] sm:$0xff]  }
0x1343   :  { %v18797_v15 = vpack.c.bf16 %v5944_v52, %v5943_v40  ;;  %v16156_v40 = vld [vmem:[%s20601_s1 + $0x878] sm:$0xff]   ;;  %v16157_v52 = vld [vmem:[%s20601_s1 + $0x830] sm:$0xff]  }
0x1345   :  { %15076 = vmatmul.mubr.bf16.vlgmr.msra.gmra.mxu0 %v18797_v15  ;;  %15096 = vmatmul.mubr.bf16.vlgmr.msra.gmra.mxu1 %v18797_v15 }
0x1346   :  { %15100 = vmatpush3.bf16.msra.mxu0 %v16107_v0  ;;  %15120 = vmatpush3.bf16.msra.mxu1 %v16108_v16  ;;  %v16158_v0 = vld [vmem:[%s20601_s1 + $0x870] sm:$0xff]   ;;  %v16159_v16 = vld [vmem:[%s20601_s1 + $0x828] sm:$0xff]  }
0x1347   :  { %15101 = vmatprep.subr.bf16.mxu0 %v16766_v2  ;;  %15121 = vmatprep.subr.bf16.mxu1 %v16766_v2 }
0x1348   :  { %15115 = vmatprep.mubr.msk.bf16.mxu0 %vm16767_vm0, %v16766_v2  ;;  %15135 = vmatprep.mubr.msk.bf16.mxu1 %vm16767_vm0, %v16766_v2 }
0x134a   :  { %15102 = vmatpush3.bf16.msra.mxu0 %v16109_v19  ;;  %15122 = vmatpush3.bf16.msra.mxu1 %v16110_v14  ;;  %v16160_v19 = vld [vmem:[%s20601_s1 + $0x868] sm:$0xff]   ;;  %v16161_v14 = vld [vmem:[%s20601_s1 + $0x820] sm:$0xff]  }
0x134b   :  { %15103 = vmatprep.subr.bf16.mxu0 %v16766_v2  ;;  %15123 = vmatprep.subr.bf16.mxu1 %v16766_v2 }
0x134e   :  { %15104 = vmatpush3.bf16.msra.mxu0 %v16111_v24  ;;  %15124 = vmatpush3.bf16.msra.mxu1 %v16112_v27  ;;  %v16162_v24 = vld [vmem:[%s20601_s1 + $0x860] sm:$0xff]   ;;  %v16163_v27 = vld [vmem:[%s20601_s1 + $0x818] sm:$0xff]  }
0x134f   :  { %15105 = vmatprep.subr.bf16.mxu0 %v16766_v2  ;;  %15125 = vmatprep.subr.bf16.mxu1 %v16766_v2 }
0x1352   :  { %15106 = vmatpush3.bf16.msra.mxu0 %v16113_v12  ;;  %15126 = vmatpush3.bf16.msra.mxu1 %v16114_v34  ;;  %v16164_v12 = vld [vmem:[%s20601_s1 + $0x858] sm:$0xff]   ;;  %v16165_v34 = vld [vmem:[%s20601_s1 + $0x810] sm:$0xff]  }
0x1353   :  { %15107 = vmatprep.subr.bf16.mxu0 %v16766_v2  ;;  %15127 = vmatprep.subr.bf16.mxu1 %v16766_v2 }
0x1356   :  { %15108 = vmatpush3.bf16.msra.mxu0 %v16115_v4  ;;  %15128 = vmatpush3.bf16.msra.mxu1 %v16116_v39  ;;  %v16166_v4 = vld [vmem:[%s20601_s1 + $0x850] sm:$0xff]   ;;  %v16167_v39 = vld [vmem:[%s20601_s1 + $0x808] sm:$0xff]  }
0x1357   :  { %15109 = vmatprep.subr.bf16.mxu0 %v16766_v2  ;;  %15129 = vmatprep.subr.bf16.mxu1 %v16766_v2 }
0x135a   :  { %15110 = vmatpush3.bf16.msra.mxu0 %v16117_v62  ;;  %15130 = vmatpush3.bf16.msra.mxu1 %v16118_v56  ;;  %v16168_v62 = vld [vmem:[%s20601_s1 + $0x848] sm:$0xff]   ;;  %v16169_v56 = vld [vmem:[%s20601_s1 + $0x800] sm:$0xff]  }
0x135b   :  { %15111 = vmatprep.subr.bf16.mxu0 %v16766_v2  ;;  %15131 = vmatprep.subr.bf16.mxu1 %v16766_v2 }
0x135e   :  { %15112 = vmatpush3.bf16.msra.mxu0 %v16119_v7  ;;  %15132 = vmatpush3.bf16.msra.mxu1 %v16120_v6  ;;  %v16170_v7 = vld [vmem:[%s20601_s1 + $0x840] sm:$0xff]   ;;  %v16171_v6 = vld [vmem:[%s20601_s1 + $0x8b8] sm:$0xff]  }
0x135f   :  { %15113 = vmatprep.subr.bf16.mxu0 %v16766_v2  ;;  %15133 = vmatprep.subr.bf16.mxu1 %v16766_v2 }
0x1362   :  { %15114 = vmatpush3.bf16.msra.mxu0 %v16121_v47  ;;  %15134 = vmatpush3.bf16.msra.mxu1 %v16122_v53  ;;  %v16172_v47 = vld [vmem:[%s20601_s1 + $0x8f8] sm:$0xff]   ;;  %v16173_v53 = vld [vmem:[%s20601_s1 + $0x8b0] sm:$0xff]  }
0x1363   :  { %15139 = vmatprep.subr.bf16.mxu0 %v16766_v2  ;;  %15159 = vmatprep.subr.bf16.mxu1 %v16766_v2 }
0x1365   :  { %15116 = vmatmul.mubr.bf16.vlgmr.msra.gmra.mxu0 %v18797_v15  ;;  %15136 = vmatmul.mubr.bf16.vlgmr.msra.gmra.mxu1 %v18797_v15 }
0x1366   :  { %15140 = vmatpush3.bf16.msra.mxu0 %v16123_v26  ;;  %15160 = vmatpush3.bf16.msra.mxu1 %v16124_v59  ;;  %v16174_v26 = vld [vmem:[%s20601_s1 + $0x8f0] sm:$0xff]   ;;  %v16175_v59 = vld [vmem:[%s20601_s1 + $0x8a8] sm:$0xff]  }
0x1367   :  { %15141 = vmatprep.subr.bf16.mxu0 %v16766_v2  ;;  %15161 = vmatprep.subr.bf16.mxu1 %v16766_v2 }
0x1368   :  { %15155 = vmatprep.mubr.msk.bf16.mxu0 %vm16767_vm0, %v16766_v2  ;;  %15175 = vmatprep.mubr.msk.bf16.mxu1 %vm16767_vm0, %v16766_v2 }
0x136a   :  { %15142 = vmatpush3.bf16.msra.mxu0 %v16125_v42  ;;  %15162 = vmatpush3.bf16.msra.mxu1 %v16126_v57  ;;  %v16176_v42 = vld [vmem:[%s20601_s1 + $0x8e8] sm:$0xff]   ;;  %v16177_v57 = vld [vmem:[%s20601_s1 + $0x8a0] sm:$0xff]  }
0x136b   :  { %15143 = vmatprep.subr.bf16.mxu0 %v16766_v2  ;;  %15163 = vmatprep.subr.bf16.mxu1 %v16766_v2 }
0x136e   :  { %15144 = vmatpush3.bf16.msra.mxu0 %v16127_v25  ;;  %15164 = vmatpush3.bf16.msra.mxu1 %v16128_v20  ;;  %v16178_v25 = vld [vmem:[%s20601_s1 + $0x8e0] sm:$0xff]   ;;  %v16179_v20 = vld [vmem:[%s20601_s1 + $0x898] sm:$0xff]  }
0x136f   :  { %15145 = vmatprep.subr.bf16.mxu0 %v16766_v2  ;;  %15165 = vmatprep.subr.bf16.mxu1 %v16766_v2 }
0x1372   :  { %15146 = vmatpush3.bf16.msra.mxu0 %v16129_v3  ;;  %15166 = vmatpush3.bf16.msra.mxu1 %v16130_v33  ;;  %v16180_v3 = vld [vmem:[%s20601_s1 + $0x8d8] sm:$0xff]   ;;  %v16181_v33 = vld [vmem:[%s20601_s1 + $0x890] sm:$0xff]  }
0x1373   :  { %15147 = vmatprep.subr.bf16.mxu0 %v16766_v2  ;;  %15167 = vmatprep.subr.bf16.mxu1 %v16766_v2 }
0x1376   :  { %15148 = vmatpush3.bf16.msra.mxu0 %v16131_v45  ;;  %15168 = vmatpush3.bf16.msra.mxu1 %v16132_v32  ;;  %v16182_v45 = vld [vmem:[%s20601_s1 + $0x8d0] sm:$0xff]   ;;  %v16183_v32 = vld [vmem:[%s20601_s1 + $0x888] sm:$0xff]  }
0x1377   :  { %15149 = vmatprep.subr.bf16.mxu0 %v16766_v2  ;;  %15169 = vmatprep.subr.bf16.mxu1 %v16766_v2 }
0x137a   :  { %15150 = vmatpush3.bf16.msra.mxu0 %v16133_v50  ;;  %15170 = vmatpush3.bf16.msra.mxu1 %v16134_v54  ;;  %v16184_v50 = vld [vmem:[%s20601_s1 + $0x8c8] sm:$0xff]   ;;  %v16185_v54 = vld [vmem:[%s20601_s1 + $0x880] sm:$0xff]  }
0x137b   :  { %15151 = vmatprep.subr.bf16.mxu0 %v16766_v2  ;;  %15171 = vmatprep.subr.bf16.mxu1 %v16766_v2 }
0x137e   :  { %15152 = vmatpush3.bf16.msra.mxu0 %v16135_v61  ;;  %15172 = vmatpush3.bf16.msra.mxu1 %v16136_v55  ;;  %v16186_v61 = vld [vmem:[%s20601_s1 + $0x8c0] sm:$0xff]  }
0x137f   :  { %15153 = vmatprep.subr.bf16.mxu0 %v16766_v2  ;;  %15173 = vmatprep.subr.bf16.mxu1 %v16766_v2 }
0x1382   :  { %15154 = vmatpush3.bf16.msra.mxu0 %v16137_v23  ;;  %15174 = vmatpush3.bf16.msra.mxu1 %v16138_v30 }
0x1383   :  { %15179 = vmatprep.subr.bf16.mxu0 %v16766_v2  ;;  %15199 = vmatprep.subr.bf16.mxu1 %v16766_v2 }
0x1385   :  { %15156 = vmatmul.mubr.bf16.vlgmr.msra.gmra.mxu0 %v18797_v15  ;;  %15176 = vmatmul.mubr.bf16.vlgmr.msra.gmra.mxu1 %v18797_v15 }
0x1386   :  { %15180 = vmatpush3.bf16.msra.mxu0 %v16139_v58  ;;  %15200 = vmatpush3.bf16.msra.mxu1 %v16140_v5 }
0x1387   :  { %15181 = vmatprep.subr.bf16.mxu0 %v16766_v2  ;;  %15201 = vmatprep.subr.bf16.mxu1 %v16766_v2 }
0x1388   :  { %15195 = vmatprep.mubr.msk.bf16.mxu0 %vm16767_vm0, %v16766_v2  ;;  %15215 = vmatprep.mubr.msk.bf16.mxu1 %vm16767_vm0, %v16766_v2 }
0x138a   :  { %15182 = vmatpush3.bf16.msra.mxu0 %v16141_v46  ;;  %15202 = vmatpush3.bf16.msra.mxu1 %v16142_v49 }
0x138b   :  { %15183 = vmatprep.subr.bf16.mxu0 %v16766_v2  ;;  %15203 = vmatprep.subr.bf16.mxu1 %v16766_v2 }
0x138e   :  { %15184 = vmatpush3.bf16.msra.mxu0 %v16143_v37  ;;  %15204 = vmatpush3.bf16.msra.mxu1 %v16144_v13 }
0x138f   :  { %15185 = vmatprep.subr.bf16.mxu0 %v16766_v2  ;;  %15205 = vmatprep.subr.bf16.mxu1 %v16766_v2 }
0x1392   :  { %15186 = vmatpush3.bf16.msra.mxu0 %v16145_v29  ;;  %15206 = vmatpush3.bf16.msra.mxu1 %v16146_v48 }
0x1393   :  { %15187 = vmatprep.subr.bf16.mxu0 %v16766_v2  ;;  %15207 = vmatprep.subr.bf16.mxu1 %v16766_v2 }
0x1396   :  { %15188 = vmatpush3.bf16.msra.mxu0 %v16147_v9  ;;  %15208 = vmatpush3.bf16.msra.mxu1 %v16148_v31 }
0x1397   :  { %15189 = vmatprep.subr.bf16.mxu0 %v16766_v2  ;;  %15209 = vmatprep.subr.bf16.mxu1 %v16766_v2 }
0x139a   :  { %15190 = vmatpush3.bf16.msra.mxu0 %v16149_v35  ;;  %15210 = vmatpush3.bf16.msra.mxu1 %v16150_v17 }
0x139b   :  { %15191 = vmatprep.subr.bf16.mxu0 %v16766_v2  ;;  %15211 = vmatprep.subr.bf16.mxu1 %v16766_v2 }
0x139e   :  { %15192 = vmatpush3.bf16.msra.mxu0 %v16151_v63  ;;  %15212 = vmatpush3.bf16.msra.mxu1 %v16152_v22 }
0x139f   :  { %15193 = vmatprep.subr.bf16.mxu0 %v16766_v2  ;;  %15213 = vmatprep.subr.bf16.mxu1 %v16766_v2 }
0x13a2   :  { %15194 = vmatpush3.bf16.msra.mxu0 %v16153_v1  ;;  %15214 = vmatpush3.bf16.msra.mxu1 %v16154_v11 }
0x13a3   :  { %15219 = vmatprep.subr.bf16.mxu0 %v16766_v2  ;;  %15239 = vmatprep.subr.bf16.mxu1 %v16766_v2 }
0x13a5   :  { %15196 = vmatmul.mubr.bf16.vlgmr.msra.gmra.mxu0 %v18797_v15  ;;  %15216 = vmatmul.mubr.bf16.vlgmr.msra.gmra.mxu1 %v18797_v15 }
0x13a6   :  { %15220 = vmatpush3.bf16.msra.mxu0 %v16155_v41  ;;  %15240 = vmatpush3.bf16.msra.mxu1 %v16156_v40 }
0x13a7   :  { %15221 = vmatprep.subr.bf16.mxu0 %v16766_v2  ;;  %15241 = vmatprep.subr.bf16.mxu1 %v16766_v2 }
0x13a8   :  { %15235 = vmatprep.mubr.msk.bf16.mxu0 %vm16767_vm0, %v16766_v2  ;;  %15255 = vmatprep.mubr.msk.bf16.mxu1 %vm16767_vm0, %v16766_v2 }
0x13aa   :  { %15222 = vmatpush3.bf16.msra.mxu0 %v16157_v52  ;;  %15242 = vmatpush3.bf16.msra.mxu1 %v16158_v0 }
0x13ab   :  { %15223 = vmatprep.subr.bf16.mxu0 %v16766_v2  ;;  %15243 = vmatprep.subr.bf16.mxu1 %v16766_v2 }
0x13ae   :  { %15224 = vmatpush3.bf16.msra.mxu0 %v16159_v16  ;;  %15244 = vmatpush3.bf16.msra.mxu1 %v16160_v19 }
0x13af   :  { %15225 = vmatprep.subr.bf16.mxu0 %v16766_v2  ;;  %15245 = vmatprep.subr.bf16.mxu1 %v16766_v2 }
0x13b2   :  { %15226 = vmatpush3.bf16.msra.mxu0 %v16161_v14  ;;  %15246 = vmatpush3.bf16.msra.mxu1 %v16162_v24 }
0x13b3   :  { %15227 = vmatprep.subr.bf16.mxu0 %v16766_v2  ;;  %15247 = vmatprep.subr.bf16.mxu1 %v16766_v2 }
0x13b6   :  { %15228 = vmatpush3.bf16.msra.mxu0 %v16163_v27  ;;  %15248 = vmatpush3.bf16.msra.mxu1 %v16164_v12 }
0x13b7   :  { %15229 = vmatprep.subr.bf16.mxu0 %v16766_v2  ;;  %15249 = vmatprep.subr.bf16.mxu1 %v16766_v2 }
0x13ba   :  { %15230 = vmatpush3.bf16.msra.mxu0 %v16165_v34  ;;  %15250 = vmatpush3.bf16.msra.mxu1 %v16166_v4 }
0x13bb   :  { %15231 = vmatprep.subr.bf16.mxu0 %v16766_v2  ;;  %15251 = vmatprep.subr.bf16.mxu1 %v16766_v2 }
0x13be   :  { %15232 = vmatpush3.bf16.msra.mxu0 %v16167_v39  ;;  %15252 = vmatpush3.bf16.msra.mxu1 %v16168_v62 }
0x13bf   :  { %15233 = vmatprep.subr.bf16.mxu0 %v16766_v2  ;;  %15253 = vmatprep.subr.bf16.mxu1 %v16766_v2 }
0x13c2   :  { %15234 = vmatpush3.bf16.msra.mxu0 %v16169_v56  ;;  %15254 = vmatpush3.bf16.msra.mxu1 %v16170_v7 }
0x13c3   :  { %15259 = vmatprep.subr.bf16.mxu0 %v16766_v2  ;;  %15279 = vmatprep.subr.bf16.mxu1 %v16766_v2 }
0x13c5   :  { %15236 = vmatmul.mubr.bf16.vlgmr.msra.gmra.mxu0 %v18797_v15  ;;  %15256 = vmatmul.mubr.bf16.vlgmr.msra.gmra.mxu1 %v18797_v15 }
0x13c6   :  { %15260 = vmatpush3.bf16.msra.mxu0 %v16171_v6  ;;  %15280 = vmatpush3.bf16.msra.mxu1 %v16172_v47 }
0x13c7   :  { %15261 = vmatprep.subr.bf16.mxu0 %v16766_v2  ;;  %15281 = vmatprep.subr.bf16.mxu1 %v16766_v2 }
0x13c8   :  { %15275 = vmatprep.mubr.msk.bf16.mxu0 %vm16767_vm0, %v16766_v2  ;;  %15295 = vmatprep.mubr.msk.bf16.mxu1 %vm16767_vm0, %v16766_v2 }
0x13ca   :  { %15262 = vmatpush3.bf16.msra.mxu0 %v16173_v53  ;;  %15282 = vmatpush3.bf16.msra.mxu1 %v16174_v26 }
0x13cb   :  { %15263 = vmatprep.subr.bf16.mxu0 %v16766_v2  ;;  %15283 = vmatprep.subr.bf16.mxu1 %v16766_v2 }
0x13ce   :  { %15264 = vmatpush3.bf16.msra.mxu0 %v16175_v59  ;;  %15284 = vmatpush3.bf16.msra.mxu1 %v16176_v42 }
0x13cf   :  { %15265 = vmatprep.subr.bf16.mxu0 %v16766_v2  ;;  %15285 = vmatprep.subr.bf16.mxu1 %v16766_v2 }
0x13d2   :  { %15266 = vmatpush3.bf16.msra.mxu0 %v16177_v57  ;;  %15286 = vmatpush3.bf16.msra.mxu1 %v16178_v25 }
0x13d3   :  { %15267 = vmatprep.subr.bf16.mxu0 %v16766_v2  ;;  %15287 = vmatprep.subr.bf16.mxu1 %v16766_v2 }
0x13d6   :  { %15268 = vmatpush3.bf16.msra.mxu0 %v16179_v20  ;;  %15288 = vmatpush3.bf16.msra.mxu1 %v16180_v3 }
0x13d7   :  { %15269 = vmatprep.subr.bf16.mxu0 %v16766_v2  ;;  %15289 = vmatprep.subr.bf16.mxu1 %v16766_v2 }
0x13da   :  { %15270 = vmatpush3.bf16.msra.mxu0 %v16181_v33  ;;  %15290 = vmatpush3.bf16.msra.mxu1 %v16182_v45 }
0x13db   :  { %15271 = vmatprep.subr.bf16.mxu0 %v16766_v2  ;;  %15291 = vmatprep.subr.bf16.mxu1 %v16766_v2 }
0x13de   :  { %15272 = vmatpush3.bf16.msra.mxu0 %v16183_v32  ;;  %15292 = vmatpush3.bf16.msra.mxu1 %v16184_v50 }
0x13df   :  { %15273 = vmatprep.subr.bf16.mxu0 %v16766_v2  ;;  %15293 = vmatprep.subr.bf16.mxu1 %v16766_v2 }
0x13e2   :  { %15274 = vmatpush3.bf16.msra.mxu0 %v16185_v54  ;;  %15294 = vmatpush3.bf16.msra.mxu1 %v16186_v61 }
0x13e3   :  { %15299 = vmatprep.subr.bf16.mxu0 %v16766_v2  ;;  %15305 = vmatprep.subr.bf16.mxu1 %v16766_v2 }
0x13e5   :  { %15276 = vmatmul.mubr.bf16.vlgmr.msra.gmra.mxu0 %v18797_v15  ;;  %15296 = vmatmul.mubr.bf16.vlgmr.msra.gmra.mxu1 %v18797_v15 }
0x13e6   :  { %15301 = vmatprep.mubr.msk.bf16.mxu0 %vm16767_vm0, %v16766_v2  ;;  %15307 = vmatprep.mubr.msk.bf16.mxu1 %vm16767_vm0, %v16766_v2 }
0x1405   :  { %v6093_v55 = vpop.f32.mrf.mxu0  ;;  %v6182_v23 = vpop.f32.mrf.mxu1 }
0x1407   :  { %v15077_v30 = vpop.f32.mrf.mxu0  ;;  %v15097_v58 = vpop.f32.mrf.mxu1 }
0x1409   :  { %v6096_v5 = vpop.f32.mrf.mxu0  ;;  %v6185_v46 = vpop.f32.mrf.mxu1 }
0x140a   :  { %v7209_v49 = vpack.c.bf16 %v6096_v5, %v6093_v55  ;;  %v7210_v37 = vpack.c.bf16 %v6185_v46, %v6182_v23 }
0x140b   :  { %v15078_v13 = vpop.f32.mrf.mxu0  ;;  %v15098_v29 = vpop.f32.mrf.mxu1 }
0x1425   :  { %v6271_v48 = vpop.f32.mrf.mxu0  ;;  %v6360_v9 = vpop.f32.mrf.mxu1 }
0x1427   :  { %v15117_v31 = vpop.f32.mrf.mxu0  ;;  %v15137_v15 = vpop.f32.mrf.mxu1 }
0x1429   :  { %v6274_v35 = vpop.f32.mrf.mxu0  ;;  %v6363_v17 = vpop.f32.mrf.mxu1 }
0x142a   :  { %v7211_v63 = vpack.c.bf16 %v6274_v35, %v6271_v48  ;;  %v7212_v22 = vpack.c.bf16 %v6363_v17, %v6360_v9 }
0x142b   :  { %v15118_v1 = vpop.f32.mrf.mxu0  ;;  %v15138_v11 = vpop.f32.mrf.mxu1 }
0x1445   :  { %v6514_v41 = vpop.f32.mrf.mxu0  ;;  %v6603_v40 = vpop.f32.mrf.mxu1 }
0x1447   :  { %v15157_v52 = vpop.f32.mrf.mxu0  ;;  %v15177_v0 = vpop.f32.mrf.mxu1 }
0x1449   :  { %v6517_v16 = vpop.f32.mrf.mxu0  ;;  %v6606_v19 = vpop.f32.mrf.mxu1 }
0x144a   :  { %v7213_v14 = vpack.c.bf16 %v6517_v16, %v6514_v41  ;;  %v7214_v24 = vpack.c.bf16 %v6606_v19, %v6603_v40 }
0x144b   :  { %v15158_v27 = vpop.f32.mrf.mxu0  ;;  %v15178_v12 = vpop.f32.mrf.mxu1 }
0x144c   :  { %v7221_v34 = vsel %vm1360_vm1, %v7213_v14, 0  ;;  %v7268_v4 = vsel %vm1360_vm1, %v7214_v24, 0 }
0x144d   :  { %15300 = vmatpush3.bf16.xpose.msra.mxu0 %v7221_v34  ;;  %15306 = vmatpush3.bf16.xpose.msra.mxu1 %v7268_v4 }
0x144e   :  { %15311 = vmatprep.subr.bf16.mxu0 %v16766_v2  ;;  %15317 = vmatprep.subr.bf16.mxu1 %v16766_v2 }
0x1454   :  { %15302 = vmatmul.mubr.msk.bf16.vlgmr.msra.gmra.mxu0 %vm1360_vm1, %v7209_v49  ;;  %15308 = vmatmul.mubr.msk.bf16.vlgmr.msra.gmra.mxu1 %vm1360_vm1, %v7210_v37 }
0x1455   :  { %15313 = vmatprep.mubr.msk.bf16.mxu0 %vm16767_vm0, %v16766_v2  ;;  %15319 = vmatprep.mubr.msk.bf16.mxu1 %vm16767_vm0, %v16766_v2 }
0x1465   :  { %v6692_v39 = vpop.f32.mrf.mxu0  ;;  %v6781_v62 = vpop.f32.mrf.mxu1 }
0x1467   :  { %v15197_v56 = vpop.f32.mrf.mxu0  ;;  %v15217_v7 = vpop.f32.mrf.mxu1 }
0x1469   :  { %v6695_v6 = vpop.f32.mrf.mxu0  ;;  %v6784_v47 = vpop.f32.mrf.mxu1 }
0x146a   :  { %v7215_v53 = vpack.c.bf16 %v6695_v6, %v6692_v39  ;;  %v7216_v26 = vpack.c.bf16 %v6784_v47, %v6781_v62 }
0x146b   :  { %v15198_v59 = vpop.f32.mrf.mxu0  ;;  %v15218_v42 = vpop.f32.mrf.mxu1 }
0x146c   :  { %v7315_v57 = vsel %vm1360_vm1, %v7215_v53, 0  ;;  %v7362_v25 = vsel %vm1360_vm1, %v7216_v26, 0 }
0x146d   :  { %15312 = vmatpush3.bf16.xpose.msra.mxu0 %v7315_v57  ;;  %15318 = vmatpush3.bf16.xpose.msra.mxu1 %v7362_v25 }
0x146e   :  { %15323 = vmatprep.subr.bf16.mxu0 %v16766_v2  ;;  %15329 = vmatprep.subr.bf16.mxu1 %v16766_v2 }
0x1474   :  { %15314 = vmatmul.mubr.msk.bf16.vlgmr.msra.gmra.mxu0 %vm1360_vm1, %v7211_v63  ;;  %15320 = vmatmul.mubr.msk.bf16.vlgmr.msra.gmra.mxu1 %vm1360_vm1, %v7212_v22 }
0x1475   :  { %15325 = vmatprep.mubr.msk.bf16.mxu0 %vm16767_vm0, %v16766_v2  ;;  %15331 = vmatprep.mubr.msk.bf16.mxu1 %vm16767_vm0, %v16766_v2 }
0x1485   :  { %v6935_v20 = vpop.f32.mrf.mxu0  ;;  %v7024_v3 = vpop.f32.mrf.mxu1 }
0x1487   :  { %v15237_v33 = vpop.f32.mrf.mxu0  ;;  %v15257_v45 = vpop.f32.mrf.mxu1 }
0x1489   :  { %v6938_v32 = vpop.f32.mrf.mxu0  ;;  %v7027_v50 = vpop.f32.mrf.mxu1 }
0x148a   :  { %v7497_v54 = vpack.c.bf16 %v6938_v32, %v6935_v20  ;;  %v7498_v61 = vpack.c.bf16 %v7027_v50, %v7024_v3 }
0x148b   :  { %v15238_v55 = vpop.f32.mrf.mxu0  ;;  %v15258_v23 = vpop.f32.mrf.mxu1 }
0x148c   :  { %15324 = vmatpush3.bf16.msra.mxu0 %v7497_v54  ;;  %15330 = vmatpush3.bf16.msra.mxu1 %v7498_v61 }
0x148d   :  { %15335 = vmatprep.subr.bf16.mxu0 %v16766_v2  ;;  %15341 = vmatprep.subr.bf16.mxu1 %v16766_v2 }
0x14a5   :  { %v19171_v30 = vpop.f32.mrf.mxu0  ;;  %v19173_v58 = vpop.f32.mrf.mxu1 }
0x14a7   :  { %v15277_v5 = vpop.f32.mrf.mxu0  ;;  %v15297_v46 = vpop.f32.mrf.mxu1 }
0x14a9   :  { %v19175_v49 = vpop.f32.mrf.mxu0  ;;  %v19177_v37 = vpop.f32.mrf.mxu1 }
0x14aa   :  { %v7499_v13 = vpack.c.bf16 %v19175_v49, %v19171_v30  ;;  %v7500_v29 = vpack.c.bf16 %v19177_v37, %v19173_v58 }
0x14ab   :  { %v15278_v48 = vpop.f32.mrf.mxu0  ;;  %v15298_v9 = vpop.f32.mrf.mxu1 }
0x1514   :  { %v7257_v31 = vpop.f32.mrf.mxu0  ;;  %v7304_v15 = vpop.f32.mrf.mxu1 }
0x1515   :  { %v7258_v35 = vadd.f32 %v7257_v31, %v17315_v18  ;;  %v7305_v22 = vadd.f32 %v7304_v15, %v17315_v18 }
0x1516   :  { %v15303_v17 = vpop.f32.mrf.mxu0  ;;  %v15309_v63 = vpop.f32.mrf.mxu1 }
0x1517   :  { %v7405_v1 = vsel %vm1549_vm6, %v7258_v35, -inf  ;;  %v7411_v19 = vsel %vm1549_vm6, %v7305_v22, -inf }
0x1518   :  { %v7307_v11 = vpop.f32.mrf.mxu1  ;;  %7406 = vmax.xlane.f32.xlu0 %v7405_v1  ;;  %v7260_v41 = vpop.f32.mrf.mxu0 }
0x1519   :  { %v7261_v40 = vadd.f32 %v7260_v41, %v17318_v21  ;;  %v7308_v16 = vadd.f32 %v7307_v11, %v17318_v21 }
0x151a   :  { %v15304_v52 = vpop.f32.mrf.mxu0  ;;  %v15310_v0 = vpop.f32.mrf.mxu1 }
0x151b   :  { %v7408_v14 = vsel %vm1549_vm6, %v7261_v40, -inf  ;;  %v7414_v24 = vsel %vm1549_vm6, %v7308_v16, -inf }
0x151c   :  { %7412 = vmax.xlane.f32.xlu0 %v7411_v19  ;;  %7409 = vmax.xlane.f32.xlu1 %v7408_v14 }
0x1520   :  { %7415 = vmax.xlane.f32.xlu1 %v7414_v24 }
0x1534   :  { %v7351_v27 = vpop.f32.mrf.mxu0  ;;  %v7398_v12 = vpop.f32.mrf.mxu1 }
0x1535   :  { %v7352_v34 = vadd.f32 %v7351_v27, %v17315_v18  ;;  %v7399_v62 = vadd.f32 %v7398_v12, %v17315_v18 }
0x1536   :  { %v15315_v4 = vpop.f32.mrf.mxu0  ;;  %v15321_v39 = vpop.f32.mrf.mxu1 }
0x1537   :  { %v7417_v56 = vsel %vm1549_vm6, %v7352_v34, -inf  ;;  %v7423_v42 = vsel %vm1549_vm6, %v7399_v62, -inf }
0x1538   :  { %v7401_v7 = vpop.f32.mrf.mxu1  ;;  %7418 = vmax.xlane.f32.xlu0 %v7417_v56  ;;  %v7354_v6 = vpop.f32.mrf.mxu0 }
0x1539   :  { %v7355_v47 = vadd.f32 %v7354_v6, %v17318_v21  ;;  %v7402_v59 = vadd.f32 %v7401_v7, %v17318_v21 }
0x153a   :  { %v15316_v53 = vpop.f32.mrf.mxu0  ;;  %v15322_v26 = vpop.f32.mrf.mxu1 }
0x153b   :  { %v7420_v57 = vsel %vm1549_vm6, %v7355_v47, -inf  ;;  %v7426_v25 = vsel %vm1549_vm6, %v7402_v59, -inf }
0x153c   :  { %7424 = vmax.xlane.f32.xlu0 %v7423_v42  ;;  %7421 = vmax.xlane.f32.xlu1 %v7420_v57 }
0x1540   :  { %7427 = vmax.xlane.f32.xlu1 %v7426_v25 }
0x15a1   :  { %v7407_v20 = vpop.xlane.xlu0 %7406 }
0x15a2   :  { %v7429_v3 = vsub.f32 %v7258_v35, %v7407_v20 }
0x15a4   :  { %v7437_v33 = vmul.f32 1.442695, %v7429_v3 }
0x15a5   :  { %v7413_v45 = vpop.xlane.xlu0 %7412  ;;  %v7410_v32 = vpop.xlane.xlu1 %7409 }
0x15a6   :  { %16615 = vpow2.f32 %v7437_v33  ;;  %v7431_v50 = vsub.f32 %v7305_v22, %v7413_v45  ;;  %v7430_v54 = vsub.f32 %v7261_v40, %v7410_v32 }
0x15a8   :  { %v7441_v61 = vmul.f32 1.442695, %v7431_v50  ;;  %v7439_v55 = vmul.f32 1.442695, %v7430_v54 }
0x15a9   :  { %v7416_v23 = vpop.xlane.xlu1 %7415 }
0x15aa   :  { %16617 = vpow2.f32 %v7441_v61  ;;  %v7432_v5 = vsub.f32 %v7308_v16, %v7416_v23 }
0x15ab   :  { %16619 = vpow2.f32 %v7439_v55 }
0x15ac   :  { %v7443_v46 = vmul.f32 1.442695, %v7432_v5 }
0x15ae   :  { %16621 = vpow2.f32 %v7443_v46 }
0x15b3   :  { %v16616_v48 = vpop.eup %16615 }
0x15b4   :  { %v7453_v9 = vsel %vm1549_vm6, %v16616_v48, 0.0 }
0x15b5   :  { %7454 = vadd.xlane.f32.xlu0 %v7453_v9 }
0x15b7   :  { %v16618_v31 = vpop.eup %16617 }
0x15b8   :  { %v16620_v15 = vpop.eup %16619  ;;  %v7459_v35 = vsel %vm1549_vm6, %v16618_v31, 0.0 }
0x15b9   :  { %7460 = vadd.xlane.f32.xlu0 %v7459_v35  ;;  %v7456_v17 = vsel %vm1549_vm6, %v16620_v15, 0.0  ;;  %v16187_v35 = vld [vmem:[%s20603_s2 + $0x88] sm:$0xff]  }
0x15ba   :  { %7457 = vadd.xlane.f32.xlu1 %v7456_v17  ;;  %v16188_v17 = vld [vmem:[%s20603_s2 + $0x80] sm:$0xff]  }
0x15bb   :  { %v16622_v63 = vpop.eup %16621 }
0x15bc   :  { %v7462_v22 = vsel %vm1549_vm6, %v16622_v63, 0.0 }
0x15be   :  { %7463 = vadd.xlane.f32.xlu1 %v7462_v22  ;;  %v16190_v22 = vld [vmem:[%s20603_s2 + $0x90] sm:$0xff]  }
0x15c1   :  { %v7419_v1 = vpop.xlane.xlu0 %7418 }
0x15c2   :  { %v7433_v11 = vsub.f32 %v7352_v34, %v7419_v1 }
0x15c4   :  { %v7445_v41 = vmul.f32 1.442695, %v7433_v11 }
0x15c5   :  { %v7425_v40 = vpop.xlane.xlu0 %7424  ;;  %v7422_v52 = vpop.xlane.xlu1 %7421 }
0x15c6   :  { %16623 = vpow2.f32 %v7445_v41  ;;  %v7435_v0 = vsub.f32 %v7399_v62, %v7425_v40  ;;  %v7434_v16 = vsub.f32 %v7355_v47, %v7422_v52  ;;  %v16191_v52 = vld [vmem:[%s20603_s2 + $0xa8] sm:$0xff]  }
0x15c8   :  { %v7449_v19 = vmul.f32 1.442695, %v7435_v0  ;;  %v7447_v14 = vmul.f32 1.442695, %v7434_v16 }
0x15c9   :  { %v7428_v24 = vpop.xlane.xlu1 %7427 }
0x15ca   :  { %16625 = vpow2.f32 %v7449_v19  ;;  %v7436_v27 = vsub.f32 %v7402_v59, %v7428_v24  ;;  %v16192_v24 = vld [vmem:[%s20603_s2 + $0xa0] sm:$0xff]  }
0x15cb   :  { %16627 = vpow2.f32 %v7447_v14 }
0x15cc   :  { %v7451_v12 = vmul.f32 1.442695, %v7436_v27  ;;  %v16193_v27 = vld [vmem:[%s20603_s2 + $0xb8] sm:$0xff]  }
0x15ce   :  { %16629 = vpow2.f32 %v7451_v12 }
0x15d3   :  { %v16624_v4 = vpop.eup %16623 }
0x15d4   :  { %v7465_v39 = vsel %vm1549_vm6, %v16624_v4, 0.0 }
0x15d5   :  { %7466 = vadd.xlane.f32.xlu0 %v7465_v39  ;;  %v16194_v39 = vld [vmem:[%s20603_s2 + $0xb0] sm:$0xff]  }
0x15d7   :  { %v16626_v56 = vpop.eup %16625 }
0x15d8   :  { %v16628_v34 = vpop.eup %16627  ;;  %v7471_v7 = vsel %vm1549_vm6, %v16626_v56, 0.0 }
0x15d9   :  { %7472 = vadd.xlane.f32.xlu0 %v7471_v7  ;;  %v7468_v62 = vsel %vm1549_vm6, %v16628_v34, 0.0 }
0x15da   :  { %7469 = vadd.xlane.f32.xlu1 %v7468_v62 }
0x15db   :  { %v16630_v6 = vpop.eup %16629 }
0x15dc   :  { %v7474_v47 = vsel %vm1549_vm6, %v16630_v6, 0.0 }
0x15de   :  { %7475 = vadd.xlane.f32.xlu1 %v7474_v47 }
0x163e   :  { %v7455_v53 = vpop.xlane.xlu0 %7454 }
0x163f   :  { %16631 = vrcp.f32 %v7455_v53 }
0x1642   :  { %v7461_v26 = vpop.xlane.xlu0 %7460 }
0x1643   :  { %v7458_v59 = vpop.xlane.xlu1 %7457 }
0x1644   :  { %16633 = vrcp.f32 %v7458_v59 }
0x1645   :  { %16635 = vrcp.f32 %v7461_v26 }
0x1647   :  { %v7464_v42 = vpop.xlane.xlu1 %7463 }
0x1648   :  { %16637 = vrcp.f32 %v7464_v42 }
0x164c   :  { %v16632_v57 = vpop.eup %16631 }
0x164d   :  { %v7478_v20 = vmul.f32 %v16632_v57, %v16616_v48 }
0x1651   :  { %v16634_v25 = vpop.eup %16633 }
0x1652   :  { %v7480_v3 = vmul.f32 %v16634_v25, %v16620_v15  ;;  %v16636_v33 = vpop.eup %16635 }
0x1653   :  { %v7482_v50 = vmul.f32 %v16636_v33, %v16618_v31 }
0x1654   :  { %v7493_v45 = vpack.c.bf16 %v7480_v3, %v7478_v20 }
0x1655   :  { %v16638_v32 = vpop.eup %16637 }
0x1656   :  { %v7484_v54 = vmul.f32 %v16638_v32, %v16622_v63  ;;  %15326 = vmatmul.mubr.msk.bf16.vlgmr.msra.gmra.mxu0 %vm1549_vm6, %v7493_v45  ;;  %v16189_v63 = vld [vmem:[%s20603_s2 + $0x98] sm:$0xff]  }
0x1657   :  { %15336 = vmatpush3.bf16.msra.mxu0 %v7499_v13  ;;  %15337 = vmatprep.mubr.msk.bf16.mxu0 %vm16767_vm0, %v16766_v2 }
0x1658   :  { %v7494_v61 = vpack.c.bf16 %v7484_v54, %v7482_v50  ;;  %15347 = vmatprep.subr.bf16.mxu0 %v16766_v2 }
0x165a   :  { %15332 = vmatmul.mubr.msk.bf16.vlgmr.msra.gmra.mxu1 %vm1549_vm6, %v7494_v61 }
0x165b   :  { %15342 = vmatpush3.bf16.msra.mxu1 %v7500_v29  ;;  %15343 = vmatprep.mubr.msk.bf16.mxu1 %vm16767_vm0, %v16766_v2 }
0x165c   :  { %15355 = vmatprep.subr.bf16.mxu1 %v16766_v2 }
0x165e   :  { %v7467_v55 = vpop.xlane.xlu0 %7466 }
0x165f   :  { %16639 = vrcp.f32 %v7467_v55 }
0x1662   :  { %v7473_v30 = vpop.xlane.xlu0 %7472 }
0x1663   :  { %v7470_v49 = vpop.xlane.xlu1 %7469 }
0x1664   :  { %16641 = vrcp.f32 %v7470_v49  ;;  %v19270_v49 = vld [vmem:[%s20602_s5 + $0x10] sm:$0x3f] }
0x1665   :  { %16643 = vrcp.f32 %v7473_v30 }
0x1667   :  { %v7476_v13 = vpop.xlane.xlu1 %7475 }
0x1668   :  { %16645 = vrcp.f32 %v7476_v13  ;;  %v7931_v13 = vrot.slane %v19270_v49, %v17402_v51 }
0x166c   :  { %v16640_v23 = vpop.eup %16639 }
0x166d   :  { %v7486_v46 = vmul.f32 %v16640_v23, %v16624_v4 }
0x1671   :  { %v16642_v5 = vpop.eup %16641 }
0x1672   :  { %v7488_v48 = vmul.f32 %v16642_v5, %v16628_v34  ;;  %v16644_v9 = vpop.eup %16643 }
0x1673   :  { %v7490_v29 = vmul.f32 %v16644_v9, %v16626_v56 }
0x1674   :  { %v7495_v58 = vpack.c.bf16 %v7488_v48, %v7486_v46 }
0x1675   :  { %v16646_v37 = vpop.eup %16645 }
0x1676   :  { %v7492_v31 = vmul.f32 %v16646_v37, %v16630_v6  ;;  %15338 = vmatmul.mubr.msk.bf16.vlgmr.msra.gmra.mxu0 %vm1549_vm6, %v7495_v58 }
0x1677   :  { %15351 = vmatprep.mubr.msk.bf16.mxu0 %vm16767_vm0, %v16766_v2  ;;  %15348 = vmatpush3.bf16.msra.mxu0 %v16187_v35 }
0x1678   :  { %v7496_v15 = vpack.c.bf16 %v7492_v31, %v7490_v29  ;;  %15349 = vmatprep.subr.bf16.mxu0 %v16766_v2 }
0x167a   :  { %15344 = vmatmul.mubr.msk.bf16.vlgmr.msra.gmra.mxu1 %vm1549_vm6, %v7496_v15 }
0x167b   :  { %15359 = vmatprep.mubr.msk.bf16.mxu1 %vm16767_vm0, %v16766_v2  ;;  %15350 = vmatpush3.bf16.msra.mxu0 %v16188_v17 }
0x167c   :  { %15356 = vmatpush3.bf16.msra.mxu1 %v16189_v63  ;;  %15363 = vmatprep.subr.bf16.mxu0 %v16766_v2 }
0x167d   :  { %15357 = vmatprep.subr.bf16.mxu1 %v16766_v2 }
0x1680   :  { %15358 = vmatpush3.bf16.msra.mxu1 %v16190_v22 }
0x1681   :  { %15371 = vmatprep.subr.bf16.mxu1 %v16766_v2 }
0x1716   :  { %v7538_v1 = vpop.f32.mrf.mxu0 }
0x1718   :  { %v15327_v11 = vpop.f32.mrf.mxu0 }
0x1719   :  { %v16197_v11 = vld [vmem:[%s20604_s3 + $0x2e4] ss:$16 sps:$4 sm:$0xff]  }
0x171a   :  { %v7541_v41 = vpop.f32.mrf.mxu0  ;;  %v7582_v40 = vpop.f32.mrf.mxu1 }
0x171b   :  { %v7677_v0 = vpack.c.bf16 %v7541_v41, %v7538_v1  ;;  %v16195_v1 = vld [vmem:[%s20604_s3 + $0x2e0] ss:$16 sps:$4 sm:$0xff]   ;;  %v16200_v41 = vld [vmem:[%s20604_s3 + $0x2ec] ss:$16 sps:$4 sm:$0xff]  }
0x171c   :  { %v15328_v16 = vpop.f32.mrf.mxu0  ;;  %v15333_v19 = vpop.f32.mrf.mxu1 }
0x171d   :  { %15352 = vmatmul.mubr.msk.bf16.vlgmr.msra.gmra.mxu0 %vm1360_vm1, %v7677_v0 }
0x171e   :  { %v7585_v14 = vpop.f32.mrf.mxu1  ;;  %15364 = vmatpush3.bf16.msra.mxu0 %v16191_v52  ;;  %15367 = vmatprep.mubr.msk.bf16.mxu0 %vm16767_vm0, %v16766_v2 }
0x171f   :  { %v7678_v12 = vpack.c.bf16 %v7585_v14, %v7582_v40  ;;  %15365 = vmatprep.subr.bf16.mxu0 %v16766_v2 }
0x1720   :  { %v15334_v4 = vpop.f32.mrf.mxu1 }
0x1721   :  { %15360 = vmatmul.mubr.msk.bf16.vlgmr.msra.gmra.mxu1 %vm1360_vm1, %v7678_v12  ;;  %v16206_v12 = vld [vmem:[%s20604_s3 + $0x2cc] ss:$16 sps:$4 sm:$0xff]   ;;  %v16201_v4 = vld [vmem:[%s20604_s3 + $0x2c0] ss:$16 sps:$4 sm:$0xff]  }
0x1722   :  { %15366 = vmatpush3.bf16.msra.mxu0 %v16192_v24  ;;  %15372 = vmatpush3.bf16.msra.mxu1 %v16193_v27  ;;  %v16203_v27 = vld [vmem:[%s20604_s3 + $0x2c4] ss:$16 sps:$4 sm:$0xff]  }
0x1723   :  { %15373 = vmatprep.subr.bf16.mxu1 %v16766_v2  ;;  %15375 = vmatprep.mubr.msk.bf16.mxu1 %vm16767_vm0, %v16766_v2 }
0x1724   :  { %8185 = vmatprep.subr.bf16.mxu0 %v16197_v11  ;;  %v7967_v11 = vrot.slane %v19270_v49, %v17538_v10 }
0x1726   :  { %15374 = vmatpush3.bf16.msra.mxu1 %v16194_v39  ;;  %v16204_v39 = vld [vmem:[%s20604_s3 + $0x2c8] ss:$16 sps:$4 sm:$0xff]  }
0x1727   :  { %8228 = vmatprep.subr.bf16.mxu1 %v16200_v41 }
0x1736   :  { %v7626_v56 = vpop.f32.mrf.mxu0 }
0x1738   :  { %v15339_v34 = vpop.f32.mrf.mxu0 }
0x1739   :  { %v16212_v34 = vld [vmem:[%s20604_s3 + $0x2ac] ss:$16 sps:$4 sm:$0xff]  }
0x173a   :  { %v7629_v7 = vpop.f32.mrf.mxu0  ;;  %v7670_v62 = vpop.f32.mrf.mxu1 }
0x173b   :  { %v7679_v6 = vpack.c.bf16 %v7629_v7, %v7626_v56  ;;  %v16209_v56 = vld [vmem:[%s20604_s3 + $0x2a4] ss:$16 sps:$4 sm:$0xff]   ;;  %v16207_v7 = vld [vmem:[%s20604_s3 + $0x2a0] ss:$16 sps:$4 sm:$0xff]  }
0x173c   :  { %v15340_v47 = vpop.f32.mrf.mxu0  ;;  %v15345_v53 = vpop.f32.mrf.mxu1 }
0x173d   :  { %15368 = vmatmul.mubr.msk.bf16.vlgmr.msra.gmra.mxu0 %vm1360_vm1, %v7679_v6  ;;  %v16215_v6 = vld [vmem:[%s20604_s3 + $0x284] ss:$16 sps:$4 sm:$0xff]   ;;  %v16218_v47 = vld [vmem:[%s20604_s3 + $0x28c] ss:$16 sps:$4 sm:$0xff]   ;;  %v16213_v53 = vld [vmem:[%s20604_s3 + $0x280] ss:$16 sps:$4 sm:$0xff]  }
0x173e   :  { %v7673_v26 = vpop.f32.mrf.mxu1  ;;  %8217 = vmatprep.mubr.bf16.mxu0 %v16769_v43  ;;  %8186 = vmatpush1.bf16.msra.mxu0 %v16195_v1 }
0x173f   :  { %v7680_v59 = vpack.c.bf16 %v7673_v26, %v7670_v62  ;;  %8187 = vmatprep.subr.bf16.mxu0 %v16203_v27  ;;  %v16210_v62 = vld [vmem:[%s20604_s3 + $0x2a8] ss:$16 sps:$4 sm:$0xff]   ;;  %v16249_v27 = vld [vmem:[%s20605_s4 + $0x230] sm:$0xff]  }
0x1740   :  { %v15346_v42 = vpop.f32.mrf.mxu1  ;;  %v16216_v26 = vld [vmem:[%s20604_s3 + $0x288] ss:$16 sps:$4 sm:$0xff]  }
0x1741   :  { %15376 = vmatmul.mubr.msk.bf16.vlgmr.msra.gmra.mxu1 %vm1360_vm1, %v7680_v59  ;;  %v16221_v59 = vld [vmem:[%s20604_s3 + $0x264] ss:$16 sps:$4 sm:$0xff]   ;;  %v16224_v42 = vld [vmem:[%s20604_s3 + $0x26c] ss:$16 sps:$4 sm:$0xff]  }
0x1742   :  { %8260 = vmatprep.mubr.bf16.mxu1 %v16769_v43  ;;  %8188 = vmatpush1.bf16.msra.mxu0 %v16201_v4  ;;  %v16251_v4 = vld [vmem:[%s20605_s4 + $0x268] sm:$0xff]  }
0x1743   :  { %8189 = vmatprep.subr.bf16.mxu0 %v16209_v56  ;;  %v16253_v56 = vld [vmem:[%s20605_s4 + $0x228] sm:$0xff]  }
0x1746   :  { %8190 = vmatpush1.bf16.msra.mxu0 %v16207_v7  ;;  %v16255_v7 = vld [vmem:[%s20605_s4 + $0x260] sm:$0xff]  }
0x1747   :  { %8191 = vmatprep.subr.bf16.mxu0 %v16215_v6  ;;  %v16257_v6 = vld [vmem:[%s20605_s4 + $0x220] sm:$0xff]  }
0x174a   :  { %8192 = vmatpush1.bf16.msra.mxu0 %v16213_v53  ;;  %v16259_v53 = vld [vmem:[%s20605_s4 + $0x258] sm:$0xff]  }
0x174b   :  { %8193 = vmatprep.subr.bf16.mxu0 %v16221_v59  ;;  %v16261_v59 = vld [vmem:[%s20605_s4 + $0x218] sm:$0xff]  }
0x17dd   :  { %v7747_v57 = vpop.f32.mrf.mxu0 }
0x17df   :  { %v15353_v25 = vpop.f32.mrf.mxu0 }
0x17e0   :  { %v16222_v25 = vld [vmem:[%s20604_s3 + $0x268] ss:$16 sps:$4 sm:$0xff]  }
0x17e1   :  { %v7750_v20 = vpop.f32.mrf.mxu0  ;;  %v7803_v3 = vpop.f32.mrf.mxu1 }
0x17e2   :  { %v7922_v61 = vadd.f32 %v7803_v3, %v7747_v57  ;;  %v16219_v57 = vld [vmem:[%s20604_s3 + $0x260] ss:$16 sps:$4 sm:$0xff]   ;;  %v16230_v3 = vld [vmem:[%s20604_s3 + $0x24c] ss:$16 sps:$4 sm:$0xff]  }
0x17e3   :  { %v15354_v33 = vpop.f32.mrf.mxu0  ;;  %v15361_v45 = vpop.f32.mrf.mxu1  ;;  %8194 = vmatpush1.bf16.msra.mxu0 %v16219_v57  ;;  %v16263_v57 = vld [vmem:[%s20605_s4 + $0x250] sm:$0xff]  }
0x17e4   :  { %v16225_v33 = vld [vmem:[%s20604_s3 + $0x240] ss:$16 sps:$4 sm:$0xff]   ;;  %v16228_v45 = vld [vmem:[%s20604_s3 + $0x248] ss:$16 sps:$4 sm:$0xff]  }
0x17e5   :  { %v7806_v32 = vpop.f32.mrf.mxu1 }
0x17e6   :  { %v7925_v46 = vadd.f32 %v7806_v32, %v7750_v20  ;;  %v16227_v20 = vld [vmem:[%s20604_s3 + $0x244] ss:$16 sps:$4 sm:$0xff]  }
0x17e7   :  { %v15362_v50 = vpop.f32.mrf.mxu1  ;;  %8195 = vmatprep.subr.bf16.mxu0 %v16227_v20  ;;  %v16233_v32 = vld [vmem:[%s20604_s3 + $0x224] ss:$16 sps:$4 sm:$0xff]  }
0x17e8   :  { %8196 = vmatpush1.bf16.msra.mxu0 %v16225_v33  ;;  %v16236_v50 = vld [vmem:[%s20604_s3 + $0x22c] ss:$16 sps:$4 sm:$0xff]   ;;  %v16265_v20 = vld [vmem:[%s20605_s4 + $0x210] sm:$0xff]  }
0x17e9   :  { %8197 = vmatprep.subr.bf16.mxu0 %v16233_v32  ;;  %v16267_v33 = vld [vmem:[%s20605_s4 + $0x248] sm:$0xff]  }
0x17ea   :  { %v16269_v32 = vld [vmem:[%s20605_s4 + $0x208] sm:$0xff]  }
0x17fd   :  { %v7859_v54 = vpop.f32.mrf.mxu0 }
0x17fe   :  { %v7923_v30 = vadd.f32 %v7922_v61, %v7859_v54  ;;  %v16231_v54 = vld [vmem:[%s20604_s3 + $0x220] ss:$16 sps:$4 sm:$0xff]   ;;  %v16234_v61 = vld [vmem:[%s20604_s3 + $0x228] ss:$16 sps:$4 sm:$0xff]  }
0x17ff   :  { %v15369_v55 = vpop.f32.mrf.mxu0  ;;  %8198 = vmatpush1.bf16.msra.mxu0 %v16231_v54  ;;  %v16271_v54 = vld [vmem:[%s20605_s4 + $0x240] sm:$0xff]  }
0x1800   :  { %v16239_v55 = vld [vmem:[%s20604_s3 + $0x204] ss:$16 sps:$4 sm:$0xff]  }
0x1801   :  { %v7862_v23 = vpop.f32.mrf.mxu0  ;;  %v7915_v5 = vpop.f32.mrf.mxu1  ;;  %8199 = vmatprep.subr.bf16.mxu0 %v16239_v55  ;;  %v16273_v55 = vld [vmem:[%s20605_s4 + $0x200] sm:$0xff]  }
0x1802   :  { %v7924_v48 = vadd.f32 %v7923_v30, %v7915_v5  ;;  %v7926_v37 = vadd.f32 %v7925_v46, %v7862_v23  ;;  %v16242_v30 = vld [vmem:[%s20604_s3 + $0x20c] ss:$16 sps:$4 sm:$0xff]   ;;  %v16240_v23 = vld [vmem:[%s20604_s3 + $0x208] ss:$16 sps:$4 sm:$0xff]  }
0x1803   :  { %v15370_v9 = vpop.f32.mrf.mxu0  ;;  %v15377_v58 = vpop.f32.mrf.mxu1 }
0x1804   :  { %v7932_v29 = vadd.f32 %v7931_v13, %v7924_v48 }
0x1805   :  { %v7918_v31 = vpop.f32.mrf.mxu1 }
0x1806   :  { %v7927_v15 = vadd.f32 %v7926_v37, %v7918_v31  ;;  %v19275_v35 = vadd.f32 %v7932_v29, %v18713_v8  ;;  %v16198_v8 = vld [vmem:[%s20604_s3 + $0x2e8] ss:$16 sps:$4 sm:$0xff]  }
0x1807   :  { %v15378_v17 = vpop.f32.mrf.mxu1  ;;  %8229 = vmatpush1.bf16.msra.mxu1 %v16198_v8 }
0x1808   :  { %v7933_v63 = vadd.f32 %v7931_v13, %v7927_v15  ;;  %7936 = vadd.xlane.f32.xlu0 %v19275_v35  ;;  %8230 = vmatprep.subr.bf16.mxu1 %v16206_v12  ;;  %v16237_v13 = vld [vmem:[%s20604_s3 + $0x200] ss:$16 sps:$4 sm:$0xff]   ;;  %v7961_v15 = vrot.slane %v19270_v49, %v17532_v60 }
0x1809   :  { %8200 = vmatpush1.bf16.msra.mxu0 %v16237_v13  ;;  %v16250_v12 = vld [vmem:[%s20605_s4 + $0x2b0] sm:$0xff]   ;;  %v12711_v13 = vld [vmem:[%s20606_s6 + $0x8] sm:$0xf] }
0x180a   :  { %v19279_v22 = vadd.f32 %v7933_v63, %v18717_v44 }
0x180b   :  { %8231 = vmatpush1.bf16.msra.mxu1 %v16204_v39  ;;  %v16252_v39 = vld [vmem:[%s20605_s4 + $0x2e8] sm:$0xff]  }
0x180c   :  { %7938 = vadd.xlane.f32.xlu1 %v19279_v22  ;;  %8232 = vmatprep.subr.bf16.mxu1 %v16212_v34  ;;  %v16254_v34 = vld [vmem:[%s20605_s4 + $0x2a8] sm:$0xff]  }
0x180f   :  { %8233 = vmatpush1.bf16.msra.mxu1 %v16210_v62  ;;  %v16256_v62 = vld [vmem:[%s20605_s4 + $0x2e0] sm:$0xff]  }
0x1810   :  { %8234 = vmatprep.subr.bf16.mxu1 %v16218_v47  ;;  %v16258_v47 = vld [vmem:[%s20605_s4 + $0x2a0] sm:$0xff]  }
0x1813   :  { %8235 = vmatpush1.bf16.msra.mxu1 %v16216_v26  ;;  %v16260_v26 = vld [vmem:[%s20605_s4 + $0x2d8] sm:$0xff]  }
0x1814   :  { %8236 = vmatprep.subr.bf16.mxu1 %v16224_v42  ;;  %v16262_v42 = vld [vmem:[%s20605_s4 + $0x298] sm:$0xff]  }
0x1817   :  { %8237 = vmatpush1.bf16.msra.mxu1 %v16222_v25  ;;  %v16264_v25 = vld [vmem:[%s20605_s4 + $0x2d0] sm:$0xff]  }
0x1818   :  { %8238 = vmatprep.subr.bf16.mxu1 %v16230_v3  ;;  %v16266_v3 = vld [vmem:[%s20605_s4 + $0x290] sm:$0xff]  }
0x181b   :  { %8239 = vmatpush1.bf16.msra.mxu1 %v16228_v45  ;;  %v16268_v45 = vld [vmem:[%s20605_s4 + $0x2c8] sm:$0xff]  }
0x181c   :  { %8240 = vmatprep.subr.bf16.mxu1 %v16236_v50  ;;  %v16270_v50 = vld [vmem:[%s20605_s4 + $0x288] sm:$0xff]  }
0x181f   :  { %8241 = vmatpush1.bf16.msra.mxu1 %v16234_v61  ;;  %v16272_v61 = vld [vmem:[%s20605_s4 + $0x2c0] sm:$0xff]  }
0x1820   :  { %8242 = vmatprep.subr.bf16.mxu1 %v16242_v30  ;;  %v16274_v30 = vld [vmem:[%s20605_s4 + $0x280] sm:$0xff]  }
0x1823   :  { %8243 = vmatpush1.bf16.msra.mxu1 %v16240_v23  ;;  %v8008_v23 = vrot.slane %v12711_v13, %v16911_v36 }
0x1891   :  { %v7937_v44 = vpop.xlane.xlu0 %7936 }
0x1892   :  { %v7940_v40 = vmul.f32 0.0078125, %v7937_v44 }
0x1894   :  { %v19295_v52 = vsub.f32 %v19275_v35, %v7940_v40 }
0x1895   :  { %v7939_v0 = vpop.xlane.xlu1 %7938 }
0x1896   :  { %v7941_v16 = vmul.f32 0.0078125, %v7939_v0  ;;  %v7944_v19 = vmul.f32 %v19295_v52, %v19295_v52  ;;  %v16244_v0 = vld [vmem:[%s20605_s4 + $0x2f8] sm:$0xff]  }
0x1897   :  { %14208 = vmatprep.subr.bf16.mxu1 %v16244_v0 }
0x1898   :  { %v19300_v14 = vsub.f32 %v19279_v22, %v7941_v16  ;;  %7946 = vadd.xlane.f32.xlu0 %v7944_v19  ;;  %v16245_v16 = vld [vmem:[%s20605_s4 + $0x238] sm:$0xff]  }
0x1899   :  { %v16246_v19 = vld [vmem:[%s20605_s4 + $0x2b8] sm:$0xff]  }
0x189a   :  { %v7945_v24 = vmul.f32 %v19300_v14, %v19300_v14 }
0x189c   :  { %7948 = vadd.xlane.f32.xlu1 %v7945_v24  ;;  %v16248_v24 = vld [vmem:[%s20605_s4 + $0x2f0] sm:$0xff]  }
0x1921   :  { %v7947_v5 = vpop.xlane.xlu0 %7946 }
0x1922   :  { %v7950_v46 = vmul.f32 0.0078125, %v7947_v5  ;;  %v8016_v5 = vrot.slane %v12711_v13, %v17402_v51 }
0x1924   :  { %v7952_v48 = vadd.f32 1e-05, %v7950_v46 }
0x1925   :  { %v7949_v9 = vpop.xlane.xlu1 %7948 }
0x1926   :  { %16647 = vrsqrt.f32 %v7952_v48  ;;  %v7951_v58 = vmul.f32 0.0078125, %v7949_v9  ;;  %v8012_v9 = vrot.slane %v12711_v13, %v16914_v38 }
0x1928   :  { %v7953_v37 = vadd.f32 1e-05, %v7951_v58  ;;  %v8020_v58 = vrot.slane %v12711_v13, %v17532_v60 }
0x192a   :  { %16649 = vrsqrt.f32 %v7953_v37 }
0x1933   :  { %v16648_v29 = vpop.eup %16647 }
0x1934   :  { %v7956_v31 = vmul.f32 %v16648_v29, %v19295_v52  ;;  %v16243_v52 = vld [vmem:[%s20605_s4 + $0x278] sm:$0xff]  }
0x1935   :  { %14186 = vmatprep.subr.bf16.mxu0 %v16243_v52 }
0x1936   :  { %v7962_v1 = vmul.f32 %v7961_v15, %v7956_v31 }
0x1937   :  { %v16650_v17 = vpop.eup %16649 }
0x1938   :  { %v7957_v63 = vmul.f32 %v16650_v17, %v19300_v14  ;;  %v7968_v41 = vadd.f32 %v7967_v11, %v7962_v1  ;;  %v16247_v14 = vld [vmem:[%s20605_s4 + $0x270] sm:$0xff]  }
0x193a   :  { %v7963_v8 = vmul.f32 %v7961_v15, %v7957_v63 }
0x193c   :  { %v7969_v44 = vadd.f32 %v7967_v11, %v7963_v8 }
0x193e   :  { %v7970_v40 = vpack.c.bf16 %v7969_v44, %v7968_v41 }
0x1940   :  { %8218 = vmatmul.mubr.bf16.vlgmr.msra.gmra.mxu0 %v7970_v40  ;;  %8261 = vmatmul.mubr.bf16.vlgmr.msra.gmra.mxu1 %v7970_v40 }
0x1941   :  { %14187 = vmatpush3.bf16.msra.mxu0 %v16245_v16  ;;  %14209 = vmatpush3.bf16.msra.mxu1 %v16246_v19 }
0x1942   :  { %14188 = vmatprep.subr.bf16.mxu0 %v16247_v14  ;;  %14210 = vmatprep.subr.bf16.mxu1 %v16248_v24 }
0x1945   :  { %14189 = vmatpush3.bf16.msra.mxu0 %v16249_v27  ;;  %14211 = vmatpush3.bf16.msra.mxu1 %v16250_v12 }
0x1946   :  { %14190 = vmatprep.subr.bf16.mxu0 %v16251_v4  ;;  %14212 = vmatprep.subr.bf16.mxu1 %v16252_v39 }
0x1949   :  { %14191 = vmatpush3.bf16.msra.mxu0 %v16253_v56  ;;  %14213 = vmatpush3.bf16.msra.mxu1 %v16254_v34 }
0x194a   :  { %14192 = vmatprep.subr.bf16.mxu0 %v16255_v7  ;;  %14214 = vmatprep.subr.bf16.mxu1 %v16256_v62 }
0x194d   :  { %14193 = vmatpush3.bf16.msra.mxu0 %v16257_v6  ;;  %14215 = vmatpush3.bf16.msra.mxu1 %v16258_v47 }
0x194e   :  { %14194 = vmatprep.subr.bf16.mxu0 %v16259_v53  ;;  %14216 = vmatprep.subr.bf16.mxu1 %v16260_v26 }
0x1951   :  { %14195 = vmatpush3.bf16.msra.mxu0 %v16261_v59  ;;  %14217 = vmatpush3.bf16.msra.mxu1 %v16262_v42 }
0x1952   :  { %14196 = vmatprep.subr.bf16.mxu0 %v16263_v57  ;;  %14218 = vmatprep.subr.bf16.mxu1 %v16264_v25 }
0x1955   :  { %14197 = vmatpush3.bf16.msra.mxu0 %v16265_v20  ;;  %14219 = vmatpush3.bf16.msra.mxu1 %v16266_v3 }
0x1956   :  { %14198 = vmatprep.subr.bf16.mxu0 %v16267_v33  ;;  %14220 = vmatprep.subr.bf16.mxu1 %v16268_v45 }
0x1959   :  { %14199 = vmatpush3.bf16.msra.mxu0 %v16269_v32  ;;  %14221 = vmatpush3.bf16.msra.mxu1 %v16270_v50 }
0x195a   :  { %14200 = vmatprep.subr.bf16.mxu0 %v16271_v54  ;;  %14222 = vmatprep.subr.bf16.mxu1 %v16272_v61 }
0x195d   :  { %14201 = vmatpush3.bf16.msra.mxu0 %v16273_v55  ;;  %14223 = vmatpush3.bf16.msra.mxu1 %v16274_v30 }
0x195e   :  { %15379 = vmatprep.subr.bf16.mxu0 %v16766_v2  ;;  %15399 = vmatprep.subr.bf16.mxu1 %v16766_v2 }
0x1a00   :  { %v8219_v46 = vpop.f32.mrf.mxu0  ;;  %v8262_v48 = vpop.f32.mrf.mxu1 }
0x1a01   :  { %v19499_v37 = vadd.f32 %v8219_v46, %v8008_v23  ;;  %v19501_v29 = vadd.f32 %v8262_v48, %v8016_v5 }
0x1a02   :  { %v8221_v31 = vpop.f32.mrf.mxu0  ;;  %v8264_v15 = vpop.f32.mrf.mxu1 }
0x1a03   :  { %v19504_v17 = vmul.f32 0.70710677, %v19499_v37  ;;  %v19507_v63 = vmul.f32 0.70710677, %v19501_v29  ;;  %v19509_v1 = vadd.f32 %v8221_v31, %v8012_v9  ;;  %v19511_v11 = vadd.f32 %v8264_v15, %v8020_v58 }
0x1a04   :  { %v8223_v16 = vpop.f32.mrf.mxu0  ;;  %v8266_v56 = vpop.f32.mrf.mxu1 }
0x1a05   :  { %v8279_v8 = vand.u32 2147483647, %v19504_v17  ;;  %v8281_v41 = vand.u32 2147483647, %v19507_v63  ;;  %v19516_v44 = vmul.f32 0.70710677, %v19509_v1  ;;  %v19526_v39 = vadd.f32 %v8223_v16, %v8008_v23 }
0x1a06   :  { %v19519_v40 = vmul.f32 0.70710677, %v19511_v11  ;;  %v8225_v34 = vpop.f32.mrf.mxu0  ;;  %v19531_v47 = vadd.f32 %v8266_v56, %v8016_v5  ;;  %v8268_v57 = vpop.f32.mrf.mxu1  ;;  %vm8439_vm12 = vcmp.ge.f32.partialorder %v19504_v17, 0.0  ;;  %vm8441_vm15 = vcmp.ge.f32.partialorder %v19507_v63, 0.0 }
0x1a07   :  { %v8287_v52 = vmul.f32 0.3275911, %v8279_v8  ;;  %v8289_v0 = vmul.f32 0.3275911, %v8281_v41  ;;  %v8280_v19 = vand.u32 2147483647, %v19516_v44  ;;  %v19533_v53 = vadd.f32 %v8225_v34, %v8012_v9 }
0x1a08   :  { %v19523_v14 = vand.u32 2147483647, %v19519_v40  ;;  %v19529_v6 = vmul.f32 0.70710677, %v19526_v39  ;;  %v19537_v59 = vmul.f32 0.70710677, %v19531_v47  ;;  %v19544_v45 = vadd.f32 %v8268_v57, %v8020_v58 }
0x1a09   :  { %v8295_v24 = vadd.f32 1.0, %v8287_v52  ;;  %v8297_v27 = vadd.f32 1.0, %v8289_v0  ;;  %v8288_v12 = vmul.f32 0.3275911, %v8280_v19  ;;  %v19540_v42 = vmul.f32 0.70710677, %v19533_v53 }
0x1a0a   :  { %v8290_v4 = vmul.f32 0.3275911, %v19523_v14  ;;  %v8283_v26 = vand.u32 2147483647, %v19529_v6  ;;  %v8285_v20 = vand.u32 2147483647, %v19537_v59 }
0x1a0b   :  { %16651 = vrcp.f32 %v8295_v24  ;;  %v8296_v7 = vadd.f32 1.0, %v8288_v12  ;;  %v8284_v3 = vand.u32 2147483647, %v19540_v42  ;;  %v8391_v54 = vsub.f32 0.0, %v8279_v8 }
0x1a0c   :  { %16653 = vrcp.f32 %v8297_v27  ;;  %v8298_v62 = vadd.f32 1.0, %v8290_v4  ;;  %v8291_v25 = vmul.f32 0.3275911, %v8283_v26  ;;  %v8293_v32 = vmul.f32 0.3275911, %v8285_v20 }
0x1a0d   :  { %16655 = vrcp.f32 %v8296_v7  ;;  %v8292_v50 = vmul.f32 0.3275911, %v8284_v3  ;;  %v19547_v61 = vmul.f32 0.70710677, %v19544_v45  ;;  %v8392_v55 = vsub.f32 0.0, %v8280_v19 }
0x1a0e   :  { %16657 = vrcp.f32 %v8298_v62  ;;  %v8299_v33 = vadd.f32 1.0, %v8291_v25  ;;  %v8301_v30 = vadd.f32 1.0, %v8293_v32  ;;  %v8393_v46 = vsub.f32 0.0, %v8281_v41 }
0x1a0f   :  { %v8300_v13 = vadd.f32 1.0, %v8292_v50  ;;  %v19550_v23 = vand.u32 2147483647, %v19547_v61  ;;  %v8399_v58 = vmul.f32 %v8391_v54, %v8279_v8  ;;  %v8400_v52 = vmul.f32 %v8392_v55, %v8280_v19 }
0x1a10   :  { %16659 = vrcp.f32 %v8299_v33  ;;  %v8395_v0 = vsub.f32 0.0, %v8283_v26  ;;  %v8401_v4 = vmul.f32 %v8393_v46, %v8281_v41  ;;  %v8394_v56 = vsub.f32 0.0, %v19523_v14 }
0x1a11   :  { %16661 = vrcp.f32 %v8301_v30  ;;  %v8294_v31 = vmul.f32 0.3275911, %v19550_v23  ;;  %v8407_v7 = vmul.f32 1.442695, %v8399_v58  ;;  %v8409_v19 = vmul.f32 1.442695, %v8400_v52 }
0x1a12   :  { %16663 = vrcp.f32 %v8300_v13  ;;  %v8403_v25 = vmul.f32 %v8395_v0, %v8283_v26  ;;  %v8397_v33 = vsub.f32 0.0, %v8285_v20  ;;  %v8411_v55 = vmul.f32 1.442695, %v8401_v4 }
0x1a13   :  { %v8302_v24 = vadd.f32 1.0, %v8294_v31  ;;  %v8402_v30 = vmul.f32 %v8394_v56, %v19523_v14  ;;  %v8396_v13 = vsub.f32 0.0, %v8284_v3  ;;  %vm8443_vm10 = vcmp.ge.f32.partialorder %v19529_v6, 0.0 }
0x1a14   :  { %v8405_v52 = vmul.f32 %v8397_v33, %v8285_v20  ;;  %v8398_v33 = vsub.f32 0.0, %v19550_v23  ;;  %vm8440_vm11 = vcmp.ge.f32.partialorder %v19516_v44, 0.0  ;;  %vm8444_vm13 = vcmp.ge.f32.partialorder %v19540_v42, 0.0 }
0x1a15   :  { %16665 = vrcp.f32 %v8302_v24  ;;  %v8404_v4 = vmul.f32 %v8396_v13, %v8284_v3  ;;  %vm8445_vm14 = vcmp.ge.f32.partialorder %v19537_v59, 0.0  ;;  %vm8442_vm2 = vcmp.ge.f32.partialorder %v19519_v40, 0.0 }
0x1a16   :  { %16667 = vpow2.f32 %v8407_v7  ;;  %vm8446_vm3 = vcmp.ge.f32.partialorder %v19547_v61, 0.0  ;;  %v8469_v63 = vmul.f32 0.5, %v19531_v47  ;;  %v8466_v40 = vmul.f32 0.5, %v19511_v11 }
0x1a17   :  { %16669 = vpow2.f32 %v8409_v19 }
0x1a18   :  { %v19552_v5 = vpop.eup %16651  ;;  %16671 = vpow2.f32 %v8411_v55 }
0x1a19   :  { %v19554_v48 = vpop.eup %16653  ;;  %v8319_v9 = vmul.f32 1.0614054, %v19552_v5 }
0x1a1a   :  { %v8321_v15 = vmul.f32 1.0614054, %v19554_v48  ;;  %v19559_v27 = vpop.eup %16655 }
0x1a1b   :  { %v8327_v16 = vadd.f32 -1.4531521, %v8319_v9  ;;  %v8320_v8 = vmul.f32 1.0614054, %v19559_v27  ;;  %v19564_v62 = vpop.eup %16657 }
0x1a1c   :  { %v8329_v12 = vadd.f32 -1.4531521, %v8321_v15  ;;  %v8322_v54 = vmul.f32 1.0614054, %v19564_v62  ;;  %v8415_v15 = vmul.f32 1.442695, %v8403_v25 }
0x1a1d   :  { %v8335_v34 = vmul.f32 %v19552_v5, %v8327_v16  ;;  %v8328_v50 = vadd.f32 -1.4531521, %v8320_v8  ;;  %v19571_v31 = vpop.eup %16659  ;;  %v8419_v25 = vmul.f32 1.442695, %v8405_v52 }
0x1a1e   :  { %v8337_v57 = vmul.f32 %v19554_v48, %v8329_v12  ;;  %v8330_v58 = vadd.f32 -1.4531521, %v8322_v54  ;;  %v8323_v14 = vmul.f32 1.0614054, %v19571_v31  ;;  %v8413_v12 = vmul.f32 1.442695, %v8402_v30  ;;  %v19576_v56 = vpop.eup %16661 }
0x1a1f   :  { %v8343_v32 = vadd.f32 1.4214138, %v8335_v34  ;;  %v8336_v9 = vmul.f32 %v19559_v27, %v8328_v50  ;;  %v19580_v19 = vpop.eup %16663  ;;  %16673 = vpow2.f32 %v8415_v15  ;;  %v8325_v20 = vmul.f32 1.0614054, %v19576_v56 }
0x1a20   :  { %v8345_v41 = vadd.f32 1.4214138, %v8337_v57  ;;  %v8338_v24 = vmul.f32 %v19564_v62, %v8330_v58  ;;  %v8331_v57 = vadd.f32 -1.4531521, %v8323_v14  ;;  %16675 = vpow2.f32 %v8413_v12 }
0x1a21   :  { %v8351_v46 = vmul.f32 %v19552_v5, %v8343_v32  ;;  %v8344_v16 = vadd.f32 1.4214138, %v8336_v9  ;;  %v8324_v55 = vmul.f32 1.0614054, %v19580_v19  ;;  %v8417_v30 = vmul.f32 1.442695, %v8404_v4 }
0x1a22   :  { %v8353_v26 = vmul.f32 %v19554_v48, %v8345_v41  ;;  %v8346_v8 = vadd.f32 1.4214138, %v8338_v24  ;;  %v8339_v54 = vmul.f32 %v19571_v31, %v8331_v57  ;;  %v8333_v41 = vadd.f32 -1.4531521, %v8325_v20  ;;  %v19588_v15 = vpop.eup %16665 }
0x1a23   :  { %v8359_v0 = vadd.f32 -0.28449672, %v8351_v46  ;;  %v8352_v7 = vmul.f32 %v19559_v27, %v8344_v16  ;;  %16677 = vpow2.f32 %v8419_v25  ;;  %v16668_v25 = vpop.eup %16667 }
0x1a24   :  { %v8361_v32 = vadd.f32 -0.28449672, %v8353_v26  ;;  %v8354_v3 = vmul.f32 %v19564_v62, %v8346_v8  ;;  %v8347_v58 = vadd.f32 1.4214138, %v8339_v54  ;;  %v8341_v52 = vmul.f32 %v19576_v56, %v8333_v41 }
0x1a25   :  { %v8367_v34 = vmul.f32 %v19552_v5, %v8359_v0  ;;  %v8360_v50 = vadd.f32 -0.28449672, %v8352_v7  ;;  %v8332_v26 = vadd.f32 -1.4531521, %v8324_v55  ;;  %v8406_v0 = vmul.f32 %v8398_v33, %v19550_v23 }
0x1a26   :  { %v8362_v9 = vadd.f32 -0.28449672, %v8354_v3  ;;  %v8369_v16 = vmul.f32 %v19554_v48, %v8361_v32  ;;  %v8355_v12 = vmul.f32 %v19571_v31, %v8347_v58  ;;  %v8349_v4 = vadd.f32 1.4214138, %v8341_v52 }
0x1a27   :  { %v8375_v13 = vadd.f32 0.2548296, %v8367_v34  ;;  %v8368_v46 = vmul.f32 %v19559_v27, %v8360_v50  ;;  %v8340_v34 = vmul.f32 %v19580_v19, %v8332_v26  ;;  %16679 = vpow2.f32 %v8417_v30  ;;  %v16670_v50 = vpop.eup %16669 }
0x1a28   :  { %v8370_v14 = vmul.f32 %v19564_v62, %v8362_v9  ;;  %v8326_v7 = vmul.f32 1.0614054, %v19588_v15  ;;  %v8363_v20 = vadd.f32 -0.28449672, %v8355_v12  ;;  %v8357_v23 = vmul.f32 %v19576_v56, %v8349_v4 }
0x1a29   :  { %v8376_v24 = vadd.f32 0.2548296, %v8368_v46  ;;  %v8383_v8 = vmul.f32 %v19552_v5, %v8375_v13  ;;  %v8348_v33 = vadd.f32 1.4214138, %v8340_v34  ;;  %v8377_v3 = vadd.f32 0.2548296, %v8369_v16  ;;  %v16672_v13 = vpop.eup %16671 }
0x1a2a   :  { %v8334_v32 = vadd.f32 -1.4531521, %v8326_v7  ;;  %v8378_v54 = vadd.f32 0.2548296, %v8370_v14  ;;  %v8371_v41 = vmul.f32 %v19571_v31, %v8363_v20  ;;  %v8421_v55 = vmul.f32 1.442695, %v8406_v0 }
0x1a2b   :  { %v8384_v57 = vmul.f32 %v19559_v27, %v8376_v24  ;;  %v8365_v30 = vadd.f32 -0.28449672, %v8357_v23  ;;  %v8356_v9 = vmul.f32 %v19580_v19, %v8348_v33  ;;  %v8423_v27 = vmul.f32 %v16668_v25, %v8383_v8 }
0x1a2c   :  { %v8342_v5 = vmul.f32 %v19588_v15, %v8334_v32  ;;  %v8379_v58 = vadd.f32 0.2548296, %v8371_v41  ;;  %v16674_v24 = vpop.eup %16673  ;;  %v8385_v12 = vmul.f32 %v19554_v48, %v8377_v3  ;;  %v8386_v16 = vmul.f32 %v19564_v62, %v8378_v54 }
0x1a2d   :  { %v8424_v46 = vmul.f32 %v16670_v50, %v8384_v57  ;;  %v8373_v52 = vmul.f32 %v19576_v56, %v8365_v30  ;;  %v8364_v26 = vadd.f32 -0.28449672, %v8356_v9  ;;  %16681 = vpow2.f32 %v8421_v55  ;;  %v16676_v57 = vpop.eup %16675 }
0x1a2e   :  { %v8387_v14 = vmul.f32 %v19571_v31, %v8379_v58  ;;  %v8350_v7 = vadd.f32 1.4214138, %v8342_v5  ;;  %v8431_v20 = vsub.f32 1.0, %v8423_v27  ;;  %v8426_v48 = vmul.f32 %v16676_v57, %v8386_v16 }
0x1a2f   :  { %v8432_v0 = vsub.f32 1.0, %v8424_v46  ;;  %v8381_v4 = vadd.f32 0.2548296, %v8373_v52  ;;  %v8372_v34 = vmul.f32 %v19580_v19, %v8364_v26  ;;  %v8425_v62 = vmul.f32 %v16672_v13, %v8385_v12 }
0x1a30   :  { %v8427_v8 = vmul.f32 %v16674_v24, %v8387_v14  ;;  %v8358_v33 = vmul.f32 %v19588_v15, %v8350_v7  ;;  %v16678_v32 = vpop.eup %16677  ;;  %v8447_v55 = vsub.f32 0.0, %v8431_v20  ;;  %v8463_v24 = vmul.f32 0.5, %v19499_v37 }
0x1a31   :  { %v8389_v25 = vmul.f32 %v19576_v56, %v8381_v4  ;;  %v8380_v23 = vadd.f32 0.2548296, %v8372_v34  ;;  %v8448_v3 = vsub.f32 0.0, %v8432_v0  ;;  %v8434_v56 = vsub.f32 1.0, %v8426_v48 }
0x1a32   :  { %v8435_v50 = vsub.f32 1.0, %v8427_v8  ;;  %v8366_v30 = vadd.f32 -0.28449672, %v8358_v33  ;;  %v8433_v13 = vsub.f32 1.0, %v8425_v62  ;;  %v8464_v16 = vmul.f32 0.5, %v19509_v1 }
0x1a33   :  { %v8429_v31 = vmul.f32 %v16678_v32, %v8389_v25  ;;  %v8388_v54 = vmul.f32 %v19580_v19, %v8380_v23  ;;  %v8456_v52 = vsel %vm8440_vm11, %v8432_v0, %v8448_v3  ;;  %v8455_v19 = vsel %vm8439_vm12, %v8431_v20, %v8447_v55 }
0x1a34   :  { %v16680_v41 = vpop.eup %16679  ;;  %v8451_v46 = vsub.f32 0.0, %v8435_v50  ;;  %v8374_v58 = vmul.f32 %v19588_v15, %v8366_v30  ;;  %v8472_v34 = vadd.f32 1.0, %v8456_v52  ;;  %v8450_v44 = vsub.f32 0.0, %v8434_v56 }
0x1a35   :  { %v8437_v9 = vsub.f32 1.0, %v8429_v31  ;;  %v8428_v5 = vmul.f32 %v16680_v41, %v8388_v54  ;;  %v8471_v17 = vadd.f32 1.0, %v8455_v19  ;;  %v8449_v8 = vsub.f32 0.0, %v8433_v13 }
0x1a36   :  { %v8459_v27 = vsel %vm8443_vm10, %v8435_v50, %v8451_v46  ;;  %v8382_v12 = vadd.f32 0.2548296, %v8374_v58  ;;  %v8467_v0 = vmul.f32 0.5, %v19526_v39  ;;  %v8468_v37 = vmul.f32 0.5, %v19533_v53 }
0x1a37   :  { %v8436_v26 = vsub.f32 1.0, %v8428_v5  ;;  %v8475_v6 = vadd.f32 1.0, %v8459_v27  ;;  %v8453_v14 = vsub.f32 0.0, %v8437_v9  ;;  %v8480_v33 = vmul.f32 %v8472_v34, %v8464_v16 }
0x1a38   :  { %v8390_v7 = vmul.f32 %v19588_v15, %v8382_v12  ;;  %v8458_v15 = vsel %vm8442_vm2, %v8434_v56, %v8450_v44  ;;  %v8479_v50 = vmul.f32 %v8471_v17, %v8463_v24  ;;  %v8457_v62 = vsel %vm8441_vm15, %v8433_v13, %v8449_v8  ;;  %v16275_v17 = vld [vmem:[%s20601_s1 + $0x938] sm:$0xff]  }
0x1a39   :  { %v8452_v4 = vsub.f32 0.0, %v8436_v26  ;;  %v8483_v23 = vmul.f32 %v8475_v6, %v8467_v0  ;;  %v8461_v42 = vsel %vm8445_vm14, %v8437_v9, %v8453_v14  ;;  %v8474_v59 = vadd.f32 1.0, %v8458_v15  ;;  %v16276_v8 = vld [vmem:[%s20601_s1 + $0x978] sm:$0xff]   ;;  %v16279_v15 = vld [vmem:[%s20601_s1 + $0x928] sm:$0xff]  }
0x1a3a   :  { %v16682_v57 = vpop.eup %16681  ;;  %v8477_v39 = vadd.f32 1.0, %v8461_v42  ;;  %v8473_v53 = vadd.f32 1.0, %v8457_v62  ;;  %v8470_v55 = vmul.f32 0.5, %v19544_v45  ;;  %v8465_v30 = vmul.f32 0.5, %v19501_v29  ;;  %v16277_v42 = vld [vmem:[%s20601_s1 + $0x930] sm:$0xff]   ;;  %v16283_v62 = vld [vmem:[%s20601_s1 + $0x918] sm:$0xff]  }
0x1a3b   :  { %v8460_v20 = vsel %vm8444_vm13, %v8436_v26, %v8452_v4  ;;  %v8430_v25 = vmul.f32 %v16682_v57, %v8390_v7  ;;  %v8487_v54 = vpack.c.bf16 %v8483_v23, %v8479_v50  ;;  %v8482_v5 = vmul.f32 %v8474_v59, %v8466_v40  ;;  %v16282_v50 = vld [vmem:[%s20601_s1 + $0x960] sm:$0xff]   ;;  %v16287_v59 = vld [vmem:[%s20601_s1 + $0x908] sm:$0xff]  }
0x1a3c   :  { %v8476_v1 = vadd.f32 1.0, %v8460_v20  ;;  %v8485_v9 = vmul.f32 %v8477_v39, %v8469_v63  ;;  %v8481_v61 = vmul.f32 %v8473_v53, %v8465_v30  ;;  %v8559_v45 = vrot.slane %v19270_v49, %v17783_v28  ;;  %v16284_v39 = vld [vmem:[%s20601_s1 + $0x958] sm:$0xff]   ;;  %v16289_v53 = vld [vmem:[%s20601_s1 + $0x900] sm:$0xff]  }
0x1a3d   :  { %v8438_v48 = vsub.f32 1.0, %v8430_v25  ;;  %v16290_v63 = vld [vmem:[%s20601_s1 + $0x940] sm:$0xff]  }
0x1a3e   :  { %v8484_v32 = vmul.f32 %v8476_v1, %v8468_v37  ;;  %v8489_v58 = vpack.c.bf16 %v8485_v9, %v8481_v61 }
0x1a3f   :  { %v8454_v3 = vsub.f32 0.0, %v8438_v48 }
0x1a40   :  { %v8488_v31 = vpack.c.bf16 %v8484_v32, %v8480_v33  ;;  %v16278_v33 = vld [vmem:[%s20601_s1 + $0x970] sm:$0xff]   ;;  %v16280_v32 = vld [vmem:[%s20601_s1 + $0x968] sm:$0xff]  }
0x1a41   :  { %v8462_v41 = vsel %vm8446_vm3, %v8438_v48, %v8454_v3  ;;  %v16281_v48 = vld [vmem:[%s20601_s1 + $0x920] sm:$0xff]   ;;  %v16285_v3 = vld [vmem:[%s20601_s1 + $0x910] sm:$0xff]  }
0x1a42   :  { %8784 = vmatprep.mubr.bf16.mxu0 %v8488_v31  ;;  %v8478_v46 = vadd.f32 1.0, %v8462_v41  ;;  %v16286_v31 = vld [vmem:[%s20601_s1 + $0x950] sm:$0xff]  }
0x1a43   :  { %8785 = vmatmul.mubr.bf16.vlgmr.msra.gmra.mxu0 %v8487_v54  ;;  %v16288_v54 = vld [vmem:[%s20601_s1 + $0x948] sm:$0xff]  }
0x1a44   :  { %15395 = vmatprep.mubr.msk.bf16.mxu0 %vm16767_vm0, %v16766_v2  ;;  %v8486_v56 = vmul.f32 %v8478_v46, %v8470_v55  ;;  %15380 = vmatpush3.bf16.msra.mxu0 %v16275_v17  ;;  %v16301_v17 = vld [vmem:[%s20601_s1 + $0x990] sm:$0xff]  }
0x1a45   :  { %15381 = vmatprep.subr.bf16.mxu0 %v16766_v2 }
0x1a46   :  { %v8490_v27 = vpack.c.bf16 %v8486_v56, %v8482_v5  ;;  %v13196_v5 = vld [vmem:[%s20602_s5 + $0x18] sm:$0x3f] }
0x1a47   :  { %v8865_v61 = vrot.slane %v13196_v5, %v16911_v36 }
0x1a48   :  { %8825 = vmatprep.mubr.bf16.mxu1 %v8490_v27  ;;  %15382 = vmatpush3.bf16.msra.mxu0 %v16277_v42  ;;  %v16311_v42 = vld [vmem:[%s20601_s1 + $0xa28] sm:$0xff]  }
0x1a49   :  { %8826 = vmatmul.mubr.bf16.vlgmr.msra.gmra.mxu1 %v8489_v58  ;;  %15383 = vmatprep.subr.bf16.mxu0 %v16766_v2 }
0x1a4a   :  { %15415 = vmatprep.mubr.msk.bf16.mxu1 %vm16767_vm0, %v16766_v2  ;;  %15400 = vmatpush3.bf16.msra.mxu1 %v16276_v8  ;;  %v16302_v8 = vld [vmem:[%s20601_s1 + $0x9d0] sm:$0xff]  }
0x1a4b   :  { %15401 = vmatprep.subr.bf16.mxu1 %v16766_v2 }
0x1a4c   :  { %15384 = vmatpush3.bf16.msra.mxu0 %v16279_v15  ;;  %v16313_v15 = vld [vmem:[%s20601_s1 + $0xa20] sm:$0xff]  }
0x1a4d   :  { %15385 = vmatprep.subr.bf16.mxu0 %v16766_v2 }
0x1a4e   :  { %15402 = vmatpush3.bf16.msra.mxu1 %v16278_v33  ;;  %v16312_v33 = vld [vmem:[%s20601_s1 + $0xa68] sm:$0xff]  }
0x1a4f   :  { %15403 = vmatprep.subr.bf16.mxu1 %v16766_v2 }
0x1a50   :  { %15386 = vmatpush3.bf16.msra.mxu0 %v16281_v48  ;;  %v16315_v48 = vld [vmem:[%s20601_s1 + $0xa18] sm:$0xff]  }
0x1a51   :  { %15387 = vmatprep.subr.bf16.mxu0 %v16766_v2 }
0x1a52   :  { %15404 = vmatpush3.bf16.msra.mxu1 %v16280_v32  ;;  %v16314_v32 = vld [vmem:[%s20601_s1 + $0xa60] sm:$0xff]  }
0x1a53   :  { %15405 = vmatprep.subr.bf16.mxu1 %v16766_v2 }
0x1a54   :  { %15388 = vmatpush3.bf16.msra.mxu0 %v16283_v62  ;;  %v16317_v62 = vld [vmem:[%s20601_s1 + $0xa10] sm:$0xff]  }
0x1a55   :  { %15389 = vmatprep.subr.bf16.mxu0 %v16766_v2 }
0x1a56   :  { %15406 = vmatpush3.bf16.msra.mxu1 %v16282_v50  ;;  %v16316_v50 = vld [vmem:[%s20601_s1 + $0xa58] sm:$0xff]  }
0x1a57   :  { %15407 = vmatprep.subr.bf16.mxu1 %v16766_v2 }
0x1a58   :  { %15390 = vmatpush3.bf16.msra.mxu0 %v16285_v3  ;;  %v16319_v3 = vld [vmem:[%s20601_s1 + $0xa08] sm:$0xff]  }
0x1a59   :  { %15391 = vmatprep.subr.bf16.mxu0 %v16766_v2 }
0x1a5a   :  { %15408 = vmatpush3.bf16.msra.mxu1 %v16284_v39  ;;  %v16318_v39 = vld [vmem:[%s20601_s1 + $0xa50] sm:$0xff]  }
0x1a5b   :  { %15409 = vmatprep.subr.bf16.mxu1 %v16766_v2 }
0x1a5c   :  { %15392 = vmatpush3.bf16.msra.mxu0 %v16287_v59  ;;  %v16321_v59 = vld [vmem:[%s20601_s1 + $0xa00] sm:$0xff]  }
0x1a5d   :  { %15393 = vmatprep.subr.bf16.mxu0 %v16766_v2 }
0x1a5e   :  { %15410 = vmatpush3.bf16.msra.mxu1 %v16286_v31  ;;  %v16320_v31 = vld [vmem:[%s20601_s1 + $0xa48] sm:$0xff]  }
0x1a5f   :  { %15411 = vmatprep.subr.bf16.mxu1 %v16766_v2 }
0x1a60   :  { %15394 = vmatpush3.bf16.msra.mxu0 %v16289_v53  ;;  %v16323_v53 = vld [vmem:[%s20601_s1 + $0xab8] sm:$0xff]  }
0x1a61   :  { %15419 = vmatprep.subr.bf16.mxu0 %v16766_v2 }
0x1a62   :  { %15412 = vmatpush3.bf16.msra.mxu1 %v16288_v54  ;;  %v16322_v54 = vld [vmem:[%s20601_s1 + $0xa40] sm:$0xff]  }
0x1a63   :  { %15413 = vmatprep.subr.bf16.mxu1 %v16766_v2 }
0x1a66   :  { %15414 = vmatpush3.bf16.msra.mxu1 %v16290_v63  ;;  %v16324_v63 = vld [vmem:[%s20601_s1 + $0xaf8] sm:$0xff]  }
0x1a67   :  { %15439 = vmatprep.subr.bf16.mxu1 %v16766_v2 }
0x1b03   :  { %v14202_v11 = vpop.f32.mrf.mxu0 }
0x1b05   :  { %v14203_v47 = vpop.f32.mrf.mxu0 }
0x1b06   :  { %v14204_v29 = vadd.f32 %v14203_v47, %v14202_v11  ;;  %v8871_v11 = vrot.slane %v13196_v5, %v16914_v38  ;;  %v16331_v5 = vld [vmem:[%s20601_s1 + $0xa98] sm:$0xff]  }
0x1b07   :  { %v14205_v13 = vpop.f32.mrf.mxu0 }
0x1b08   :  { %v8787_v19 = vadd.f32 %v14204_v29, %v8559_v45 }
0x1b09   :  { %v14206_v52 = vpop.f32.mrf.mxu0  ;;  %v14224_v26 = vpop.f32.mrf.mxu1 }
0x1b0a   :  { %v14207_v24 = vadd.f32 %v14206_v52, %v14205_v13 }
0x1b0b   :  { %v14225_v12 = vpop.f32.mrf.mxu1 }
0x1b0c   :  { %v14226_v16 = vadd.f32 %v14225_v12, %v14224_v26  ;;  %v8790_v4 = vadd.f32 %v14207_v24, %v8559_v45  ;;  %v16291_v26 = vld [vmem:[%s20601_s1 + $0x9b8] sm:$0xff]   ;;  %v16293_v12 = vld [vmem:[%s20601_s1 + $0x9b0] sm:$0xff]  }
0x1b0d   :  { %v14227_v6 = vpop.f32.mrf.mxu1 }
0x1b0e   :  { %v8828_v14 = vadd.f32 %v14226_v16, %v8787_v19  ;;  %v16292_v19 = vld [vmem:[%s20601_s1 + $0x9f8] sm:$0xff]   ;;  %v16294_v16 = vld [vmem:[%s20601_s1 + $0x9f0] sm:$0xff]  }
0x1b0f   :  { %v14228_v34 = vpop.f32.mrf.mxu1 }
0x1b10   :  { %v14229_v44 = vadd.f32 %v14228_v34, %v14227_v6  ;;  %v19636_v7 = vadd.f32 %v8828_v14, %v19275_v35  ;;  %v16295_v6 = vld [vmem:[%s20601_s1 + $0x9a8] sm:$0xff]   ;;  %v16298_v34 = vld [vmem:[%s20601_s1 + $0x9e0] sm:$0xff]  }
0x1b11   :  { %v16296_v14 = vld [vmem:[%s20601_s1 + $0x9e8] sm:$0xff]  }
0x1b12   :  { %v8831_v57 = vadd.f32 %v14229_v44, %v8790_v4  ;;  %8840 = vadd.xlane.f32.xlu0 %v19636_v7  ;;  %v16297_v4 = vld [vmem:[%s20601_s1 + $0x9a0] sm:$0xff]   ;;  %v16299_v44 = vld [vmem:[%s20601_s1 + $0x998] sm:$0xff]  }
0x1b14   :  { %v19640_v49 = vadd.f32 %v8831_v57, %v19279_v22  ;;  %v16300_v57 = vld [vmem:[%s20601_s1 + $0x9d8] sm:$0xff]  }
0x1b16   :  { %8842 = vadd.xlane.f32.xlu1 %v19640_v49 }
0x1b9b   :  { %v8841_v35 = vpop.xlane.xlu0 %8840 }
0x1b9c   :  { %v8844_v0 = vmul.f32 0.0078125, %v8841_v35  ;;  %v16303_v35 = vld [vmem:[%s20601_s1 + $0x988] sm:$0xff]  }
0x1b9e   :  { %v8846_v22 = vsub.f32 %v19636_v7, %v8844_v0  ;;  %v16304_v0 = vld [vmem:[%s20601_s1 + $0x9c8] sm:$0xff]  }
0x1b9f   :  { %v8843_v20 = vpop.xlane.xlu1 %8842 }
0x1ba0   :  { %v8845_v37 = vmul.f32 0.0078125, %v8843_v20  ;;  %v8848_v1 = vmul.f32 %v8846_v22, %v8846_v22  ;;  %v16306_v20 = vld [vmem:[%s20601_s1 + $0x9c0] sm:$0xff]  }
0x1ba2   :  { %v8847_v25 = vsub.f32 %v19640_v49, %v8845_v37  ;;  %8850 = vadd.xlane.f32.xlu0 %v8848_v1  ;;  %v16307_v37 = vld [vmem:[%s20601_s1 + $0xa38] sm:$0xff]  }
0x1ba3   :  { %v16308_v1 = vld [vmem:[%s20601_s1 + $0xa78] sm:$0xff]  }
0x1ba4   :  { %v8849_v23 = vmul.f32 %v8847_v25, %v8847_v25 }
0x1ba6   :  { %8852 = vadd.xlane.f32.xlu1 %v8849_v23  ;;  %v16310_v23 = vld [vmem:[%s20601_s1 + $0xa70] sm:$0xff]  }
0x1c2b   :  { %v8851_v41 = vpop.xlane.xlu0 %8850 }
0x1c2c   :  { %v8854_v40 = vmul.f32 0.0078125, %v8851_v41  ;;  %v16325_v41 = vld [vmem:[%s20601_s1 + $0xab0] sm:$0xff]  }
0x1c2e   :  { %v8856_v55 = vadd.f32 1e-05, %v8854_v40  ;;  %v16326_v40 = vld [vmem:[%s20601_s1 + $0xaf0] sm:$0xff]  }
0x1c2f   :  { %v8853_v46 = vpop.xlane.xlu1 %8852 }
0x1c30   :  { %16683 = vrsqrt.f32 %v8856_v55  ;;  %v8855_v30 = vmul.f32 0.0078125, %v8853_v46  ;;  %v16327_v55 = vld [vmem:[%s20601_s1 + $0xaa8] sm:$0xff]  }
0x1c31   :  { %v16328_v46 = vld [vmem:[%s20601_s1 + $0xae8] sm:$0xff]  }
0x1c32   :  { %v8857_v9 = vadd.f32 1e-05, %v8855_v30  ;;  %v16329_v30 = vld [vmem:[%s20601_s1 + $0xaa0] sm:$0xff]  }
0x1c34   :  { %16685 = vrsqrt.f32 %v8857_v9  ;;  %v16330_v9 = vld [vmem:[%s20601_s1 + $0xae0] sm:$0xff]  }
0x1c3d   :  { %v16684_v56 = vpop.eup %16683 }
0x1c3e   :  { %v8860_v27 = vmul.f32 %v16684_v56, %v8846_v22  ;;  %v16305_v22 = vld [vmem:[%s20601_s1 + $0x980] sm:$0xff]   ;;  %v16332_v56 = vld [vmem:[%s20601_s1 + $0xad8] sm:$0xff]  }
0x1c40   :  { %v8866_v47 = vmul.f32 %v8865_v61, %v8860_v27  ;;  %v16334_v27 = vld [vmem:[%s20601_s1 + $0xad0] sm:$0xff]  }
0x1c41   :  { %v16686_v58 = vpop.eup %16685 }
0x1c42   :  { %v8861_v45 = vmul.f32 %v16686_v58, %v8847_v25  ;;  %v8872_v13 = vadd.f32 %v8871_v11, %v8866_v47  ;;  %v16309_v25 = vld [vmem:[%s20601_s1 + $0xa30] sm:$0xff]   ;;  %v16335_v58 = vld [vmem:[%s20601_s1 + $0xa88] sm:$0xff]   ;;  %v16337_v47 = vld [vmem:[%s20601_s1 + $0xa80] sm:$0xff]  }
0x1c44   :  { %v8867_v29 = vmul.f32 %v8865_v61, %v8861_v45  ;;  %v16333_v61 = vld [vmem:[%s20601_s1 + $0xa90] sm:$0xff]   ;;  %v16338_v45 = vld [vmem:[%s20601_s1 + $0xac0] sm:$0xff]  }
0x1c46   :  { %v8873_v52 = vadd.f32 %v8871_v11, %v8867_v29  ;;  %v16336_v11 = vld [vmem:[%s20601_s1 + $0xac8] sm:$0xff]   ;;  %v16339_v29 = vld [vmem:[%s20601_s1 + $0xb38] sm:$0xff]  }
0x1c48   :  { %v19720_v24 = vpack.c.bf16 %v8873_v52, %v8872_v13  ;;  %v16340_v13 = vld [vmem:[%s20601_s1 + $0xb78] sm:$0xff]   ;;  %v16341_v52 = vld [vmem:[%s20601_s1 + $0xb30] sm:$0xff]  }
0x1c4a   :  { %15396 = vmatmul.mubr.bf16.vlgmr.msra.gmra.mxu0 %v19720_v24  ;;  %15416 = vmatmul.mubr.bf16.vlgmr.msra.gmra.mxu1 %v19720_v24 }
0x1c4b   :  { %15420 = vmatpush3.bf16.msra.mxu0 %v16291_v26  ;;  %15440 = vmatpush3.bf16.msra.mxu1 %v16292_v19  ;;  %v16342_v26 = vld [vmem:[%s20601_s1 + $0xb70] sm:$0xff]   ;;  %v16343_v19 = vld [vmem:[%s20601_s1 + $0xb28] sm:$0xff]  }
0x1c4c   :  { %15421 = vmatprep.subr.bf16.mxu0 %v16766_v2  ;;  %15441 = vmatprep.subr.bf16.mxu1 %v16766_v2 }
0x1c4d   :  { %15435 = vmatprep.mubr.msk.bf16.mxu0 %vm16767_vm0, %v16766_v2  ;;  %15455 = vmatprep.mubr.msk.bf16.mxu1 %vm16767_vm0, %v16766_v2 }
0x1c4f   :  { %15422 = vmatpush3.bf16.msra.mxu0 %v16293_v12  ;;  %15442 = vmatpush3.bf16.msra.mxu1 %v16294_v16  ;;  %v16344_v12 = vld [vmem:[%s20601_s1 + $0xb68] sm:$0xff]   ;;  %v16345_v16 = vld [vmem:[%s20601_s1 + $0xb20] sm:$0xff]  }
0x1c50   :  { %15423 = vmatprep.subr.bf16.mxu0 %v16766_v2  ;;  %15443 = vmatprep.subr.bf16.mxu1 %v16766_v2 }
0x1c53   :  { %15424 = vmatpush3.bf16.msra.mxu0 %v16295_v6  ;;  %15444 = vmatpush3.bf16.msra.mxu1 %v16296_v14  ;;  %v16346_v6 = vld [vmem:[%s20601_s1 + $0xb60] sm:$0xff]   ;;  %v16347_v14 = vld [vmem:[%s20601_s1 + $0xb18] sm:$0xff]  }
0x1c54   :  { %15425 = vmatprep.subr.bf16.mxu0 %v16766_v2  ;;  %15445 = vmatprep.subr.bf16.mxu1 %v16766_v2 }
0x1c57   :  { %15426 = vmatpush3.bf16.msra.mxu0 %v16297_v4  ;;  %15446 = vmatpush3.bf16.msra.mxu1 %v16298_v34  ;;  %v16348_v4 = vld [vmem:[%s20601_s1 + $0xb58] sm:$0xff]   ;;  %v16349_v34 = vld [vmem:[%s20601_s1 + $0xb10] sm:$0xff]  }
0x1c58   :  { %15427 = vmatprep.subr.bf16.mxu0 %v16766_v2  ;;  %15447 = vmatprep.subr.bf16.mxu1 %v16766_v2 }
0x1c5b   :  { %15428 = vmatpush3.bf16.msra.mxu0 %v16299_v44  ;;  %15448 = vmatpush3.bf16.msra.mxu1 %v16300_v57  ;;  %v16350_v44 = vld [vmem:[%s20601_s1 + $0xb50] sm:$0xff]   ;;  %v16351_v57 = vld [vmem:[%s20601_s1 + $0xb08] sm:$0xff]  }
0x1c5c   :  { %15429 = vmatprep.subr.bf16.mxu0 %v16766_v2  ;;  %15449 = vmatprep.subr.bf16.mxu1 %v16766_v2 }
0x1c5f   :  { %15430 = vmatpush3.bf16.msra.mxu0 %v16301_v17  ;;  %15450 = vmatpush3.bf16.msra.mxu1 %v16302_v8  ;;  %v16352_v17 = vld [vmem:[%s20601_s1 + $0xb48] sm:$0xff]   ;;  %v16353_v8 = vld [vmem:[%s20601_s1 + $0xb00] sm:$0xff]  }
0x1c60   :  { %15431 = vmatprep.subr.bf16.mxu0 %v16766_v2  ;;  %15451 = vmatprep.subr.bf16.mxu1 %v16766_v2 }
0x1c63   :  { %15432 = vmatpush3.bf16.msra.mxu0 %v16303_v35  ;;  %15452 = vmatpush3.bf16.msra.mxu1 %v16304_v0  ;;  %v16354_v35 = vld [vmem:[%s20601_s1 + $0xb40] sm:$0xff]   ;;  %v16355_v0 = vld [vmem:[%s20601_s1 + $0xbb8] sm:$0xff]  }
0x1c64   :  { %15433 = vmatprep.subr.bf16.mxu0 %v16766_v2  ;;  %15453 = vmatprep.subr.bf16.mxu1 %v16766_v2 }
0x1c67   :  { %15434 = vmatpush3.bf16.msra.mxu0 %v16305_v22  ;;  %15454 = vmatpush3.bf16.msra.mxu1 %v16306_v20  ;;  %v16356_v22 = vld [vmem:[%s20601_s1 + $0xbf8] sm:$0xff]   ;;  %v16357_v20 = vld [vmem:[%s20601_s1 + $0xbb0] sm:$0xff]  }
0x1c68   :  { %15459 = vmatprep.subr.bf16.mxu0 %v16766_v2  ;;  %15479 = vmatprep.subr.bf16.mxu1 %v16766_v2 }
0x1c6a   :  { %15436 = vmatmul.mubr.bf16.vlgmr.msra.gmra.mxu0 %v19720_v24  ;;  %15456 = vmatmul.mubr.bf16.vlgmr.msra.gmra.mxu1 %v19720_v24 }
0x1c6b   :  { %15460 = vmatpush3.bf16.msra.mxu0 %v16307_v37  ;;  %15480 = vmatpush3.bf16.msra.mxu1 %v16308_v1  ;;  %v16358_v37 = vld [vmem:[%s20601_s1 + $0xbf0] sm:$0xff]   ;;  %v16359_v1 = vld [vmem:[%s20601_s1 + $0xba8] sm:$0xff]  }
0x1c6c   :  { %15461 = vmatprep.subr.bf16.mxu0 %v16766_v2  ;;  %15481 = vmatprep.subr.bf16.mxu1 %v16766_v2 }
0x1c6d   :  { %15475 = vmatprep.mubr.msk.bf16.mxu0 %vm16767_vm0, %v16766_v2  ;;  %15495 = vmatprep.mubr.msk.bf16.mxu1 %vm16767_vm0, %v16766_v2 }
0x1c6f   :  { %15462 = vmatpush3.bf16.msra.mxu0 %v16309_v25  ;;  %15482 = vmatpush3.bf16.msra.mxu1 %v16310_v23  ;;  %v16360_v25 = vld [vmem:[%s20601_s1 + $0xbe8] sm:$0xff]   ;;  %v16361_v23 = vld [vmem:[%s20601_s1 + $0xba0] sm:$0xff]  }
0x1c70   :  { %15463 = vmatprep.subr.bf16.mxu0 %v16766_v2  ;;  %15483 = vmatprep.subr.bf16.mxu1 %v16766_v2 }
0x1c73   :  { %15464 = vmatpush3.bf16.msra.mxu0 %v16311_v42  ;;  %15484 = vmatpush3.bf16.msra.mxu1 %v16312_v33  ;;  %v16362_v42 = vld [vmem:[%s20601_s1 + $0xbe0] sm:$0xff]   ;;  %v16363_v33 = vld [vmem:[%s20601_s1 + $0xb98] sm:$0xff]  }
0x1c74   :  { %15465 = vmatprep.subr.bf16.mxu0 %v16766_v2  ;;  %15485 = vmatprep.subr.bf16.mxu1 %v16766_v2 }
0x1c77   :  { %15466 = vmatpush3.bf16.msra.mxu0 %v16313_v15  ;;  %15486 = vmatpush3.bf16.msra.mxu1 %v16314_v32  ;;  %v16364_v15 = vld [vmem:[%s20601_s1 + $0xbd8] sm:$0xff]   ;;  %v16365_v32 = vld [vmem:[%s20601_s1 + $0xb90] sm:$0xff]  }
0x1c78   :  { %15467 = vmatprep.subr.bf16.mxu0 %v16766_v2  ;;  %15487 = vmatprep.subr.bf16.mxu1 %v16766_v2 }
0x1c7b   :  { %15468 = vmatpush3.bf16.msra.mxu0 %v16315_v48  ;;  %15488 = vmatpush3.bf16.msra.mxu1 %v16316_v50  ;;  %v16366_v48 = vld [vmem:[%s20601_s1 + $0xbd0] sm:$0xff]   ;;  %v16367_v50 = vld [vmem:[%s20601_s1 + $0xb88] sm:$0xff]  }
0x1c7c   :  { %15469 = vmatprep.subr.bf16.mxu0 %v16766_v2  ;;  %15489 = vmatprep.subr.bf16.mxu1 %v16766_v2 }
0x1c7f   :  { %15470 = vmatpush3.bf16.msra.mxu0 %v16317_v62  ;;  %15490 = vmatpush3.bf16.msra.mxu1 %v16318_v39  ;;  %v16368_v62 = vld [vmem:[%s20601_s1 + $0xbc8] sm:$0xff]   ;;  %v16369_v39 = vld [vmem:[%s20601_s1 + $0xb80] sm:$0xff]  }
0x1c80   :  { %15471 = vmatprep.subr.bf16.mxu0 %v16766_v2  ;;  %15491 = vmatprep.subr.bf16.mxu1 %v16766_v2 }
0x1c83   :  { %15472 = vmatpush3.bf16.msra.mxu0 %v16319_v3  ;;  %15492 = vmatpush3.bf16.msra.mxu1 %v16320_v31  ;;  %v16370_v3 = vld [vmem:[%s20601_s1 + $0xbc0] sm:$0xff]  }
0x1c84   :  { %15473 = vmatprep.subr.bf16.mxu0 %v16766_v2  ;;  %15493 = vmatprep.subr.bf16.mxu1 %v16766_v2 }
0x1c87   :  { %15474 = vmatpush3.bf16.msra.mxu0 %v16321_v59  ;;  %15494 = vmatpush3.bf16.msra.mxu1 %v16322_v54 }
0x1c88   :  { %15499 = vmatprep.subr.bf16.mxu0 %v16766_v2  ;;  %15519 = vmatprep.subr.bf16.mxu1 %v16766_v2 }
0x1c8a   :  { %15476 = vmatmul.mubr.bf16.vlgmr.msra.gmra.mxu0 %v19720_v24  ;;  %15496 = vmatmul.mubr.bf16.vlgmr.msra.gmra.mxu1 %v19720_v24 }
0x1c8b   :  { %15500 = vmatpush3.bf16.msra.mxu0 %v16323_v53  ;;  %15520 = vmatpush3.bf16.msra.mxu1 %v16324_v63 }
0x1c8c   :  { %15501 = vmatprep.subr.bf16.mxu0 %v16766_v2  ;;  %15521 = vmatprep.subr.bf16.mxu1 %v16766_v2 }
0x1c8d   :  { %15515 = vmatprep.mubr.msk.bf16.mxu0 %vm16767_vm0, %v16766_v2  ;;  %15535 = vmatprep.mubr.msk.bf16.mxu1 %vm16767_vm0, %v16766_v2 }
0x1c8f   :  { %15502 = vmatpush3.bf16.msra.mxu0 %v16325_v41  ;;  %15522 = vmatpush3.bf16.msra.mxu1 %v16326_v40 }
0x1c90   :  { %15503 = vmatprep.subr.bf16.mxu0 %v16766_v2  ;;  %15523 = vmatprep.subr.bf16.mxu1 %v16766_v2 }
0x1c93   :  { %15504 = vmatpush3.bf16.msra.mxu0 %v16327_v55  ;;  %15524 = vmatpush3.bf16.msra.mxu1 %v16328_v46 }
0x1c94   :  { %15505 = vmatprep.subr.bf16.mxu0 %v16766_v2  ;;  %15525 = vmatprep.subr.bf16.mxu1 %v16766_v2 }
0x1c97   :  { %15506 = vmatpush3.bf16.msra.mxu0 %v16329_v30  ;;  %15526 = vmatpush3.bf16.msra.mxu1 %v16330_v9 }
0x1c98   :  { %15507 = vmatprep.subr.bf16.mxu0 %v16766_v2  ;;  %15527 = vmatprep.subr.bf16.mxu1 %v16766_v2 }
0x1c9b   :  { %15508 = vmatpush3.bf16.msra.mxu0 %v16331_v5  ;;  %15528 = vmatpush3.bf16.msra.mxu1 %v16332_v56 }
0x1c9c   :  { %15509 = vmatprep.subr.bf16.mxu0 %v16766_v2  ;;  %15529 = vmatprep.subr.bf16.mxu1 %v16766_v2 }
0x1c9f   :  { %15510 = vmatpush3.bf16.msra.mxu0 %v16333_v61  ;;  %15530 = vmatpush3.bf16.msra.mxu1 %v16334_v27 }
0x1ca0   :  { %15511 = vmatprep.subr.bf16.mxu0 %v16766_v2  ;;  %15531 = vmatprep.subr.bf16.mxu1 %v16766_v2 }
0x1ca3   :  { %15512 = vmatpush3.bf16.msra.mxu0 %v16335_v58  ;;  %15532 = vmatpush3.bf16.msra.mxu1 %v16336_v11 }
0x1ca4   :  { %15513 = vmatprep.subr.bf16.mxu0 %v16766_v2  ;;  %15533 = vmatprep.subr.bf16.mxu1 %v16766_v2 }
0x1ca7   :  { %15514 = vmatpush3.bf16.msra.mxu0 %v16337_v47  ;;  %15534 = vmatpush3.bf16.msra.mxu1 %v16338_v45 }
0x1ca8   :  { %15539 = vmatprep.subr.bf16.mxu0 %v16766_v2  ;;  %15559 = vmatprep.subr.bf16.mxu1 %v16766_v2 }
0x1caa   :  { %15516 = vmatmul.mubr.bf16.vlgmr.msra.gmra.mxu0 %v19720_v24  ;;  %15536 = vmatmul.mubr.bf16.vlgmr.msra.gmra.mxu1 %v19720_v24 }
0x1cab   :  { %15540 = vmatpush3.bf16.msra.mxu0 %v16339_v29  ;;  %15560 = vmatpush3.bf16.msra.mxu1 %v16340_v13 }
0x1cac   :  { %15541 = vmatprep.subr.bf16.mxu0 %v16766_v2  ;;  %15561 = vmatprep.subr.bf16.mxu1 %v16766_v2 }
0x1cad   :  { %15555 = vmatprep.mubr.msk.bf16.mxu0 %vm16767_vm0, %v16766_v2  ;;  %15575 = vmatprep.mubr.msk.bf16.mxu1 %vm16767_vm0, %v16766_v2 }
0x1caf   :  { %15542 = vmatpush3.bf16.msra.mxu0 %v16341_v52  ;;  %15562 = vmatpush3.bf16.msra.mxu1 %v16342_v26 }
0x1cb0   :  { %15543 = vmatprep.subr.bf16.mxu0 %v16766_v2  ;;  %15563 = vmatprep.subr.bf16.mxu1 %v16766_v2 }
0x1cb3   :  { %15544 = vmatpush3.bf16.msra.mxu0 %v16343_v19  ;;  %15564 = vmatpush3.bf16.msra.mxu1 %v16344_v12 }
0x1cb4   :  { %15545 = vmatprep.subr.bf16.mxu0 %v16766_v2  ;;  %15565 = vmatprep.subr.bf16.mxu1 %v16766_v2 }
0x1cb7   :  { %15546 = vmatpush3.bf16.msra.mxu0 %v16345_v16  ;;  %15566 = vmatpush3.bf16.msra.mxu1 %v16346_v6 }
0x1cb8   :  { %15547 = vmatprep.subr.bf16.mxu0 %v16766_v2  ;;  %15567 = vmatprep.subr.bf16.mxu1 %v16766_v2 }
0x1cbb   :  { %15548 = vmatpush3.bf16.msra.mxu0 %v16347_v14  ;;  %15568 = vmatpush3.bf16.msra.mxu1 %v16348_v4 }
0x1cbc   :  { %15549 = vmatprep.subr.bf16.mxu0 %v16766_v2  ;;  %15569 = vmatprep.subr.bf16.mxu1 %v16766_v2 }
0x1cbf   :  { %15550 = vmatpush3.bf16.msra.mxu0 %v16349_v34  ;;  %15570 = vmatpush3.bf16.msra.mxu1 %v16350_v44 }
0x1cc0   :  { %15551 = vmatprep.subr.bf16.mxu0 %v16766_v2  ;;  %15571 = vmatprep.subr.bf16.mxu1 %v16766_v2 }
0x1cc3   :  { %15552 = vmatpush3.bf16.msra.mxu0 %v16351_v57  ;;  %15572 = vmatpush3.bf16.msra.mxu1 %v16352_v17 }
0x1cc4   :  { %15553 = vmatprep.subr.bf16.mxu0 %v16766_v2  ;;  %15573 = vmatprep.subr.bf16.mxu1 %v16766_v2 }
0x1cc7   :  { %15554 = vmatpush3.bf16.msra.mxu0 %v16353_v8  ;;  %15574 = vmatpush3.bf16.msra.mxu1 %v16354_v35 }
0x1cc8   :  { %15579 = vmatprep.subr.bf16.mxu0 %v16766_v2  ;;  %15599 = vmatprep.subr.bf16.mxu1 %v16766_v2 }
0x1cca   :  { %15556 = vmatmul.mubr.bf16.vlgmr.msra.gmra.mxu0 %v19720_v24  ;;  %15576 = vmatmul.mubr.bf16.vlgmr.msra.gmra.mxu1 %v19720_v24 }
0x1ccb   :  { %15580 = vmatpush3.bf16.msra.mxu0 %v16355_v0  ;;  %15600 = vmatpush3.bf16.msra.mxu1 %v16356_v22 }
0x1ccc   :  { %15581 = vmatprep.subr.bf16.mxu0 %v16766_v2  ;;  %15601 = vmatprep.subr.bf16.mxu1 %v16766_v2 }
0x1ccd   :  { %15595 = vmatprep.mubr.msk.bf16.mxu0 %vm16767_vm0, %v16766_v2  ;;  %15615 = vmatprep.mubr.msk.bf16.mxu1 %vm16767_vm0, %v16766_v2 }
0x1ccf   :  { %15582 = vmatpush3.bf16.msra.mxu0 %v16357_v20  ;;  %15602 = vmatpush3.bf16.msra.mxu1 %v16358_v37 }
0x1cd0   :  { %15583 = vmatprep.subr.bf16.mxu0 %v16766_v2  ;;  %15603 = vmatprep.subr.bf16.mxu1 %v16766_v2 }
0x1cd3   :  { %15584 = vmatpush3.bf16.msra.mxu0 %v16359_v1  ;;  %15604 = vmatpush3.bf16.msra.mxu1 %v16360_v25 }
0x1cd4   :  { %15585 = vmatprep.subr.bf16.mxu0 %v16766_v2  ;;  %15605 = vmatprep.subr.bf16.mxu1 %v16766_v2 }
0x1cd7   :  { %15586 = vmatpush3.bf16.msra.mxu0 %v16361_v23  ;;  %15606 = vmatpush3.bf16.msra.mxu1 %v16362_v42 }
0x1cd8   :  { %15587 = vmatprep.subr.bf16.mxu0 %v16766_v2  ;;  %15607 = vmatprep.subr.bf16.mxu1 %v16766_v2 }
0x1cdb   :  { %15588 = vmatpush3.bf16.msra.mxu0 %v16363_v33  ;;  %15608 = vmatpush3.bf16.msra.mxu1 %v16364_v15 }
0x1cdc   :  { %15589 = vmatprep.subr.bf16.mxu0 %v16766_v2  ;;  %15609 = vmatprep.subr.bf16.mxu1 %v16766_v2 }
0x1cdf   :  { %15590 = vmatpush3.bf16.msra.mxu0 %v16365_v32  ;;  %15610 = vmatpush3.bf16.msra.mxu1 %v16366_v48 }
0x1ce0   :  { %15591 = vmatprep.subr.bf16.mxu0 %v16766_v2  ;;  %15611 = vmatprep.subr.bf16.mxu1 %v16766_v2 }
0x1ce3   :  { %15592 = vmatpush3.bf16.msra.mxu0 %v16367_v50  ;;  %15612 = vmatpush3.bf16.msra.mxu1 %v16368_v62 }
0x1ce4   :  { %15593 = vmatprep.subr.bf16.mxu0 %v16766_v2  ;;  %15613 = vmatprep.subr.bf16.mxu1 %v16766_v2 }
0x1ce7   :  { %15594 = vmatpush3.bf16.msra.mxu0 %v16369_v39  ;;  %15614 = vmatpush3.bf16.msra.mxu1 %v16370_v3 }
0x1ce8   :  { %15619 = vmatprep.subr.bf16.mxu0 %v16766_v2  ;;  %15625 = vmatprep.subr.bf16.mxu1 %v16766_v2 }
0x1cea   :  { %15596 = vmatmul.mubr.bf16.vlgmr.msra.gmra.mxu0 %v19720_v24  ;;  %15616 = vmatmul.mubr.bf16.vlgmr.msra.gmra.mxu1 %v19720_v24 }
0x1ceb   :  { %15621 = vmatprep.mubr.msk.bf16.mxu0 %vm16767_vm0, %v16766_v2  ;;  %15627 = vmatprep.mubr.msk.bf16.mxu1 %vm16767_vm0, %v16766_v2 }
0x1d0a   :  { %v9022_v31 = vpop.f32.mrf.mxu0  ;;  %v9111_v59 = vpop.f32.mrf.mxu1 }
0x1d0c   :  { %v15397_v54 = vpop.f32.mrf.mxu0  ;;  %v15417_v53 = vpop.f32.mrf.mxu1 }
0x1d0e   :  { %v9025_v63 = vpop.f32.mrf.mxu0  ;;  %v9114_v41 = vpop.f32.mrf.mxu1 }
0x1d0f   :  { %v10138_v40 = vpack.c.bf16 %v9025_v63, %v9022_v31  ;;  %v10139_v55 = vpack.c.bf16 %v9114_v41, %v9111_v59 }
0x1d10   :  { %v15398_v46 = vpop.f32.mrf.mxu0  ;;  %v15418_v30 = vpop.f32.mrf.mxu1 }
0x1d2a   :  { %v9200_v9 = vpop.f32.mrf.mxu0  ;;  %v9289_v5 = vpop.f32.mrf.mxu1 }
0x1d2c   :  { %v15437_v56 = vpop.f32.mrf.mxu0  ;;  %v15457_v24 = vpop.f32.mrf.mxu1 }
0x1d2e   :  { %v9203_v61 = vpop.f32.mrf.mxu0  ;;  %v9292_v27 = vpop.f32.mrf.mxu1 }
0x1d2f   :  { %v10140_v58 = vpack.c.bf16 %v9203_v61, %v9200_v9  ;;  %v10141_v11 = vpack.c.bf16 %v9292_v27, %v9289_v5 }
0x1d30   :  { %v15438_v47 = vpop.f32.mrf.mxu0  ;;  %v15458_v45 = vpop.f32.mrf.mxu1 }
0x1d4a   :  { %v9443_v29 = vpop.f32.mrf.mxu0  ;;  %v9532_v13 = vpop.f32.mrf.mxu1 }
0x1d4c   :  { %v15477_v52 = vpop.f32.mrf.mxu0  ;;  %v15497_v26 = vpop.f32.mrf.mxu1 }
0x1d4e   :  { %v9446_v19 = vpop.f32.mrf.mxu0  ;;  %v9535_v12 = vpop.f32.mrf.mxu1 }
0x1d4f   :  { %v10142_v16 = vpack.c.bf16 %v9446_v19, %v9443_v29  ;;  %v10143_v6 = vpack.c.bf16 %v9535_v12, %v9532_v13 }
0x1d50   :  { %v15478_v14 = vpop.f32.mrf.mxu0  ;;  %v15498_v4 = vpop.f32.mrf.mxu1 }
0x1d51   :  { %v10150_v34 = vsel %vm1360_vm1, %v10142_v16, 0  ;;  %v10197_v44 = vsel %vm1360_vm1, %v10143_v6, 0 }
0x1d52   :  { %15620 = vmatpush3.bf16.xpose.msra.mxu0 %v10150_v34  ;;  %15626 = vmatpush3.bf16.xpose.msra.mxu1 %v10197_v44 }
0x1d53   :  { %15631 = vmatprep.subr.bf16.mxu0 %v16766_v2  ;;  %15637 = vmatprep.subr.bf16.mxu1 %v16766_v2 }
0x1d59   :  { %15622 = vmatmul.mubr.msk.bf16.vlgmr.msra.gmra.mxu0 %vm1360_vm1, %v10138_v40  ;;  %15628 = vmatmul.mubr.msk.bf16.vlgmr.msra.gmra.mxu1 %vm1360_vm1, %v10139_v55 }
0x1d5a   :  { %15633 = vmatprep.mubr.msk.bf16.mxu0 %vm16767_vm0, %v16766_v2  ;;  %15639 = vmatprep.mubr.msk.bf16.mxu1 %vm16767_vm0, %v16766_v2 }
0x1d6a   :  { %v9621_v57 = vpop.f32.mrf.mxu0  ;;  %v9710_v17 = vpop.f32.mrf.mxu1 }
0x1d6c   :  { %v15517_v8 = vpop.f32.mrf.mxu0  ;;  %v15537_v35 = vpop.f32.mrf.mxu1 }
0x1d6e   :  { %v9624_v0 = vpop.f32.mrf.mxu0  ;;  %v9713_v22 = vpop.f32.mrf.mxu1 }
0x1d6f   :  { %v10144_v20 = vpack.c.bf16 %v9624_v0, %v9621_v57  ;;  %v10145_v37 = vpack.c.bf16 %v9713_v22, %v9710_v17 }
0x1d70   :  { %v15518_v1 = vpop.f32.mrf.mxu0  ;;  %v15538_v25 = vpop.f32.mrf.mxu1 }
0x1d71   :  { %v10244_v23 = vsel %vm1360_vm1, %v10144_v20, 0  ;;  %v10291_v42 = vsel %vm1360_vm1, %v10145_v37, 0 }
0x1d72   :  { %15632 = vmatpush3.bf16.xpose.msra.mxu0 %v10244_v23  ;;  %15638 = vmatpush3.bf16.xpose.msra.mxu1 %v10291_v42 }
0x1d73   :  { %15643 = vmatprep.subr.bf16.mxu0 %v16766_v2  ;;  %15649 = vmatprep.subr.bf16.mxu1 %v16766_v2 }
0x1d79   :  { %15634 = vmatmul.mubr.msk.bf16.vlgmr.msra.gmra.mxu0 %vm1360_vm1, %v10140_v58  ;;  %15640 = vmatmul.mubr.msk.bf16.vlgmr.msra.gmra.mxu1 %vm1360_vm1, %v10141_v11 }
0x1d7a   :  { %15645 = vmatprep.mubr.msk.bf16.mxu0 %vm16767_vm0, %v16766_v2  ;;  %15651 = vmatprep.mubr.msk.bf16.mxu1 %vm16767_vm0, %v16766_v2 }
0x1d8a   :  { %v9864_v33 = vpop.f32.mrf.mxu0  ;;  %v9953_v15 = vpop.f32.mrf.mxu1 }
0x1d8c   :  { %v15557_v32 = vpop.f32.mrf.mxu0  ;;  %v15577_v48 = vpop.f32.mrf.mxu1 }
0x1d8e   :  { %v9867_v50 = vpop.f32.mrf.mxu0  ;;  %v9956_v62 = vpop.f32.mrf.mxu1 }
0x1d8f   :  { %v10426_v39 = vpack.c.bf16 %v9867_v50, %v9864_v33  ;;  %v10427_v3 = vpack.c.bf16 %v9956_v62, %v9953_v15 }
0x1d90   :  { %v15558_v31 = vpop.f32.mrf.mxu0  ;;  %v15578_v59 = vpop.f32.mrf.mxu1 }
0x1d91   :  { %15644 = vmatpush3.bf16.msra.mxu0 %v10426_v39  ;;  %15650 = vmatpush3.bf16.msra.mxu1 %v10427_v3 }
0x1d92   :  { %15655 = vmatprep.subr.bf16.mxu0 %v16766_v2  ;;  %15661 = vmatprep.subr.bf16.mxu1 %v16766_v2 }
0x1daa   :  { %v20094_v54 = vpop.f32.mrf.mxu0  ;;  %v20096_v53 = vpop.f32.mrf.mxu1 }
0x1dac   :  { %v15597_v63 = vpop.f32.mrf.mxu0  ;;  %v15617_v41 = vpop.f32.mrf.mxu1 }
0x1dae   :  { %v20098_v40 = vpop.f32.mrf.mxu0  ;;  %v20100_v55 = vpop.f32.mrf.mxu1 }
0x1daf   :  { %v10428_v46 = vpack.c.bf16 %v20098_v40, %v20094_v54  ;;  %v10429_v30 = vpack.c.bf16 %v20100_v55, %v20096_v53 }
0x1db0   :  { %v15598_v9 = vpop.f32.mrf.mxu0  ;;  %v15618_v5 = vpop.f32.mrf.mxu1 }
0x1e19   :  { %v10186_v56 = vpop.f32.mrf.mxu0  ;;  %v10233_v24 = vpop.f32.mrf.mxu1 }
0x1e1a   :  { %v10187_v61 = vadd.f32 %v10186_v56, %v17315_v18  ;;  %v10234_v11 = vadd.f32 %v10233_v24, %v17315_v18 }
0x1e1b   :  { %v15623_v27 = vpop.f32.mrf.mxu0  ;;  %v15629_v58 = vpop.f32.mrf.mxu1 }
0x1e1c   :  { %v10334_v47 = vsel %vm1549_vm6, %v10187_v61, -inf  ;;  %v10340_v12 = vsel %vm1549_vm6, %v10234_v11, -inf }
0x1e1d   :  { %v10236_v45 = vpop.f32.mrf.mxu1  ;;  %10335 = vmax.xlane.f32.xlu0 %v10334_v47  ;;  %v10189_v29 = vpop.f32.mrf.mxu0 }
0x1e1e   :  { %v10190_v13 = vadd.f32 %v10189_v29, %v17318_v21  ;;  %v10237_v19 = vadd.f32 %v10236_v45, %v17318_v21 }
0x1e1f   :  { %v15624_v52 = vpop.f32.mrf.mxu0  ;;  %v15630_v26 = vpop.f32.mrf.mxu1 }
0x1e20   :  { %v10337_v16 = vsel %vm1549_vm6, %v10190_v13, -inf  ;;  %v10343_v6 = vsel %vm1549_vm6, %v10237_v19, -inf }
0x1e21   :  { %10341 = vmax.xlane.f32.xlu0 %v10340_v12  ;;  %10338 = vmax.xlane.f32.xlu1 %v10337_v16 }
0x1e25   :  { %10344 = vmax.xlane.f32.xlu1 %v10343_v6 }
0x1e39   :  { %v10280_v14 = vpop.f32.mrf.mxu0  ;;  %v10327_v4 = vpop.f32.mrf.mxu1 }
0x1e3a   :  { %v10281_v34 = vadd.f32 %v10280_v14, %v17315_v18  ;;  %v10328_v17 = vadd.f32 %v10327_v4, %v17315_v18 }
0x1e3b   :  { %v15635_v44 = vpop.f32.mrf.mxu0  ;;  %v15641_v57 = vpop.f32.mrf.mxu1 }
0x1e3c   :  { %v10346_v8 = vsel %vm1549_vm6, %v10281_v34, -inf  ;;  %v10352_v25 = vsel %vm1549_vm6, %v10328_v17, -inf }
0x1e3d   :  { %v10330_v35 = vpop.f32.mrf.mxu1  ;;  %10347 = vmax.xlane.f32.xlu0 %v10346_v8  ;;  %v10283_v0 = vpop.f32.mrf.mxu0 }
0x1e3e   :  { %v10284_v22 = vadd.f32 %v10283_v0, %v17318_v21  ;;  %v10331_v1 = vadd.f32 %v10330_v35, %v17318_v21 }
0x1e3f   :  { %v15636_v20 = vpop.f32.mrf.mxu0  ;;  %v15642_v37 = vpop.f32.mrf.mxu1 }
0x1e40   :  { %v10349_v23 = vsel %vm1549_vm6, %v10284_v22, -inf  ;;  %v10355_v42 = vsel %vm1549_vm6, %v10331_v1, -inf }
0x1e41   :  { %10353 = vmax.xlane.f32.xlu0 %v10352_v25  ;;  %10350 = vmax.xlane.f32.xlu1 %v10349_v23 }
0x1e45   :  { %10356 = vmax.xlane.f32.xlu1 %v10355_v42 }
0x1ea6   :  { %v10336_v18 = vpop.xlane.xlu0 %10335 }
0x1ea7   :  { %v10358_v33 = vsub.f32 %v10187_v61, %v10336_v18 }
0x1ea9   :  { %v10366_v15 = vmul.f32 1.442695, %v10358_v33 }
0x1eaa   :  { %v10342_v32 = vpop.xlane.xlu0 %10341  ;;  %v10339_v48 = vpop.xlane.xlu1 %10338 }
0x1eab   :  { %16687 = vpow2.f32 %v10366_v15  ;;  %v10360_v50 = vsub.f32 %v10234_v11, %v10342_v32  ;;  %v10359_v62 = vsub.f32 %v10190_v13, %v10339_v48 }
0x1ead   :  { %v10370_v39 = vmul.f32 1.442695, %v10360_v50  ;;  %v10368_v3 = vmul.f32 1.442695, %v10359_v62 }
0x1eae   :  { %v10345_v21 = vpop.xlane.xlu1 %10344 }
0x1eaf   :  { %16689 = vpow2.f32 %v10370_v39  ;;  %v10361_v31 = vsub.f32 %v10237_v19, %v10345_v21 }
0x1eb0   :  { %16691 = vpow2.f32 %v10368_v3 }
0x1eb1   :  { %v10372_v59 = vmul.f32 1.442695, %v10361_v31 }
0x1eb3   :  { %16693 = vpow2.f32 %v10372_v59 }
0x1eb8   :  { %v16688_v63 = vpop.eup %16687 }
0x1eb9   :  { %v10382_v41 = vsel %vm1549_vm6, %v16688_v63, 0.0 }
0x1eba   :  { %10383 = vadd.xlane.f32.xlu0 %v10382_v41 }
0x1ebc   :  { %v16690_v9 = vpop.eup %16689 }
0x1ebd   :  { %v16692_v5 = vpop.eup %16691  ;;  %v10388_v56 = vsel %vm1549_vm6, %v16690_v9, 0.0 }
0x1ebe   :  { %10389 = vadd.xlane.f32.xlu0 %v10388_v56  ;;  %v10385_v24 = vsel %vm1549_vm6, %v16692_v5, 0.0  ;;  %v16373_v56 = vld [vmem:[%s20603_s2 + $0xd8] sm:$0xff]  }
0x1ebf   :  { %10386 = vadd.xlane.f32.xlu1 %v10385_v24  ;;  %v16374_v24 = vld [vmem:[%s20603_s2 + $0xd0] sm:$0xff]  }
0x1ec0   :  { %v16694_v61 = vpop.eup %16693 }
0x1ec1   :  { %v10391_v27 = vsel %vm1549_vm6, %v16694_v61, 0.0 }
0x1ec3   :  { %10392 = vadd.xlane.f32.xlu1 %v10391_v27 }
0x1ec6   :  { %v10348_v58 = vpop.xlane.xlu0 %10347 }
0x1ec7   :  { %v10362_v11 = vsub.f32 %v10281_v34, %v10348_v58 }
0x1ec9   :  { %v10374_v47 = vmul.f32 1.442695, %v10362_v11 }
0x1eca   :  { %v10354_v45 = vpop.xlane.xlu0 %10353  ;;  %v10351_v29 = vpop.xlane.xlu1 %10350 }
0x1ecb   :  { %16695 = vpow2.f32 %v10374_v47  ;;  %v10364_v13 = vsub.f32 %v10328_v17, %v10354_v45  ;;  %v10363_v52 = vsub.f32 %v10284_v22, %v10351_v29  ;;  %v16375_v47 = vld [vmem:[%s20603_s2 + $0xe8] sm:$0xff]  }
0x1ecd   :  { %v10378_v26 = vmul.f32 1.442695, %v10364_v13  ;;  %v10376_v19 = vmul.f32 1.442695, %v10363_v52 }
0x1ece   :  { %v10357_v12 = vpop.xlane.xlu1 %10356 }
0x1ecf   :  { %16697 = vpow2.f32 %v10378_v26  ;;  %v10365_v16 = vsub.f32 %v10331_v1, %v10357_v12  ;;  %v16376_v26 = vld [vmem:[%s20603_s2 + $0xe0] sm:$0xff]  }
0x1ed0   :  { %16699 = vpow2.f32 %v10376_v19  ;;  %v16377_v19 = vld [vmem:[%s20603_s2 + $0xf8] sm:$0xff]  }
0x1ed1   :  { %v10380_v6 = vmul.f32 1.442695, %v10365_v16 }
0x1ed3   :  { %16701 = vpow2.f32 %v10380_v6  ;;  %v16378_v6 = vld [vmem:[%s20603_s2 + $0xf0] sm:$0xff]  }
0x1ed8   :  { %v16696_v14 = vpop.eup %16695 }
0x1ed9   :  { %v10394_v4 = vsel %vm1549_vm6, %v16696_v14, 0.0 }
0x1eda   :  { %10395 = vadd.xlane.f32.xlu0 %v10394_v4 }
0x1edc   :  { %v16698_v44 = vpop.eup %16697 }
0x1edd   :  { %v16700_v34 = vpop.eup %16699  ;;  %v10400_v57 = vsel %vm1549_vm6, %v16698_v44, 0.0 }
0x1ede   :  { %10401 = vadd.xlane.f32.xlu0 %v10400_v57  ;;  %v10397_v17 = vsel %vm1549_vm6, %v16700_v34, 0.0 }
0x1edf   :  { %10398 = vadd.xlane.f32.xlu1 %v10397_v17 }
0x1ee0   :  { %v16702_v8 = vpop.eup %16701 }
0x1ee1   :  { %v10403_v35 = vsel %vm1549_vm6, %v16702_v8, 0.0 }
0x1ee3   :  { %10404 = vadd.xlane.f32.xlu1 %v10403_v35 }
0x1f43   :  { %v10384_v0 = vpop.xlane.xlu0 %10383 }
0x1f44   :  { %16703 = vrcp.f32 %v10384_v0 }
0x1f47   :  { %v10390_v22 = vpop.xlane.xlu0 %10389 }
0x1f48   :  { %v10387_v20 = vpop.xlane.xlu1 %10386 }
0x1f49   :  { %16705 = vrcp.f32 %v10387_v20 }
0x1f4a   :  { %16707 = vrcp.f32 %v10390_v22 }
0x1f4c   :  { %v10393_v37 = vpop.xlane.xlu1 %10392 }
0x1f4d   :  { %16709 = vrcp.f32 %v10393_v37 }
0x1f51   :  { %v16704_v1 = vpop.eup %16703 }
0x1f52   :  { %v10407_v23 = vmul.f32 %v16704_v1, %v16688_v63 }
0x1f56   :  { %v16706_v25 = vpop.eup %16705 }
0x1f57   :  { %v10409_v42 = vmul.f32 %v16706_v25, %v16692_v5  ;;  %v16708_v18 = vpop.eup %16707  ;;  %v16372_v5 = vld [vmem:[%s20603_s2 + $0xc0] sm:$0xff]  }
0x1f58   :  { %v10411_v32 = vmul.f32 %v16708_v18, %v16690_v9  ;;  %v16371_v9 = vld [vmem:[%s20603_s2 + $0xc8] sm:$0xff]  }
0x1f59   :  { %v10422_v33 = vpack.c.bf16 %v10409_v42, %v10407_v23 }
0x1f5a   :  { %v16710_v15 = vpop.eup %16709 }
0x1f5b   :  { %v10413_v48 = vmul.f32 %v16710_v15, %v16694_v61  ;;  %15646 = vmatmul.mubr.msk.bf16.vlgmr.msra.gmra.mxu0 %vm1549_vm6, %v10422_v33 }
0x1f5c   :  { %15656 = vmatpush3.bf16.msra.mxu0 %v10428_v46  ;;  %15657 = vmatprep.mubr.msk.bf16.mxu0 %vm16767_vm0, %v16766_v2 }
0x1f5d   :  { %v10423_v50 = vpack.c.bf16 %v10413_v48, %v10411_v32  ;;  %15667 = vmatprep.subr.bf16.mxu0 %v16766_v2 }
0x1f5f   :  { %15652 = vmatmul.mubr.msk.bf16.vlgmr.msra.gmra.mxu1 %vm1549_vm6, %v10423_v50 }
0x1f60   :  { %15662 = vmatpush3.bf16.msra.mxu1 %v10429_v30  ;;  %15663 = vmatprep.mubr.msk.bf16.mxu1 %vm16767_vm0, %v16766_v2 }
0x1f61   :  { %15675 = vmatprep.subr.bf16.mxu1 %v16766_v2 }
0x1f63   :  { %v10396_v62 = vpop.xlane.xlu0 %10395 }
0x1f64   :  { %16711 = vrcp.f32 %v10396_v62  ;;  %v20193_v62 = vld [vmem:[%s20602_s5 + $0x18] sm:$0x3f] }
0x1f67   :  { %v10402_v54 = vpop.xlane.xlu0 %10401 }
0x1f68   :  { %v10399_v40 = vpop.xlane.xlu1 %10398 }
0x1f69   :  { %16713 = vrcp.f32 %v10399_v40 }
0x1f6a   :  { %16715 = vrcp.f32 %v10402_v54 }
0x1f6c   :  { %v10405_v46 = vpop.xlane.xlu1 %10404 }
0x1f6d   :  { %16717 = vrcp.f32 %v10405_v46 }
0x1f71   :  { %v16712_v39 = vpop.eup %16711 }
0x1f72   :  { %v10415_v21 = vmul.f32 %v16712_v39, %v16696_v14 }
0x1f76   :  { %v16714_v3 = vpop.eup %16713 }
0x1f77   :  { %v10417_v31 = vmul.f32 %v16714_v3, %v16700_v34  ;;  %v16716_v59 = vpop.eup %16715 }
0x1f78   :  { %v10419_v30 = vmul.f32 %v16716_v59, %v16698_v44 }
0x1f79   :  { %v10424_v53 = vpack.c.bf16 %v10417_v31, %v10415_v21 }
0x1f7a   :  { %v16718_v55 = vpop.eup %16717 }
0x1f7b   :  { %v10421_v63 = vmul.f32 %v16718_v55, %v16702_v8  ;;  %15658 = vmatmul.mubr.msk.bf16.vlgmr.msra.gmra.mxu0 %vm1549_vm6, %v10424_v53 }
0x1f7c   :  { %15671 = vmatprep.mubr.msk.bf16.mxu0 %vm16767_vm0, %v16766_v2  ;;  %15668 = vmatpush3.bf16.msra.mxu0 %v16371_v9 }
0x1f7d   :  { %v10425_v41 = vpack.c.bf16 %v10421_v63, %v10419_v30  ;;  %15669 = vmatprep.subr.bf16.mxu0 %v16766_v2 }
0x1f7f   :  { %15664 = vmatmul.mubr.msk.bf16.vlgmr.msra.gmra.mxu1 %vm1549_vm6, %v10425_v41 }
0x1f80   :  { %15679 = vmatprep.mubr.msk.bf16.mxu1 %vm16767_vm0, %v16766_v2  ;;  %15670 = vmatpush3.bf16.msra.mxu0 %v16372_v5  ;;  %v16379_v5 = vld [vmem:[%s20604_s3 + $0x3e0] ss:$16 sps:$4 sm:$0xff]  }
0x1f81   :  { %15676 = vmatpush3.bf16.msra.mxu1 %v16373_v56  ;;  %15683 = vmatprep.subr.bf16.mxu0 %v16766_v2  ;;  %v16381_v56 = vld [vmem:[%s20604_s3 + $0x3e4] ss:$16 sps:$4 sm:$0xff]  }
0x1f82   :  { %15677 = vmatprep.subr.bf16.mxu1 %v16766_v2 }
0x1f85   :  { %15678 = vmatpush3.bf16.msra.mxu1 %v16374_v24  ;;  %v16384_v24 = vld [vmem:[%s20604_s3 + $0x3ec] ss:$16 sps:$4 sm:$0xff]  }
0x1f86   :  { %15691 = vmatprep.subr.bf16.mxu1 %v16766_v2 }
0x201b   :  { %v10467_v61 = vpop.f32.mrf.mxu0 }
0x201d   :  { %v15647_v27 = vpop.f32.mrf.mxu0 }
0x201f   :  { %v10470_v58 = vpop.f32.mrf.mxu0  ;;  %v10511_v11 = vpop.f32.mrf.mxu1 }
0x2020   :  { %v10606_v45 = vpack.c.bf16 %v10470_v58, %v10467_v61 }
0x2021   :  { %v15648_v29 = vpop.f32.mrf.mxu0  ;;  %v15653_v13 = vpop.f32.mrf.mxu1 }
0x2022   :  { %15672 = vmatmul.mubr.msk.bf16.vlgmr.msra.gmra.mxu0 %vm1360_vm1, %v10606_v45  ;;  %v16387_v13 = vld [vmem:[%s20604_s3 + $0x3c4] ss:$16 sps:$4 sm:$0xff]  }
0x2023   :  { %v10514_v52 = vpop.f32.mrf.mxu1  ;;  %15684 = vmatpush3.bf16.msra.mxu0 %v16375_v47  ;;  %15687 = vmatprep.mubr.msk.bf16.mxu0 %vm16767_vm0, %v16766_v2 }
0x2024   :  { %v10607_v12 = vpack.c.bf16 %v10514_v52, %v10511_v11  ;;  %15685 = vmatprep.subr.bf16.mxu0 %v16766_v2  ;;  %v16390_v52 = vld [vmem:[%s20604_s3 + $0x3cc] ss:$16 sps:$4 sm:$0xff]  }
0x2025   :  { %v15654_v16 = vpop.f32.mrf.mxu1 }
0x2026   :  { %15680 = vmatmul.mubr.msk.bf16.vlgmr.msra.gmra.mxu1 %vm1360_vm1, %v10607_v12  ;;  %v16393_v12 = vld [vmem:[%s20604_s3 + $0x3a4] ss:$16 sps:$4 sm:$0xff]   ;;  %v16396_v16 = vld [vmem:[%s20604_s3 + $0x3ac] ss:$16 sps:$4 sm:$0xff]  }
0x2027   :  { %15686 = vmatpush3.bf16.msra.mxu0 %v16376_v26  ;;  %15692 = vmatpush3.bf16.msra.mxu1 %v16377_v19  ;;  %v16385_v26 = vld [vmem:[%s20604_s3 + $0x3c0] ss:$16 sps:$4 sm:$0xff]   ;;  %v16388_v19 = vld [vmem:[%s20604_s3 + $0x3c8] ss:$16 sps:$4 sm:$0xff]  }
0x2028   :  { %15693 = vmatprep.subr.bf16.mxu1 %v16766_v2  ;;  %15695 = vmatprep.mubr.msk.bf16.mxu1 %vm16767_vm0, %v16766_v2 }
0x2029   :  { %11114 = vmatprep.subr.bf16.mxu0 %v16381_v56 }
0x202b   :  { %15694 = vmatpush3.bf16.msra.mxu1 %v16378_v6  ;;  %v16391_v6 = vld [vmem:[%s20604_s3 + $0x3a0] ss:$16 sps:$4 sm:$0xff]  }
0x202c   :  { %11157 = vmatprep.subr.bf16.mxu1 %v16384_v24  ;;  %v16427_v24 = vld [vmem:[%s20605_s4 + $0x378] sm:$0xff]  }
0x203b   :  { %v10555_v14 = vpop.f32.mrf.mxu0 }
0x203d   :  { %v15659_v4 = vpop.f32.mrf.mxu0 }
0x203e   :  { %v16399_v4 = vld [vmem:[%s20604_s3 + $0x384] ss:$16 sps:$4 sm:$0xff]  }
0x203f   :  { %v10558_v44 = vpop.f32.mrf.mxu0  ;;  %v10599_v34 = vpop.f32.mrf.mxu1 }
0x2040   :  { %v10608_v57 = vpack.c.bf16 %v10558_v44, %v10555_v14  ;;  %v16394_v14 = vld [vmem:[%s20604_s3 + $0x3a8] ss:$16 sps:$4 sm:$0xff]   ;;  %v16402_v44 = vld [vmem:[%s20604_s3 + $0x38c] ss:$16 sps:$4 sm:$0xff]  }
0x2041   :  { %v15660_v17 = vpop.f32.mrf.mxu0  ;;  %v15665_v8 = vpop.f32.mrf.mxu1 }
0x2042   :  { %15688 = vmatmul.mubr.msk.bf16.vlgmr.msra.gmra.mxu0 %vm1360_vm1, %v10608_v57  ;;  %v16400_v57 = vld [vmem:[%s20604_s3 + $0x388] ss:$16 sps:$4 sm:$0xff]   ;;  %v16405_v17 = vld [vmem:[%s20604_s3 + $0x364] ss:$16 sps:$4 sm:$0xff]   ;;  %v16408_v8 = vld [vmem:[%s20604_s3 + $0x36c] ss:$16 sps:$4 sm:$0xff]  }
0x2043   :  { %v10602_v35 = vpop.f32.mrf.mxu1  ;;  %11146 = vmatprep.mubr.bf16.mxu0 %v16769_v43  ;;  %11115 = vmatpush1.bf16.msra.mxu0 %v16379_v5 }
0x2044   :  { %v10609_v0 = vpack.c.bf16 %v10602_v35, %v10599_v34  ;;  %11116 = vmatprep.subr.bf16.mxu0 %v16387_v13  ;;  %v16397_v34 = vld [vmem:[%s20604_s3 + $0x380] ss:$16 sps:$4 sm:$0xff]   ;;  %v16437_v13 = vld [vmem:[%s20605_s4 + $0x328] sm:$0xff]  }
0x2045   :  { %v15666_v22 = vpop.f32.mrf.mxu1  ;;  %v16403_v35 = vld [vmem:[%s20604_s3 + $0x360] ss:$16 sps:$4 sm:$0xff]  }
0x2046   :  { %15696 = vmatmul.mubr.msk.bf16.vlgmr.msra.gmra.mxu1 %vm1360_vm1, %v10609_v0  ;;  %v16406_v0 = vld [vmem:[%s20604_s3 + $0x368] ss:$16 sps:$4 sm:$0xff]   ;;  %v16411_v22 = vld [vmem:[%s20604_s3 + $0x344] ss:$16 sps:$4 sm:$0xff]  }
0x2047   :  { %11189 = vmatprep.mubr.bf16.mxu1 %v16769_v43  ;;  %v10860_v43 = vrot.slane %v20193_v62, %v17402_v51  ;;  %11117 = vmatpush1.bf16.msra.mxu0 %v16385_v26  ;;  %v16439_v26 = vld [vmem:[%s20605_s4 + $0x360] sm:$0xff]  }
0x2048   :  { %11118 = vmatprep.subr.bf16.mxu0 %v16393_v12  ;;  %v16441_v12 = vld [vmem:[%s20605_s4 + $0x320] sm:$0xff]  }
0x204b   :  { %11119 = vmatpush1.bf16.msra.mxu0 %v16391_v6  ;;  %v16443_v6 = vld [vmem:[%s20605_s4 + $0x358] sm:$0xff]  }
0x204c   :  { %11120 = vmatprep.subr.bf16.mxu0 %v16399_v4  ;;  %v16445_v4 = vld [vmem:[%s20605_s4 + $0x318] sm:$0xff]  }
0x204f   :  { %11121 = vmatpush1.bf16.msra.mxu0 %v16397_v34  ;;  %v16447_v34 = vld [vmem:[%s20605_s4 + $0x350] sm:$0xff]  }
0x2050   :  { %11122 = vmatprep.subr.bf16.mxu0 %v16405_v17  ;;  %v16449_v17 = vld [vmem:[%s20605_s4 + $0x310] sm:$0xff]  }
0x2053   :  { %11123 = vmatpush1.bf16.msra.mxu0 %v16403_v35  ;;  %v16451_v35 = vld [vmem:[%s20605_s4 + $0x348] sm:$0xff]  }
0x2054   :  { %11124 = vmatprep.subr.bf16.mxu0 %v16411_v22  ;;  %v16453_v22 = vld [vmem:[%s20605_s4 + $0x308] sm:$0xff]  }
0x20e2   :  { %v10676_v20 = vpop.f32.mrf.mxu0 }
0x20e4   :  { %v15673_v37 = vpop.f32.mrf.mxu0 }
0x20e5   :  { %v16409_v37 = vld [vmem:[%s20604_s3 + $0x340] ss:$16 sps:$4 sm:$0xff]  }
0x20e6   :  { %v10679_v1 = vpop.f32.mrf.mxu0  ;;  %v10732_v25 = vpop.f32.mrf.mxu1  ;;  %11125 = vmatpush1.bf16.msra.mxu0 %v16409_v37  ;;  %v16455_v37 = vld [vmem:[%s20605_s4 + $0x340] sm:$0xff]  }
0x20e7   :  { %v10851_v32 = vadd.f32 %v10732_v25, %v10676_v20  ;;  %v16414_v20 = vld [vmem:[%s20604_s3 + $0x34c] ss:$16 sps:$4 sm:$0xff]   ;;  %v16417_v25 = vld [vmem:[%s20604_s3 + $0x324] ss:$16 sps:$4 sm:$0xff]  }
0x20e8   :  { %v15674_v23 = vpop.f32.mrf.mxu0  ;;  %v15681_v42 = vpop.f32.mrf.mxu1  ;;  %11126 = vmatprep.subr.bf16.mxu0 %v16417_v25  ;;  %v16457_v25 = vld [vmem:[%s20605_s4 + $0x300] sm:$0xff]  }
0x20e9   :  { %v16420_v23 = vld [vmem:[%s20604_s3 + $0x32c] ss:$16 sps:$4 sm:$0xff]   ;;  %v16415_v42 = vld [vmem:[%s20604_s3 + $0x320] ss:$16 sps:$4 sm:$0xff]  }
0x20ea   :  { %v10735_v18 = vpop.f32.mrf.mxu1  ;;  %11127 = vmatpush1.bf16.msra.mxu0 %v16415_v42  ;;  %v13197_v42 = vld [vmem:[%s20606_s6 + $0xc] sm:$0xf] }
0x20eb   :  { %v10854_v46 = vadd.f32 %v10735_v18, %v10679_v1  ;;  %v16412_v1 = vld [vmem:[%s20604_s3 + $0x348] ss:$16 sps:$4 sm:$0xff]  }
0x20ec   :  { %v15682_v33 = vpop.f32.mrf.mxu1  ;;  %v16418_v18 = vld [vmem:[%s20604_s3 + $0x328] ss:$16 sps:$4 sm:$0xff]  }
0x20ed   :  { %v16423_v33 = vld [vmem:[%s20604_s3 + $0x304] ss:$16 sps:$4 sm:$0xff]  }
0x20ee   :  { %11128 = vmatprep.subr.bf16.mxu0 %v16423_v33  ;;  %v10945_v33 = vrot.slane %v13197_v42, %v17402_v51 }
0x2102   :  { %v10788_v15 = vpop.f32.mrf.mxu0 }
0x2103   :  { %v10852_v50 = vadd.f32 %v10851_v32, %v10788_v15  ;;  %v16426_v15 = vld [vmem:[%s20604_s3 + $0x30c] ss:$16 sps:$4 sm:$0xff]   ;;  %v16421_v32 = vld [vmem:[%s20604_s3 + $0x300] ss:$16 sps:$4 sm:$0xff]  }
0x2104   :  { %v15689_v48 = vpop.f32.mrf.mxu0  ;;  %11129 = vmatpush1.bf16.msra.mxu0 %v16421_v32 }
0x2105   :  { %v16424_v48 = vld [vmem:[%s20604_s3 + $0x308] ss:$16 sps:$4 sm:$0xff]   ;;  %14366 = vmatprep.subr.bf16.mxu0 %v16427_v24 }
0x2106   :  { %v10791_v54 = vpop.f32.mrf.mxu0  ;;  %v10844_v40 = vpop.f32.mrf.mxu1 }
0x2107   :  { %v10853_v39 = vadd.f32 %v10852_v50, %v10844_v40  ;;  %v10855_v31 = vadd.f32 %v10854_v46, %v10791_v54 }
0x2108   :  { %v15690_v3 = vpop.f32.mrf.mxu0  ;;  %v15697_v21 = vpop.f32.mrf.mxu1 }
0x2109   :  { %v10861_v59 = vadd.f32 %v10860_v43, %v10853_v39 }
0x210a   :  { %v10847_v53 = vpop.f32.mrf.mxu1 }
0x210b   :  { %v10856_v55 = vadd.f32 %v10855_v31, %v10847_v53  ;;  %v20198_v30 = vadd.f32 %v10861_v59, %v19636_v7  ;;  %v16382_v7 = vld [vmem:[%s20604_s3 + $0x3e8] ss:$16 sps:$4 sm:$0xff]   ;;  %v10890_v31 = vrot.slane %v20193_v62, %v17532_v60 }
0x210c   :  { %v15698_v63 = vpop.f32.mrf.mxu1  ;;  %11158 = vmatpush1.bf16.msra.mxu1 %v16382_v7 }
0x210d   :  { %v10862_v41 = vadd.f32 %v10860_v43, %v10856_v55  ;;  %10865 = vadd.xlane.f32.xlu0 %v20198_v30  ;;  %11159 = vmatprep.subr.bf16.mxu1 %v16390_v52  ;;  %v10896_v63 = vrot.slane %v20193_v62, %v17538_v10  ;;  %v16430_v10 = vld [vmem:[%s20605_s4 + $0x3b8] sm:$0xff]   ;;  %v16438_v52 = vld [vmem:[%s20605_s4 + $0x3a8] sm:$0xff]  }
0x210f   :  { %v20202_v9 = vadd.f32 %v10862_v41, %v19640_v49 }
0x2110   :  { %11160 = vmatpush1.bf16.msra.mxu1 %v16388_v19  ;;  %v16440_v19 = vld [vmem:[%s20605_s4 + $0x3e0] sm:$0xff]  }
0x2111   :  { %10867 = vadd.xlane.f32.xlu1 %v20202_v9  ;;  %11161 = vmatprep.subr.bf16.mxu1 %v16396_v16  ;;  %v16442_v16 = vld [vmem:[%s20605_s4 + $0x3a0] sm:$0xff]  }
0x2114   :  { %11162 = vmatpush1.bf16.msra.mxu1 %v16394_v14  ;;  %v16444_v14 = vld [vmem:[%s20605_s4 + $0x3d8] sm:$0xff]  }
0x2115   :  { %11163 = vmatprep.subr.bf16.mxu1 %v16402_v44  ;;  %v16446_v44 = vld [vmem:[%s20605_s4 + $0x398] sm:$0xff]  }
0x2118   :  { %11164 = vmatpush1.bf16.msra.mxu1 %v16400_v57  ;;  %v16448_v57 = vld [vmem:[%s20605_s4 + $0x3d0] sm:$0xff]  }
0x2119   :  { %11165 = vmatprep.subr.bf16.mxu1 %v16408_v8  ;;  %v16450_v8 = vld [vmem:[%s20605_s4 + $0x390] sm:$0xff]  }
0x211c   :  { %11166 = vmatpush1.bf16.msra.mxu1 %v16406_v0  ;;  %v16452_v0 = vld [vmem:[%s20605_s4 + $0x3c8] sm:$0xff]  }
0x211d   :  { %11167 = vmatprep.subr.bf16.mxu1 %v16414_v20  ;;  %v16454_v20 = vld [vmem:[%s20605_s4 + $0x388] sm:$0xff]  }
0x2120   :  { %11168 = vmatpush1.bf16.msra.mxu1 %v16412_v1  ;;  %v16456_v1 = vld [vmem:[%s20605_s4 + $0x3c0] sm:$0xff]  }
0x2121   :  { %11169 = vmatprep.subr.bf16.mxu1 %v16420_v23  ;;  %v16458_v23 = vld [vmem:[%s20605_s4 + $0x380] sm:$0xff]  }
0x2124   :  { %11170 = vmatpush1.bf16.msra.mxu1 %v16418_v18  ;;  %v10937_v18 = vrot.slane %v13197_v42, %v16911_v36 }
0x2125   :  { %11171 = vmatprep.subr.bf16.mxu1 %v16426_v15 }
0x2128   :  { %11172 = vmatpush1.bf16.msra.mxu1 %v16424_v48  ;;  %v10941_v48 = vrot.slane %v13197_v42, %v16914_v38 }
0x2196   :  { %v10866_v49 = vpop.xlane.xlu0 %10865 }
0x2197   :  { %v10869_v61 = vmul.f32 0.0078125, %v10866_v49  ;;  %v16428_v49 = vld [vmem:[%s20605_s4 + $0x3f8] sm:$0xff]  }
0x2198   :  { %14388 = vmatprep.subr.bf16.mxu1 %v16428_v49 }
0x2199   :  { %v20218_v27 = vsub.f32 %v20198_v30, %v10869_v61  ;;  %v16429_v61 = vld [vmem:[%s20605_s4 + $0x338] sm:$0xff]  }
0x219a   :  { %v10868_v58 = vpop.xlane.xlu1 %10867 }
0x219b   :  { %v10870_v11 = vmul.f32 0.0078125, %v10868_v58  ;;  %v10873_v47 = vmul.f32 %v20218_v27, %v20218_v27  ;;  %v16432_v58 = vld [vmem:[%s20605_s4 + $0x3f0] sm:$0xff]  }
0x219d   :  { %v20223_v45 = vsub.f32 %v20202_v9, %v10870_v11  ;;  %10875 = vadd.xlane.f32.xlu0 %v10873_v47  ;;  %v16433_v11 = vld [vmem:[%s20605_s4 + $0x330] sm:$0xff]  }
0x219e   :  { %v16434_v47 = vld [vmem:[%s20605_s4 + $0x3b0] sm:$0xff]  }
0x219f   :  { %v10874_v29 = vmul.f32 %v20223_v45, %v20223_v45 }
0x21a1   :  { %10877 = vadd.xlane.f32.xlu1 %v10874_v29  ;;  %v16436_v29 = vld [vmem:[%s20605_s4 + $0x3e8] sm:$0xff]  }
0x2226   :  { %v10876_v50 = vpop.xlane.xlu0 %10875 }
0x2227   :  { %v10879_v43 = vmul.f32 0.0078125, %v10876_v50  ;;  %v10949_v50 = vrot.slane %v13197_v42, %v17532_v60 }
0x2229   :  { %v10881_v54 = vadd.f32 1e-05, %v10879_v43 }
0x222a   :  { %v10878_v40 = vpop.xlane.xlu1 %10877 }
0x222b   :  { %16719 = vrsqrt.f32 %v10881_v54  ;;  %v10880_v46 = vmul.f32 0.0078125, %v10878_v40 }
0x222d   :  { %v10882_v39 = vadd.f32 1e-05, %v10880_v46 }
0x222f   :  { %16721 = vrsqrt.f32 %v10882_v39 }
0x2238   :  { %v16720_v3 = vpop.eup %16719 }
0x2239   :  { %v10885_v21 = vmul.f32 %v16720_v3, %v20218_v27  ;;  %v16431_v27 = vld [vmem:[%s20605_s4 + $0x370] sm:$0xff]  }
0x223b   :  { %v10891_v55 = vmul.f32 %v10890_v31, %v10885_v21 }
0x223c   :  { %v16722_v59 = vpop.eup %16721 }
0x223d   :  { %v10886_v53 = vmul.f32 %v16722_v59, %v20223_v45  ;;  %v10897_v5 = vadd.f32 %v10896_v63, %v10891_v55  ;;  %v16435_v45 = vld [vmem:[%s20605_s4 + $0x368] sm:$0xff]  }
0x223f   :  { %v10892_v41 = vmul.f32 %v10890_v31, %v10886_v53 }
0x2241   :  { %v10898_v56 = vadd.f32 %v10896_v63, %v10892_v41 }
0x2243   :  { %v10899_v7 = vpack.c.bf16 %v10898_v56, %v10897_v5 }
0x2245   :  { %11147 = vmatmul.mubr.bf16.vlgmr.msra.gmra.mxu0 %v10899_v7  ;;  %11190 = vmatmul.mubr.bf16.vlgmr.msra.gmra.mxu1 %v10899_v7 }
0x2246   :  { %14367 = vmatpush3.bf16.msra.mxu0 %v16429_v61  ;;  %14389 = vmatpush3.bf16.msra.mxu1 %v16430_v10 }
0x2247   :  { %14368 = vmatprep.subr.bf16.mxu0 %v16431_v27  ;;  %14390 = vmatprep.subr.bf16.mxu1 %v16432_v58 }
0x224a   :  { %14369 = vmatpush3.bf16.msra.mxu0 %v16433_v11  ;;  %14391 = vmatpush3.bf16.msra.mxu1 %v16434_v47 }
0x224b   :  { %14370 = vmatprep.subr.bf16.mxu0 %v16435_v45  ;;  %14392 = vmatprep.subr.bf16.mxu1 %v16436_v29 }
0x224e   :  { %14371 = vmatpush3.bf16.msra.mxu0 %v16437_v13  ;;  %14393 = vmatpush3.bf16.msra.mxu1 %v16438_v52 }
0x224f   :  { %14372 = vmatprep.subr.bf16.mxu0 %v16439_v26  ;;  %14394 = vmatprep.subr.bf16.mxu1 %v16440_v19 }
0x2252   :  { %14373 = vmatpush3.bf16.msra.mxu0 %v16441_v12  ;;  %14395 = vmatpush3.bf16.msra.mxu1 %v16442_v16 }
0x2253   :  { %14374 = vmatprep.subr.bf16.mxu0 %v16443_v6  ;;  %14396 = vmatprep.subr.bf16.mxu1 %v16444_v14 }
0x2256   :  { %14375 = vmatpush3.bf16.msra.mxu0 %v16445_v4  ;;  %14397 = vmatpush3.bf16.msra.mxu1 %v16446_v44 }
0x2257   :  { %14376 = vmatprep.subr.bf16.mxu0 %v16447_v34  ;;  %14398 = vmatprep.subr.bf16.mxu1 %v16448_v57 }
0x225a   :  { %14377 = vmatpush3.bf16.msra.mxu0 %v16449_v17  ;;  %14399 = vmatpush3.bf16.msra.mxu1 %v16450_v8 }
0x225b   :  { %14378 = vmatprep.subr.bf16.mxu0 %v16451_v35  ;;  %14400 = vmatprep.subr.bf16.mxu1 %v16452_v0 }
0x225e   :  { %14379 = vmatpush3.bf16.msra.mxu0 %v16453_v22  ;;  %14401 = vmatpush3.bf16.msra.mxu1 %v16454_v20 }
0x225f   :  { %14380 = vmatprep.subr.bf16.mxu0 %v16455_v37  ;;  %14402 = vmatprep.subr.bf16.mxu1 %v16456_v1 }
0x2262   :  { %14381 = vmatpush3.bf16.msra.mxu0 %v16457_v25  ;;  %14403 = vmatpush3.bf16.msra.mxu1 %v16458_v23 }
0x2263   :  { %15699 = vmatprep.subr.bf16.mxu0 %v16766_v2 }
0x2305   :  { %v11148_v15 = vpop.f32.mrf.mxu0  ;;  %v11191_v32 = vpop.f32.mrf.mxu1 }
0x2306   :  { %v20421_v43 = vadd.f32 %v11148_v15, %v10937_v18  ;;  %v20423_v54 = vadd.f32 %v11191_v32, %v10945_v33 }
0x2307   :  { %v11150_v40 = vpop.f32.mrf.mxu0  ;;  %v11193_v46 = vpop.f32.mrf.mxu1 }
0x2308   :  { %v20426_v39 = vmul.f32 0.70710677, %v20421_v43  ;;  %v20429_v3 = vmul.f32 0.70710677, %v20423_v54  ;;  %v20431_v21 = vadd.f32 %v11150_v40, %v10941_v48  ;;  %v20433_v31 = vadd.f32 %v11193_v46, %v10949_v50 }
0x2309   :  { %v11152_v5 = vpop.f32.mrf.mxu0  ;;  %v11195_v58 = vpop.f32.mrf.mxu1 }
0x230a   :  { %v11208_v59 = vand.u32 2147483647, %v20426_v39  ;;  %v11210_v60 = vand.u32 2147483647, %v20429_v3  ;;  %v20438_v53 = vmul.f32 0.70710677, %v20431_v21  ;;  %v20448_v27 = vadd.f32 %v11152_v5, %v10937_v18 }
0x230b   :  { %v20441_v55 = vmul.f32 0.70710677, %v20433_v31  ;;  %v11154_v11 = vpop.f32.mrf.mxu0  ;;  %v20453_v13 = vadd.f32 %v11195_v58, %v10945_v33  ;;  %v11197_v16 = vpop.f32.mrf.mxu1  ;;  %vm11368_vm4 = vcmp.ge.f32.partialorder %v20426_v39, 0.0  ;;  %vm11370_vm8 = vcmp.ge.f32.partialorder %v20429_v3, 0.0 }
0x230c   :  { %v11216_v63 = vmul.f32 0.3275911, %v11208_v59  ;;  %v11218_v41 = vmul.f32 0.3275911, %v11210_v60  ;;  %v11209_v56 = vand.u32 2147483647, %v20438_v53  ;;  %v20455_v52 = vadd.f32 %v11154_v11, %v10941_v48 }
0x230d   :  { %v20445_v7 = vand.u32 2147483647, %v20441_v55  ;;  %v20451_v29 = vmul.f32 0.70710677, %v20448_v27  ;;  %v20459_v19 = vmul.f32 0.70710677, %v20453_v13  ;;  %v20466_v34 = vadd.f32 %v11197_v16, %v10949_v50 }
0x230e   :  { %v11224_v24 = vadd.f32 1.0, %v11216_v63  ;;  %v11226_v49 = vadd.f32 1.0, %v11218_v41  ;;  %v11217_v61 = vmul.f32 0.3275911, %v11209_v56  ;;  %v20462_v12 = vmul.f32 0.70710677, %v20455_v52 }
0x230f   :  { %v11219_v10 = vmul.f32 0.3275911, %v20445_v7  ;;  %v11212_v26 = vand.u32 2147483647, %v20451_v29  ;;  %v11214_v14 = vand.u32 2147483647, %v20459_v19 }
0x2310   :  { %16723 = vrcp.f32 %v11224_v24  ;;  %v11225_v47 = vadd.f32 1.0, %v11217_v61  ;;  %v11213_v4 = vand.u32 2147483647, %v20462_v12  ;;  %v11320_v8 = vsub.f32 0.0, %v11208_v59 }
0x2311   :  { %16725 = vrcp.f32 %v11226_v49  ;;  %v11227_v45 = vadd.f32 1.0, %v11219_v10  ;;  %v11220_v6 = vmul.f32 0.3275911, %v11212_v26  ;;  %v11222_v57 = vmul.f32 0.3275911, %v11214_v14 }
0x2312   :  { %16727 = vrcp.f32 %v11225_v47  ;;  %v11221_v17 = vmul.f32 0.3275911, %v11213_v4  ;;  %v20469_v35 = vmul.f32 0.70710677, %v20466_v34  ;;  %v11321_v0 = vsub.f32 0.0, %v11209_v56 }
0x2313   :  { %16729 = vrcp.f32 %v11227_v45  ;;  %v11228_v44 = vadd.f32 1.0, %v11220_v6  ;;  %v11230_v22 = vadd.f32 1.0, %v11222_v57  ;;  %v11322_v25 = vsub.f32 0.0, %v11210_v60 }
0x2314   :  { %v11229_v20 = vadd.f32 1.0, %v11221_v17  ;;  %v20472_v37 = vand.u32 2147483647, %v20469_v35  ;;  %v11328_v18 = vmul.f32 %v11320_v8, %v11208_v59  ;;  %v11329_v32 = vmul.f32 %v11321_v0, %v11209_v56 }
0x2315   :  { %16731 = vrcp.f32 %v11228_v44  ;;  %v11324_v48 = vsub.f32 0.0, %v11212_v26  ;;  %v11330_v41 = vmul.f32 %v11322_v25, %v11210_v60  ;;  %v11323_v5 = vsub.f32 0.0, %v20445_v7 }
0x2316   :  { %16733 = vrcp.f32 %v11230_v22  ;;  %v11223_v33 = vmul.f32 0.3275911, %v20472_v37  ;;  %v11336_v49 = vmul.f32 1.442695, %v11328_v18  ;;  %v11338_v56 = vmul.f32 1.442695, %v11329_v32 }
0x2317   :  { %16735 = vrcp.f32 %v11229_v20  ;;  %v11332_v58 = vmul.f32 %v11324_v48, %v11212_v26  ;;  %v11326_v11 = vsub.f32 0.0, %v11214_v14  ;;  %v11340_v6 = vmul.f32 1.442695, %v11330_v41 }
0x2318   :  { %v11231_v40 = vadd.f32 1.0, %v11223_v33  ;;  %v11331_v44 = vmul.f32 %v11323_v5, %v20445_v7  ;;  %v11325_v57 = vsub.f32 0.0, %v11213_v4  ;;  %vm11372_vm1 = vcmp.ge.f32.partialorder %v20451_v29, 0.0 }
0x2319   :  { %v11344_v20 = vmul.f32 1.442695, %v11332_v58  ;;  %v11334_v25 = vmul.f32 %v11326_v11, %v11214_v14  ;;  %vm11369_vm6 = vcmp.ge.f32.partialorder %v20438_v53, 0.0  ;;  %vm11373_vm5 = vcmp.ge.f32.partialorder %v20462_v12, 0.0 }
0x231a   :  { %16737 = vrcp.f32 %v11231_v40  ;;  %v11333_v32 = vmul.f32 %v11325_v57, %v11213_v4  ;;  %vm11374_vm7 = vcmp.ge.f32.partialorder %v20459_v19, 0.0  ;;  %vm11371_vm9 = vcmp.ge.f32.partialorder %v20441_v55, 0.0 }
0x231b   :  { %16739 = vpow2.f32 %v11336_v49  ;;  %v11327_v49 = vsub.f32 0.0, %v20472_v37  ;;  %vm11375_vm10 = vcmp.ge.f32.partialorder %v20469_v35, 0.0  ;;  %v11398_v3 = vmul.f32 0.5, %v20453_v13 }
0x231c   :  { %16741 = vpow2.f32 %v11338_v56  ;;  %v11395_v55 = vmul.f32 0.5, %v20433_v31  ;;  %v11488_v31 = vrot.slane %v20193_v62, %v17783_v28  ;;  %v16459_v28 = vld [vmem:[%s20607_s7 + $0x38] sm:$0xff]  }
0x231d   :  { %v20474_v1 = vpop.eup %16723  ;;  %16743 = vpow2.f32 %v11340_v6 }
0x231e   :  { %v20476_v23 = vpop.eup %16725  ;;  %v11248_v42 = vmul.f32 1.0614054, %v20474_v1  ;;  %16745 = vpow2.f32 %v11344_v20 }
0x231f   :  { %v11250_v15 = vmul.f32 1.0614054, %v20476_v23  ;;  %v20481_v46 = vpop.eup %16727 }
0x2320   :  { %v11256_v50 = vadd.f32 -1.4531521, %v11248_v42  ;;  %v11249_v59 = vmul.f32 1.0614054, %v20481_v46  ;;  %v20486_v61 = vpop.eup %16729 }
0x2321   :  { %v11258_v63 = vadd.f32 -1.4531521, %v11250_v15  ;;  %v11251_v16 = vmul.f32 1.0614054, %v20486_v61  ;;  %v11342_v15 = vmul.f32 1.442695, %v11331_v44 }
0x2322   :  { %v11264_v24 = vmul.f32 %v20474_v1, %v11256_v50  ;;  %v11257_v45 = vadd.f32 -1.4531521, %v11249_v59  ;;  %v20493_v22 = vpop.eup %16731 }
0x2323   :  { %v11266_v10 = vmul.f32 %v20476_v23, %v11258_v63  ;;  %v11259_v0 = vadd.f32 -1.4531521, %v11251_v16  ;;  %v11252_v7 = vmul.f32 1.0614054, %v20493_v22  ;;  %v20498_v48 = vpop.eup %16733  ;;  %16747 = vpow2.f32 %v11342_v15 }
0x2324   :  { %v11272_v47 = vadd.f32 1.4214138, %v11264_v24  ;;  %v11265_v8 = vmul.f32 %v20481_v46, %v11257_v45  ;;  %v20502_v5 = vpop.eup %16735  ;;  %v11254_v14 = vmul.f32 1.0614054, %v20498_v48  ;;  %v11348_v24 = vmul.f32 1.442695, %v11334_v25 }
0x2325   :  { %v11274_v60 = vadd.f32 1.4214138, %v11266_v10  ;;  %v11267_v33 = vmul.f32 %v20486_v61, %v11259_v0  ;;  %v11260_v41 = vadd.f32 -1.4531521, %v11252_v7  ;;  %v11253_v11 = vmul.f32 1.0614054, %v20502_v5 }
0x2326   :  { %v11280_v17 = vmul.f32 %v20474_v1, %v11272_v47  ;;  %v11273_v18 = vadd.f32 1.4214138, %v11265_v8  ;;  %v11262_v58 = vadd.f32 -1.4531521, %v11254_v14  ;;  %v11346_v47 = vmul.f32 1.442695, %v11333_v32 }
0x2327   :  { %v11282_v26 = vmul.f32 %v20476_v23, %v11274_v60  ;;  %v11275_v63 = vadd.f32 1.4214138, %v11267_v33  ;;  %v11268_v56 = vmul.f32 %v20493_v22, %v11260_v41  ;;  %v20510_v44 = vpop.eup %16737  ;;  %16749 = vpow2.f32 %v11348_v24 }
0x2328   :  { %v11288_v42 = vadd.f32 -0.28449672, %v11280_v17  ;;  %v11281_v40 = vmul.f32 %v20481_v46, %v11273_v18  ;;  %v11270_v57 = vmul.f32 %v20498_v48, %v11262_v58  ;;  %v11261_v17 = vadd.f32 -1.4531521, %v11253_v11 }
0x2329   :  { %v11290_v59 = vadd.f32 -0.28449672, %v11282_v26  ;;  %v11283_v4 = vmul.f32 %v20486_v61, %v11275_v63  ;;  %v11276_v6 = vadd.f32 1.4214138, %v11268_v56  ;;  %v11335_v8 = vmul.f32 %v11327_v49, %v20472_v37 }
0x232a   :  { %v11296_v50 = vmul.f32 %v20474_v1, %v11288_v42  ;;  %v11289_v10 = vadd.f32 -0.28449672, %v11281_v40  ;;  %v11278_v42 = vadd.f32 1.4214138, %v11270_v57  ;;  %v11269_v18 = vmul.f32 %v20502_v5, %v11261_v17 }
0x232b   :  { %v11291_v60 = vadd.f32 -0.28449672, %v11283_v4  ;;  %v11298_v0 = vmul.f32 %v20476_v23, %v11290_v59  ;;  %v11284_v25 = vmul.f32 %v20493_v22, %v11276_v6  ;;  %16751 = vpow2.f32 %v11346_v47 }
0x232c   :  { %v11304_v45 = vadd.f32 0.2548296, %v11296_v50  ;;  %v11297_v16 = vmul.f32 %v20481_v46, %v11289_v10  ;;  %v11255_v33 = vmul.f32 1.0614054, %v20510_v44  ;;  %v16740_v50 = vpop.eup %16739  ;;  %v11286_v37 = vmul.f32 %v20498_v48, %v11278_v42 }
0x232d   :  { %v11299_v20 = vmul.f32 %v20486_v61, %v11291_v60  ;;  %v11292_v32 = vadd.f32 -0.28449672, %v11284_v25  ;;  %v11277_v40 = vadd.f32 1.4214138, %v11269_v18  ;;  %v16742_v41 = vpop.eup %16741  ;;  %v11306_v14 = vadd.f32 0.2548296, %v11298_v0 }
0x232e   :  { %v11305_v26 = vadd.f32 0.2548296, %v11297_v16  ;;  %v11312_v7 = vmul.f32 %v20474_v1, %v11304_v45  ;;  %v11263_v63 = vadd.f32 -1.4531521, %v11255_v33  ;;  %v11350_v59 = vmul.f32 1.442695, %v11335_v8  ;;  %v16744_v58 = vpop.eup %16743 }
0x232f   :  { %v11307_v24 = vadd.f32 0.2548296, %v11299_v20  ;;  %v11300_v49 = vmul.f32 %v20493_v22, %v11292_v32  ;;  %v11294_v4 = vadd.f32 -0.28449672, %v11286_v37  ;;  %v11285_v56 = vmul.f32 %v20502_v5, %v11277_v40  ;;  %v16746_v16 = vpop.eup %16745 }
0x2330   :  { %v11313_v15 = vmul.f32 %v20481_v46, %v11305_v26  ;;  %v11271_v1 = vmul.f32 %v20510_v44, %v11263_v63  ;;  %v11352_v46 = vmul.f32 %v16740_v50, %v11312_v7  ;;  %v11314_v60 = vmul.f32 %v20476_v23, %v11306_v14  ;;  %v16748_v20 = vpop.eup %16747 }
0x2331   :  { %v11308_v11 = vadd.f32 0.2548296, %v11300_v49  ;;  %v11302_v47 = vmul.f32 %v20498_v48, %v11294_v4  ;;  %v11293_v45 = vadd.f32 -0.28449672, %v11285_v56  ;;  %v11315_v6 = vmul.f32 %v20486_v61, %v11307_v24 }
0x2332   :  { %v11353_v10 = vmul.f32 %v16742_v41, %v11313_v15  ;;  %16753 = vpow2.f32 %v11350_v59  ;;  %v11279_v26 = vadd.f32 1.4214138, %v11271_v1  ;;  %v11360_v25 = vsub.f32 1.0, %v11352_v46 }
0x2333   :  { %v11316_v57 = vmul.f32 %v20493_v22, %v11308_v11  ;;  %v11310_v8 = vadd.f32 0.2548296, %v11302_v47  ;;  %v11301_v0 = vmul.f32 %v20502_v5, %v11293_v45  ;;  %v11355_v23 = vmul.f32 %v16748_v20, %v11315_v6 }
0x2334   :  { %v11361_v17 = vsub.f32 1.0, %v11353_v10  ;;  %v11287_v7 = vmul.f32 %v20510_v44, %v11279_v26  ;;  %v16750_v15 = vpop.eup %16749  ;;  %v11354_v61 = vmul.f32 %v16744_v58, %v11314_v60  ;;  %v11376_v63 = vsub.f32 0.0, %v11360_v25 }
0x2335   :  { %v11356_v42 = vmul.f32 %v16746_v16, %v11316_v57  ;;  %v11318_v18 = vmul.f32 %v20498_v48, %v11310_v8  ;;  %v11309_v33 = vadd.f32 0.2548296, %v11301_v0  ;;  %v11363_v48 = vsub.f32 1.0, %v11355_v23 }
0x2336   :  { %v11377_v50 = vsub.f32 0.0, %v11361_v17  ;;  %v11295_v14 = vadd.f32 -0.28449672, %v11287_v7  ;;  %v11362_v4 = vsub.f32 1.0, %v11354_v61  ;;  %v11392_v58 = vmul.f32 0.5, %v20421_v43 }
0x2337   :  { %v11364_v32 = vsub.f32 1.0, %v11356_v42  ;;  %v11358_v22 = vmul.f32 %v16750_v15, %v11318_v18  ;;  %v11317_v37 = vmul.f32 %v20502_v5, %v11309_v33  ;;  %v11384_v5 = vsel %vm11368_vm4, %v11360_v25, %v11376_v63 }
0x2338   :  { %v16752_v40 = vpop.eup %16751  ;;  %v11303_v10 = vmul.f32 %v20510_v44, %v11295_v14  ;;  %v11385_v56 = vsel %vm11369_vm6, %v11361_v17, %v11377_v50  ;;  %v11393_v11 = vmul.f32 0.5, %v20431_v21  ;;  %v11379_v53 = vsub.f32 0.0, %v11363_v48 }
0x2339   :  { %v11380_v41 = vsub.f32 0.0, %v11364_v32  ;;  %v11366_v24 = vsub.f32 1.0, %v11358_v22  ;;  %v11357_v49 = vmul.f32 %v16752_v40, %v11317_v37  ;;  %v11401_v16 = vadd.f32 1.0, %v11385_v56 }
0x233a   :  { %v11311_v46 = vadd.f32 0.2548296, %v11303_v10  ;;  %v11400_v39 = vadd.f32 1.0, %v11384_v5  ;;  %v11378_v57 = vsub.f32 0.0, %v11362_v4  ;;  %v11396_v17 = vmul.f32 0.5, %v20448_v27 }
0x233b   :  { %v11388_v59 = vsel %vm11372_vm1, %v11364_v32, %v11380_v41  ;;  %v11365_v1 = vsub.f32 1.0, %v11357_v49  ;;  %v11382_v47 = vsub.f32 0.0, %v11366_v24  ;;  %v11397_v43 = vmul.f32 0.5, %v20455_v52 }
0x233c   :  { %v11404_v29 = vadd.f32 1.0, %v11388_v59  ;;  %v11319_v60 = vmul.f32 %v20510_v44, %v11311_v46  ;;  %v11409_v20 = vmul.f32 %v11401_v16, %v11393_v11  ;;  %v11387_v44 = vsel %vm11371_vm9, %v11363_v48, %v11379_v53 }
0x233d   :  { %v11381_v45 = vsub.f32 0.0, %v11365_v1  ;;  %v11390_v12 = vsel %vm11374_vm7, %v11366_v24, %v11382_v47  ;;  %v11408_v18 = vmul.f32 %v11400_v39, %v11392_v58  ;;  %v11386_v33 = vsel %vm11370_vm8, %v11362_v4, %v11378_v57 }
0x233e   :  { %v11412_v26 = vmul.f32 %v11404_v29, %v11396_v17  ;;  %v11406_v27 = vadd.f32 1.0, %v11390_v12  ;;  %v11403_v19 = vadd.f32 1.0, %v11387_v44  ;;  %v11402_v52 = vadd.f32 1.0, %v11386_v33  ;;  %v16461_v17 = vld [vmem:[%s20607_s7 + $0x28] sm:$0xff]   ;;  %v11765_v33 = vld [vmem:[%s20608_s8] sm:$0x7] }
0x233f   :  { %v16754_v6 = vpop.eup %16753  ;;  %v11389_v8 = vsel %vm11373_vm5, %v11365_v1, %v11381_v45  ;;  %v11399_v61 = vmul.f32 0.5, %v20466_v34  ;;  %v11394_v22 = vmul.f32 0.5, %v20423_v54 }
0x2340   :  { %v11405_v21 = vadd.f32 1.0, %v11389_v8  ;;  %v11359_v0 = vmul.f32 %v16754_v6, %v11319_v60  ;;  %v11416_v23 = vpack.c.bf16 %v11412_v26, %v11408_v18  ;;  %v11414_v37 = vmul.f32 %v11406_v27, %v11398_v3  ;;  %v16462_v8 = vld [vmem:[%s20607_s7 + $0x20] sm:$0xff]  }
0x2341   :  { %v11411_v40 = vmul.f32 %v11403_v19, %v11395_v55  ;;  %v11410_v35 = vmul.f32 %v11402_v52, %v11394_v22  ;;  %v16466_v26 = vld [vmem:[%s20607_s7] sm:$0xff]   ;;  %v11797_v52 = vrot.slane %v11765_v33, %v16914_v38 }
0x2342   :  { %v11413_v25 = vmul.f32 %v11405_v21, %v11397_v43  ;;  %v11367_v42 = vsub.f32 1.0, %v11359_v0  ;;  %v16463_v43 = vld [vmem:[%s20607_s7 + $0x18] sm:$0xff]   ;;  %v16464_v21 = vld [vmem:[%s20607_s7 + $0x10] sm:$0xff]   ;;  %v16465_v0 = vld [vmem:[%s20607_s7 + $0x8] sm:$0xff]  }
0x2343   :  { %v11418_v14 = vpack.c.bf16 %v11414_v37, %v11410_v35 }
0x2344   :  { %v11383_v7 = vsub.f32 0.0, %v11367_v42  ;;  %v11417_v15 = vpack.c.bf16 %v11413_v25, %v11409_v20 }
0x2346   :  { %v11391_v32 = vsel %vm11375_vm10, %v11367_v42, %v11383_v7  ;;  %11713 = vmatprep.mubr.bf16.mxu0 %v11417_v15  ;;  %v11791_v15 = vrot.slane %v11765_v33, %v16911_v36 }
0x2347   :  { %v11407_v50 = vadd.f32 1.0, %v11391_v32  ;;  %11714 = vmatmul.mubr.bf16.vlgmr.msra.gmra.mxu0 %v11416_v23 }
0x2348   :  { %15715 = vmatprep.mubr.msk.bf16.mxu0 %vm16767_vm0, %v16766_v2  ;;  %15700 = vmatpush3.bf16.msra.mxu0 %v16459_v28 }
0x2349   :  { %v11415_v63 = vmul.f32 %v11407_v50, %v11399_v61  ;;  %15701 = vmatprep.subr.bf16.mxu0 %v16766_v2  ;;  %v11820_v50 = vrot.slane %v11765_v33, %v17402_v51 }
0x234b   :  { %v11419_v41 = vpack.c.bf16 %v11415_v63, %v11411_v40 }
0x234d   :  { %11754 = vmatprep.mubr.bf16.mxu1 %v11419_v41 }
0x234e   :  { %11755 = vmatmul.mubr.bf16.vlgmr.msra.gmra.mxu1 %v11418_v14 }
0x2407   :  { %v14382_v13 = vpop.f32.mrf.mxu0 }
0x2409   :  { %v14383_v24 = vpop.f32.mrf.mxu0 }
0x240a   :  { %v14384_v34 = vadd.f32 %v14383_v24, %v14382_v13 }
0x240b   :  { %v14385_v49 = vpop.f32.mrf.mxu0 }
0x240c   :  { %v11716_v59 = vadd.f32 %v14384_v34, %v11488_v31 }
0x240d   :  { %v14386_v48 = vpop.f32.mrf.mxu0 }
0x240e   :  { %v14404_v54 = vpop.f32.mrf.mxu1  ;;  %v14387_v10 = vadd.f32 %v14386_v48, %v14385_v49 }
0x2410   :  { %v14405_v4 = vpop.f32.mrf.mxu1  ;;  %v11719_v58 = vadd.f32 %v14387_v10, %v11488_v31 }
0x2411   :  { %v14406_v56 = vadd.f32 %v14405_v4, %v14404_v54 }
0x2412   :  { %v14407_v1 = vpop.f32.mrf.mxu1 }
0x2413   :  { %v11757_v5 = vadd.f32 %v14406_v56, %v11716_v59 }
0x2414   :  { %v14408_v46 = vpop.f32.mrf.mxu1 }
0x2415   :  { %v14409_v11 = vadd.f32 %v14408_v46, %v14407_v1  ;;  %v11763_v29 = vadd.f32 %v11757_v5, %v20198_v30 }
0x2417   :  { %v11760_v47 = vadd.f32 %v14409_v11, %v11719_v58  ;;  %11766 = vadd.xlane.f32.xlu0 %v11763_v29 }
0x2419   :  { %v11764_v45 = vadd.f32 %v11760_v47, %v20202_v9  ;;  %v16460_v9 = vld [vmem:[%s20607_s7 + $0x30] sm:$0xff]  }
0x241a   :  { %15702 = vmatpush3.bf16.msra.mxu0 %v16460_v9 }
0x241b   :  { %11768 = vadd.xlane.f32.xlu1 %v11764_v45  ;;  %15703 = vmatprep.subr.bf16.mxu0 %v16766_v2 }
0x241e   :  { %15704 = vmatpush3.bf16.msra.mxu0 %v16461_v17 }
0x241f   :  { %15705 = vmatprep.subr.bf16.mxu0 %v16766_v2 }
0x2422   :  { %15706 = vmatpush3.bf16.msra.mxu0 %v16462_v8 }
0x2423   :  { %15707 = vmatprep.subr.bf16.mxu0 %v16766_v2 }
0x2426   :  { %15708 = vmatpush3.bf16.msra.mxu0 %v16463_v43 }
0x2427   :  { %15709 = vmatprep.subr.bf16.mxu0 %v16766_v2 }
0x242a   :  { %15710 = vmatpush3.bf16.msra.mxu0 %v16464_v21 }
0x242b   :  { %15711 = vmatprep.subr.bf16.mxu0 %v16766_v2 }
0x242e   :  { %15712 = vmatpush3.bf16.msra.mxu0 %v16465_v0 }
0x242f   :  { %15713 = vmatprep.subr.bf16.mxu0 %v16766_v2 }
0x2432   :  { %15714 = vmatpush3.bf16.msra.mxu0 %v16466_v26 }
0x24a0   :  { %v11767_v62 = vpop.xlane.xlu0 %11766 }
0x24a1   :  { %v11770_v16 = vmul.f32 0.0078125, %v11767_v62 }
0x24a3   :  { %v11772_v53 = vsub.f32 %v11763_v29, %v11770_v16 }
0x24a4   :  { %v11769_v60 = vpop.xlane.xlu1 %11768 }
0x24a5   :  { %v11771_v6 = vmul.f32 0.0078125, %v11769_v60  ;;  %v11774_v39 = vmul.f32 %v11772_v53, %v11772_v53 }
0x24a7   :  { %v11773_v57 = vsub.f32 %v11764_v45, %v11771_v6  ;;  %11776 = vadd.xlane.f32.xlu0 %v11774_v39 }
0x24a9   :  { %v11775_v30 = vmul.f32 %v11773_v57, %v11773_v57 }
0x24ab   :  { %11778 = vadd.xlane.f32.xlu1 %v11775_v30 }
0x2530   :  { %v11777_v12 = vpop.xlane.xlu0 %11776 }
0x2531   :  { %v11780_v20 = vmul.f32 0.0078125, %v11777_v12 }
0x2533   :  { %v11782_v44 = vadd.f32 1e-05, %v11780_v20 }
0x2534   :  { %v11779_v25 = vpop.xlane.xlu1 %11778 }
0x2535   :  { %16755 = vrsqrt.f32 %v11782_v44  ;;  %v11781_v42 = vmul.f32 0.0078125, %v11779_v25 }
0x2537   :  { %v11783_v18 = vadd.f32 1e-05, %v11781_v42 }
0x2539   :  { %16757 = vrsqrt.f32 %v11783_v18 }
0x2542   :  { %v16756_v27 = vpop.eup %16755 }
0x2543   :  { %v11786_v7 = vmul.f32 %v16756_v27, %v11772_v53 }
0x2545   :  { %v11792_v2 = vmul.f32 %v11791_v15, %v11786_v7 }
0x2546   :  { %v16758_v19 = vpop.eup %16757 }
0x2547   :  { %v11787_v23 = vmul.f32 %v16758_v19, %v11773_v57  ;;  %v11798_v32 = vadd.f32 %v11797_v52, %v11792_v2 }
0x2549   :  { %v11793_v3 = vmul.f32 %v11791_v15, %v11787_v23 }
0x254b   :  { %v11799_v55 = vadd.f32 %v11797_v52, %v11793_v3 }
0x254d   :  { %v11800_v61 = vpack.c.bf16 %v11799_v55, %v11798_v32 }
0x254f   :  { %15716 = vmatmul.mubr.bf16.vlgmr.msra.gmra.mxu0 %v11800_v61 }
0x260f   :  { %v11903_v22 = vpop.f32.mrf.mxu0 }
0x2610   :  { %v11904_v37 = vadd.f32 %v11903_v22, %v11820_v50 }
0x2611   :  { %v15717_v40 = vpop.f32.mrf.mxu0 }
0x2612   :  { %11910 = vst [vmem:[%s20609_s9] sm:$0xff] %v11904_v37 }
0x2613   :  { %v11906_v36 = vpop.f32.mrf.mxu0 }
0x2614   :  { %v11907_v63 = vadd.f32 %v11906_v36, %v11820_v50 }
0x2615   :  { %v15718_v35 = vpop.f32.mrf.mxu0 }
0x2616   :  { %11911 = vst [vmem:[%s20609_s9 + $0x8] sm:$0xff] %v11907_v63 }

</bundles_post_ra>
